<compile_context>
chip_gen: v6e
topology: v6e:2x2x1
jax: 0.10.0
libtpu: 0.0.40
codegen_flags: <defaults>
</compile_context>

<pallas_src>
import functools

import jax
import jax.numpy as jnp
from jax.experimental import pallas as pl
from jax.experimental.pallas import tpu as pltpu


# ---------------------------------------------------------------------------
# Kernel: full forward pass, K-tiled over the 3072-wide contraction of linear1
# ---------------------------------------------------------------------------
def _mlp_fwd_kernel(x_ref, w1_ref, b1_ref, w2_ref, b2_ref, seed_ref, params_ref,
                    logits_ref, pred_ref, acc_ref, *, eps, keep_thr, n_classes, tk):
    k = pl.program_id(0)

    @pl.when(k == 0)
    def _init():
        acc_ref[...] = jnp.zeros_like(acc_ref)

    # x is fully VMEM-resident; slice this grid step's K tile in-kernel.
    off = pl.multiple_of(k * tk, tk)
    x_blk = x_ref[:, pl.ds(off, tk)].astype(jnp.bfloat16)
    # linear1 partial product for this K tile (bf16 MXU, f32 accumulate).
    acc_ref[...] += jnp.dot(x_blk, w1_ref[...],
                            preferred_element_type=jnp.float32)

    @pl.when(k == pl.num_programs(0) - 1)
    def _finalize():
        h = acc_ref[...] + b1_ref[...]                       # (B, H) + (1, H)
        B, H = h.shape
        n = B * H

        # Custom BatchNorm1d(num_features=1): stats over dims (0, 1),
        # unbiased variance (torch.var default correction=1).
        row_sum = jnp.sum(h, axis=1, keepdims=True)          # (B, 1)
        mean = jnp.sum(row_sum, axis=0, keepdims=True) / n   # (1, 1)
        d = h - mean
        row_sq = jnp.sum(d * d, axis=1, keepdims=True)       # (B, 1)
        var = jnp.sum(row_sq, axis=0, keepdims=True) / (n - 1)
        gamma = params_ref[0]
        beta = params_ref[1]
        hn = d * (jax.lax.rsqrt(var + eps) * gamma) + beta

        # ReLU
        hr = jnp.maximum(hn, 0.0)

        # Custom Dropout: keep with prob (1 - p), dropped -> 0, NO rescale.
        # 31 uniform bits from an integer counter hash; threshold compare.
        rows = jax.lax.broadcasted_iota(jnp.int32, (B, H), 0)
        cols = jax.lax.broadcasted_iota(jnp.int32, (B, H), 1)
        z = rows * jnp.int32(H) + cols
        z = z * jnp.int32(40503) + seed_ref[0]
        z = (z ^ jnp.right_shift(z, 16)) * jnp.int32(73244475)
        z = (z ^ jnp.right_shift(z, 16)) * jnp.int32(73244475)
        z = z ^ jnp.right_shift(z, 16)
        bits = z & jnp.int32(0x7FFFFFFF)                     # uniform in [0, 2^31)
        hd = jnp.where(bits < jnp.int32(keep_thr), hr, jnp.zeros_like(hr))

        # linear2 (+ bias); classes zero-padded to a lane-dense 128 slab.
        logits = (jnp.dot(hd, w2_ref[...], preferred_element_type=jnp.float32)
                  + b2_ref[...])
        logits_ref[...] = logits

        # Fused argmax: mask padded lanes to -inf; ties -> lowest class index.
        CP = logits.shape[1]
        col = jax.lax.broadcasted_iota(jnp.int32, logits.shape, 1)
        masked = jnp.where(col < jnp.int32(n_classes), logits,
                           jnp.full_like(logits, -jnp.inf))
        mx = jnp.max(masked, axis=1, keepdims=True)
        cand = jnp.where(masked == mx, col, jnp.int32(CP))
        pred_ref[...] = jnp.min(cand, axis=1, keepdims=True)


# ---------------------------------------------------------------------------
# One-time weight prep (do NOT redo per forward call)
# ---------------------------------------------------------------------------
def prepare_params(w1, b1, w2, b2, n_class_pad=128):
    """Transpose + bf16-cast W1 and lane-pad the classifier -- once, offline."""
    H, K = w1.shape
    C = w2.shape[0]
    CP = n_class_pad
    w1t = jnp.asarray(w1, jnp.float32).T.astype(jnp.bfloat16)          # (K, H)
    b1r = jnp.asarray(b1, jnp.float32).reshape(1, H)
    w2t = jnp.zeros((H, CP), jnp.float32).at[:, :C].set(
        jnp.asarray(w2, jnp.float32).T)
    b2r = jnp.zeros((1, CP), jnp.float32).at[0, :C].set(
        jnp.asarray(b2, jnp.float32))
    return w1t, b1r, w2t, b2r


# ---------------------------------------------------------------------------
# Hot path: one jit, one pallas_call
# ---------------------------------------------------------------------------
@functools.partial(jax.jit, static_argnames=("drop_rate", "eps", "n_classes"))
def forward_prepped(x, w1t, b1r, w2t, b2r, gamma_beta, seed, *,
                    drop_rate=0.5, eps=1e-5, n_classes=10):
    """Returns (logits [B, n_classes], pred [B]) for the training-mode forward."""
    x = jnp.asarray(x, jnp.float32)
    B, K = x.shape
    Kw, H = w1t.shape
    assert K == Kw, "linear1 weight / input mismatch"
    CP = w2t.shape[1]

    TK = 1536 if K % 1536 == 0 else K       # 2 grid steps at the module's K=3072
    grid_k = K // TK

    keep_prob = 1.0 - float(drop_rate)
    keep_thr = max(0, min(int(keep_prob * 2147483648.0), 2147483647))

    cost = pl.CostEstimate(
        flops=2 * B * K * H + 2 * B * H * CP,
        transcendentals=0,
        bytes_accessed=int(w1t.size * 2 + x.size * 4 + w2t.size * 4
                           + b1r.size * 4 + B * CP * 4 + B * 4))

    logits_pad, pred = pl.pallas_call(
        functools.partial(_mlp_fwd_kernel, eps=float(eps), keep_thr=keep_thr,
                          n_classes=int(n_classes), tk=TK),
        out_shape=(jax.ShapeDtypeStruct((B, CP), jnp.float32),
                   jax.ShapeDtypeStruct((B, 1), jnp.int32)),
        grid=(grid_k,),
        in_specs=[
            pl.BlockSpec((B, K), lambda k: (0, 0)),      # x        (resident, 96 KiB)
            pl.BlockSpec((TK, H), lambda k: (k, 0)),     # W1^T bf16 (streamed over K)
            pl.BlockSpec((1, H), lambda k: (0, 0)),      # b1       (resident)
            pl.BlockSpec((H, CP), lambda k: (0, 0)),     # W2^T pad (resident)
            pl.BlockSpec((1, CP), lambda k: (0, 0)),     # b2  pad  (resident)
            pl.BlockSpec(memory_space=pltpu.MemorySpace.SMEM),   # seed (int32[1])
            pl.BlockSpec(memory_space=pltpu.MemorySpace.SMEM),   # [gamma, beta]
        ],
        out_specs=(pl.BlockSpec((B, CP), lambda k: (0, 0)),
                   pl.BlockSpec((B, 1), lambda k: (0, 0))),
        scratch_shapes=[pltpu.VMEM((B, H), jnp.float32)],        # f32 accumulator
        compiler_params=pltpu.CompilerParams(
            dimension_semantics=("arbitrary",),          # K axis revisits the output
            vmem_limit_bytes=32 * 1024 * 1024),
        cost_estimate=cost,
    )(x, w1t, b1r, w2t, b2r, seed, gamma_beta)

    return logits_pad[:, :n_classes], pred[:, 0]


# ---------------------------------------------------------------------------
# Convenience wrappers mirroring Model.forward (prep is redone here; use
# prepare_params + forward_prepped in a real training/inference loop).
# ---------------------------------------------------------------------------
def model_logits(x, w1, b1, w2, b2, gamma, beta, *,
                 drop_rate=0.5, eps=1e-5, seed=0):
    prepped = prepare_params(w1, b1, w2, b2)
    gb = jnp.asarray([gamma, beta], dtype=jnp.float32)
    sd = jnp.asarray([seed], dtype=jnp.int32)
    logits, _ = forward_prepped(x, *prepped, gb, sd, drop_rate=drop_rate,
                                eps=eps, n_classes=w2.shape[0])
    return logits


def model_forward(x, w1, b1, w2, b2, gamma, beta, y=None, *,
                  drop_rate=0.5, eps=1e-5, seed=0):
    """Mirrors Model.forward: pred if y is None, else (loss, acc)."""
    prepped = prepare_params(w1, b1, w2, b2)
    gb = jnp.asarray([gamma, beta], dtype=jnp.float32)
    sd = jnp.asarray([seed], dtype=jnp.int32)
    logits, pred = forward_prepped(x, *prepped, gb, sd, drop_rate=drop_rate,
                                   eps=eps, n_classes=w2.shape[0])
    if y is None:
        return pred
    # TODO(synk): cross-entropy loss / accuracy on the tiny [B,10] logits are
    # computed in plain JAX here rather than in a dedicated Pallas kernel.
    logz = jax.nn.log_softmax(logits, axis=1)
    loss = -jnp.mean(jnp.take_along_axis(logz, y[:, None], axis=1))
    acc = jnp.mean((pred == y).astype(jnp.float32))
    return loss, acc


# ---------------------------------------------------------------------------
# Pure-JAX reference (same bf16 weight quantization, same dropout hash)
# ---------------------------------------------------------------------------
def _reference_forward(x, w1, b1, w2, b2, gamma, beta, drop_rate, eps, seed):
    hp = jax.lax.Precision.HIGHEST
    xq = jnp.asarray(x, jnp.float32).astype(jnp.bfloat16).astype(jnp.float32)
    w1q = jnp.asarray(w1, jnp.float32).astype(jnp.bfloat16).astype(jnp.float32)
    h = jnp.dot(xq, w1q.T, precision=hp) + b1
    n = h.size
    mean = jnp.mean(h)
    var = jnp.sum((h - mean) ** 2) / (n - 1)
    hn = (h - mean) / jnp.sqrt(var + eps) * gamma + beta
    hr = jnp.maximum(hn, 0.0)
    B, H = hr.shape
    idx = (jnp.arange(B, dtype=jnp.int32)[:, None] * jnp.int32(H)
           + jnp.arange(H, dtype=jnp.int32)[None, :])
    z = idx * jnp.int32(40503) + jnp.int32(seed)
    z = (z ^ jnp.right_shift(z, 16)) * jnp.int32(73244475)
    z = (z ^ jnp.right_shift(z, 16)) * jnp.int32(73244475)
    z = z ^ jnp.right_shift(z, 16)
    bits = z & jnp.int32(0x7FFFFFFF)
    keep_thr = max(0, min(int((1.0 - drop_rate) * 2147483648.0), 2147483647))
    mask = bits < jnp.int32(keep_thr)
    hd = jnp.where(mask, hr, 0.0)
    logits = jnp.dot(hd, w2.T, precision=hp) + b2
    return logits, jnp.argmax(logits, axis=1), mask


# ---------------------------------------------------------------------------
# Demo / self-check
# ---------------------------------------------------------------------------
if __name__ == "__main__":
    key = jax.random.PRNGKey(0)
    kx, k1, kb1, k2, kb2, ky = jax.random.split(key, 6)

    B, IN, HID, NC = 8, 3072, 1536, 10        # dims fixed by the module
    x = jax.random.normal(kx, (B, IN), dtype=jnp.float32)
    w1 = jax.random.normal(k1, (HID, IN), dtype=jnp.float32) * 0.02
    b1 = jax.random.normal(kb1, (HID,), dtype=jnp.float32) * 0.01
    w2 = jax.random.normal(k2, (NC, HID), dtype=jnp.float32) * 0.02
    b2 = jax.random.normal(kb2, (NC,), dtype=jnp.float32) * 0.01
    gamma, beta = 1.0, 0.0                    # BatchNorm1d(1) initial parameters
    y = jax.random.randint(ky, (B,), 0, NC)

    drop_rate, seed = 0.5, 1234

    # One-time weight prep, then the single-dispatch prepped forward.
    prepped = prepare_params(w1, b1, w2, b2)
    gb = jnp.asarray([gamma, beta], dtype=jnp.float32)
    sd = jnp.asarray([seed], dtype=jnp.int32)
    logits, pred = forward_prepped(x, *prepped, gb, sd,
                                   drop_rate=drop_rate, eps=1e-5, n_classes=NC)
    logits, pred = jax.block_until_ready((logits, pred))

    # Convenience wrappers (pred-only and loss/acc paths).
    pred2 = jax.block_until_ready(
        model_forward(x, w1, b1, w2, b2, gamma, beta,
                      drop_rate=drop_rate, seed=seed))
    loss, acc = jax.block_until_ready(
        model_forward(x, w1, b1, w2, b2, gamma, beta, y=y,
                      drop_rate=drop_rate, seed=seed))

    # Reference (same bf16 weight quantization and dropout mask by construction)
    ref_logits, ref_pred, ref_mask = _reference_forward(
        x, w1, b1, w2, b2, gamma, beta, drop_rate, 1e-5, seed)

    assert logits.shape == (B, NC) and pred.shape == (B,)
    assert bool(jnp.all(jnp.isfinite(logits)))
    assert bool(jnp.allclose(logits, ref_logits, rtol=2e-2, atol=2e-2)), (
        float(jnp.max(jnp.abs(logits - ref_logits))))
    assert bool(jnp.all(pred == ref_pred))
    assert bool(jnp.all(pred2 == ref_pred))
    keep_frac = float(jnp.mean(ref_mask.astype(jnp.float32)))
    assert abs(keep_frac - (1.0 - drop_rate)) < 0.15   # dropout keep-rate sanity
    assert bool(jnp.isfinite(loss)) and 0.0 <= float(acc) <= 1.0

    print("KERNEL_OK")
</pallas_src>

<mosaic_0001>
module attributes {stable_mosaic.version = 11 : i64} {
  func.func @_mlp_fwd_kernel(%arg0: i32, %arg1: memref<8x3072xf32, #tpu.memory_space<vmem>>, %arg2: memref<1536x1536xbf16, #tpu.memory_space<vmem>>, %arg3: memref<1x1536xf32, #tpu.memory_space<vmem>>, %arg4: memref<1536x128xf32, #tpu.memory_space<vmem>>, %arg5: memref<1x128xf32, #tpu.memory_space<vmem>>, %arg6: memref<1xi32, #tpu.memory_space<smem>>, %arg7: memref<2xf32, #tpu.memory_space<smem>>, %arg8: memref<8x128xf32, #tpu.memory_space<vmem>>, %arg9: memref<8x1xi32, #tpu.memory_space<vmem>>, %arg10: memref<8x1536xf32, #tpu.memory_space<vmem>>) attributes {dimension_semantics = [#tpu.dimension_semantics<arbitrary>], iteration_bounds = array<i64: 2>, scalar_prefetch = 0 : i64, scratch_operands = 1 : i64, tpu.core_type = #tpu.core_type<tc>, window_params = [{pipeline_mode = #tpu.pipeline_mode<synchronous>, transform_indices = @transform_0, window_bounds = array<i64: 8, 3072>}, {transform_indices = @transform_1, window_bounds = array<i64: 1536, 1536>}, {pipeline_mode = #tpu.pipeline_mode<synchronous>, transform_indices = @transform_2, window_bounds = array<i64: 1, 1536>}, {pipeline_mode = #tpu.pipeline_mode<synchronous>, transform_indices = @transform_3, window_bounds = array<i64: 1536, 128>}, {pipeline_mode = #tpu.pipeline_mode<synchronous>, transform_indices = @transform_4, window_bounds = array<i64: 1, 128>}, {transform_indices = @transform_5, window_bounds = array<i64: 1>}, {transform_indices = @transform_6, window_bounds = array<i64: 2>}, {pipeline_mode = #tpu.pipeline_mode<synchronous>, transform_indices = @transform_7, window_bounds = array<i64: 8, 128>}, {pipeline_mode = #tpu.pipeline_mode<synchronous>, transform_indices = @transform_8, window_bounds = array<i64: 8, 1>}]} {
    %c0_i32 = arith.constant 0 : i32
    %0 = arith.cmpi eq, %arg0, %c0_i32 : i32
    %1 = arith.extui %0 : i1 to i32
    %c0_i32_0 = arith.constant 0 : i32
    %2 = arith.cmpi ne, %1, %c0_i32_0 : i32
    scf.if %2 {
      %cst_8 = arith.constant 0.000000e+00 : f32
      %16 = vector.broadcast %cst_8 : f32 to vector<8x1536xf32>
      %c0_9 = arith.constant 0 : index
      %c0_10 = arith.constant 0 : index
      %17 = vector.load %arg10[%c0_9, %c0_10] : memref<8x1536xf32, #tpu.memory_space<vmem>>, vector<8x1536xf32>
      tpu.vector_store %arg10[%c0_9, %c0_10], %16 {strides = array<i32>} : memref<8x1536xf32, #tpu.memory_space<vmem>>, vector<8x1536xf32>,
    } else {
    }
    %c1536_i32 = arith.constant 1536 : i32
    %3 = arith.muli %arg0, %c1536_i32 : i32
    %4 = tpu.assume_multiple %3, 1536 : i32
    %c0 = arith.constant 0 : index
    %5 = arith.index_cast %4 : i32 to index
    %6 = vector.load %arg1[%c0, %5] : memref<8x3072xf32, #tpu.memory_space<vmem>>, vector<8x1536xf32>
    %7 = arith.truncf %6 : vector<8x1536xf32> to vector<8x1536xbf16>
    %c0_1 = arith.constant 0 : index
    %c0_2 = arith.constant 0 : index
    %8 = vector.load %arg10[%c0_1, %c0_2] : memref<8x1536xf32, #tpu.memory_space<vmem>>, vector<8x1536xf32>
    %c0_3 = arith.constant 0 : index
    %c0_4 = arith.constant 0 : index
    %9 = vector.load %arg2[%c0_3, %c0_4] : memref<1536x1536xbf16, #tpu.memory_space<vmem>>, vector<1536x1536xbf16>
    %cst = arith.constant dense<0.000000e+00> : vector<8x1536xf32>
    %10 = tpu.matmul %7, %9, %cst {dimension_numbers = #tpu.dot_dimension_numbers<[1], [0], [0], [1], [0, 0, 1, 1], [], []>} : vector<8x1536xbf16>, vector<1536x1536xbf16>, vector<8x1536xf32> -> vector<8x1536xf32>
    %11 = arith.addf %8, %10 : vector<8x1536xf32>
    %c0_5 = arith.constant 0 : index
    %c0_6 = arith.constant 0 : index
    %12 = vector.load %arg10[%c0_5, %c0_6] : memref<8x1536xf32, #tpu.memory_space<vmem>>, vector<8x1536xf32>
    tpu.vector_store %arg10[%c0_5, %c0_6], %11 {strides = array<i32>} : memref<8x1536xf32, #tpu.memory_space<vmem>>, vector<8x1536xf32>,
    %c1_i32 = arith.constant 1 : i32
    %13 = arith.cmpi eq, %arg0, %c1_i32 : i32
    %14 = arith.extui %13 : i1 to i32
    %c0_i32_7 = arith.constant 0 : i32
    %15 = arith.cmpi ne, %14, %c0_i32_7 : i32
    scf.if %15 {
      %c0_8 = arith.constant 0 : index
      %c0_9 = arith.constant 0 : index
      %16 = vector.load %arg10[%c0_8, %c0_9] : memref<8x1536xf32, #tpu.memory_space<vmem>>, vector<8x1536xf32>
      %c0_10 = arith.constant 0 : index
      %c0_11 = arith.constant 0 : index
      %17 = vector.load %arg3[%c0_10, %c0_11] : memref<1x1536xf32, #tpu.memory_space<vmem>>, vector<1x1536xf32>
      %18 = vector.broadcast %17 : vector<1x1536xf32> to vector<8x1536xf32>
      %19 = arith.addf %16, %18 : vector<8x1536xf32>
      %cst_12 = arith.constant dense<0.000000e+00> : vector<8xf32>
      %20 = vector.multi_reduction <add>, %19, %cst_12 [1] : vector<8x1536xf32> to vector<8xf32>
      %21 = vector.shape_cast %20 : vector<8xf32> to vector<8x1xf32>
      %cst_13 = arith.constant dense<0.000000e+00> : vector<1xf32>
      %22 = vector.multi_reduction <add>, %21, %cst_13 [0] : vector<8x1xf32> to vector<1xf32>
      %23 = vector.shape_cast %22 : vector<1xf32> to vector<1x1xf32>
      %cst_14 = arith.constant 1.228800e+04 : f32
      %24 = vector.broadcast %cst_14 : f32 to vector<1x1xf32>
      %25 = arith.divf %23, %24 : vector<1x1xf32>
      %26 = vector.broadcast %25 : vector<1x1xf32> to vector<8x1536xf32>
      %27 = arith.subf %19, %26 : vector<8x1536xf32>
      %28 = arith.mulf %27, %27 : vector<8x1536xf32>
      %cst_15 = arith.constant dense<0.000000e+00> : vector<8xf32>
      %29 = vector.multi_reduction <add>, %28, %cst_15 [1] : vector<8x1536xf32> to vector<8xf32>
      %30 = vector.shape_cast %29 : vector<8xf32> to vector<8x1xf32>
      %cst_16 = arith.constant dense<0.000000e+00> : vector<1xf32>
      %31 = vector.multi_reduction <add>, %30, %cst_16 [0] : vector<8x1xf32> to vector<1xf32>
      %32 = vector.shape_cast %31 : vector<1xf32> to vector<1x1xf32>
      %cst_17 = arith.constant 1.228700e+04 : f32
      %33 = vector.broadcast %cst_17 : f32 to vector<1x1xf32>
      %34 = arith.divf %32, %33 : vector<1x1xf32>
      %c0_18 = arith.constant 0 : index
      %35 = memref.load %arg7[%c0_18] : memref<2xf32, #tpu.memory_space<smem>>
      %c1 = arith.constant 1 : index
      %36 = memref.load %arg7[%c1] : memref<2xf32, #tpu.memory_space<smem>>
      %cst_19 = arith.constant 9.99999974E-6 : f32
      %37 = vector.broadcast %cst_19 : f32 to vector<1x1xf32>
      %38 = arith.addf %34, %37 : vector<1x1xf32>
      %39 = math.rsqrt %38 : vector<1x1xf32>
      %40 = vector.broadcast %35 : f32 to vector<1x1xf32>
      %41 = arith.mulf %39, %40 : vector<1x1xf32>
      %42 = vector.broadcast %41 : vector<1x1xf32> to vector<8x1536xf32>
      %43 = arith.mulf %27, %42 : vector<8x1536xf32>
      %44 = vector.broadcast %36 : f32 to vector<8x1536xf32>
      %45 = arith.addf %43, %44 : vector<8x1536xf32>
      %cst_20 = arith.constant 0.000000e+00 : f32
      %46 = vector.broadcast %cst_20 : f32 to vector<8x1536xf32>
      %47 = arith.maximumf %45, %46 : vector<8x1536xf32>
      %48 = tpu.iota {dimensions = array<i32: 0>} : vector<8x1536xi32>
      %49 = tpu.iota {dimensions = array<i32: 1>} : vector<8x1536xi32>
      %c1536_i32_21 = arith.constant 1536 : i32
      %50 = vector.broadcast %c1536_i32_21 : i32 to vector<8x1536xi32>
      %51 = arith.muli %48, %50 : vector<8x1536xi32>
      %52 = arith.addi %51, %49 : vector<8x1536xi32>
      %c40503_i32 = arith.constant 40503 : i32
      %53 = vector.broadcast %c40503_i32 : i32 to vector<8x1536xi32>
      %54 = arith.muli %52, %53 : vector<8x1536xi32>
      %c0_22 = arith.constant 0 : index
      %55 = memref.load %arg6[%c0_22] : memref<1xi32, #tpu.memory_space<smem>>
      %56 = vector.broadcast %55 : i32 to vector<8x1536xi32>
      %57 = arith.addi %54, %56 : vector<8x1536xi32>
      %c16_i32 = arith.constant 16 : i32
      %58 = vector.broadcast %c16_i32 : i32 to vector<8x1536xi32>
      %59 = arith.shrsi %57, %58 : vector<8x1536xi32>
      %60 = arith.xori %57, %59 : vector<8x1536xi32>
      %c73244475_i32 = arith.constant 73244475 : i32
      %61 = vector.broadcast %c73244475_i32 : i32 to vector<8x1536xi32>
      %62 = arith.muli %60, %61 : vector<8x1536xi32>
      %c16_i32_23 = arith.constant 16 : i32
      %63 = vector.broadcast %c16_i32_23 : i32 to vector<8x1536xi32>
      %64 = arith.shrsi %62, %63 : vector<8x1536xi32>
      %65 = arith.xori %62, %64 : vector<8x1536xi32>
      %c73244475_i32_24 = arith.constant 73244475 : i32
      %66 = vector.broadcast %c73244475_i32_24 : i32 to vector<8x1536xi32>
      %67 = arith.muli %65, %66 : vector<8x1536xi32>
      %c16_i32_25 = arith.constant 16 : i32
      %68 = vector.broadcast %c16_i32_25 : i32 to vector<8x1536xi32>
      %69 = arith.shrsi %67, %68 : vector<8x1536xi32>
      %70 = arith.xori %67, %69 : vector<8x1536xi32>
      %c2147483647_i32 = arith.constant 2147483647 : i32
      %71 = vector.broadcast %c2147483647_i32 : i32 to vector<8x1536xi32>
      %72 = arith.andi %70, %71 : vector<8x1536xi32>
      %c1073741824_i32 = arith.constant 1073741824 : i32
      %73 = vector.broadcast %c1073741824_i32 : i32 to vector<8x1536xi32>
      %74 = arith.cmpi slt, %72, %73 : vector<8x1536xi32>
      %cst_26 = arith.constant 0.000000e+00 : f32
      %75 = vector.broadcast %cst_26 : f32 to vector<8x1536xf32>
      %76 = arith.select %74, %47, %75 : vector<8x1536xi1>, vector<8x1536xf32>
      %c0_27 = arith.constant 0 : index
      %c0_28 = arith.constant 0 : index
      %77 = vector.load %arg4[%c0_27, %c0_28] : memref<1536x128xf32, #tpu.memory_space<vmem>>, vector<1536x128xf32>
      %cst_29 = arith.constant dense<0.000000e+00> : vector<8x128xf32>
      %78 = tpu.matmul %76, %77, %cst_29 {dimension_numbers = #tpu.dot_dimension_numbers<[1], [0], [0], [1], [0, 0, 1, 1], [], []>} : vector<8x1536xf32>, vector<1536x128xf32>, vector<8x128xf32> -> vector<8x128xf32>
      %c0_30 = arith.constant 0 : index
      %c0_31 = arith.constant 0 : index
      %79 = vector.load %arg5[%c0_30, %c0_31] : memref<1x128xf32, #tpu.memory_space<vmem>>, vector<1x128xf32>
      %80 = vector.broadcast %79 : vector<1x128xf32> to vector<8x128xf32>
      %81 = arith.addf %78, %80 : vector<8x128xf32>
      %c0_32 = arith.constant 0 : index
      %c0_33 = arith.constant 0 : index
      %82 = vector.load %arg8[%c0_32, %c0_33] : memref<8x128xf32, #tpu.memory_space<vmem>>, vector<8x128xf32>
      tpu.vector_store %arg8[%c0_32, %c0_33], %81 {strides = array<i32>} : memref<8x128xf32, #tpu.memory_space<vmem>>, vector<8x128xf32>,
      %83 = tpu.iota {dimensions = array<i32: 1>} : vector<8x128xi32>
      %c10_i32 = arith.constant 10 : i32
      %84 = vector.broadcast %c10_i32 : i32 to vector<8x128xi32>
      %85 = arith.cmpi slt, %83, %84 : vector<8x128xi32>
      %cst_34 = arith.constant 0xFF800000 : f32
      %86 = vector.broadcast %cst_34 : f32 to vector<8x128xf32>
      %87 = arith.select %85, %81, %86 : vector<8x128xi1>, vector<8x128xf32>
      %cst_35 = arith.constant dense<0xFF800000> : vector<8xf32>
      %88 = vector.multi_reduction <maximumf>, %87, %cst_35 [1] : vector<8x128xf32> to vector<8xf32>
      %89 = vector.shape_cast %88 : vector<8xf32> to vector<8x1xf32>
      %90 = vector.broadcast %89 : vector<8x1xf32> to vector<8x128xf32>
      %91 = arith.cmpf oeq, %87, %90 : vector<8x128xf32>
      %c128_i32 = arith.constant 128 : i32
      %92 = vector.broadcast %c128_i32 : i32 to vector<8x128xi32>
      %93 = arith.select %91, %83, %92 : vector<8x128xi1>, vector<8x128xi32>
      %cst_36 = arith.constant dense<2147483647> : vector<8xi32>
      %94 = vector.multi_reduction <minsi>, %93, %cst_36 [1] : vector<8x128xi32> to vector<8xi32>
      %95 = vector.shape_cast %94 : vector<8xi32> to vector<8x1xi32>
      %c0_37 = arith.constant 0 : index
      %c0_38 = arith.constant 0 : index
      %96 = vector.load %arg9[%c0_37, %c0_38] : memref<8x1xi32, #tpu.memory_space<vmem>>, vector<8x1xi32>
      tpu.vector_store %arg9[%c0_37, %c0_38], %95 {strides = array<i32>} : memref<8x1xi32, #tpu.memory_space<vmem>>, vector<8x1xi32>,
    } else {
    }
    return
  }
  func.func @transform_0(%arg0: i32) -> (i32, i32) {
    %c0_i32 = arith.constant 0 : i32
    %c0_i32_0 = arith.constant 0 : i32
    %c0_i32_1 = arith.constant 0 : i32
    return %c0_i32, %c0_i32_0 : i32, i32
  }
  func.func @transform_1(%arg0: i32) -> (i32, i32) {
    %c0_i32 = arith.constant 0 : i32
    %c0_i32_0 = arith.constant 0 : i32
    return %arg0, %c0_i32 : i32, i32
  }
  func.func @transform_2(%arg0: i32) -> (i32, i32) {
    %c0_i32 = arith.constant 0 : i32
    %c0_i32_0 = arith.constant 0 : i32
    %c0_i32_1 = arith.constant 0 : i32
    return %c0_i32, %c0_i32_0 : i32, i32
  }
  func.func @transform_3(%arg0: i32) -> (i32, i32) {
    %c0_i32 = arith.constant 0 : i32
    %c0_i32_0 = arith.constant 0 : i32
    %c0_i32_1 = arith.constant 0 : i32
    return %c0_i32, %c0_i32_0 : i32, i32
  }
  func.func @transform_4(%arg0: i32) -> (i32, i32) {
    %c0_i32 = arith.constant 0 : i32
    %c0_i32_0 = arith.constant 0 : i32
    %c0_i32_1 = arith.constant 0 : i32
    return %c0_i32, %c0_i32_0 : i32, i32
  }
  func.func @transform_5(%arg0: i32) -> i32 {
    %c0_i32 = arith.constant 0 : i32
    %c0_i32_0 = arith.constant 0 : i32
    return %c0_i32 : i32
  }
  func.func @transform_6(%arg0: i32) -> i32 {
    %c0_i32 = arith.constant 0 : i32
    %c0_i32_0 = arith.constant 0 : i32
    return %c0_i32 : i32
  }
  func.func @transform_7(%arg0: i32) -> (i32, i32) {
    %c0_i32 = arith.constant 0 : i32
    %c0_i32_0 = arith.constant 0 : i32
    %c0_i32_1 = arith.constant 0 : i32
    return %c0_i32, %c0_i32_0 : i32, i32
  }
  func.func @transform_8(%arg0: i32) -> (i32, i32) {
    %c0_i32 = arith.constant 0 : i32
    %c0_i32_0 = arith.constant 0 : i32
    %c0_i32_1 = arith.constant 0 : i32
    return %c0_i32, %c0_i32_0 : i32, i32
  }
}

</mosaic_0001>

<bundles_post_ra>
// kernel: forward_prepped.1
= control target key start
LH: loop header
LB: loop body
LE: loop exit
PB: predicated region body
PF: predicated region fallthrough
CT: control target
= control target key end

     0   :  { %s15264_s0 = inlined_call_operand.hbm [shape: f32[8,3072], index: 0, kind: input, shape index: {}]   ;;  %s15265_s1 = inlined_call_operand.hbm [shape: bf16[3072,1536], index: 1, kind: input, shape index: {}]   ;;  %s15266_s2 = inlined_call_operand.hbm [shape: f32[1,1536], index: 2, kind: input, shape index: {}]   ;;  %s15267_s3 = inlined_call_operand.hbm [shape: f32[1536,128], index: 3, kind: input, shape index: {}]   ;;  %s15268_s4 = inlined_call_operand.hbm [shape: f32[1,128], index: 4, kind: input, shape index: {}]   ;;  %s15269_s5 = inlined_call_operand.<no memory space> [shape: s32[1], index: 5, kind: input, shape index: {}]   ;;  %s15270_s6 = inlined_call_operand.hbm [shape: f32[2], index: 6, kind: input, shape index: {}]   ;;  %s15271_s7 = inlined_call_operand.hbm [shape: f32[8,128], index: 7, kind: output, shape index: {0}]   ;;  %s15272_s8 = inlined_call_operand.vmem [shape: s32[8,1], index: 8, kind: output, shape index: {1}]  }
   0x1   :  { %14 = sst [smem:[#allocation3]] %s15269_s5 }
   0x2   :  { %15 = vsyncpa [#allocation5], 0 }
   0x3   :  { %16 = vsyncpa [#allocation9], 0 }
   0x4   :  { %18 = vsyncpa [#allocation9 + $0x1], 0 }
   0x5   :  { %19 = vsyncpa [#allocation12], 0 }
   0x6   :  { %20 = vsyncpa [#allocation7], 0 }
   0x7   :  { %21 = vsyncpa [#allocation6], 0  ;;  %s13509_s29 = smov 0   ;;  %s13511_s30 = smov 0  }
   0x8   :  { %s13513_s9 = smov 0   ;;  %s13515_s10 = smov 0  }
   0x9 LB: > { %s13528_s5 = sadd.s32 4294967295, %s13447_s10   ;;  %p68_p0 = scmp.ne.s32.totalorder %s13439_s30, %s13435_s29  ;;  %s13447_s10 = sphi %s13515_s10, %s15306_s10   ;;  %s13443_s9 = sphi %s13513_s9, %s15305_s9   ;;  %s13439_s30 = sphi %s13511_s30, %s15304_s30   ;;  %s13435_s29 = sphi %s13509_s29, %s15303_s29  }
   0xa   : > { %p15273_p1 = scmp.eq.s32.totalorder %s13528_s5, 0  ;;  %p9993_p2 = scmp.ge.s32.totalorder %s13447_s10, 1 }
   0xb   : > { %p226_p3 = scmp.lt.s32.totalorder %s13447_s10, 3  ;;  %s13449_s13 = smov [#allocation10]  }
   0xc   : > { %p13537_p5 = por %p15273_p1, %p68_p0  ;;  %s250_s14 = sshll.u32 %s13449_s13, 4  ;;  %s251_s14 = int_to_ptr.vmem [resolvable:$true] %s250_s14 }
   0xd   : > { %p13541_p6 = pnand %p9993_p2, %p226_p3  ;;  %s13450_s16 = smov [#allocation11]  }
   0xe   : > { %s15276_s11 = scalar_select %p13537_p5, 1, 0 }
   0xf   : > { %s15277_s12 = scalar_select %p13541_p6, 1, 0 }
  0x10   : > { %p11419_p7 = pneg %p13541_p6  ;;  %s260_s17 = sshll.u32 %s13450_s16, 4  ;;  %s261_s17 = int_to_ptr.vmem [resolvable:$true] %s260_s17 }
  0x11   : > { %s13237_s18 = scalar_lea.vmem %s251_s14, 192  ;;  %p13245_p13 = scmp.lt.s32.totalorder %s251_s14, %s251_s14 }
  0x12   : > { %p13549_p8 = pnand %p11419_p7, %p15273_p1  ;;  %p13238_p10 = scmp.ne.s32.totalorder %s251_s14, %s13237_s18 }
  0x13   : > { %p13246_p0 = scmp.lt.s32.totalorder %s13237_s18, %s13237_s18 }
  0x14   : > { %p13228_p9 = pneg %p13549_p8 }
  0x15   : > { %p13247_p2 = por %p13246_p0, %p13245_p13 }
  0x16   : > { %p13240_p11 = pnand %p13238_p10, %p13228_p9 }
  0x18   : > { %p13241_p12 = pneg %p13240_p11 }
  0x1a   : > { %p13248_p3 = pnand %p13247_p2, %p13241_p12 }
  0x1c   : > { %13251 = shalt.err (!%p13248_p3)
}
  0x1d   : > { %11425 = dma.hbm_to_vmem [thread:$0]  (!%p13549_p8), %s15266_s2, 192, %s251_s14, [#allocation9]  }
  0x1e   : > { %s13263_s21 = scalar_lea.vmem %s261_s17, 24576  ;;  %p13271_p10 = scmp.lt.s32.totalorder %s261_s17, %s261_s17 }
  0x1f   : > { %p13264_p7 = scmp.ne.s32.totalorder %s261_s17, %s13263_s21  ;;  %p13272_p11 = scmp.lt.s32.totalorder %s13263_s21, %s13263_s21 }
  0x21   : > { %p13266_p4 = pnand %p13264_p7, %p13228_p9  ;;  %p13273_p5 = por %p13272_p11, %p13271_p10 }
  0x23   : > { %p13267_p1 = pneg %p13266_p4 }
  0x25   : > { %p13274_p6 = pnand %p13273_p5, %p13267_p1 }
  0x27   : > { %13277 = shalt.err (!%p13274_p6)
}
  0x28   : > { %s13451_s22 = smov 128   ;;  %s13452_s23 = smov 8  }
  0x29   : > { %11428 = dma.hbm_to_vmem [thread:$0]  (!%p13549_p8), %s15267_s3, 24576, %s261_s17, [#allocation12], %s13451_s22, %s13451_s22, %s13452_s23  }
  0x2a   : > { %s13453_s26 = smov [#allocation4]   ;;  %s13454_s28 = smov [#allocation13]  }
  0x2b   : > { %s239_s27 = sshll.u32 %s13453_s26, 4  ;;  %s274_s29 = sshll.u32 %s13454_s28, 4  ;;  %s240_s27 = int_to_ptr.vmem [resolvable:$true] %s239_s27  ;;  %s275_s29 = int_to_ptr.vmem [resolvable:$true] %s274_s29 }
  0x2c   : > { %s13289_s13 = scalar_lea.vmem %s240_s27, 3072  ;;  %p13297_p6 = scmp.lt.s32.totalorder %s240_s27, %s240_s27 }
  0x2d   : > { %p13290_p4 = scmp.ne.s32.totalorder %s240_s27, %s13289_s13  ;;  %p13298_p12 = scmp.lt.s32.totalorder %s13289_s13, %s13289_s13 }
  0x2f   : > { %p13292_p1 = pnand %p13290_p4, %p13228_p9  ;;  %p13299_p13 = por %p13298_p12, %p13297_p6 }
  0x31   : > { %p13293_p5 = pneg %p13292_p1 }
  0x33   : > { %p13300_p0 = pnand %p13299_p13, %p13293_p5 }
  0x35   : > { %13303 = shalt.err (!%p13300_p0)
}
  0x36   : > { %11422 = dma.hbm_to_vmem [thread:$0]  (!%p13549_p8), %s15264_s0, 3072, %s240_s27, [#allocation5]  }
  0x37   : > { %s13315_s17 = scalar_lea.vmem %s275_s29, 16  ;;  %s13322_s18 = scalar_lea.vmem %s275_s29, 32 }
  0x38   : > { %p13316_p2 = scmp.ne.s32.totalorder %s275_s29, %s13315_s17  ;;  %p13323_p10 = scmp.lt.s32.totalorder %s275_s29, %s275_s29 }
  0x39   : > { %p13324_p11 = scmp.lt.s32.totalorder %s13322_s18, %s13315_s17 }
  0x3a   : > { %p13318_p3 = pnand %p13316_p2, %p13228_p9 }
  0x3b   : > { %p13325_p4 = por %p13324_p11, %p13323_p10 }
  0x3c   : > { %p13319_p7 = pneg %p13318_p3 }
  0x3e   : > { %p13326_p1 = pnand %p13325_p4, %p13319_p7 }
  0x40   : > { %13329 = shalt.err (!%p13326_p1)
}
  0x41   : > { %11431 = dma.hbm_to_vmem [thread:$0]  (!%p13549_p8), %s15268_s4, 16, %s275_s29, [#allocation12]  }
  0x42   : > { %s13455_s21 = smov [#allocation14]   ;;  %s13593_s24 = sadd.s32 1, %s13447_s10  }
  0x43   : > { %11434 = dma.hbm_to_smem (!%p13549_p8), %s15270_s6, 16, %s13455_s21, [#allocation7]  }
  0x44   : > { %s52_s25 = ssub.s32 %s13447_s10, %s13593_s24  ;;  %s55_s26 = sadd.s32 1, %s13443_s9 }
  0x45   : > { %p53_p9 = scmp.eq.s32.totalorder %s52_s25, 0  ;;  %p62_p5 = scmp.ne.s32.totalorder %s13443_s9, %s13439_s30 }
  0x46   : > { %p63_p6 = scmp.eq.s32.totalorder %s13447_s10, 0  ;;  %p11444_p13 = scmp.lt.s32.totalorder %s13447_s10, 2 }
  0x47   : > { %s13602_s27 = scalar_select %p53_p9, %s13443_s9, %s55_s26  }
  0x48   : > { %p64_p12 = por %p63_p6, %p62_p5  ;;  %s297_s28 = sand.u32 1, %s13447_s10  }
  0x49   : > { %s299_s29 = sand.u32 1, %s13443_s9   ;;  %s11445_s15 = smul.u32 147456, %s13447_s10 }
  0x4a   : > { %s11390_s13 = smul.u32 9216, %s299_s29  ;;  %p13608_p0 = pnand %p11444_p13, %p64_p12 }
  0x4b   : > { %s13615_s18 = scalar_lea.hbm %s15265_s1, %s11445_s15  ;;  %s13619_s21 = scalar_lea.sflag [#allocation9], %s297_s28 }
  0x4c   : > { %s301_s19 = scalar_lea.vmem [#allocation8], %s11390_s13  ;;  %s13341_s10 = scalar_lea.hbm %s13615_s18, 147456 }
  0x4d   : > { %s309_s20 = sshll.u32 %s301_s19, 4  ;;  %p13342_p8 = scmp.ne.s32.totalorder %s13615_s18, %s13341_s10  ;;  %s13617_s20 = int_to_ptr.vmem [resolvable:$true] %s309_s20 }
  0x4e   : > { %p13343_p2 = pneg %p13608_p0  ;;  %s13346_s25 = scalar_lea.hbm %s15265_s1, 294912 }
  0x4f   : > { %p13347_p10 = scmp.lt.s32.totalorder %s13615_s18, %s15265_s1  ;;  %p13348_p11 = scmp.lt.s32.totalorder %s13346_s25, %s13341_s10 }
  0x50   : > { %p13344_p3 = pnand %p13343_p2, %p13342_p8 }
  0x51   : > { %p13349_p4 = por %p13348_p11, %p13347_p10 }
  0x52   : > { %p13345_p7 = pneg %p13344_p3 }
  0x54   : > { %p13350_p1 = pnand %p13349_p4, %p13345_p7 }
  0x56   : > { %13353 = shalt.err (!%p13350_p1)
}
  0x57   : > { %s13354_s28 = scalar_lea.vmem %s13617_s20, 147456  ;;  %s13456_s13 = smov [#allocation8]  }
  0x58   : > { %p13355_p9 = scmp.ne.s32.totalorder %s13617_s20, %s13354_s28  ;;  %s13359_s15 = sshll.u32 %s13456_s13, 4  ;;  %s13360_s15 = int_to_ptr.vmem [resolvable:$false] %s13359_s15 }
  0x59   : > { %s13361_s16 = scalar_lea.vmem %s13360_s15, 294912  ;;  %p13362_p12 = scmp.lt.s32.totalorder %s13617_s20, %s13360_s15 }
  0x5a   : > { %p13357_p5 = pnand %p13355_p9, %p13343_p2  ;;  %p13363_p13 = scmp.lt.s32.totalorder %s13361_s16, %s13354_s28 }
  0x5c   : > { %p13358_p6 = pneg %p13357_p5  ;;  %p13364_p8 = por %p13363_p13, %p13362_p12 }
  0x5e   : > { %p13365_p3 = pnand %p13364_p8, %p13358_p6 }
  0x60   : > { %13368 = shalt.err (!%p13365_p3)
}
  0x61   : > { %s13457_s17 = smov 768   ;;  %s13458_s19 = smov 48  }
  0x62   : > { %11438 = dma.hbm_to_vmem [thread:$0]  (!%p13608_p0), %s13615_s18, 147456, %s13617_s20, %s13619_s21, %s13457_s17, %s13457_s17, %s13458_s19  }
  0x63   : > { %p15280_p2 = scmp.ne.s32.totalorder %s15277_s12, 0 }
  0x64   : > { %p15281_p7 = scmp.eq.s32.totalorder (!%p15280_p2), %s13528_s5, 0 }
  0x65   : > { %321 = sbr.rel (%p15280_p2) target bundleno = 2591 (0xa1f), region = 48 }
  0x6a   : > { %13410 = dma.done.wait (%p15281_p7), [#allocation5], 3072   ;;  %p15282_p10 = pmov %p15281_p7 }
  0x6b   : > { %s327_s10 = sand.u32 1, %s13528_s5   ;;  %s329_s22 = sand.u32 1, %s13439_s30  }
  0x6c   : > { %13412 = vsyncadd (%p15282_p10), [#allocation5], 4294964224  ;;  %s11392_s23 = smul.u32 9216, %s329_s22  ;;  %s328_s25 = scalar_lea.sflag [#allocation9], %s327_s10 }
  0x6d   : > { %p15283_p11 = scmp.ne.s32.totalorder %s15276_s11, 0 }
  0x6e   : > { %s13648_s26 = scalar_lea.vmem [#allocation8], %s11392_s23 }
  0x6f   : > { %13414 = dma.done.wait (%p15283_p11), %s328_s25, 147456  }
  0x70   : > { %13416 = vsyncadd (%p15283_p11), %s328_s25, 4294819840  ;;  %p15284_p0 = pmov %p15281_p7 }
  0x72   : > { %13418 = dma.done.wait (%p15284_p0), [#allocation9], 192   ;;  %p15285_p4 = pmov %p15284_p0 }
  0x73   : > { %p15286_p1 = pmov %p15284_p0 }
  0x74   : > { %13420 = vsyncadd (%p15285_p4), [#allocation9], 4294967104 }
  0x75   : > { %13422 = dma.done.wait (%p15286_p1), [#allocation12], 24592   ;;  %p15287_p9 = pmov %p15284_p0 }
  0x76   : > { %p15288_p5 = pmov %p15284_p0 }
  0x77   : > { %13424 = vsyncadd (%p15287_p9), [#allocation12], 4294942704 }
  0x78   : > { %13426 = dma.done.wait (%p15288_p5), [#allocation7], 16   ;;  %p15289_p6 = pmov %p15284_p0 }
  0x7a   : > { %13428 = vsyncadd (%p15289_p6), [#allocation7], 4294967280 }
  0x7b   : > { %352 = sfence }
  0x7c   : > { %p15290_p12 = scmp.ne.s32.totalorder %s13528_s5, 0 }
  0x7e   : > { %380 = sbr.rel (%p15290_p12) target bundleno = 138 (0x8a), region = 76 }
  0x83   : > { %v13459_v0 = vmov 0.0  }
  0x84   : > { %381 = vst [vmem:[#allocation2 + $0x30] sm:$0xff] %v13459_v0  ;;  %382 = vst [vmem:[#allocation2] sm:$0xff] %v13459_v0 }
  0x85   : > { %383 = vst [vmem:[#allocation2 + $0x58] sm:$0xff] %v13459_v0  ;;  %384 = vst [vmem:[#allocation2 + $0x18] sm:$0xff] %v13459_v0 }
  0x86   : > { %385 = vst [vmem:[#allocation2 + $0x50] sm:$0xff] %v13459_v0  ;;  %386 = vst [vmem:[#allocation2 + $0x20] sm:$0xff] %v13459_v0 }
  0x87   : > { %387 = vst [vmem:[#allocation2 + $0x8] sm:$0xff] %v13459_v0  ;;  %388 = vst [vmem:[#allocation2 + $0x38] sm:$0xff] %v13459_v0 }
  0x88   : > { %389 = vst [vmem:[#allocation2 + $0x28] sm:$0xff] %v13459_v0  ;;  %390 = vst [vmem:[#allocation2 + $0x48] sm:$0xff] %v13459_v0 }
  0x89   : > { %391 = vst [vmem:[#allocation2 + $0x10] sm:$0xff] %v13459_v0  ;;  %392 = vst [vmem:[#allocation2 + $0x40] sm:$0xff] %v13459_v0 }
  0x8a PF: > { %v11496_v1 = vld [vmem:[%s13648_s26 + $0x2a4] ss:$48 sps:$4 sm:$0xff]   ;;  %v11500_v3 = vld [vmem:[%s13648_s26 + $0x2a0] ss:$48 sps:$4 sm:$0xff]   ;;  %s393_s11 = smul.u32 1536, %s13528_s5  ;;  %p11161_p13 = scmp.ne.s32.totalorder %s13528_s5, 1 }
  0x8b   : > { %v11498_v2 = vld [vmem:[%s13648_s26 + $0x8a4] ss:$48 sps:$4 sm:$0xff]   ;;  %7346 = vmatprep.subr.bf16.mxu0 %v11496_v1  ;;  %v11501_v4 = vld [vmem:[%s13648_s26 + $0x8a0] ss:$48 sps:$4 sm:$0xff]   ;;  %s9087_s20 = sld [smem:[#allocation3]] (!%p11161_p13) }
  0x8c   : > { %7387 = vmatprep.subr.bf16.mxu1 %v11498_v2  ;;  %v11502_v5 = vld [vmem:[%s13648_s26 + $0x244] ss:$48 sps:$4 sm:$0xff]   ;;  %7347 = vmatpush1.bf16.msra.mxu0 %v11500_v3  ;;  %v11506_v7 = vld [vmem:[%s13648_s26 + $0x240] ss:$48 sps:$4 sm:$0xff]   ;;  %s394_s12 = sshra.s32 %s393_s11, 7  ;;  %s15109_s21 = sld [smem:[#allocation14]] (!%p11161_p13) }
  0x8d   : > { %7388 = vmatpush1.bf16.msra.mxu1 %v11501_v4  ;;  %v11504_v6 = vld [vmem:[%s13648_s26 + $0x844] ss:$48 sps:$4 sm:$0xff]   ;;  %7348 = vmatprep.subr.bf16.mxu0 %v11502_v5  ;;  %v11507_v8 = vld [vmem:[%s13648_s26 + $0x840] ss:$48 sps:$4 sm:$0xff]   ;;  %s10008_s14 = sshll.u32 %s394_s12, 3  ;;  %s11162_s29 = sld [smem:[#allocation14 + $0x1]] (!%p11161_p13) }
  0x8e   : > { %7389 = vmatprep.subr.bf16.mxu1 %v11504_v6  ;;  %v11508_v9 = vld [vmem:[%s13648_s26 + $0x1e4] ss:$48 sps:$4 sm:$0xff]   ;;  %v11512_v11 = vld [vmem:[%s13648_s26 + $0x1e0] ss:$48 sps:$4 sm:$0xff]   ;;  %s13715_s18 = scalar_lea.vmem [#allocation4], %s10008_s14 }
  0x8f   : > { %v11510_v10 = vld [vmem:[%s13648_s26 + $0x7e4] ss:$48 sps:$4 sm:$0xff]   ;;  %v11513_v12 = vld [vmem:[%s13648_s26 + $0x7e0] ss:$48 sps:$4 sm:$0xff]   ;;  %v399_v47 = vld [vmem:[%s13715_s18 + $0x8] sm:$0xff] }
  0x90   : > { %7349 = vmatpush1.bf16.msra.mxu0 %v11506_v7  ;;  %v11514_v13 = vld [vmem:[%s13648_s26 + $0x184] ss:$48 sps:$4 sm:$0xff]   ;;  %v11518_v15 = vld [vmem:[%s13648_s26 + $0x180] ss:$48 sps:$4 sm:$0xff]   ;;  %v13720_v50 = vpack.c.bf16 %v399_v47, %v399_v47  ;;  %v401_v51 = vld [vmem:[%s13715_s18 + $0x18] sm:$0xff] }
  0x91   : > { %7390 = vmatpush1.bf16.msra.mxu1 %v11507_v8  ;;  %7350 = vmatprep.subr.bf16.mxu0 %v11508_v9  ;;  %v11516_v14 = vld [vmem:[%s13648_s26 + $0x784] ss:$48 sps:$4 sm:$0xff]   ;;  %v11519_v16 = vld [vmem:[%s13648_s26 + $0x780] ss:$48 sps:$4 sm:$0xff]   ;;  %v13724_v53 = vpack.c.bf16 %v401_v51, %v401_v51 }
  0x92   : > { %7391 = vmatprep.subr.bf16.mxu1 %v11510_v10  ;;  %v11520_v17 = vld [vmem:[%s13648_s26 + $0x124] ss:$48 sps:$4 sm:$0xff]   ;;  %v11524_v19 = vld [vmem:[%s13648_s26 + $0x120] ss:$48 sps:$4 sm:$0xff]   ;;  %7378 = vmatprep.mubr.bf16.mxu0 %v13720_v50 }
  0x93   : > { %v11522_v18 = vld [vmem:[%s13648_s26 + $0x724] ss:$48 sps:$4 sm:$0xff]   ;;  %v11525_v20 = vld [vmem:[%s13648_s26 + $0x720] ss:$48 sps:$4 sm:$0xff]   ;;  %7419 = vmatprep.mubr.bf16.mxu1 %v13724_v53 }
  0x94   : > { %7351 = vmatpush1.bf16.msra.mxu0 %v11512_v11  ;;  %v11526_v21 = vld [vmem:[%s13648_s26 + $0xc4] ss:$48 sps:$4 sm:$0xff]   ;;  %v11530_v23 = vld [vmem:[%s13648_s26 + $0xc0] ss:$48 sps:$4 sm:$0xff]  }
  0x95   : > { %7392 = vmatpush1.bf16.msra.mxu1 %v11513_v12  ;;  %7352 = vmatprep.subr.bf16.mxu0 %v11514_v13  ;;  %v11528_v22 = vld [vmem:[%s13648_s26 + $0x6c4] ss:$48 sps:$4 sm:$0xff]   ;;  %v11531_v24 = vld [vmem:[%s13648_s26 + $0x6c0] ss:$48 sps:$4 sm:$0xff]  }
  0x96   : > { %7393 = vmatprep.subr.bf16.mxu1 %v11516_v14  ;;  %v11532_v25 = vld [vmem:[%s13648_s26 + $0x64] ss:$48 sps:$4 sm:$0xff]   ;;  %v11536_v27 = vld [vmem:[%s13648_s26 + $0x60] ss:$48 sps:$4 sm:$0xff]  }
  0x97   : > { %v11534_v26 = vld [vmem:[%s13648_s26 + $0x664] ss:$48 sps:$4 sm:$0xff]   ;;  %v11537_v28 = vld [vmem:[%s13648_s26 + $0x660] ss:$48 sps:$4 sm:$0xff]  }
  0x98   : > { %7353 = vmatpush1.bf16.msra.mxu0 %v11518_v15  ;;  %v11538_v29 = vld [vmem:[%s13648_s26 + $0x4] ss:$48 sps:$4 sm:$0xff]   ;;  %v11542_v31 = vld [vmem:[%s13648_s26] ss:$48 sps:$4 sm:$0xff]  }
  0x99   : > { %7394 = vmatpush1.bf16.msra.mxu1 %v11519_v16  ;;  %7354 = vmatprep.subr.bf16.mxu0 %v11520_v17  ;;  %v11540_v30 = vld [vmem:[%s13648_s26 + $0x604] ss:$48 sps:$4 sm:$0xff]   ;;  %v11543_v32 = vld [vmem:[%s13648_s26 + $0x600] ss:$48 sps:$4 sm:$0xff]  }
  0x9a   : > { %7395 = vmatprep.subr.bf16.mxu1 %v11522_v18  ;;  %v11544_v33 = vld [vmem:[%s13648_s26 + $0x5a4] ss:$48 sps:$4 sm:$0xff]   ;;  %v11548_v35 = vld [vmem:[%s13648_s26 + $0x5a0] ss:$48 sps:$4 sm:$0xff]  }
  0x9b   : > { %v11546_v34 = vld [vmem:[%s13648_s26 + $0xba4] ss:$48 sps:$4 sm:$0xff]   ;;  %v11549_v36 = vld [vmem:[%s13648_s26 + $0xba0] ss:$48 sps:$4 sm:$0xff]  }
  0x9c   : > { %7355 = vmatpush1.bf16.msra.mxu0 %v11524_v19  ;;  %v11550_v37 = vld [vmem:[%s13648_s26 + $0x544] ss:$48 sps:$4 sm:$0xff]   ;;  %v11554_v39 = vld [vmem:[%s13648_s26 + $0x540] ss:$48 sps:$4 sm:$0xff]  }
  0x9d   : > { %7396 = vmatpush1.bf16.msra.mxu1 %v11525_v20  ;;  %7356 = vmatprep.subr.bf16.mxu0 %v11526_v21  ;;  %v11552_v38 = vld [vmem:[%s13648_s26 + $0xb44] ss:$48 sps:$4 sm:$0xff]   ;;  %v11555_v40 = vld [vmem:[%s13648_s26 + $0xb40] ss:$48 sps:$4 sm:$0xff]  }
  0x9e   : > { %7397 = vmatprep.subr.bf16.mxu1 %v11528_v22  ;;  %v11556_v41 = vld [vmem:[%s13648_s26 + $0x4e4] ss:$48 sps:$4 sm:$0xff]   ;;  %v11560_v43 = vld [vmem:[%s13648_s26 + $0x4e0] ss:$48 sps:$4 sm:$0xff]  }
  0x9f   : > { %v11558_v42 = vld [vmem:[%s13648_s26 + $0xae4] ss:$48 sps:$4 sm:$0xff]   ;;  %v11561_v44 = vld [vmem:[%s13648_s26 + $0xae0] ss:$48 sps:$4 sm:$0xff]  }
  0xa0   : > { %7357 = vmatpush1.bf16.msra.mxu0 %v11530_v23  ;;  %v11562_v45 = vld [vmem:[%s13648_s26 + $0x484] ss:$48 sps:$4 sm:$0xff]   ;;  %v11566_v48 = vld [vmem:[%s13648_s26 + $0x480] ss:$48 sps:$4 sm:$0xff]  }
  0xa1   : > { %7398 = vmatpush1.bf16.msra.mxu1 %v11531_v24  ;;  %7358 = vmatprep.subr.bf16.mxu0 %v11532_v25  ;;  %v11564_v46 = vld [vmem:[%s13648_s26 + $0xa84] ss:$48 sps:$4 sm:$0xff]   ;;  %v11567_v49 = vld [vmem:[%s13648_s26 + $0xa80] ss:$48 sps:$4 sm:$0xff]  }
  0xa2   : > { %7399 = vmatprep.subr.bf16.mxu1 %v11534_v26  ;;  %v11568_v52 = vld [vmem:[%s13648_s26 + $0x424] ss:$48 sps:$4 sm:$0xff]   ;;  %v11572_v55 = vld [vmem:[%s13648_s26 + $0x420] ss:$48 sps:$4 sm:$0xff]  }
  0xa3   : > { %v11570_v54 = vld [vmem:[%s13648_s26 + $0xa24] ss:$48 sps:$4 sm:$0xff]   ;;  %v11573_v56 = vld [vmem:[%s13648_s26 + $0xa20] ss:$48 sps:$4 sm:$0xff]  }
  0xa4   : > { %7359 = vmatpush1.bf16.msra.mxu0 %v11536_v27  ;;  %v11574_v57 = vld [vmem:[%s13648_s26 + $0x3c4] ss:$48 sps:$4 sm:$0xff]   ;;  %v11578_v59 = vld [vmem:[%s13648_s26 + $0x3c0] ss:$48 sps:$4 sm:$0xff]  }
  0xa5   : > { %7400 = vmatpush1.bf16.msra.mxu1 %v11537_v28  ;;  %7360 = vmatprep.subr.bf16.mxu0 %v11538_v29  ;;  %v11576_v58 = vld [vmem:[%s13648_s26 + $0x9c4] ss:$48 sps:$4 sm:$0xff]   ;;  %v11579_v60 = vld [vmem:[%s13648_s26 + $0x9c0] ss:$48 sps:$4 sm:$0xff]  }
  0xa6   : > { %7401 = vmatprep.subr.bf16.mxu1 %v11540_v30  ;;  %v11580_v61 = vld [vmem:[%s13648_s26 + $0x364] ss:$48 sps:$4 sm:$0xff]   ;;  %v11584_v63 = vld [vmem:[%s13648_s26 + $0x360] ss:$48 sps:$4 sm:$0xff]  }
  0xa7   : > { %v11582_v62 = vld [vmem:[%s13648_s26 + $0x964] ss:$48 sps:$4 sm:$0xff]   ;;  %v11585_v0 = vld [vmem:[%s13648_s26 + $0x960] ss:$48 sps:$4 sm:$0xff]  }
  0xa8   : > { %7361 = vmatpush1.bf16.msra.mxu0 %v11542_v31  ;;  %v11586_v1 = vld [vmem:[%s13648_s26 + $0x304] ss:$48 sps:$4 sm:$0xff]   ;;  %v11590_v3 = vld [vmem:[%s13648_s26 + $0x300] ss:$48 sps:$4 sm:$0xff]  }
  0xa9   : > { %7402 = vmatpush1.bf16.msra.mxu1 %v11543_v32  ;;  %7362 = vmatprep.subr.bf16.mxu0 %v11544_v33  ;;  %v11588_v2 = vld [vmem:[%s13648_s26 + $0x904] ss:$48 sps:$4 sm:$0xff]   ;;  %v11591_v4 = vld [vmem:[%s13648_s26 + $0x900] ss:$48 sps:$4 sm:$0xff]  }
  0xaa   : > { %7403 = vmatprep.subr.bf16.mxu1 %v11546_v34  ;;  %v398_v5 = vld [vmem:[%s13715_s18] sm:$0xff]  ;;  %v400_v6 = vld [vmem:[%s13715_s18 + $0x10] sm:$0xff] }
  0xab   : > { %v11594_v7 = vld [vmem:[%s13648_s26 + $0xea4] ss:$48 sps:$4 sm:$0xff]   ;;  %v13747_v9 = vpack.c.bf16 %v398_v5, %v398_v5  ;;  %v13749_v10 = vpack.c.bf16 %v400_v6, %v400_v6  ;;  %v11592_v11 = vld [vmem:[%s13648_s26 + $0xea0] ss:$48 sps:$4 sm:$0xff]  }
  0xac   : > { %7363 = vmatpush2.bf16.msra.mxu0 %v11548_v35  ;;  %v11597_v8 = vld [vmem:[%s13648_s26 + $0x14a4] ss:$48 sps:$4 sm:$0xff]   ;;  %v11595_v12 = vld [vmem:[%s13648_s26 + $0x14a0] ss:$48 sps:$4 sm:$0xff]   ;;  %v403_v35 = vld [vmem:[%s13715_s18 + $0x28] sm:$0xff] }
  0xad   : > { %7404 = vmatpush2.bf16.msra.mxu1 %v11549_v36  ;;  %7364 = vmatprep.subr.bf16.mxu0 %v11550_v37  ;;  %v11600_v13 = vld [vmem:[%s13648_s26 + $0xe44] ss:$48 sps:$4 sm:$0xff]   ;;  %v11598_v15 = vld [vmem:[%s13648_s26 + $0xe40] ss:$48 sps:$4 sm:$0xff]  }
  0xae   : > { %7405 = vmatprep.subr.bf16.mxu1 %v11552_v38  ;;  %v11603_v14 = vld [vmem:[%s13648_s26 + $0x1444] ss:$48 sps:$4 sm:$0xff]   ;;  %v11601_v16 = vld [vmem:[%s13648_s26 + $0x1440] ss:$48 sps:$4 sm:$0xff]   ;;  %v13780_v38 = vpack.c.bf16 %v403_v35, %v403_v35 }
  0xaf   : > { %v11606_v17 = vld [vmem:[%s13648_s26 + $0xde4] ss:$48 sps:$4 sm:$0xff]   ;;  %v11604_v19 = vld [vmem:[%s13648_s26 + $0xde0] ss:$48 sps:$4 sm:$0xff]  }
  0xb0   : > { %7365 = vmatpush2.bf16.msra.mxu0 %v11554_v39  ;;  %v11609_v18 = vld [vmem:[%s13648_s26 + $0x13e4] ss:$48 sps:$4 sm:$0xff]   ;;  %v11607_v20 = vld [vmem:[%s13648_s26 + $0x13e0] ss:$48 sps:$4 sm:$0xff]   ;;  %v405_v39 = vld [vmem:[%s13715_s18 + $0x38] sm:$0xff] }
  0xb1   : > { %7406 = vmatpush2.bf16.msra.mxu1 %v11555_v40  ;;  %7366 = vmatprep.subr.bf16.mxu0 %v11556_v41  ;;  %v11612_v21 = vld [vmem:[%s13648_s26 + $0xd84] ss:$48 sps:$4 sm:$0xff]   ;;  %v11610_v23 = vld [vmem:[%s13648_s26 + $0xd80] ss:$48 sps:$4 sm:$0xff]   ;;  %v13784_v41 = vpack.c.bf16 %v405_v39, %v405_v39 }
  0xb2   : > { %7407 = vmatprep.subr.bf16.mxu1 %v11558_v42  ;;  %v11615_v22 = vld [vmem:[%s13648_s26 + $0x1384] ss:$48 sps:$4 sm:$0xff]   ;;  %v11613_v24 = vld [vmem:[%s13648_s26 + $0x1380] ss:$48 sps:$4 sm:$0xff]  }
  0xb3   : > { %v11618_v25 = vld [vmem:[%s13648_s26 + $0xd24] ss:$48 sps:$4 sm:$0xff]   ;;  %v11616_v27 = vld [vmem:[%s13648_s26 + $0xd20] ss:$48 sps:$4 sm:$0xff]  }
  0xb4   : > { %7367 = vmatpush2.bf16.msra.mxu0 %v11560_v43  ;;  %v11621_v26 = vld [vmem:[%s13648_s26 + $0x1324] ss:$48 sps:$4 sm:$0xff]   ;;  %v11619_v28 = vld [vmem:[%s13648_s26 + $0x1320] ss:$48 sps:$4 sm:$0xff]  }
  0xb5   : > { %7408 = vmatpush2.bf16.msra.mxu1 %v11561_v44  ;;  %7368 = vmatprep.subr.bf16.mxu0 %v11562_v45  ;;  %v11624_v29 = vld [vmem:[%s13648_s26 + $0xcc4] ss:$48 sps:$4 sm:$0xff]   ;;  %v11622_v31 = vld [vmem:[%s13648_s26 + $0xcc0] ss:$48 sps:$4 sm:$0xff]  }
  0xb6   : > { %7409 = vmatprep.subr.bf16.mxu1 %v11564_v46  ;;  %v11627_v30 = vld [vmem:[%s13648_s26 + $0x12c4] ss:$48 sps:$4 sm:$0xff]   ;;  %v11625_v32 = vld [vmem:[%s13648_s26 + $0x12c0] ss:$48 sps:$4 sm:$0xff]  }
  0xb7   : > { %v11630_v33 = vld [vmem:[%s13648_s26 + $0xc64] ss:$48 sps:$4 sm:$0xff]   ;;  %v11628_v36 = vld [vmem:[%s13648_s26 + $0xc60] ss:$48 sps:$4 sm:$0xff]  }
  0xb8   : > { %7369 = vmatpush2.bf16.msra.mxu0 %v11566_v48  ;;  %v11633_v34 = vld [vmem:[%s13648_s26 + $0x1264] ss:$48 sps:$4 sm:$0xff]   ;;  %v11631_v37 = vld [vmem:[%s13648_s26 + $0x1260] ss:$48 sps:$4 sm:$0xff]  }
  0xb9   : > { %7410 = vmatpush2.bf16.msra.mxu1 %v11567_v49  ;;  %7370 = vmatprep.subr.bf16.mxu0 %v11568_v52  ;;  %v11636_v40 = vld [vmem:[%s13648_s26 + $0xc04] ss:$48 sps:$4 sm:$0xff]   ;;  %v11634_v43 = vld [vmem:[%s13648_s26 + $0xc00] ss:$48 sps:$4 sm:$0xff]  }
  0xba   : > { %7411 = vmatprep.subr.bf16.mxu1 %v11570_v54  ;;  %v11639_v42 = vld [vmem:[%s13648_s26 + $0x1204] ss:$48 sps:$4 sm:$0xff]   ;;  %v11637_v44 = vld [vmem:[%s13648_s26 + $0x1200] ss:$48 sps:$4 sm:$0xff]  }
  0xbb   : > { %v11642_v45 = vld [vmem:[%s13648_s26 + $0x11a4] ss:$48 sps:$4 sm:$0xff]   ;;  %v11640_v47 = vld [vmem:[%s13648_s26 + $0x11a0] ss:$48 sps:$4 sm:$0xff]  }
  0xbc   : > { %7371 = vmatpush2.bf16.msra.mxu0 %v11572_v55  ;;  %v11645_v46 = vld [vmem:[%s13648_s26 + $0x17a4] ss:$48 sps:$4 sm:$0xff]   ;;  %v11643_v48 = vld [vmem:[%s13648_s26 + $0x17a0] ss:$48 sps:$4 sm:$0xff]  }
  0xbd   : > { %7412 = vmatpush2.bf16.msra.mxu1 %v11573_v56  ;;  %7372 = vmatprep.subr.bf16.mxu0 %v11574_v57  ;;  %v11648_v49 = vld [vmem:[%s13648_s26 + $0x1144] ss:$48 sps:$4 sm:$0xff]   ;;  %v11646_v52 = vld [vmem:[%s13648_s26 + $0x1140] ss:$48 sps:$4 sm:$0xff]  }
  0xbe   : > { %7413 = vmatprep.subr.bf16.mxu1 %v11576_v58  ;;  %v11651_v51 = vld [vmem:[%s13648_s26 + $0x1744] ss:$48 sps:$4 sm:$0xff]   ;;  %v11649_v54 = vld [vmem:[%s13648_s26 + $0x1740] ss:$48 sps:$4 sm:$0xff]  }
  0xbf   : > { %v11654_v55 = vld [vmem:[%s13648_s26 + $0x10e4] ss:$48 sps:$4 sm:$0xff]   ;;  %v11652_v57 = vld [vmem:[%s13648_s26 + $0x10e0] ss:$48 sps:$4 sm:$0xff]  }
  0xc0   : > { %7373 = vmatpush2.bf16.msra.mxu0 %v11578_v59  ;;  %v11657_v56 = vld [vmem:[%s13648_s26 + $0x16e4] ss:$48 sps:$4 sm:$0xff]   ;;  %v11655_v58 = vld [vmem:[%s13648_s26 + $0x16e0] ss:$48 sps:$4 sm:$0xff]  }
  0xc1   : > { %7414 = vmatpush2.bf16.msra.mxu1 %v11579_v60  ;;  %7374 = vmatprep.subr.bf16.mxu0 %v11580_v61  ;;  %v11660_v59 = vld [vmem:[%s13648_s26 + $0x1084] ss:$48 sps:$4 sm:$0xff]   ;;  %v11658_v61 = vld [vmem:[%s13648_s26 + $0x1080] ss:$48 sps:$4 sm:$0xff]  }
  0xc2   : > { %7415 = vmatprep.subr.bf16.mxu1 %v11582_v62  ;;  %v11663_v60 = vld [vmem:[%s13648_s26 + $0x1684] ss:$48 sps:$4 sm:$0xff]   ;;  %v11661_v62 = vld [vmem:[%s13648_s26 + $0x1680] ss:$48 sps:$4 sm:$0xff]  }
  0xc3   : > { %v11670_v5 = vld [vmem:[%s13648_s26 + $0xfc0] ss:$48 sps:$4 sm:$0xff]   ;;  %v11711_v39 = vld [vmem:[%s13648_s26 + $0x1f84] ss:$48 sps:$4 sm:$0xff]  }
  0xc4   : > { %7375 = vmatpush2.bf16.msra.mxu0 %v11584_v63  ;;  %v11666_v63 = vld [vmem:[%s13648_s26 + $0x1024] ss:$48 sps:$4 sm:$0xff]   ;;  %v11673_v6 = vld [vmem:[%s13648_s26 + $0x15c0] ss:$48 sps:$4 sm:$0xff]  }
  0xc5   : > { %7416 = vmatpush2.bf16.msra.mxu1 %v11585_v0  ;;  %7376 = vmatprep.subr.bf16.mxu0 %v11586_v1  ;;  %v11669_v0 = vld [vmem:[%s13648_s26 + $0x1624] ss:$48 sps:$4 sm:$0xff]   ;;  %v11664_v1 = vld [vmem:[%s13648_s26 + $0x1020] ss:$48 sps:$4 sm:$0xff]  }
  0xc6   : > { %7417 = vmatprep.subr.bf16.mxu1 %v11588_v2  ;;  %v11667_v2 = vld [vmem:[%s13648_s26 + $0x1620] ss:$48 sps:$4 sm:$0xff]  }
  0xc7   : > { %v11700_v35 = vld [vmem:[%s13648_s26 + $0x19e0] ss:$48 sps:$4 sm:$0xff]  }
  0xc8   : > { %7377 = vmatpush2.bf16.msra.mxu0 %v11590_v3  ;;  %v11672_v3 = vld [vmem:[%s13648_s26 + $0xfc4] ss:$48 sps:$4 sm:$0xff]  }
  0xc9   : > { %7418 = vmatpush2.bf16.msra.mxu1 %v11591_v4  ;;  %7428 = vmatprep.subr.bf16.mxu0 %v11594_v7  ;;  %v11675_v4 = vld [vmem:[%s13648_s26 + $0x15c4] ss:$48 sps:$4 sm:$0xff]  }
  0xca   : > { %7469 = vmatprep.subr.bf16.mxu1 %v11597_v8  ;;  %v11678_v7 = vld [vmem:[%s13648_s26 + $0xf64] ss:$48 sps:$4 sm:$0xff]  }
  0xcb   : > { %7379 = vmatmul.mubr.bf16.vlgmr.msra.gmra.mxu0 %v13747_v9  ;;  %v11681_v8 = vld [vmem:[%s13648_s26 + $0x1564] ss:$48 sps:$4 sm:$0xff]  }
  0xcc   : > { %7420 = vmatmul.mubr.bf16.vlgmr.msra.gmra.mxu1 %v13749_v10  ;;  %7429 = vmatpush1.bf16.msra.mxu0 %v11592_v11  ;;  %v11676_v11 = vld [vmem:[%s13648_s26 + $0xf60] ss:$48 sps:$4 sm:$0xff]  }
  0xcd   : > { %7470 = vmatpush1.bf16.msra.mxu1 %v11595_v12  ;;  %7430 = vmatprep.subr.bf16.mxu0 %v11600_v13  ;;  %v11679_v12 = vld [vmem:[%s13648_s26 + $0x1560] ss:$48 sps:$4 sm:$0xff]   ;;  %v11684_v13 = vld [vmem:[%s13648_s26 + $0xf04] ss:$48 sps:$4 sm:$0xff]  }
  0xce   : > { %7471 = vmatprep.subr.bf16.mxu1 %v11603_v14  ;;  %7460 = vmatprep.mubr.bf16.mxu0 %v13780_v38  ;;  %v11687_v14 = vld [vmem:[%s13648_s26 + $0x1504] ss:$48 sps:$4 sm:$0xff]  }
  0xcf   : > { %7501 = vmatprep.mubr.bf16.mxu1 %v13784_v41 }
  0xd0   : > { %7431 = vmatpush1.bf16.msra.mxu0 %v11598_v15  ;;  %v11682_v15 = vld [vmem:[%s13648_s26 + $0xf00] ss:$48 sps:$4 sm:$0xff]  }
  0xd1   : > { %7472 = vmatpush1.bf16.msra.mxu1 %v11601_v16  ;;  %7432 = vmatprep.subr.bf16.mxu0 %v11606_v17  ;;  %v11685_v16 = vld [vmem:[%s13648_s26 + $0x1500] ss:$48 sps:$4 sm:$0xff]  }
  0xd2   : > { %7473 = vmatprep.subr.bf16.mxu1 %v11609_v18  ;;  %v402_v17 = vld [vmem:[%s13715_s18 + $0x20] sm:$0xff]  ;;  %v404_v18 = vld [vmem:[%s13715_s18 + $0x30] sm:$0xff] }
  0xd4   : > { %7433 = vmatpush1.bf16.msra.mxu0 %v11604_v19  ;;  %v11690_v19 = vld [vmem:[%s13648_s26 + $0x1aa4] ss:$48 sps:$4 sm:$0xff]  }
  0xd5   : > { %7474 = vmatpush1.bf16.msra.mxu1 %v11607_v20  ;;  %7434 = vmatprep.subr.bf16.mxu0 %v11612_v21  ;;  %v11693_v20 = vld [vmem:[%s13648_s26 + $0x20a4] ss:$48 sps:$4 sm:$0xff]   ;;  %v13827_v21 = vpack.c.bf16 %v402_v17, %v402_v17  ;;  %v11760_v17 = vld [vmem:[%s13648_s26 + $0x1c20] ss:$48 sps:$4 sm:$0xff]  }
  0xd6   : > { %7475 = vmatprep.subr.bf16.mxu1 %v11615_v22  ;;  %v13829_v22 = vpack.c.bf16 %v404_v18, %v404_v18  ;;  %v11763_v18 = vld [vmem:[%s13648_s26 + $0x2220] ss:$48 sps:$4 sm:$0xff]  }
  0xd8   : > { %7435 = vmatpush1.bf16.msra.mxu0 %v11610_v23  ;;  %v11688_v23 = vld [vmem:[%s13648_s26 + $0x1aa0] ss:$48 sps:$4 sm:$0xff]  }
  0xd9   : > { %7476 = vmatpush1.bf16.msra.mxu1 %v11613_v24  ;;  %7436 = vmatprep.subr.bf16.mxu0 %v11618_v25  ;;  %v11691_v24 = vld [vmem:[%s13648_s26 + $0x20a0] ss:$48 sps:$4 sm:$0xff]   ;;  %v11696_v25 = vld [vmem:[%s13648_s26 + $0x1a44] ss:$48 sps:$4 sm:$0xff]  }
  0xda   : > { %7477 = vmatprep.subr.bf16.mxu1 %v11621_v26  ;;  %v11699_v26 = vld [vmem:[%s13648_s26 + $0x2044] ss:$48 sps:$4 sm:$0xff]  }
  0xdc   : > { %7437 = vmatpush1.bf16.msra.mxu0 %v11616_v27  ;;  %v407_v27 = vld [vmem:[%s13715_s18 + $0x48] sm:$0xff] }
  0xdd   : > { %7478 = vmatpush1.bf16.msra.mxu1 %v11619_v28  ;;  %7438 = vmatprep.subr.bf16.mxu0 %v11624_v29  ;;  %v11694_v28 = vld [vmem:[%s13648_s26 + $0x1a40] ss:$48 sps:$4 sm:$0xff]  }
  0xde   : > { %7479 = vmatprep.subr.bf16.mxu1 %v11627_v30  ;;  %v11697_v29 = vld [vmem:[%s13648_s26 + $0x2040] ss:$48 sps:$4 sm:$0xff]   ;;  %v13840_v30 = vpack.c.bf16 %v407_v27, %v407_v27 }
  0xdf   : > { %v11772_v27 = vld [vmem:[%s13648_s26 + $0x1b60] ss:$48 sps:$4 sm:$0xff]  }
  0xe0   : > { %7439 = vmatpush1.bf16.msra.mxu0 %v11622_v31  ;;  %v409_v31 = vld [vmem:[%s13715_s18 + $0x58] sm:$0xff] }
  0xe1   : > { %7480 = vmatpush1.bf16.msra.mxu1 %v11625_v32  ;;  %7440 = vmatprep.subr.bf16.mxu0 %v11630_v33  ;;  %v11702_v32 = vld [vmem:[%s13648_s26 + $0x19e4] ss:$48 sps:$4 sm:$0xff]   ;;  %v13844_v33 = vpack.c.bf16 %v409_v31, %v409_v31 }
  0xe2   : > { %7481 = vmatprep.subr.bf16.mxu1 %v11633_v34  ;;  %v11705_v34 = vld [vmem:[%s13648_s26 + $0x1fe4] ss:$48 sps:$4 sm:$0xff]  }
  0xe3   : > { %v11783_v31 = vld [vmem:[%s13648_s26 + $0x2104] ss:$48 sps:$4 sm:$0xff]  }
  0xe4   : > { %7441 = vmatpush1.bf16.msra.mxu0 %v11628_v36  ;;  %v11703_v36 = vld [vmem:[%s13648_s26 + $0x1fe0] ss:$48 sps:$4 sm:$0xff]  }
  0xe5   : > { %7482 = vmatpush1.bf16.msra.mxu1 %v11631_v37  ;;  %7442 = vmatprep.subr.bf16.mxu0 %v11636_v40  ;;  %v11708_v37 = vld [vmem:[%s13648_s26 + $0x1984] ss:$48 sps:$4 sm:$0xff]   ;;  %v11706_v40 = vld [vmem:[%s13648_s26 + $0x1980] ss:$48 sps:$4 sm:$0xff]  }
  0xe6   : > { %7483 = vmatprep.subr.bf16.mxu1 %v11639_v42  ;;  %v11709_v42 = vld [vmem:[%s13648_s26 + $0x1f80] ss:$48 sps:$4 sm:$0xff]  }
  0xe8   : > { %7443 = vmatpush1.bf16.msra.mxu0 %v11634_v43  ;;  %v11714_v43 = vld [vmem:[%s13648_s26 + $0x1924] ss:$48 sps:$4 sm:$0xff]  }
  0xe9   : > { %7484 = vmatpush1.bf16.msra.mxu1 %v11637_v44  ;;  %7444 = vmatprep.subr.bf16.mxu0 %v11642_v45  ;;  %v11717_v44 = vld [vmem:[%s13648_s26 + $0x1f24] ss:$48 sps:$4 sm:$0xff]   ;;  %v11712_v45 = vld [vmem:[%s13648_s26 + $0x1920] ss:$48 sps:$4 sm:$0xff]  }
  0xea   : > { %7485 = vmatprep.subr.bf16.mxu1 %v11645_v46  ;;  %v11715_v46 = vld [vmem:[%s13648_s26 + $0x1f20] ss:$48 sps:$4 sm:$0xff]  }
  0xec   : > { %7445 = vmatpush2.bf16.msra.mxu0 %v11640_v47  ;;  %v11720_v47 = vld [vmem:[%s13648_s26 + $0x18c4] ss:$48 sps:$4 sm:$0xff]  }
  0xed   : > { %7486 = vmatpush2.bf16.msra.mxu1 %v11643_v48  ;;  %7446 = vmatprep.subr.bf16.mxu0 %v11648_v49  ;;  %v11723_v48 = vld [vmem:[%s13648_s26 + $0x1ec4] ss:$48 sps:$4 sm:$0xff]   ;;  %v11718_v49 = vld [vmem:[%s13648_s26 + $0x18c0] ss:$48 sps:$4 sm:$0xff]  }
  0xee   : > { %7487 = vmatprep.subr.bf16.mxu1 %v11651_v51  ;;  %v11721_v51 = vld [vmem:[%s13648_s26 + $0x1ec0] ss:$48 sps:$4 sm:$0xff]  }
  0xf0   : > { %7447 = vmatpush2.bf16.msra.mxu0 %v11646_v52  ;;  %v11726_v52 = vld [vmem:[%s13648_s26 + $0x1864] ss:$48 sps:$4 sm:$0xff]  }
  0xf1   : > { %7488 = vmatpush2.bf16.msra.mxu1 %v11649_v54  ;;  %7448 = vmatprep.subr.bf16.mxu0 %v11654_v55  ;;  %v11729_v54 = vld [vmem:[%s13648_s26 + $0x1e64] ss:$48 sps:$4 sm:$0xff]   ;;  %v11724_v55 = vld [vmem:[%s13648_s26 + $0x1860] ss:$48 sps:$4 sm:$0xff]  }
  0xf2   : > { %7489 = vmatprep.subr.bf16.mxu1 %v11657_v56  ;;  %v11727_v56 = vld [vmem:[%s13648_s26 + $0x1e60] ss:$48 sps:$4 sm:$0xff]  }
  0xf4   : > { %7449 = vmatpush2.bf16.msra.mxu0 %v11652_v57  ;;  %v11732_v57 = vld [vmem:[%s13648_s26 + $0x1804] ss:$48 sps:$4 sm:$0xff]  }
  0xf5   : > { %7490 = vmatpush2.bf16.msra.mxu1 %v11655_v58  ;;  %7450 = vmatprep.subr.bf16.mxu0 %v11660_v59  ;;  %v11735_v58 = vld [vmem:[%s13648_s26 + $0x1e04] ss:$48 sps:$4 sm:$0xff]   ;;  %v11730_v59 = vld [vmem:[%s13648_s26 + $0x1800] ss:$48 sps:$4 sm:$0xff]  }
  0xf6   : > { %7491 = vmatprep.subr.bf16.mxu1 %v11663_v60  ;;  %v11733_v60 = vld [vmem:[%s13648_s26 + $0x1e00] ss:$48 sps:$4 sm:$0xff]  }
  0xf8   : > { %7451 = vmatpush2.bf16.msra.mxu0 %v11658_v61  ;;  %v11738_v61 = vld [vmem:[%s13648_s26 + $0x1da4] ss:$48 sps:$4 sm:$0xff]  }
  0xf9   : > { %7492 = vmatpush2.bf16.msra.mxu1 %v11661_v62  ;;  %7452 = vmatprep.subr.bf16.mxu0 %v11666_v63  ;;  %v11741_v62 = vld [vmem:[%s13648_s26 + $0x23a4] ss:$48 sps:$4 sm:$0xff]   ;;  %v11736_v63 = vld [vmem:[%s13648_s26 + $0x1da0] ss:$48 sps:$4 sm:$0xff]  }
  0xfa   : > { %7493 = vmatprep.subr.bf16.mxu1 %v11669_v0  ;;  %v11739_v0 = vld [vmem:[%s13648_s26 + $0x23a0] ss:$48 sps:$4 sm:$0xff]  }
  0xfc   : > { %7453 = vmatpush2.bf16.msra.mxu0 %v11664_v1  ;;  %v11744_v1 = vld [vmem:[%s13648_s26 + $0x1d44] ss:$48 sps:$4 sm:$0xff]  }
  0xfd   : > { %7494 = vmatpush2.bf16.msra.mxu1 %v11667_v2  ;;  %7454 = vmatprep.subr.bf16.mxu0 %v11672_v3  ;;  %v11747_v2 = vld [vmem:[%s13648_s26 + $0x2344] ss:$48 sps:$4 sm:$0xff]   ;;  %v11742_v3 = vld [vmem:[%s13648_s26 + $0x1d40] ss:$48 sps:$4 sm:$0xff]  }
  0xfe   : > { %7495 = vmatprep.subr.bf16.mxu1 %v11675_v4  ;;  %v11745_v4 = vld [vmem:[%s13648_s26 + $0x2340] ss:$48 sps:$4 sm:$0xff]  }
 0x100   : > { %7455 = vmatpush2.bf16.msra.mxu0 %v11670_v5  ;;  %v11750_v5 = vld [vmem:[%s13648_s26 + $0x1ce4] ss:$48 sps:$4 sm:$0xff]  }
 0x101   : > { %7496 = vmatpush2.bf16.msra.mxu1 %v11673_v6  ;;  %7456 = vmatprep.subr.bf16.mxu0 %v11678_v7  ;;  %v11753_v6 = vld [vmem:[%s13648_s26 + $0x22e4] ss:$48 sps:$4 sm:$0xff]   ;;  %v11748_v7 = vld [vmem:[%s13648_s26 + $0x1ce0] ss:$48 sps:$4 sm:$0xff]  }
 0x102   : > { %7497 = vmatprep.subr.bf16.mxu1 %v11681_v8  ;;  %v11751_v8 = vld [vmem:[%s13648_s26 + $0x22e0] ss:$48 sps:$4 sm:$0xff]  }
 0x104   : > { %7457 = vmatpush2.bf16.msra.mxu0 %v11676_v11  ;;  %v11756_v11 = vld [vmem:[%s13648_s26 + $0x1c84] ss:$48 sps:$4 sm:$0xff]  }
 0x105   : > { %7498 = vmatpush2.bf16.msra.mxu1 %v11679_v12  ;;  %7458 = vmatprep.subr.bf16.mxu0 %v11684_v13  ;;  %v11759_v12 = vld [vmem:[%s13648_s26 + $0x2284] ss:$48 sps:$4 sm:$0xff]   ;;  %v11754_v13 = vld [vmem:[%s13648_s26 + $0x1c80] ss:$48 sps:$4 sm:$0xff]  }
 0x106   : > { %7499 = vmatprep.subr.bf16.mxu1 %v11687_v14  ;;  %v11757_v14 = vld [vmem:[%s13648_s26 + $0x2280] ss:$48 sps:$4 sm:$0xff]  }
 0x108   : > { %7459 = vmatpush2.bf16.msra.mxu0 %v11682_v15  ;;  %v11762_v15 = vld [vmem:[%s13648_s26 + $0x1c24] ss:$48 sps:$4 sm:$0xff]  }
 0x109   : > { %7500 = vmatpush2.bf16.msra.mxu1 %v11685_v16  ;;  %7510 = vmatprep.subr.bf16.mxu0 %v11690_v19  ;;  %v11765_v16 = vld [vmem:[%s13648_s26 + $0x2224] ss:$48 sps:$4 sm:$0xff]  }
 0x10a   : > { %7551 = vmatprep.subr.bf16.mxu1 %v11693_v20  ;;  %v11768_v19 = vld [vmem:[%s13648_s26 + $0x1bc4] ss:$48 sps:$4 sm:$0xff]  }
 0x10b   : > { %7461 = vmatmul.mubr.bf16.vlgmr.msra.gmra.mxu0 %v13827_v21  ;;  %v11771_v20 = vld [vmem:[%s13648_s26 + $0x21c4] ss:$48 sps:$4 sm:$0xff]  }
 0x10c   : > { %7502 = vmatmul.mubr.bf16.vlgmr.msra.gmra.mxu1 %v13829_v22  ;;  %7511 = vmatpush1.bf16.msra.mxu0 %v11688_v23  ;;  %v11766_v23 = vld [vmem:[%s13648_s26 + $0x1bc0] ss:$48 sps:$4 sm:$0xff]  }
 0x10d   : > { %7552 = vmatpush1.bf16.msra.mxu1 %v11691_v24  ;;  %7512 = vmatprep.subr.bf16.mxu0 %v11696_v25  ;;  %v11769_v24 = vld [vmem:[%s13648_s26 + $0x21c0] ss:$48 sps:$4 sm:$0xff]   ;;  %v11774_v25 = vld [vmem:[%s13648_s26 + $0x1b64] ss:$48 sps:$4 sm:$0xff]  }
 0x10e   : > { %7553 = vmatprep.subr.bf16.mxu1 %v11699_v26  ;;  %7542 = vmatprep.mubr.bf16.mxu0 %v13840_v30  ;;  %v11777_v26 = vld [vmem:[%s13648_s26 + $0x2164] ss:$48 sps:$4 sm:$0xff]  }
 0x10f   : > { %7583 = vmatprep.mubr.bf16.mxu1 %v13844_v33 }
 0x110   : > { %7513 = vmatpush1.bf16.msra.mxu0 %v11694_v28  ;;  %v11775_v28 = vld [vmem:[%s13648_s26 + $0x2160] ss:$48 sps:$4 sm:$0xff]  }
 0x111   : > { %7554 = vmatpush1.bf16.msra.mxu1 %v11697_v29  ;;  %7514 = vmatprep.subr.bf16.mxu0 %v11702_v32  ;;  %v11780_v29 = vld [vmem:[%s13648_s26 + $0x1b04] ss:$48 sps:$4 sm:$0xff]   ;;  %v11778_v32 = vld [vmem:[%s13648_s26 + $0x1b00] ss:$48 sps:$4 sm:$0xff]  }
 0x112   : > { %7555 = vmatprep.subr.bf16.mxu1 %v11705_v34  ;;  %v11781_v34 = vld [vmem:[%s13648_s26 + $0x2100] ss:$48 sps:$4 sm:$0xff]  }
 0x114   : > { %7515 = vmatpush1.bf16.msra.mxu0 %v11700_v35  ;;  %v406_v35 = vld [vmem:[%s13715_s18 + $0x40] sm:$0xff] }
 0x115   : > { %7556 = vmatpush1.bf16.msra.mxu1 %v11703_v36  ;;  %7516 = vmatprep.subr.bf16.mxu0 %v11708_v37  ;;  %v408_v36 = vld [vmem:[%s13715_s18 + $0x50] sm:$0xff]  ;;  %v11786_v37 = vld [vmem:[%s13648_s26 + $0x2ac] ss:$48 sps:$4 sm:$0xff]  }
 0x116   : > { %7557 = vmatprep.subr.bf16.mxu1 %v11711_v39  ;;  %v11789_v39 = vld [vmem:[%s13648_s26 + $0x8ac] ss:$48 sps:$4 sm:$0xff]  }
 0x118   : > { %7517 = vmatpush1.bf16.msra.mxu0 %v11706_v40  ;;  %v13907_v40 = vpack.c.bf16 %v406_v35, %v406_v35  ;;  %v11856_v35 = vld [vmem:[%s13648_s26 + $0x428] ss:$48 sps:$4 sm:$0xff]  }
 0x119   : > { %7558 = vmatpush1.bf16.msra.mxu1 %v11709_v42  ;;  %7518 = vmatprep.subr.bf16.mxu0 %v11714_v43  ;;  %v13909_v42 = vpack.c.bf16 %v408_v36, %v408_v36  ;;  %v11784_v43 = vld [vmem:[%s13648_s26 + $0x2a8] ss:$48 sps:$4 sm:$0xff]  }
 0x11a   : > { %7559 = vmatprep.subr.bf16.mxu1 %v11717_v44  ;;  %v11787_v44 = vld [vmem:[%s13648_s26 + $0x8a8] ss:$48 sps:$4 sm:$0xff]  }
 0x11b   : > { %v11859_v36 = vld [vmem:[%s13648_s26 + $0xa28] ss:$48 sps:$4 sm:$0xff]  }
 0x11c   : > { %7519 = vmatpush1.bf16.msra.mxu0 %v11712_v45  ;;  %v11792_v45 = vld [vmem:[%s13648_s26 + $0x24c] ss:$48 sps:$4 sm:$0xff]  }
 0x11d   : > { %7560 = vmatpush1.bf16.msra.mxu1 %v11715_v46  ;;  %7520 = vmatprep.subr.bf16.mxu0 %v11720_v47  ;;  %v11795_v46 = vld [vmem:[%s13648_s26 + $0x84c] ss:$48 sps:$4 sm:$0xff]   ;;  %v11790_v47 = vld [vmem:[%s13648_s26 + $0x248] ss:$48 sps:$4 sm:$0xff]  }
 0x11e   : > { %7561 = vmatprep.subr.bf16.mxu1 %v11723_v48  ;;  %v11793_v48 = vld [vmem:[%s13648_s26 + $0x848] ss:$48 sps:$4 sm:$0xff]  }
 0x120   : > { %7521 = vmatpush1.bf16.msra.mxu0 %v11718_v49  ;;  %v11798_v49 = vld [vmem:[%s13648_s26 + $0x1ec] ss:$48 sps:$4 sm:$0xff]  }
 0x121   : > { %7562 = vmatpush1.bf16.msra.mxu1 %v11721_v51  ;;  %7522 = vmatprep.subr.bf16.mxu0 %v11726_v52  ;;  %v11801_v51 = vld [vmem:[%s13648_s26 + $0x7ec] ss:$48 sps:$4 sm:$0xff]   ;;  %v11796_v52 = vld [vmem:[%s13648_s26 + $0x1e8] ss:$48 sps:$4 sm:$0xff]  }
 0x122   : > { %7563 = vmatprep.subr.bf16.mxu1 %v11729_v54  ;;  %v11799_v54 = vld [vmem:[%s13648_s26 + $0x7e8] ss:$48 sps:$4 sm:$0xff]  }
 0x124   : > { %7523 = vmatpush1.bf16.msra.mxu0 %v11724_v55  ;;  %v11804_v55 = vld [vmem:[%s13648_s26 + $0x18c] ss:$48 sps:$4 sm:$0xff]  }
 0x125   : > { %7564 = vmatpush1.bf16.msra.mxu1 %v11727_v56  ;;  %7524 = vmatprep.subr.bf16.mxu0 %v11732_v57  ;;  %v11807_v56 = vld [vmem:[%s13648_s26 + $0x78c] ss:$48 sps:$4 sm:$0xff]   ;;  %v11802_v57 = vld [vmem:[%s13648_s26 + $0x188] ss:$48 sps:$4 sm:$0xff]  }
 0x126   : > { %7565 = vmatprep.subr.bf16.mxu1 %v11735_v58  ;;  %v11805_v58 = vld [vmem:[%s13648_s26 + $0x788] ss:$48 sps:$4 sm:$0xff]  }
 0x128   : > { %7525 = vmatpush1.bf16.msra.mxu0 %v11730_v59  ;;  %v11810_v59 = vld [vmem:[%s13648_s26 + $0x12c] ss:$48 sps:$4 sm:$0xff]  }
 0x129   : > { %7566 = vmatpush1.bf16.msra.mxu1 %v11733_v60  ;;  %7526 = vmatprep.subr.bf16.mxu0 %v11738_v61  ;;  %v11813_v60 = vld [vmem:[%s13648_s26 + $0x72c] ss:$48 sps:$4 sm:$0xff]   ;;  %v11808_v61 = vld [vmem:[%s13648_s26 + $0x128] ss:$48 sps:$4 sm:$0xff]  }
 0x12a   : > { %7567 = vmatprep.subr.bf16.mxu1 %v11741_v62  ;;  %v11811_v62 = vld [vmem:[%s13648_s26 + $0x728] ss:$48 sps:$4 sm:$0xff]  }
 0x12c   : > { %7527 = vmatpush2.bf16.msra.mxu0 %v11736_v63  ;;  %v11816_v63 = vld [vmem:[%s13648_s26 + $0xcc] ss:$48 sps:$4 sm:$0xff]  }
 0x12d   : > { %7568 = vmatpush2.bf16.msra.mxu1 %v11739_v0  ;;  %7528 = vmatprep.subr.bf16.mxu0 %v11744_v1  ;;  %v11819_v0 = vld [vmem:[%s13648_s26 + $0x6cc] ss:$48 sps:$4 sm:$0xff]   ;;  %v11814_v1 = vld [vmem:[%s13648_s26 + $0xc8] ss:$48 sps:$4 sm:$0xff]  }
 0x12e   : > { %7569 = vmatprep.subr.bf16.mxu1 %v11747_v2  ;;  %v11817_v2 = vld [vmem:[%s13648_s26 + $0x6c8] ss:$48 sps:$4 sm:$0xff]  }
 0x130   : > { %7529 = vmatpush2.bf16.msra.mxu0 %v11742_v3  ;;  %v11822_v3 = vld [vmem:[%s13648_s26 + $0x6c] ss:$48 sps:$4 sm:$0xff]  }
 0x131   : > { %7570 = vmatpush2.bf16.msra.mxu1 %v11745_v4  ;;  %7530 = vmatprep.subr.bf16.mxu0 %v11750_v5  ;;  %v11825_v4 = vld [vmem:[%s13648_s26 + $0x66c] ss:$48 sps:$4 sm:$0xff]   ;;  %v11820_v5 = vld [vmem:[%s13648_s26 + $0x68] ss:$48 sps:$4 sm:$0xff]  }
 0x132   : > { %7571 = vmatprep.subr.bf16.mxu1 %v11753_v6  ;;  %v11823_v6 = vld [vmem:[%s13648_s26 + $0x668] ss:$48 sps:$4 sm:$0xff]  }
 0x134   : > { %7531 = vmatpush2.bf16.msra.mxu0 %v11748_v7  ;;  %v11828_v7 = vld [vmem:[%s13648_s26 + $0xc] ss:$48 sps:$4 sm:$0xff]  }
 0x135   : > { %7572 = vmatpush2.bf16.msra.mxu1 %v11751_v8  ;;  %7532 = vmatprep.subr.bf16.mxu0 %v11756_v11  ;;  %v11831_v8 = vld [vmem:[%s13648_s26 + $0x60c] ss:$48 sps:$4 sm:$0xff]   ;;  %v11826_v11 = vld [vmem:[%s13648_s26 + $0x8] ss:$48 sps:$4 sm:$0xff]  }
 0x136   : > { %7573 = vmatprep.subr.bf16.mxu1 %v11759_v12  ;;  %v11829_v12 = vld [vmem:[%s13648_s26 + $0x608] ss:$48 sps:$4 sm:$0xff]  }
 0x138   : > { %7533 = vmatpush2.bf16.msra.mxu0 %v11754_v13  ;;  %v11834_v13 = vld [vmem:[%s13648_s26 + $0x5ac] ss:$48 sps:$4 sm:$0xff]  }
 0x139   : > { %7574 = vmatpush2.bf16.msra.mxu1 %v11757_v14  ;;  %7534 = vmatprep.subr.bf16.mxu0 %v11762_v15  ;;  %v11837_v14 = vld [vmem:[%s13648_s26 + $0xbac] ss:$48 sps:$4 sm:$0xff]   ;;  %v11832_v15 = vld [vmem:[%s13648_s26 + $0x5a8] ss:$48 sps:$4 sm:$0xff]  }
 0x13a   : > { %7575 = vmatprep.subr.bf16.mxu1 %v11765_v16  ;;  %v11835_v16 = vld [vmem:[%s13648_s26 + $0xba8] ss:$48 sps:$4 sm:$0xff]  }
 0x13c   : > { %7535 = vmatpush2.bf16.msra.mxu0 %v11760_v17  ;;  %v11840_v17 = vld [vmem:[%s13648_s26 + $0x54c] ss:$48 sps:$4 sm:$0xff]  }
 0x13d   : > { %7576 = vmatpush2.bf16.msra.mxu1 %v11763_v18  ;;  %7536 = vmatprep.subr.bf16.mxu0 %v11768_v19  ;;  %v11843_v18 = vld [vmem:[%s13648_s26 + $0xb4c] ss:$48 sps:$4 sm:$0xff]   ;;  %v11838_v19 = vld [vmem:[%s13648_s26 + $0x548] ss:$48 sps:$4 sm:$0xff]  }
 0x13e   : > { %7577 = vmatprep.subr.bf16.mxu1 %v11771_v20  ;;  %v11841_v20 = vld [vmem:[%s13648_s26 + $0xb48] ss:$48 sps:$4 sm:$0xff]  }
 0x140   : > { %7537 = vmatpush2.bf16.msra.mxu0 %v11766_v23  ;;  %v11846_v23 = vld [vmem:[%s13648_s26 + $0x4ec] ss:$48 sps:$4 sm:$0xff]  }
 0x141   : > { %7578 = vmatpush2.bf16.msra.mxu1 %v11769_v24  ;;  %7538 = vmatprep.subr.bf16.mxu0 %v11774_v25  ;;  %v11849_v24 = vld [vmem:[%s13648_s26 + $0xaec] ss:$48 sps:$4 sm:$0xff]   ;;  %v11844_v25 = vld [vmem:[%s13648_s26 + $0x4e8] ss:$48 sps:$4 sm:$0xff]  }
 0x142   : > { %7579 = vmatprep.subr.bf16.mxu1 %v11777_v26  ;;  %v11847_v26 = vld [vmem:[%s13648_s26 + $0xae8] ss:$48 sps:$4 sm:$0xff]  }
 0x144   : > { %7539 = vmatpush2.bf16.msra.mxu0 %v11772_v27  ;;  %v11852_v27 = vld [vmem:[%s13648_s26 + $0x48c] ss:$48 sps:$4 sm:$0xff]  }
 0x145   : > { %7580 = vmatpush2.bf16.msra.mxu1 %v11775_v28  ;;  %7540 = vmatprep.subr.bf16.mxu0 %v11780_v29  ;;  %v11855_v28 = vld [vmem:[%s13648_s26 + $0xa8c] ss:$48 sps:$4 sm:$0xff]   ;;  %v11850_v29 = vld [vmem:[%s13648_s26 + $0x488] ss:$48 sps:$4 sm:$0xff]  }
 0x146   : > { %7581 = vmatprep.subr.bf16.mxu1 %v11783_v31  ;;  %v11853_v31 = vld [vmem:[%s13648_s26 + $0xa88] ss:$48 sps:$4 sm:$0xff]  }
 0x148   : > { %7541 = vmatpush2.bf16.msra.mxu0 %v11778_v32  ;;  %v11858_v32 = vld [vmem:[%s13648_s26 + $0x42c] ss:$48 sps:$4 sm:$0xff]  }
 0x149   : > { %7582 = vmatpush2.bf16.msra.mxu1 %v11781_v34  ;;  %7592 = vmatprep.subr.bf16.mxu0 %v11786_v37  ;;  %v11861_v34 = vld [vmem:[%s13648_s26 + $0xa2c] ss:$48 sps:$4 sm:$0xff]  }
 0x14a   : > { %7633 = vmatprep.subr.bf16.mxu1 %v11789_v39  ;;  %v11864_v37 = vld [vmem:[%s13648_s26 + $0x3cc] ss:$48 sps:$4 sm:$0xff]  }
 0x14b   : > { %7543 = vmatmul.mubr.bf16.vlgmr.msra.gmra.mxu0 %v13907_v40  ;;  %v11867_v39 = vld [vmem:[%s13648_s26 + $0x9cc] ss:$48 sps:$4 sm:$0xff]  }
 0x14c   : > { %7584 = vmatmul.mubr.bf16.vlgmr.msra.gmra.mxu1 %v13909_v42  ;;  %7593 = vmatpush1.bf16.msra.mxu0 %v11784_v43  ;;  %v11862_v43 = vld [vmem:[%s13648_s26 + $0x3c8] ss:$48 sps:$4 sm:$0xff]  }
 0x14d   : > { %7634 = vmatpush1.bf16.msra.mxu1 %v11787_v44  ;;  %7594 = vmatprep.subr.bf16.mxu0 %v11792_v45  ;;  %v11865_v44 = vld [vmem:[%s13648_s26 + $0x9c8] ss:$48 sps:$4 sm:$0xff]   ;;  %v11870_v45 = vld [vmem:[%s13648_s26 + $0x36c] ss:$48 sps:$4 sm:$0xff]  }
 0x14e   : > { %7635 = vmatprep.subr.bf16.mxu1 %v11795_v46  ;;  %7624 = vmatprep.mubr.bf16.mxu0 %v13720_v50  ;;  %v11873_v46 = vld [vmem:[%s13648_s26 + $0x96c] ss:$48 sps:$4 sm:$0xff]  }
 0x14f   : > { %7665 = vmatprep.mubr.bf16.mxu1 %v13724_v53 }
 0x150   : > { %7595 = vmatpush1.bf16.msra.mxu0 %v11790_v47  ;;  %v11868_v47 = vld [vmem:[%s13648_s26 + $0x368] ss:$48 sps:$4 sm:$0xff]  }
 0x151   : > { %7636 = vmatpush1.bf16.msra.mxu1 %v11793_v48  ;;  %7596 = vmatprep.subr.bf16.mxu0 %v11798_v49  ;;  %v11871_v48 = vld [vmem:[%s13648_s26 + $0x968] ss:$48 sps:$4 sm:$0xff]   ;;  %v11876_v49 = vld [vmem:[%s13648_s26 + $0x30c] ss:$48 sps:$4 sm:$0xff]  }
 0x152   : > { %7637 = vmatprep.subr.bf16.mxu1 %v11801_v51  ;;  %v11879_v51 = vld [vmem:[%s13648_s26 + $0x90c] ss:$48 sps:$4 sm:$0xff]  }
 0x154   : > { %7597 = vmatpush1.bf16.msra.mxu0 %v11796_v52  ;;  %v11874_v52 = vld [vmem:[%s13648_s26 + $0x308] ss:$48 sps:$4 sm:$0xff]  }
 0x155   : > { %7638 = vmatpush1.bf16.msra.mxu1 %v11799_v54  ;;  %7598 = vmatprep.subr.bf16.mxu0 %v11804_v55  ;;  %v11877_v54 = vld [vmem:[%s13648_s26 + $0x908] ss:$48 sps:$4 sm:$0xff]   ;;  %v11882_v55 = vld [vmem:[%s13648_s26 + $0xeac] ss:$48 sps:$4 sm:$0xff]  }
 0x156   : > { %7639 = vmatprep.subr.bf16.mxu1 %v11807_v56  ;;  %v11885_v56 = vld [vmem:[%s13648_s26 + $0x14ac] ss:$48 sps:$4 sm:$0xff]  }
 0x158   : > { %7599 = vmatpush1.bf16.msra.mxu0 %v11802_v57  ;;  %v11880_v57 = vld [vmem:[%s13648_s26 + $0xea8] ss:$48 sps:$4 sm:$0xff]  }
 0x159   : > { %7640 = vmatpush1.bf16.msra.mxu1 %v11805_v58  ;;  %7600 = vmatprep.subr.bf16.mxu0 %v11810_v59  ;;  %v11883_v58 = vld [vmem:[%s13648_s26 + $0x14a8] ss:$48 sps:$4 sm:$0xff]   ;;  %v11888_v59 = vld [vmem:[%s13648_s26 + $0xe4c] ss:$48 sps:$4 sm:$0xff]  }
 0x15a   : > { %7641 = vmatprep.subr.bf16.mxu1 %v11813_v60  ;;  %v11891_v60 = vld [vmem:[%s13648_s26 + $0x144c] ss:$48 sps:$4 sm:$0xff]  }
 0x15c   : > { %7601 = vmatpush1.bf16.msra.mxu0 %v11808_v61 }
 0x15d   : > { %7642 = vmatpush1.bf16.msra.mxu1 %v11811_v62  ;;  %7602 = vmatprep.subr.bf16.mxu0 %v11816_v63  ;;  %v11886_v63 = vld [vmem:[%s13648_s26 + $0xe48] ss:$48 sps:$4 sm:$0xff]  }
 0x15e   : > { %7643 = vmatprep.subr.bf16.mxu1 %v11819_v0 }
 0x160   : > { %7603 = vmatpush1.bf16.msra.mxu0 %v11814_v1  ;;  %v11889_v1 = vld [vmem:[%s13648_s26 + $0x1448] ss:$48 sps:$4 sm:$0xff]  }
 0x161   : > { %7644 = vmatpush1.bf16.msra.mxu1 %v11817_v2  ;;  %7604 = vmatprep.subr.bf16.mxu0 %v11822_v3 }
 0x162   : > { %7645 = vmatprep.subr.bf16.mxu1 %v11825_v4  ;;  %v11894_v4 = vld [vmem:[%s13648_s26 + $0xdec] ss:$48 sps:$4 sm:$0xff]  }
 0x164   : > { %7605 = vmatpush1.bf16.msra.mxu0 %v11820_v5  ;;  %v11897_v5 = vld [vmem:[%s13648_s26 + $0x13ec] ss:$48 sps:$4 sm:$0xff]  }
 0x165   : > { %7646 = vmatpush1.bf16.msra.mxu1 %v11823_v6  ;;  %7606 = vmatprep.subr.bf16.mxu0 %v11828_v7 }
 0x166   : > { %7647 = vmatprep.subr.bf16.mxu1 %v11831_v8 }
 0x168   : > { %7607 = vmatpush1.bf16.msra.mxu0 %v11826_v11  ;;  %v11892_v11 = vld [vmem:[%s13648_s26 + $0xde8] ss:$48 sps:$4 sm:$0xff]  }
 0x169   : > { %7648 = vmatpush1.bf16.msra.mxu1 %v11829_v12  ;;  %7608 = vmatprep.subr.bf16.mxu0 %v11834_v13  ;;  %v11895_v12 = vld [vmem:[%s13648_s26 + $0x13e8] ss:$48 sps:$4 sm:$0xff]  }
 0x16a   : > { %7649 = vmatprep.subr.bf16.mxu1 %v11837_v14 }
 0x16c   : > { %7609 = vmatpush2.bf16.msra.mxu0 %v11832_v15  ;;  %v11900_v15 = vld [vmem:[%s13648_s26 + $0xd8c] ss:$48 sps:$4 sm:$0xff]  }
 0x16d   : > { %7650 = vmatpush2.bf16.msra.mxu1 %v11835_v16  ;;  %7610 = vmatprep.subr.bf16.mxu0 %v11840_v17  ;;  %v11903_v16 = vld [vmem:[%s13648_s26 + $0x138c] ss:$48 sps:$4 sm:$0xff]   ;;  %v11898_v17 = vld [vmem:[%s13648_s26 + $0xd88] ss:$48 sps:$4 sm:$0xff]  }
 0x16e   : > { %7651 = vmatprep.subr.bf16.mxu1 %v11843_v18  ;;  %v11901_v18 = vld [vmem:[%s13648_s26 + $0x1388] ss:$48 sps:$4 sm:$0xff]  }
 0x170   : > { %7611 = vmatpush2.bf16.msra.mxu0 %v11838_v19  ;;  %v11906_v19 = vld [vmem:[%s13648_s26 + $0xd2c] ss:$48 sps:$4 sm:$0xff]  }
 0x171   : > { %7652 = vmatpush2.bf16.msra.mxu1 %v11841_v20  ;;  %7612 = vmatprep.subr.bf16.mxu0 %v11846_v23  ;;  %v11909_v20 = vld [vmem:[%s13648_s26 + $0x132c] ss:$48 sps:$4 sm:$0xff]   ;;  %v11904_v23 = vld [vmem:[%s13648_s26 + $0xd28] ss:$48 sps:$4 sm:$0xff]  }
 0x172   : > { %7653 = vmatprep.subr.bf16.mxu1 %v11849_v24  ;;  %v11907_v24 = vld [vmem:[%s13648_s26 + $0x1328] ss:$48 sps:$4 sm:$0xff]  }
 0x174   : > { %7613 = vmatpush2.bf16.msra.mxu0 %v11844_v25  ;;  %v11912_v25 = vld [vmem:[%s13648_s26 + $0xccc] ss:$48 sps:$4 sm:$0xff]  }
 0x175   : > { %7654 = vmatpush2.bf16.msra.mxu1 %v11847_v26  ;;  %7614 = vmatprep.subr.bf16.mxu0 %v11852_v27  ;;  %v11915_v26 = vld [vmem:[%s13648_s26 + $0x12cc] ss:$48 sps:$4 sm:$0xff]   ;;  %v11910_v27 = vld [vmem:[%s13648_s26 + $0xcc8] ss:$48 sps:$4 sm:$0xff]  }
 0x176   : > { %7655 = vmatprep.subr.bf16.mxu1 %v11855_v28  ;;  %v11913_v28 = vld [vmem:[%s13648_s26 + $0x12c8] ss:$48 sps:$4 sm:$0xff]  }
 0x178   : > { %7615 = vmatpush2.bf16.msra.mxu0 %v11850_v29  ;;  %v11918_v29 = vld [vmem:[%s13648_s26 + $0xc6c] ss:$48 sps:$4 sm:$0xff]  }
 0x179   : > { %7656 = vmatpush2.bf16.msra.mxu1 %v11853_v31  ;;  %7616 = vmatprep.subr.bf16.mxu0 %v11858_v32  ;;  %v11921_v31 = vld [vmem:[%s13648_s26 + $0x126c] ss:$48 sps:$4 sm:$0xff]   ;;  %v11916_v32 = vld [vmem:[%s13648_s26 + $0xc68] ss:$48 sps:$4 sm:$0xff]  }
 0x17a   : > { %7657 = vmatprep.subr.bf16.mxu1 %v11861_v34  ;;  %v11919_v34 = vld [vmem:[%s13648_s26 + $0x1268] ss:$48 sps:$4 sm:$0xff]  }
 0x17c   : > { %7617 = vmatpush2.bf16.msra.mxu0 %v11856_v35  ;;  %v11924_v35 = vld [vmem:[%s13648_s26 + $0xc0c] ss:$48 sps:$4 sm:$0xff]  }
 0x17d   : > { %7658 = vmatpush2.bf16.msra.mxu1 %v11859_v36  ;;  %7618 = vmatprep.subr.bf16.mxu0 %v11864_v37  ;;  %v11927_v36 = vld [vmem:[%s13648_s26 + $0x120c] ss:$48 sps:$4 sm:$0xff]   ;;  %v11922_v37 = vld [vmem:[%s13648_s26 + $0xc08] ss:$48 sps:$4 sm:$0xff]  }
 0x17e   : > { %7659 = vmatprep.subr.bf16.mxu1 %v11867_v39  ;;  %v11925_v39 = vld [vmem:[%s13648_s26 + $0x1208] ss:$48 sps:$4 sm:$0xff]  }
 0x180   : > { %7619 = vmatpush2.bf16.msra.mxu0 %v11862_v43  ;;  %v11930_v43 = vld [vmem:[%s13648_s26 + $0x11ac] ss:$48 sps:$4 sm:$0xff]  }
 0x181   : > { %7660 = vmatpush2.bf16.msra.mxu1 %v11865_v44  ;;  %7620 = vmatprep.subr.bf16.mxu0 %v11870_v45  ;;  %v11933_v44 = vld [vmem:[%s13648_s26 + $0x17ac] ss:$48 sps:$4 sm:$0xff]   ;;  %v11928_v45 = vld [vmem:[%s13648_s26 + $0x11a8] ss:$48 sps:$4 sm:$0xff]  }
 0x182   : > { %7661 = vmatprep.subr.bf16.mxu1 %v11873_v46  ;;  %v11931_v46 = vld [vmem:[%s13648_s26 + $0x17a8] ss:$48 sps:$4 sm:$0xff]  }
 0x184   : > { %7621 = vmatpush2.bf16.msra.mxu0 %v11868_v47  ;;  %v11936_v47 = vld [vmem:[%s13648_s26 + $0x114c] ss:$48 sps:$4 sm:$0xff]  }
 0x185   : > { %7662 = vmatpush2.bf16.msra.mxu1 %v11871_v48  ;;  %7622 = vmatprep.subr.bf16.mxu0 %v11876_v49  ;;  %v11939_v48 = vld [vmem:[%s13648_s26 + $0x174c] ss:$48 sps:$4 sm:$0xff]   ;;  %v11934_v49 = vld [vmem:[%s13648_s26 + $0x1148] ss:$48 sps:$4 sm:$0xff]  }
 0x186   : > { %7663 = vmatprep.subr.bf16.mxu1 %v11879_v51  ;;  %v11937_v51 = vld [vmem:[%s13648_s26 + $0x1748] ss:$48 sps:$4 sm:$0xff]  }
 0x188   : > { %7623 = vmatpush2.bf16.msra.mxu0 %v11874_v52  ;;  %v11942_v52 = vld [vmem:[%s13648_s26 + $0x10ec] ss:$48 sps:$4 sm:$0xff]  }
 0x189   : > { %7664 = vmatpush2.bf16.msra.mxu1 %v11877_v54  ;;  %7674 = vmatprep.subr.bf16.mxu0 %v11882_v55  ;;  %v11945_v54 = vld [vmem:[%s13648_s26 + $0x16ec] ss:$48 sps:$4 sm:$0xff]   ;;  %v11940_v55 = vld [vmem:[%s13648_s26 + $0x10e8] ss:$48 sps:$4 sm:$0xff]  }
 0x18a   : > { %7715 = vmatprep.subr.bf16.mxu1 %v11885_v56  ;;  %v11943_v56 = vld [vmem:[%s13648_s26 + $0x16e8] ss:$48 sps:$4 sm:$0xff]  }
 0x18b   : > { %v7380_v61 = vpop.f32.mrf.mxu0  ;;  %7625 = vmatmul.mubr.bf16.vlgmr.msra.gmra.mxu0 %v13747_v9 }
 0x18c   : > { %v7421_v62 = vpop.f32.mrf.mxu1  ;;  %7666 = vmatmul.mubr.bf16.vlgmr.msra.gmra.mxu1 %v13749_v10  ;;  %7675 = vmatpush1.bf16.msra.mxu0 %v11880_v57  ;;  %v11948_v57 = vld [vmem:[%s13648_s26 + $0x108c] ss:$48 sps:$4 sm:$0xff]  }
 0x18d   : > { %v13986_v0 = vadd.f32 %v7421_v62, %v7380_v61  ;;  %7716 = vmatpush1.bf16.msra.mxu1 %v11883_v58  ;;  %v7382_v2 = vpop.f32.mrf.mxu0  ;;  %7676 = vmatprep.subr.bf16.mxu0 %v11888_v59  ;;  %v11951_v58 = vld [vmem:[%s13648_s26 + $0x168c] ss:$48 sps:$4 sm:$0xff]   ;;  %v11946_v59 = vld [vmem:[%s13648_s26 + $0x1088] ss:$48 sps:$4 sm:$0xff]  }
 0x18e   : > { %v7423_v3 = vpop.f32.mrf.mxu1  ;;  %7717 = vmatprep.subr.bf16.mxu1 %v11891_v60  ;;  %7706 = vmatprep.mubr.bf16.mxu0 %v13780_v38  ;;  %v11949_v60 = vld [vmem:[%s13648_s26 + $0x1688] ss:$48 sps:$4 sm:$0xff]   ;;  %v11954_v61 = vld [vmem:[%s13648_s26 + $0x102c] ss:$48 sps:$4 sm:$0xff]  }
 0x18f   : > { %v13991_v6 = vadd.f32 %v7423_v3, %v7382_v2  ;;  %7747 = vmatprep.mubr.bf16.mxu1 %v13784_v41  ;;  %v7384_v7 = vpop.f32.mrf.mxu0  ;;  %v11957_v62 = vld [vmem:[%s13648_s26 + $0x162c] ss:$48 sps:$4 sm:$0xff]  }
 0x190   : > { %v7425_v8 = vpop.f32.mrf.mxu1  ;;  %7677 = vmatpush1.bf16.msra.mxu0 %v11886_v63  ;;  %v11952_v63 = vld [vmem:[%s13648_s26 + $0x1028] ss:$48 sps:$4 sm:$0xff]   ;;  %v11960_v2 = vld [vmem:[%s13648_s26 + $0xfcc] ss:$48 sps:$4 sm:$0xff]  }
 0x191   : > { %7718 = vmatpush1.bf16.msra.mxu1 %v11889_v1  ;;  %v7385_v13 = vpop.f32.mrf.mxu0  ;;  %7678 = vmatprep.subr.bf16.mxu0 %v11894_v4  ;;  %v11955_v1 = vld [vmem:[%s13648_s26 + $0x1628] ss:$48 sps:$4 sm:$0xff]   ;;  %v11963_v3 = vld [vmem:[%s13648_s26 + $0x15cc] ss:$48 sps:$4 sm:$0xff]  }
 0x192   : > { %v7426_v14 = vpop.f32.mrf.mxu1  ;;  %7719 = vmatprep.subr.bf16.mxu1 %v11897_v5  ;;  %v11958_v4 = vld [vmem:[%s13648_s26 + $0xfc8] ss:$48 sps:$4 sm:$0xff]   ;;  %v11966_v7 = vld [vmem:[%s13648_s26 + $0xf6c] ss:$48 sps:$4 sm:$0xff]  }
 0x193   : > { %v11961_v5 = vld [vmem:[%s13648_s26 + $0x15c8] ss:$48 sps:$4 sm:$0xff]   ;;  %v11969_v8 = vld [vmem:[%s13648_s26 + $0x156c] ss:$48 sps:$4 sm:$0xff]  }
 0x194   : > { %7679 = vmatpush1.bf16.msra.mxu0 %v11892_v11  ;;  %v11964_v11 = vld [vmem:[%s13648_s26 + $0xf68] ss:$48 sps:$4 sm:$0xff]   ;;  %v11972_v13 = vld [vmem:[%s13648_s26 + $0xf0c] ss:$48 sps:$4 sm:$0xff]  }
 0x195   : > { %7720 = vmatpush1.bf16.msra.mxu1 %v11895_v12  ;;  %7680 = vmatprep.subr.bf16.mxu0 %v11900_v15  ;;  %v11967_v12 = vld [vmem:[%s13648_s26 + $0x1568] ss:$48 sps:$4 sm:$0xff]   ;;  %v11975_v14 = vld [vmem:[%s13648_s26 + $0x150c] ss:$48 sps:$4 sm:$0xff]  }
 0x196   : > { %7721 = vmatprep.subr.bf16.mxu1 %v11903_v16  ;;  %v11970_v15 = vld [vmem:[%s13648_s26 + $0xf08] ss:$48 sps:$4 sm:$0xff]  }
 0x197   : > { %v11973_v16 = vld [vmem:[%s13648_s26 + $0x1508] ss:$48 sps:$4 sm:$0xff]  }
 0x198   : > { %7681 = vmatpush1.bf16.msra.mxu0 %v11898_v17  ;;  %v11978_v17 = vld [vmem:[%s13648_s26 + $0x1aac] ss:$48 sps:$4 sm:$0xff]  }
 0x199   : > { %7722 = vmatpush1.bf16.msra.mxu1 %v11901_v18  ;;  %7682 = vmatprep.subr.bf16.mxu0 %v11906_v19  ;;  %v11981_v18 = vld [vmem:[%s13648_s26 + $0x20ac] ss:$48 sps:$4 sm:$0xff]   ;;  %v11976_v19 = vld [vmem:[%s13648_s26 + $0x1aa8] ss:$48 sps:$4 sm:$0xff]  }
 0x19a   : > { %7723 = vmatprep.subr.bf16.mxu1 %v11909_v20  ;;  %v11979_v20 = vld [vmem:[%s13648_s26 + $0x20a8] ss:$48 sps:$4 sm:$0xff]  }
 0x19c   : > { %7683 = vmatpush1.bf16.msra.mxu0 %v11904_v23  ;;  %v11984_v23 = vld [vmem:[%s13648_s26 + $0x1a4c] ss:$48 sps:$4 sm:$0xff]  }
 0x19d   : > { %7724 = vmatpush1.bf16.msra.mxu1 %v11907_v24  ;;  %7684 = vmatprep.subr.bf16.mxu0 %v11912_v25  ;;  %v11987_v24 = vld [vmem:[%s13648_s26 + $0x204c] ss:$48 sps:$4 sm:$0xff]   ;;  %v11982_v25 = vld [vmem:[%s13648_s26 + $0x1a48] ss:$48 sps:$4 sm:$0xff]  }
 0x19e   : > { %7725 = vmatprep.subr.bf16.mxu1 %v11915_v26  ;;  %v11985_v26 = vld [vmem:[%s13648_s26 + $0x2048] ss:$48 sps:$4 sm:$0xff]  }
 0x1a0   : > { %7685 = vmatpush1.bf16.msra.mxu0 %v11910_v27 }
 0x1a1   : > { %7726 = vmatpush1.bf16.msra.mxu1 %v11913_v28  ;;  %7686 = vmatprep.subr.bf16.mxu0 %v11918_v29 }
 0x1a2   : > { %7727 = vmatprep.subr.bf16.mxu1 %v11921_v31 }
 0x1a4   : > { %7687 = vmatpush1.bf16.msra.mxu0 %v11916_v32  ;;  %v11990_v32 = vld [vmem:[%s13648_s26 + $0x19ec] ss:$48 sps:$4 sm:$0xff]  }
 0x1a5   : > { %7728 = vmatpush1.bf16.msra.mxu1 %v11919_v34  ;;  %7688 = vmatprep.subr.bf16.mxu0 %v11924_v35  ;;  %v11993_v34 = vld [vmem:[%s13648_s26 + $0x1fec] ss:$48 sps:$4 sm:$0xff]   ;;  %v11988_v35 = vld [vmem:[%s13648_s26 + $0x19e8] ss:$48 sps:$4 sm:$0xff]  }
 0x1a6   : > { %7729 = vmatprep.subr.bf16.mxu1 %v11927_v36  ;;  %v11991_v36 = vld [vmem:[%s13648_s26 + $0x1fe8] ss:$48 sps:$4 sm:$0xff]  }
 0x1a8   : > { %7689 = vmatpush1.bf16.msra.mxu0 %v11922_v37 }
 0x1a9   : > { %7730 = vmatpush1.bf16.msra.mxu1 %v11925_v39  ;;  %7690 = vmatprep.subr.bf16.mxu0 %v11930_v43 }
 0x1aa   : > { %7731 = vmatprep.subr.bf16.mxu1 %v11933_v44 }
 0x1ac   : > { %7691 = vmatpush2.bf16.msra.mxu0 %v11928_v45  ;;  %v11996_v45 = vld [vmem:[%s13648_s26 + $0x198c] ss:$48 sps:$4 sm:$0xff]  }
 0x1ad   : > { %7732 = vmatpush2.bf16.msra.mxu1 %v11931_v46  ;;  %7692 = vmatprep.subr.bf16.mxu0 %v11936_v47  ;;  %v11999_v46 = vld [vmem:[%s13648_s26 + $0x1f8c] ss:$48 sps:$4 sm:$0xff]   ;;  %v11994_v47 = vld [vmem:[%s13648_s26 + $0x1988] ss:$48 sps:$4 sm:$0xff]  }
 0x1ae   : > { %7733 = vmatprep.subr.bf16.mxu1 %v11939_v48  ;;  %v11997_v48 = vld [vmem:[%s13648_s26 + $0x1f88] ss:$48 sps:$4 sm:$0xff]  }
 0x1b0   : > { %7693 = vmatpush2.bf16.msra.mxu0 %v11934_v49  ;;  %v12002_v49 = vld [vmem:[%s13648_s26 + $0x192c] ss:$48 sps:$4 sm:$0xff]  }
 0x1b1   : > { %7734 = vmatpush2.bf16.msra.mxu1 %v11937_v51  ;;  %7694 = vmatprep.subr.bf16.mxu0 %v11942_v52  ;;  %v12005_v51 = vld [vmem:[%s13648_s26 + $0x1f2c] ss:$48 sps:$4 sm:$0xff]   ;;  %v12000_v52 = vld [vmem:[%s13648_s26 + $0x1928] ss:$48 sps:$4 sm:$0xff]  }
 0x1b2   : > { %7735 = vmatprep.subr.bf16.mxu1 %v11945_v54  ;;  %v12003_v54 = vld [vmem:[%s13648_s26 + $0x1f28] ss:$48 sps:$4 sm:$0xff]  }
 0x1b4   : > { %7695 = vmatpush2.bf16.msra.mxu0 %v11940_v55  ;;  %v12008_v55 = vld [vmem:[%s13648_s26 + $0x18cc] ss:$48 sps:$4 sm:$0xff]  }
 0x1b5   : > { %7736 = vmatpush2.bf16.msra.mxu1 %v11943_v56  ;;  %7696 = vmatprep.subr.bf16.mxu0 %v11948_v57  ;;  %v12011_v56 = vld [vmem:[%s13648_s26 + $0x1ecc] ss:$48 sps:$4 sm:$0xff]   ;;  %v12006_v57 = vld [vmem:[%s13648_s26 + $0x18c8] ss:$48 sps:$4 sm:$0xff]  }
 0x1b6   : > { %7737 = vmatprep.subr.bf16.mxu1 %v11951_v58  ;;  %v12009_v58 = vld [vmem:[%s13648_s26 + $0x1ec8] ss:$48 sps:$4 sm:$0xff]  }
 0x1b8   : > { %7697 = vmatpush2.bf16.msra.mxu0 %v11946_v59  ;;  %v12014_v59 = vld [vmem:[%s13648_s26 + $0x186c] ss:$48 sps:$4 sm:$0xff]  }
 0x1b9   : > { %7738 = vmatpush2.bf16.msra.mxu1 %v11949_v60  ;;  %7698 = vmatprep.subr.bf16.mxu0 %v11954_v61  ;;  %v12017_v60 = vld [vmem:[%s13648_s26 + $0x1e6c] ss:$48 sps:$4 sm:$0xff]   ;;  %v12012_v61 = vld [vmem:[%s13648_s26 + $0x1868] ss:$48 sps:$4 sm:$0xff]  }
 0x1ba   : > { %7739 = vmatprep.subr.bf16.mxu1 %v11957_v62  ;;  %v12015_v62 = vld [vmem:[%s13648_s26 + $0x1e68] ss:$48 sps:$4 sm:$0xff]  }
 0x1bc   : > { %7699 = vmatpush2.bf16.msra.mxu0 %v11952_v63  ;;  %v12020_v63 = vld [vmem:[%s13648_s26 + $0x180c] ss:$48 sps:$4 sm:$0xff]  }
 0x1bd   : > { %7740 = vmatpush2.bf16.msra.mxu1 %v11955_v1  ;;  %7700 = vmatprep.subr.bf16.mxu0 %v11960_v2  ;;  %v12023_v1 = vld [vmem:[%s13648_s26 + $0x1e0c] ss:$48 sps:$4 sm:$0xff]   ;;  %v12018_v2 = vld [vmem:[%s13648_s26 + $0x1808] ss:$48 sps:$4 sm:$0xff]  }
 0x1be   : > { %7741 = vmatprep.subr.bf16.mxu1 %v11963_v3  ;;  %v12021_v3 = vld [vmem:[%s13648_s26 + $0x1e08] ss:$48 sps:$4 sm:$0xff]  }
 0x1c0   : > { %7701 = vmatpush2.bf16.msra.mxu0 %v11958_v4  ;;  %v12026_v4 = vld [vmem:[%s13648_s26 + $0x1dac] ss:$48 sps:$4 sm:$0xff]  }
 0x1c1   : > { %7742 = vmatpush2.bf16.msra.mxu1 %v11961_v5  ;;  %7702 = vmatprep.subr.bf16.mxu0 %v11966_v7  ;;  %v12029_v5 = vld [vmem:[%s13648_s26 + $0x23ac] ss:$48 sps:$4 sm:$0xff]   ;;  %v12024_v7 = vld [vmem:[%s13648_s26 + $0x1da8] ss:$48 sps:$4 sm:$0xff]  }
 0x1c2   : > { %7743 = vmatprep.subr.bf16.mxu1 %v11969_v8  ;;  %v12027_v8 = vld [vmem:[%s13648_s26 + $0x23a8] ss:$48 sps:$4 sm:$0xff]  }
 0x1c4   : > { %7703 = vmatpush2.bf16.msra.mxu0 %v11964_v11  ;;  %v12032_v11 = vld [vmem:[%s13648_s26 + $0x1d4c] ss:$48 sps:$4 sm:$0xff]  }
 0x1c5   : > { %7744 = vmatpush2.bf16.msra.mxu1 %v11967_v12  ;;  %7704 = vmatprep.subr.bf16.mxu0 %v11972_v13  ;;  %v12035_v12 = vld [vmem:[%s13648_s26 + $0x234c] ss:$48 sps:$4 sm:$0xff]   ;;  %v12030_v13 = vld [vmem:[%s13648_s26 + $0x1d48] ss:$48 sps:$4 sm:$0xff]  }
 0x1c6   : > { %7745 = vmatprep.subr.bf16.mxu1 %v11975_v14  ;;  %v12033_v14 = vld [vmem:[%s13648_s26 + $0x2348] ss:$48 sps:$4 sm:$0xff]  }
 0x1c8   : > { %7705 = vmatpush2.bf16.msra.mxu0 %v11970_v15  ;;  %v12038_v15 = vld [vmem:[%s13648_s26 + $0x1cec] ss:$48 sps:$4 sm:$0xff]  }
 0x1c9   : > { %7746 = vmatpush2.bf16.msra.mxu1 %v11973_v16  ;;  %7756 = vmatprep.subr.bf16.mxu0 %v11978_v17  ;;  %v12041_v16 = vld [vmem:[%s13648_s26 + $0x22ec] ss:$48 sps:$4 sm:$0xff]   ;;  %v12036_v17 = vld [vmem:[%s13648_s26 + $0x1ce8] ss:$48 sps:$4 sm:$0xff]  }
 0x1ca   : > { %7797 = vmatprep.subr.bf16.mxu1 %v11981_v18  ;;  %v12039_v18 = vld [vmem:[%s13648_s26 + $0x22e8] ss:$48 sps:$4 sm:$0xff]  }
 0x1cb   : > { %v14057_v27 = vpop.f32.mrf.mxu0  ;;  %7707 = vmatmul.mubr.bf16.vlgmr.msra.gmra.mxu0 %v13827_v21 }
 0x1cc   : > { %v14059_v28 = vpop.f32.mrf.mxu1  ;;  %7748 = vmatmul.mubr.bf16.vlgmr.msra.gmra.mxu1 %v13829_v22  ;;  %7757 = vmatpush1.bf16.msra.mxu0 %v11976_v19  ;;  %v12044_v19 = vld [vmem:[%s13648_s26 + $0x1c8c] ss:$48 sps:$4 sm:$0xff]  }
 0x1cd   : > { %7798 = vmatpush1.bf16.msra.mxu1 %v11979_v20  ;;  %v14063_v29 = vpop.f32.mrf.mxu0  ;;  %7758 = vmatprep.subr.bf16.mxu0 %v11984_v23  ;;  %v12047_v20 = vld [vmem:[%s13648_s26 + $0x228c] ss:$48 sps:$4 sm:$0xff]   ;;  %v12042_v23 = vld [vmem:[%s13648_s26 + $0x1c88] ss:$48 sps:$4 sm:$0xff]  }
 0x1ce   : > { %v14065_v31 = vpop.f32.mrf.mxu1  ;;  %7799 = vmatprep.subr.bf16.mxu1 %v11987_v24  ;;  %7788 = vmatprep.mubr.bf16.mxu0 %v13840_v30  ;;  %v12045_v24 = vld [vmem:[%s13648_s26 + $0x2288] ss:$48 sps:$4 sm:$0xff]  }
 0x1cf   : > { %7829 = vmatprep.mubr.bf16.mxu1 %v13844_v33  ;;  %v7466_v37 = vpop.f32.mrf.mxu0 }
 0x1d0   : > { %v7507_v39 = vpop.f32.mrf.mxu1  ;;  %7759 = vmatpush1.bf16.msra.mxu0 %v11982_v25  ;;  %v12050_v25 = vld [vmem:[%s13648_s26 + $0x1c2c] ss:$48 sps:$4 sm:$0xff]   ;;  %v12054_v37 = vld [vmem:[%s13648_s26 + $0x1bc8] ss:$48 sps:$4 sm:$0xff]  }
 0x1d1   : > { %7800 = vmatpush1.bf16.msra.mxu1 %v11985_v26  ;;  %v7467_v43 = vpop.f32.mrf.mxu0  ;;  %7760 = vmatprep.subr.bf16.mxu0 %v11990_v32  ;;  %v12053_v26 = vld [vmem:[%s13648_s26 + $0x222c] ss:$48 sps:$4 sm:$0xff]   ;;  %v12048_v32 = vld [vmem:[%s13648_s26 + $0x1c28] ss:$48 sps:$4 sm:$0xff]  }
 0x1d2   : > { %v7508_v44 = vpop.f32.mrf.mxu1  ;;  %7801 = vmatprep.subr.bf16.mxu1 %v11993_v34  ;;  %v12051_v34 = vld [vmem:[%s13648_s26 + $0x2228] ss:$48 sps:$4 sm:$0xff]   ;;  %v12062_v43 = vld [vmem:[%s13648_s26 + $0x1b6c] ss:$48 sps:$4 sm:$0xff]  }
 0x1d3   : > { %v12057_v39 = vld [vmem:[%s13648_s26 + $0x21c8] ss:$48 sps:$4 sm:$0xff]   ;;  %v12065_v44 = vld [vmem:[%s13648_s26 + $0x216c] ss:$48 sps:$4 sm:$0xff]  }
 0x1d4   : > { %7761 = vmatpush1.bf16.msra.mxu0 %v11988_v35  ;;  %v12056_v35 = vld [vmem:[%s13648_s26 + $0x1bcc] ss:$48 sps:$4 sm:$0xff]  }
 0x1d5   : > { %7802 = vmatpush1.bf16.msra.mxu1 %v11991_v36  ;;  %7762 = vmatprep.subr.bf16.mxu0 %v11996_v45  ;;  %v12059_v36 = vld [vmem:[%s13648_s26 + $0x21cc] ss:$48 sps:$4 sm:$0xff]   ;;  %v12060_v45 = vld [vmem:[%s13648_s26 + $0x1b68] ss:$48 sps:$4 sm:$0xff]  }
 0x1d6   : > { %7803 = vmatprep.subr.bf16.mxu1 %v11999_v46  ;;  %v12063_v46 = vld [vmem:[%s13648_s26 + $0x2168] ss:$48 sps:$4 sm:$0xff]  }
 0x1d8   : > { %7763 = vmatpush1.bf16.msra.mxu0 %v11994_v47  ;;  %v12068_v47 = vld [vmem:[%s13648_s26 + $0x1b0c] ss:$48 sps:$4 sm:$0xff]  }
 0x1d9   : > { %7804 = vmatpush1.bf16.msra.mxu1 %v11997_v48  ;;  %7764 = vmatprep.subr.bf16.mxu0 %v12002_v49  ;;  %v12071_v48 = vld [vmem:[%s13648_s26 + $0x210c] ss:$48 sps:$4 sm:$0xff]   ;;  %v12066_v49 = vld [vmem:[%s13648_s26 + $0x1b08] ss:$48 sps:$4 sm:$0xff]  }
 0x1da   : > { %7805 = vmatprep.subr.bf16.mxu1 %v12005_v51  ;;  %v12069_v51 = vld [vmem:[%s13648_s26 + $0x2108] ss:$48 sps:$4 sm:$0xff]  }
 0x1dc   : > { %7765 = vmatpush1.bf16.msra.mxu0 %v12000_v52  ;;  %v12074_v52 = vld [vmem:[%s13648_s26 + $0x2b4] ss:$48 sps:$4 sm:$0xff]  }
 0x1dd   : > { %7806 = vmatpush1.bf16.msra.mxu1 %v12003_v54  ;;  %7766 = vmatprep.subr.bf16.mxu0 %v12008_v55  ;;  %v12077_v54 = vld [vmem:[%s13648_s26 + $0x8b4] ss:$48 sps:$4 sm:$0xff]   ;;  %v7463_v55 = vadd.f32 %v14057_v27, %v13986_v0 }
 0x1de   : > { %7807 = vmatprep.subr.bf16.mxu1 %v12011_v56  ;;  %v12072_v56 = vld [vmem:[%s13648_s26 + $0x2b0] ss:$48 sps:$4 sm:$0xff]  }
 0x1e0   : > { %7767 = vmatpush1.bf16.msra.mxu0 %v12006_v57  ;;  %v12075_v57 = vld [vmem:[%s13648_s26 + $0x8b0] ss:$48 sps:$4 sm:$0xff]  }
 0x1e1   : > { %7808 = vmatpush1.bf16.msra.mxu1 %v12009_v58  ;;  %7768 = vmatprep.subr.bf16.mxu0 %v12014_v59  ;;  %v7465_v58 = vadd.f32 %v14063_v29, %v13991_v6  ;;  %v12080_v59 = vld [vmem:[%s13648_s26 + $0x254] ss:$48 sps:$4 sm:$0xff]  }
 0x1e2   : > { %7809 = vmatprep.subr.bf16.mxu1 %v12017_v60  ;;  %v12083_v60 = vld [vmem:[%s13648_s26 + $0x854] ss:$48 sps:$4 sm:$0xff]  }
 0x1e3   : > { %v7506_v6 = vadd.f32 %v14065_v31, %v7465_v58  ;;  %v12131_v58 = vld [vmem:[%s13648_s26 + $0xb54] ss:$48 sps:$4 sm:$0xff]  }
 0x1e4   : > { %7769 = vmatpush1.bf16.msra.mxu0 %v12012_v61  ;;  %v7504_v61 = vadd.f32 %v14059_v28, %v7463_v55  ;;  %v423_v28 = vld [vmem:[#allocation2] sm:$0xff] }
 0x1e5   : > { %7810 = vmatpush1.bf16.msra.mxu1 %v12015_v62  ;;  %7770 = vmatprep.subr.bf16.mxu0 %v12020_v63  ;;  %v12078_v62 = vld [vmem:[%s13648_s26 + $0x250] ss:$48 sps:$4 sm:$0xff]  }
 0x1e6   : > { %7811 = vmatprep.subr.bf16.mxu1 %v12023_v1  ;;  %v12081_v63 = vld [vmem:[%s13648_s26 + $0x850] ss:$48 sps:$4 sm:$0xff]  }
 0x1e7   : > { %v12120_v55 = vld [vmem:[%s13648_s26 + $0x5b0] ss:$48 sps:$4 sm:$0xff]  }
 0x1e8   : > { %7771 = vmatpush1.bf16.msra.mxu0 %v12018_v2  ;;  %v422_v2 = vld [vmem:[#allocation2 + $0x30] sm:$0xff] }
 0x1e9   : > { %7812 = vmatpush1.bf16.msra.mxu1 %v12021_v3  ;;  %7772 = vmatprep.subr.bf16.mxu0 %v12026_v4  ;;  %v12086_v4 = vld [vmem:[%s13648_s26 + $0x1f4] ss:$48 sps:$4 sm:$0xff]  }
 0x1ea   : > { %7813 = vmatprep.subr.bf16.mxu1 %v12029_v5  ;;  %v12089_v5 = vld [vmem:[%s13648_s26 + $0x7f4] ss:$48 sps:$4 sm:$0xff]  }
 0x1ec   : > { %7773 = vmatpush2.bf16.msra.mxu0 %v12024_v7 }
 0x1ed   : > { %7814 = vmatpush2.bf16.msra.mxu1 %v12027_v8  ;;  %7774 = vmatprep.subr.bf16.mxu0 %v12032_v11  ;;  %v12084_v11 = vld [vmem:[%s13648_s26 + $0x1f0] ss:$48 sps:$4 sm:$0xff]  }
 0x1ee   : > { %7815 = vmatprep.subr.bf16.mxu1 %v12035_v12  ;;  %v12087_v12 = vld [vmem:[%s13648_s26 + $0x7f0] ss:$48 sps:$4 sm:$0xff]  }
 0x1f0   : > { %7775 = vmatpush2.bf16.msra.mxu0 %v12030_v13 }
 0x1f1   : > { %7816 = vmatpush2.bf16.msra.mxu1 %v12033_v14  ;;  %7776 = vmatprep.subr.bf16.mxu0 %v12038_v15 }
 0x1f2   : > { %7817 = vmatprep.subr.bf16.mxu1 %v12041_v16 }
 0x1f4   : > { %7777 = vmatpush2.bf16.msra.mxu0 %v12036_v17 }
 0x1f5   : > { %7818 = vmatpush2.bf16.msra.mxu1 %v12039_v18  ;;  %7778 = vmatprep.subr.bf16.mxu0 %v12044_v19  ;;  %v12092_v18 = vld [vmem:[%s13648_s26 + $0x194] ss:$48 sps:$4 sm:$0xff]  }
 0x1f6   : > { %7819 = vmatprep.subr.bf16.mxu1 %v12047_v20  ;;  %v12095_v19 = vld [vmem:[%s13648_s26 + $0x794] ss:$48 sps:$4 sm:$0xff]  }
 0x1f8   : > { %7779 = vmatpush2.bf16.msra.mxu0 %v12042_v23  ;;  %v12090_v23 = vld [vmem:[%s13648_s26 + $0x190] ss:$48 sps:$4 sm:$0xff]  }
 0x1f9   : > { %7820 = vmatpush2.bf16.msra.mxu1 %v12045_v24  ;;  %7780 = vmatprep.subr.bf16.mxu0 %v12050_v25  ;;  %v12093_v24 = vld [vmem:[%s13648_s26 + $0x790] ss:$48 sps:$4 sm:$0xff]   ;;  %v12098_v25 = vld [vmem:[%s13648_s26 + $0x134] ss:$48 sps:$4 sm:$0xff]  }
 0x1fa   : > { %7821 = vmatprep.subr.bf16.mxu1 %v12053_v26  ;;  %v12101_v26 = vld [vmem:[%s13648_s26 + $0x734] ss:$48 sps:$4 sm:$0xff]  }
 0x1fc   : > { %7781 = vmatpush2.bf16.msra.mxu0 %v12048_v32  ;;  %v12096_v32 = vld [vmem:[%s13648_s26 + $0x130] ss:$48 sps:$4 sm:$0xff]  }
 0x1fd   : > { %7822 = vmatpush2.bf16.msra.mxu1 %v12051_v34  ;;  %7782 = vmatprep.subr.bf16.mxu0 %v12056_v35  ;;  %v12099_v34 = vld [vmem:[%s13648_s26 + $0x730] ss:$48 sps:$4 sm:$0xff]   ;;  %v12104_v35 = vld [vmem:[%s13648_s26 + $0xd4] ss:$48 sps:$4 sm:$0xff]  }
 0x1fe   : > { %7823 = vmatprep.subr.bf16.mxu1 %v12059_v36  ;;  %v12107_v36 = vld [vmem:[%s13648_s26 + $0x6d4] ss:$48 sps:$4 sm:$0xff]  }
 0x200   : > { %7783 = vmatpush2.bf16.msra.mxu0 %v12054_v37  ;;  %v12102_v37 = vld [vmem:[%s13648_s26 + $0xd0] ss:$48 sps:$4 sm:$0xff]  }
 0x201   : > { %7824 = vmatpush2.bf16.msra.mxu1 %v12057_v39  ;;  %7784 = vmatprep.subr.bf16.mxu0 %v12062_v43  ;;  %v12105_v39 = vld [vmem:[%s13648_s26 + $0x6d0] ss:$48 sps:$4 sm:$0xff]   ;;  %v12110_v43 = vld [vmem:[%s13648_s26 + $0x74] ss:$48 sps:$4 sm:$0xff]  }
 0x202   : > { %7825 = vmatprep.subr.bf16.mxu1 %v12065_v44  ;;  %v12113_v44 = vld [vmem:[%s13648_s26 + $0x674] ss:$48 sps:$4 sm:$0xff]  }
 0x204   : > { %7785 = vmatpush2.bf16.msra.mxu0 %v12060_v45  ;;  %v12108_v45 = vld [vmem:[%s13648_s26 + $0x70] ss:$48 sps:$4 sm:$0xff]  }
 0x205   : > { %7826 = vmatpush2.bf16.msra.mxu1 %v12063_v46  ;;  %7786 = vmatprep.subr.bf16.mxu0 %v12068_v47  ;;  %v12111_v46 = vld [vmem:[%s13648_s26 + $0x670] ss:$48 sps:$4 sm:$0xff]   ;;  %v12116_v47 = vld [vmem:[%s13648_s26 + $0x14] ss:$48 sps:$4 sm:$0xff]  }
 0x206   : > { %7827 = vmatprep.subr.bf16.mxu1 %v12071_v48  ;;  %v12119_v48 = vld [vmem:[%s13648_s26 + $0x614] ss:$48 sps:$4 sm:$0xff]  }
 0x208   : > { %7787 = vmatpush2.bf16.msra.mxu0 %v12066_v49  ;;  %v12114_v49 = vld [vmem:[%s13648_s26 + $0x10] ss:$48 sps:$4 sm:$0xff]  }
 0x209   : > { %7828 = vmatpush2.bf16.msra.mxu1 %v12069_v51  ;;  %7838 = vmatprep.subr.bf16.mxu0 %v12074_v52  ;;  %v12117_v51 = vld [vmem:[%s13648_s26 + $0x610] ss:$48 sps:$4 sm:$0xff]   ;;  %v12122_v52 = vld [vmem:[%s13648_s26 + $0x5b4] ss:$48 sps:$4 sm:$0xff]  }
 0x20a   : > { %7879 = vmatprep.subr.bf16.mxu1 %v12077_v54  ;;  %v12125_v54 = vld [vmem:[%s13648_s26 + $0xbb4] ss:$48 sps:$4 sm:$0xff]  }
 0x20b   : > { %v7544_v1 = vpop.f32.mrf.mxu0  ;;  %7789 = vmatmul.mubr.bf16.vlgmr.msra.gmra.mxu0 %v13907_v40 }
 0x20c   : > { %v7585_v0 = vpop.f32.mrf.mxu1  ;;  %7830 = vmatmul.mubr.bf16.vlgmr.msra.gmra.mxu1 %v13909_v42  ;;  %v7545_v27 = vadd.f32 %v7544_v1, %v7504_v61  ;;  %7839 = vmatpush1.bf16.msra.mxu0 %v12072_v56  ;;  %v12123_v56 = vld [vmem:[%s13648_s26 + $0xbb0] ss:$48 sps:$4 sm:$0xff]   ;;  %v12134_v61 = vld [vmem:[%s13648_s26 + $0x4f4] ss:$48 sps:$4 sm:$0xff]  }
 0x20d   : > { %7880 = vmatpush1.bf16.msra.mxu1 %v12075_v57  ;;  %v7546_v29 = vpop.f32.mrf.mxu0  ;;  %7840 = vmatprep.subr.bf16.mxu0 %v12080_v59  ;;  %v12128_v57 = vld [vmem:[%s13648_s26 + $0x554] ss:$48 sps:$4 sm:$0xff]   ;;  %v12126_v59 = vld [vmem:[%s13648_s26 + $0x550] ss:$48 sps:$4 sm:$0xff]  }
 0x20e   : > { %v7587_v3 = vpop.f32.mrf.mxu1  ;;  %7881 = vmatprep.subr.bf16.mxu1 %v12083_v60  ;;  %v7586_v7 = vadd.f32 %v7585_v0, %v7545_v27  ;;  %v7547_v8 = vadd.f32 %v7546_v29, %v7506_v6  ;;  %7870 = vmatprep.mubr.bf16.mxu0 %v13720_v50  ;;  %v12129_v60 = vld [vmem:[%s13648_s26 + $0xb50] ss:$48 sps:$4 sm:$0xff]   ;;  %v12143_v0 = vld [vmem:[%s13648_s26 + $0xa94] ss:$48 sps:$4 sm:$0xff]  }
 0x20f   : > { %7911 = vmatprep.mubr.bf16.mxu1 %v13724_v53  ;;  %v7548_v31 = vpop.f32.mrf.mxu0  ;;  %v12135_v1 = vld [vmem:[%s13648_s26 + $0xaf0] ss:$48 sps:$4 sm:$0xff]   ;;  %v12146_v29 = vld [vmem:[%s13648_s26 + $0x434] ss:$48 sps:$4 sm:$0xff]  }
 0x210   : > { %v7589_v13 = vpop.f32.mrf.mxu1  ;;  %v8822_v14 = vadd.f32 %v7586_v7, %v422_v2  ;;  %v7588_v15 = vadd.f32 %v7587_v3, %v7547_v8  ;;  %7841 = vmatpush1.bf16.msra.mxu0 %v12078_v62  ;;  %v12137_v62 = vld [vmem:[%s13648_s26 + $0xaf4] ss:$48 sps:$4 sm:$0xff]   ;;  %v12138_v6 = vld [vmem:[%s13648_s26 + $0x490] ss:$48 sps:$4 sm:$0xff]  }
 0x211   : > { %7882 = vmatpush1.bf16.msra.mxu1 %v12081_v63  ;;  %v7549_v16 = vpop.f32.mrf.mxu0  ;;  %7842 = vmatprep.subr.bf16.mxu0 %v12086_v4  ;;  %v12132_v63 = vld [vmem:[%s13648_s26 + $0x4f0] ss:$48 sps:$4 sm:$0xff]   ;;  %v12140_v2 = vld [vmem:[%s13648_s26 + $0x494] ss:$48 sps:$4 sm:$0xff]  }
 0x212   : > { %v7590_v17 = vpop.f32.mrf.mxu1  ;;  %7883 = vmatprep.subr.bf16.mxu1 %v12089_v5  ;;  %8834 = vst [vmem:[#allocation2 + $0x30] sm:$0xff] %v8822_v14  ;;  %v8823_v20 = vadd.f32 %v7588_v15, %v423_v28  ;;  %v12141_v27 = vld [vmem:[%s13648_s26 + $0xa90] ss:$48 sps:$4 sm:$0xff]   ;;  %v12149_v28 = vld [vmem:[%s13648_s26 + $0xa34] ss:$48 sps:$4 sm:$0xff]  }
 0x213   : > { %v12144_v3 = vld [vmem:[%s13648_s26 + $0x430] ss:$48 sps:$4 sm:$0xff]   ;;  %v12152_v5 = vld [vmem:[%s13648_s26 + $0x3d4] ss:$48 sps:$4 sm:$0xff]  }
 0x214   : > { %8835 = vst [vmem:[#allocation2] sm:$0xff] %v8823_v20  ;;  %7843 = vmatpush1.bf16.msra.mxu0 %v12084_v11  ;;  %v12147_v4 = vld [vmem:[%s13648_s26 + $0xa30] ss:$48 sps:$4 sm:$0xff]   ;;  %v12155_v7 = vld [vmem:[%s13648_s26 + $0x9d4] ss:$48 sps:$4 sm:$0xff]  }
 0x215   : > { %7884 = vmatpush1.bf16.msra.mxu1 %v12087_v12  ;;  %7844 = vmatprep.subr.bf16.mxu0 %v12092_v18  ;;  %v12150_v8 = vld [vmem:[%s13648_s26 + $0x3d0] ss:$48 sps:$4 sm:$0xff]   ;;  %v12158_v12 = vld [vmem:[%s13648_s26 + $0x374] ss:$48 sps:$4 sm:$0xff]  }
 0x216   : > { %7885 = vmatprep.subr.bf16.mxu1 %v12095_v19  ;;  %v12153_v11 = vld [vmem:[%s13648_s26 + $0x9d0] ss:$48 sps:$4 sm:$0xff]   ;;  %v12161_v31 = vld [vmem:[%s13648_s26 + $0x974] ss:$48 sps:$4 sm:$0xff]  }
 0x217   : > { %v12156_v13 = vld [vmem:[%s13648_s26 + $0x370] ss:$48 sps:$4 sm:$0xff]   ;;  %v12164_v15 = vld [vmem:[%s13648_s26 + $0x314] ss:$48 sps:$4 sm:$0xff]  }
 0x218   : > { %7845 = vmatpush1.bf16.msra.mxu0 %v12090_v23  ;;  %v12159_v14 = vld [vmem:[%s13648_s26 + $0x970] ss:$48 sps:$4 sm:$0xff]   ;;  %v12167_v16 = vld [vmem:[%s13648_s26 + $0x914] ss:$48 sps:$4 sm:$0xff]  }
 0x219   : > { %7886 = vmatpush1.bf16.msra.mxu1 %v12093_v24  ;;  %7846 = vmatprep.subr.bf16.mxu0 %v12098_v25  ;;  %v12162_v17 = vld [vmem:[%s13648_s26 + $0x310] ss:$48 sps:$4 sm:$0xff]   ;;  %v12170_v19 = vld [vmem:[%s13648_s26 + $0xeb4] ss:$48 sps:$4 sm:$0xff]  }
 0x21a   : > { %7887 = vmatprep.subr.bf16.mxu1 %v12101_v26  ;;  %v12165_v18 = vld [vmem:[%s13648_s26 + $0x910] ss:$48 sps:$4 sm:$0xff]   ;;  %v12173_v20 = vld [vmem:[%s13648_s26 + $0x14b4] ss:$48 sps:$4 sm:$0xff]  }
 0x21b   : > { %v12168_v23 = vld [vmem:[%s13648_s26 + $0xeb0] ss:$48 sps:$4 sm:$0xff]   ;;  %v12176_v25 = vld [vmem:[%s13648_s26 + $0xe54] ss:$48 sps:$4 sm:$0xff]  }
 0x21c   : > { %7847 = vmatpush1.bf16.msra.mxu0 %v12096_v32  ;;  %v12171_v24 = vld [vmem:[%s13648_s26 + $0x14b0] ss:$48 sps:$4 sm:$0xff]   ;;  %v12179_v26 = vld [vmem:[%s13648_s26 + $0x1454] ss:$48 sps:$4 sm:$0xff]  }
 0x21d   : > { %7888 = vmatpush1.bf16.msra.mxu1 %v12099_v34  ;;  %7848 = vmatprep.subr.bf16.mxu0 %v12104_v35  ;;  %v12174_v32 = vld [vmem:[%s13648_s26 + $0xe50] ss:$48 sps:$4 sm:$0xff]  }
 0x21e   : > { %7889 = vmatprep.subr.bf16.mxu1 %v12107_v36 }
 0x220   : > { %7849 = vmatpush1.bf16.msra.mxu0 %v12102_v37  ;;  %v12177_v37 = vld [vmem:[%s13648_s26 + $0x1450] ss:$48 sps:$4 sm:$0xff]  }
 0x221   : > { %7890 = vmatpush1.bf16.msra.mxu1 %v12105_v39  ;;  %7850 = vmatprep.subr.bf16.mxu0 %v12110_v43 }
 0x222   : > { %7891 = vmatprep.subr.bf16.mxu1 %v12113_v44  ;;  %v12182_v44 = vld [vmem:[%s13648_s26 + $0xdf4] ss:$48 sps:$4 sm:$0xff]  }
 0x224   : > { %7851 = vmatpush1.bf16.msra.mxu0 %v12108_v45  ;;  %v12185_v45 = vld [vmem:[%s13648_s26 + $0x13f4] ss:$48 sps:$4 sm:$0xff]  }
 0x225   : > { %7892 = vmatpush1.bf16.msra.mxu1 %v12111_v46  ;;  %7852 = vmatprep.subr.bf16.mxu0 %v12116_v47  ;;  %v12180_v47 = vld [vmem:[%s13648_s26 + $0xdf0] ss:$48 sps:$4 sm:$0xff]  }
 0x226   : > { %7893 = vmatprep.subr.bf16.mxu1 %v12119_v48  ;;  %v12183_v48 = vld [vmem:[%s13648_s26 + $0x13f0] ss:$48 sps:$4 sm:$0xff]  }
 0x228   : > { %7853 = vmatpush1.bf16.msra.mxu0 %v12114_v49 }
 0x229   : > { %7894 = vmatpush1.bf16.msra.mxu1 %v12117_v51  ;;  %7854 = vmatprep.subr.bf16.mxu0 %v12122_v52 }
 0x22a   : > { %7895 = vmatprep.subr.bf16.mxu1 %v12125_v54 }
 0x22c   : > { %7855 = vmatpush2.bf16.msra.mxu0 %v12120_v55  ;;  %v12188_v55 = vld [vmem:[%s13648_s26 + $0xd94] ss:$48 sps:$4 sm:$0xff]  }
 0x22d   : > { %7896 = vmatpush2.bf16.msra.mxu1 %v12123_v56  ;;  %7856 = vmatprep.subr.bf16.mxu0 %v12128_v57  ;;  %v12191_v56 = vld [vmem:[%s13648_s26 + $0x1394] ss:$48 sps:$4 sm:$0xff]   ;;  %v12186_v57 = vld [vmem:[%s13648_s26 + $0xd90] ss:$48 sps:$4 sm:$0xff]  }
 0x22e   : > { %7897 = vmatprep.subr.bf16.mxu1 %v12131_v58  ;;  %v12189_v58 = vld [vmem:[%s13648_s26 + $0x1390] ss:$48 sps:$4 sm:$0xff]  }
 0x230   : > { %7857 = vmatpush2.bf16.msra.mxu0 %v12126_v59  ;;  %v12194_v59 = vld [vmem:[%s13648_s26 + $0xd34] ss:$48 sps:$4 sm:$0xff]  }
 0x231   : > { %7898 = vmatpush2.bf16.msra.mxu1 %v12129_v60  ;;  %7858 = vmatprep.subr.bf16.mxu0 %v12134_v61  ;;  %v12197_v60 = vld [vmem:[%s13648_s26 + $0x1334] ss:$48 sps:$4 sm:$0xff]   ;;  %v12192_v61 = vld [vmem:[%s13648_s26 + $0xd30] ss:$48 sps:$4 sm:$0xff]  }
 0x232   : > { %7899 = vmatprep.subr.bf16.mxu1 %v12137_v62  ;;  %v12195_v62 = vld [vmem:[%s13648_s26 + $0x1330] ss:$48 sps:$4 sm:$0xff]  }
 0x234   : > { %7859 = vmatpush2.bf16.msra.mxu0 %v12132_v63  ;;  %v12200_v63 = vld [vmem:[%s13648_s26 + $0xcd4] ss:$48 sps:$4 sm:$0xff]  }
 0x235   : > { %7900 = vmatpush2.bf16.msra.mxu1 %v12135_v1  ;;  %7860 = vmatprep.subr.bf16.mxu0 %v12140_v2  ;;  %v12203_v1 = vld [vmem:[%s13648_s26 + $0x12d4] ss:$48 sps:$4 sm:$0xff]   ;;  %v12198_v2 = vld [vmem:[%s13648_s26 + $0xcd0] ss:$48 sps:$4 sm:$0xff]  }
 0x236   : > { %7901 = vmatprep.subr.bf16.mxu1 %v12143_v0  ;;  %v12201_v0 = vld [vmem:[%s13648_s26 + $0x12d0] ss:$48 sps:$4 sm:$0xff]  }
 0x238   : > { %7861 = vmatpush2.bf16.msra.mxu0 %v12138_v6  ;;  %v12206_v6 = vld [vmem:[%s13648_s26 + $0xc74] ss:$48 sps:$4 sm:$0xff]  }
 0x239   : > { %7902 = vmatpush2.bf16.msra.mxu1 %v12141_v27  ;;  %7862 = vmatprep.subr.bf16.mxu0 %v12146_v29  ;;  %v12209_v27 = vld [vmem:[%s13648_s26 + $0x1274] ss:$48 sps:$4 sm:$0xff]   ;;  %v12204_v29 = vld [vmem:[%s13648_s26 + $0xc70] ss:$48 sps:$4 sm:$0xff]  }
 0x23a   : > { %7903 = vmatprep.subr.bf16.mxu1 %v12149_v28  ;;  %v12207_v28 = vld [vmem:[%s13648_s26 + $0x1270] ss:$48 sps:$4 sm:$0xff]  }
 0x23c   : > { %7863 = vmatpush2.bf16.msra.mxu0 %v12144_v3  ;;  %v12212_v3 = vld [vmem:[%s13648_s26 + $0xc14] ss:$48 sps:$4 sm:$0xff]  }
 0x23d   : > { %7904 = vmatpush2.bf16.msra.mxu1 %v12147_v4  ;;  %7864 = vmatprep.subr.bf16.mxu0 %v12152_v5  ;;  %v12215_v4 = vld [vmem:[%s13648_s26 + $0x1214] ss:$48 sps:$4 sm:$0xff]   ;;  %v12210_v5 = vld [vmem:[%s13648_s26 + $0xc10] ss:$48 sps:$4 sm:$0xff]  }
 0x23e   : > { %7905 = vmatprep.subr.bf16.mxu1 %v12155_v7  ;;  %v12213_v7 = vld [vmem:[%s13648_s26 + $0x1210] ss:$48 sps:$4 sm:$0xff]  }
 0x240   : > { %7865 = vmatpush2.bf16.msra.mxu0 %v12150_v8  ;;  %v12218_v8 = vld [vmem:[%s13648_s26 + $0x11b4] ss:$48 sps:$4 sm:$0xff]  }
 0x241   : > { %7906 = vmatpush2.bf16.msra.mxu1 %v12153_v11  ;;  %7866 = vmatprep.subr.bf16.mxu0 %v12158_v12  ;;  %v12221_v11 = vld [vmem:[%s13648_s26 + $0x17b4] ss:$48 sps:$4 sm:$0xff]   ;;  %v12216_v12 = vld [vmem:[%s13648_s26 + $0x11b0] ss:$48 sps:$4 sm:$0xff]  }
 0x242   : > { %7907 = vmatprep.subr.bf16.mxu1 %v12161_v31  ;;  %v12219_v31 = vld [vmem:[%s13648_s26 + $0x17b0] ss:$48 sps:$4 sm:$0xff]  }
 0x244   : > { %7867 = vmatpush2.bf16.msra.mxu0 %v12156_v13  ;;  %v12224_v13 = vld [vmem:[%s13648_s26 + $0x1154] ss:$48 sps:$4 sm:$0xff]  }
 0x245   : > { %7908 = vmatpush2.bf16.msra.mxu1 %v12159_v14  ;;  %7868 = vmatprep.subr.bf16.mxu0 %v12164_v15  ;;  %v12227_v14 = vld [vmem:[%s13648_s26 + $0x1754] ss:$48 sps:$4 sm:$0xff]   ;;  %v12222_v15 = vld [vmem:[%s13648_s26 + $0x1150] ss:$48 sps:$4 sm:$0xff]  }
 0x246   : > { %7909 = vmatprep.subr.bf16.mxu1 %v12167_v16  ;;  %v12225_v16 = vld [vmem:[%s13648_s26 + $0x1750] ss:$48 sps:$4 sm:$0xff]  }
 0x248   : > { %7869 = vmatpush2.bf16.msra.mxu0 %v12162_v17  ;;  %v12230_v17 = vld [vmem:[%s13648_s26 + $0x10f4] ss:$48 sps:$4 sm:$0xff]  }
 0x249   : > { %7910 = vmatpush2.bf16.msra.mxu1 %v12165_v18  ;;  %7920 = vmatprep.subr.bf16.mxu0 %v12170_v19  ;;  %v12233_v18 = vld [vmem:[%s13648_s26 + $0x16f4] ss:$48 sps:$4 sm:$0xff]   ;;  %v12228_v19 = vld [vmem:[%s13648_s26 + $0x10f0] ss:$48 sps:$4 sm:$0xff]  }
 0x24a   : > { %7961 = vmatprep.subr.bf16.mxu1 %v12173_v20  ;;  %v12231_v20 = vld [vmem:[%s13648_s26 + $0x16f0] ss:$48 sps:$4 sm:$0xff]  }
 0x24b   : > { %v7626_v34 = vpop.f32.mrf.mxu0  ;;  %7871 = vmatmul.mubr.bf16.vlgmr.msra.gmra.mxu0 %v13747_v9 }
 0x24c   : > { %v7667_v35 = vpop.f32.mrf.mxu1  ;;  %7912 = vmatmul.mubr.bf16.vlgmr.msra.gmra.mxu1 %v13749_v10  ;;  %7921 = vmatpush1.bf16.msra.mxu0 %v12168_v23  ;;  %v12236_v23 = vld [vmem:[%s13648_s26 + $0x1094] ss:$48 sps:$4 sm:$0xff]  }
 0x24d   : > { %v14208_v36 = vadd.f32 %v7667_v35, %v7626_v34  ;;  %7962 = vmatpush1.bf16.msra.mxu1 %v12171_v24  ;;  %v7628_v39 = vpop.f32.mrf.mxu0  ;;  %7922 = vmatprep.subr.bf16.mxu0 %v12176_v25  ;;  %v12239_v24 = vld [vmem:[%s13648_s26 + $0x1694] ss:$48 sps:$4 sm:$0xff]   ;;  %v12234_v25 = vld [vmem:[%s13648_s26 + $0x1090] ss:$48 sps:$4 sm:$0xff]  }
 0x24e   : > { %v7669_v43 = vpop.f32.mrf.mxu1  ;;  %7963 = vmatprep.subr.bf16.mxu1 %v12179_v26  ;;  %7952 = vmatprep.mubr.bf16.mxu0 %v13780_v38  ;;  %v12237_v26 = vld [vmem:[%s13648_s26 + $0x1690] ss:$48 sps:$4 sm:$0xff]   ;;  %v12245_v34 = vld [vmem:[%s13648_s26 + $0x1634] ss:$48 sps:$4 sm:$0xff]  }
 0x24f   : > { %v14213_v46 = vadd.f32 %v7669_v43, %v7628_v39  ;;  %7993 = vmatprep.mubr.bf16.mxu1 %v13784_v41  ;;  %v7630_v49 = vpop.f32.mrf.mxu0  ;;  %v12240_v35 = vld [vmem:[%s13648_s26 + $0x1030] ss:$48 sps:$4 sm:$0xff]   ;;  %v12248_v39 = vld [vmem:[%s13648_s26 + $0xfd4] ss:$48 sps:$4 sm:$0xff]  }
 0x250   : > { %v7671_v51 = vpop.f32.mrf.mxu1  ;;  %7923 = vmatpush1.bf16.msra.mxu0 %v12174_v32  ;;  %v12242_v32 = vld [vmem:[%s13648_s26 + $0x1034] ss:$48 sps:$4 sm:$0xff]   ;;  %v12252_v49 = vld [vmem:[%s13648_s26 + $0xf70] ss:$48 sps:$4 sm:$0xff]  }
 0x251   : > { %7964 = vmatpush1.bf16.msra.mxu1 %v12177_v37  ;;  %v7631_v52 = vpop.f32.mrf.mxu0  ;;  %7924 = vmatprep.subr.bf16.mxu0 %v12182_v44  ;;  %v12243_v37 = vld [vmem:[%s13648_s26 + $0x1630] ss:$48 sps:$4 sm:$0xff]   ;;  %v12251_v43 = vld [vmem:[%s13648_s26 + $0x15d4] ss:$48 sps:$4 sm:$0xff]  }
 0x252   : > { %v7672_v54 = vpop.f32.mrf.mxu1  ;;  %7965 = vmatprep.subr.bf16.mxu1 %v12185_v45  ;;  %v12246_v44 = vld [vmem:[%s13648_s26 + $0xfd0] ss:$48 sps:$4 sm:$0xff]   ;;  %v12260_v52 = vld [vmem:[%s13648_s26 + $0xf14] ss:$48 sps:$4 sm:$0xff]  }
 0x253   : > { %v12249_v45 = vld [vmem:[%s13648_s26 + $0x15d0] ss:$48 sps:$4 sm:$0xff]   ;;  %v12263_v54 = vld [vmem:[%s13648_s26 + $0x1514] ss:$48 sps:$4 sm:$0xff]  }
 0x254   : > { %7925 = vmatpush1.bf16.msra.mxu0 %v12180_v47  ;;  %v12254_v47 = vld [vmem:[%s13648_s26 + $0xf74] ss:$48 sps:$4 sm:$0xff]   ;;  %v12255_v51 = vld [vmem:[%s13648_s26 + $0x1570] ss:$48 sps:$4 sm:$0xff]  }
 0x255   : > { %7966 = vmatpush1.bf16.msra.mxu1 %v12183_v48  ;;  %7926 = vmatprep.subr.bf16.mxu0 %v12188_v55  ;;  %v12257_v48 = vld [vmem:[%s13648_s26 + $0x1574] ss:$48 sps:$4 sm:$0xff]   ;;  %v12258_v55 = vld [vmem:[%s13648_s26 + $0xf10] ss:$48 sps:$4 sm:$0xff]  }
 0x256   : > { %7967 = vmatprep.subr.bf16.mxu1 %v12191_v56  ;;  %v12261_v56 = vld [vmem:[%s13648_s26 + $0x1510] ss:$48 sps:$4 sm:$0xff]  }
 0x258   : > { %7927 = vmatpush1.bf16.msra.mxu0 %v12186_v57  ;;  %v12266_v57 = vld [vmem:[%s13648_s26 + $0x1ab4] ss:$48 sps:$4 sm:$0xff]  }
 0x259   : > { %7968 = vmatpush1.bf16.msra.mxu1 %v12189_v58  ;;  %7928 = vmatprep.subr.bf16.mxu0 %v12194_v59  ;;  %v12269_v58 = vld [vmem:[%s13648_s26 + $0x20b4] ss:$48 sps:$4 sm:$0xff]   ;;  %v12264_v59 = vld [vmem:[%s13648_s26 + $0x1ab0] ss:$48 sps:$4 sm:$0xff]  }
 0x25a   : > { %7969 = vmatprep.subr.bf16.mxu1 %v12197_v60  ;;  %v12267_v60 = vld [vmem:[%s13648_s26 + $0x20b0] ss:$48 sps:$4 sm:$0xff]  }
 0x25c   : > { %7929 = vmatpush1.bf16.msra.mxu0 %v12192_v61  ;;  %v12272_v61 = vld [vmem:[%s13648_s26 + $0x1a54] ss:$48 sps:$4 sm:$0xff]  }
 0x25d   : > { %7970 = vmatpush1.bf16.msra.mxu1 %v12195_v62  ;;  %7930 = vmatprep.subr.bf16.mxu0 %v12200_v63  ;;  %v12275_v62 = vld [vmem:[%s13648_s26 + $0x2054] ss:$48 sps:$4 sm:$0xff]   ;;  %v12270_v63 = vld [vmem:[%s13648_s26 + $0x1a50] ss:$48 sps:$4 sm:$0xff]  }
 0x25e   : > { %7971 = vmatprep.subr.bf16.mxu1 %v12203_v1  ;;  %v12273_v1 = vld [vmem:[%s13648_s26 + $0x2050] ss:$48 sps:$4 sm:$0xff]  }
 0x260   : > { %7931 = vmatpush1.bf16.msra.mxu0 %v12198_v2 }
 0x261   : > { %7972 = vmatpush1.bf16.msra.mxu1 %v12201_v0  ;;  %7932 = vmatprep.subr.bf16.mxu0 %v12206_v6 }
 0x262   : > { %7973 = vmatprep.subr.bf16.mxu1 %v12209_v27 }
 0x264   : > { %7933 = vmatpush1.bf16.msra.mxu0 %v12204_v29  ;;  %v12278_v29 = vld [vmem:[%s13648_s26 + $0x19f4] ss:$48 sps:$4 sm:$0xff]  }
 0x265   : > { %7974 = vmatpush1.bf16.msra.mxu1 %v12207_v28  ;;  %7934 = vmatprep.subr.bf16.mxu0 %v12212_v3  ;;  %v12281_v28 = vld [vmem:[%s13648_s26 + $0x1ff4] ss:$48 sps:$4 sm:$0xff]   ;;  %v12276_v3 = vld [vmem:[%s13648_s26 + $0x19f0] ss:$48 sps:$4 sm:$0xff]  }
 0x266   : > { %7975 = vmatprep.subr.bf16.mxu1 %v12215_v4  ;;  %v12279_v4 = vld [vmem:[%s13648_s26 + $0x1ff0] ss:$48 sps:$4 sm:$0xff]  }
 0x268   : > { %7935 = vmatpush1.bf16.msra.mxu0 %v12210_v5 }
 0x269   : > { %7976 = vmatpush1.bf16.msra.mxu1 %v12213_v7  ;;  %7936 = vmatprep.subr.bf16.mxu0 %v12218_v8 }
 0x26a   : > { %7977 = vmatprep.subr.bf16.mxu1 %v12221_v11 }
 0x26c   : > { %7937 = vmatpush2.bf16.msra.mxu0 %v12216_v12  ;;  %v12284_v12 = vld [vmem:[%s13648_s26 + $0x1994] ss:$48 sps:$4 sm:$0xff]  }
 0x26d   : > { %7978 = vmatpush2.bf16.msra.mxu1 %v12219_v31  ;;  %7938 = vmatprep.subr.bf16.mxu0 %v12224_v13  ;;  %v12287_v31 = vld [vmem:[%s13648_s26 + $0x1f94] ss:$48 sps:$4 sm:$0xff]   ;;  %v12282_v13 = vld [vmem:[%s13648_s26 + $0x1990] ss:$48 sps:$4 sm:$0xff]  }
 0x26e   : > { %7979 = vmatprep.subr.bf16.mxu1 %v12227_v14  ;;  %v12285_v14 = vld [vmem:[%s13648_s26 + $0x1f90] ss:$48 sps:$4 sm:$0xff]  }
 0x270   : > { %7939 = vmatpush2.bf16.msra.mxu0 %v12222_v15  ;;  %v12290_v15 = vld [vmem:[%s13648_s26 + $0x1934] ss:$48 sps:$4 sm:$0xff]  }
 0x271   : > { %7980 = vmatpush2.bf16.msra.mxu1 %v12225_v16  ;;  %7940 = vmatprep.subr.bf16.mxu0 %v12230_v17  ;;  %v12293_v16 = vld [vmem:[%s13648_s26 + $0x1f34] ss:$48 sps:$4 sm:$0xff]   ;;  %v12288_v17 = vld [vmem:[%s13648_s26 + $0x1930] ss:$48 sps:$4 sm:$0xff]  }
 0x272   : > { %7981 = vmatprep.subr.bf16.mxu1 %v12233_v18  ;;  %v12291_v18 = vld [vmem:[%s13648_s26 + $0x1f30] ss:$48 sps:$4 sm:$0xff]  }
 0x274   : > { %7941 = vmatpush2.bf16.msra.mxu0 %v12228_v19  ;;  %v12296_v19 = vld [vmem:[%s13648_s26 + $0x18d4] ss:$48 sps:$4 sm:$0xff]  }
 0x275   : > { %7982 = vmatpush2.bf16.msra.mxu1 %v12231_v20  ;;  %7942 = vmatprep.subr.bf16.mxu0 %v12236_v23  ;;  %v12299_v20 = vld [vmem:[%s13648_s26 + $0x1ed4] ss:$48 sps:$4 sm:$0xff]   ;;  %v12294_v23 = vld [vmem:[%s13648_s26 + $0x18d0] ss:$48 sps:$4 sm:$0xff]  }
 0x276   : > { %7983 = vmatprep.subr.bf16.mxu1 %v12239_v24  ;;  %v12297_v24 = vld [vmem:[%s13648_s26 + $0x1ed0] ss:$48 sps:$4 sm:$0xff]  }
 0x278   : > { %7943 = vmatpush2.bf16.msra.mxu0 %v12234_v25  ;;  %v12302_v25 = vld [vmem:[%s13648_s26 + $0x1874] ss:$48 sps:$4 sm:$0xff]  }
 0x279   : > { %7984 = vmatpush2.bf16.msra.mxu1 %v12237_v26  ;;  %7944 = vmatprep.subr.bf16.mxu0 %v12242_v32  ;;  %v12305_v26 = vld [vmem:[%s13648_s26 + $0x1e74] ss:$48 sps:$4 sm:$0xff]   ;;  %v12300_v32 = vld [vmem:[%s13648_s26 + $0x1870] ss:$48 sps:$4 sm:$0xff]  }
 0x27a   : > { %7985 = vmatprep.subr.bf16.mxu1 %v12245_v34  ;;  %v12303_v34 = vld [vmem:[%s13648_s26 + $0x1e70] ss:$48 sps:$4 sm:$0xff]  }
 0x27c   : > { %7945 = vmatpush2.bf16.msra.mxu0 %v12240_v35  ;;  %v12308_v35 = vld [vmem:[%s13648_s26 + $0x1814] ss:$48 sps:$4 sm:$0xff]  }
 0x27d   : > { %7986 = vmatpush2.bf16.msra.mxu1 %v12243_v37  ;;  %7946 = vmatprep.subr.bf16.mxu0 %v12248_v39  ;;  %v12311_v37 = vld [vmem:[%s13648_s26 + $0x1e14] ss:$48 sps:$4 sm:$0xff]   ;;  %v12306_v39 = vld [vmem:[%s13648_s26 + $0x1810] ss:$48 sps:$4 sm:$0xff]  }
 0x27e   : > { %7987 = vmatprep.subr.bf16.mxu1 %v12251_v43  ;;  %v12309_v43 = vld [vmem:[%s13648_s26 + $0x1e10] ss:$48 sps:$4 sm:$0xff]  }
 0x280   : > { %7947 = vmatpush2.bf16.msra.mxu0 %v12246_v44  ;;  %v12314_v44 = vld [vmem:[%s13648_s26 + $0x1db4] ss:$48 sps:$4 sm:$0xff]  }
 0x281   : > { %7988 = vmatpush2.bf16.msra.mxu1 %v12249_v45  ;;  %7948 = vmatprep.subr.bf16.mxu0 %v12254_v47  ;;  %v12317_v45 = vld [vmem:[%s13648_s26 + $0x23b4] ss:$48 sps:$4 sm:$0xff]   ;;  %v12312_v47 = vld [vmem:[%s13648_s26 + $0x1db0] ss:$48 sps:$4 sm:$0xff]  }
 0x282   : > { %7989 = vmatprep.subr.bf16.mxu1 %v12257_v48  ;;  %v12315_v48 = vld [vmem:[%s13648_s26 + $0x23b0] ss:$48 sps:$4 sm:$0xff]  }
 0x284   : > { %7949 = vmatpush2.bf16.msra.mxu0 %v12252_v49  ;;  %v12320_v49 = vld [vmem:[%s13648_s26 + $0x1d54] ss:$48 sps:$4 sm:$0xff]  }
 0x285   : > { %7990 = vmatpush2.bf16.msra.mxu1 %v12255_v51  ;;  %7950 = vmatprep.subr.bf16.mxu0 %v12260_v52  ;;  %v12323_v51 = vld [vmem:[%s13648_s26 + $0x2354] ss:$48 sps:$4 sm:$0xff]   ;;  %v12318_v52 = vld [vmem:[%s13648_s26 + $0x1d50] ss:$48 sps:$4 sm:$0xff]  }
 0x286   : > { %7991 = vmatprep.subr.bf16.mxu1 %v12263_v54  ;;  %v12321_v54 = vld [vmem:[%s13648_s26 + $0x2350] ss:$48 sps:$4 sm:$0xff]  }
 0x288   : > { %7951 = vmatpush2.bf16.msra.mxu0 %v12258_v55  ;;  %v12326_v55 = vld [vmem:[%s13648_s26 + $0x1cf4] ss:$48 sps:$4 sm:$0xff]  }
 0x289   : > { %7992 = vmatpush2.bf16.msra.mxu1 %v12261_v56  ;;  %8002 = vmatprep.subr.bf16.mxu0 %v12266_v57  ;;  %v12329_v56 = vld [vmem:[%s13648_s26 + $0x22f4] ss:$48 sps:$4 sm:$0xff]   ;;  %v12324_v57 = vld [vmem:[%s13648_s26 + $0x1cf0] ss:$48 sps:$4 sm:$0xff]  }
 0x28a   : > { %8043 = vmatprep.subr.bf16.mxu1 %v12269_v58  ;;  %v12327_v58 = vld [vmem:[%s13648_s26 + $0x22f0] ss:$48 sps:$4 sm:$0xff]  }
 0x28b   : > { %v14279_v2 = vpop.f32.mrf.mxu0  ;;  %7953 = vmatmul.mubr.bf16.vlgmr.msra.gmra.mxu0 %v13827_v21 }
 0x28c   : > { %v14281_v0 = vpop.f32.mrf.mxu1  ;;  %7994 = vmatmul.mubr.bf16.vlgmr.msra.gmra.mxu1 %v13829_v22  ;;  %8003 = vmatpush1.bf16.msra.mxu0 %v12264_v59  ;;  %v12332_v59 = vld [vmem:[%s13648_s26 + $0x1c94] ss:$48 sps:$4 sm:$0xff]  }
 0x28d   : > { %8044 = vmatpush1.bf16.msra.mxu1 %v12267_v60  ;;  %v14285_v6 = vpop.f32.mrf.mxu0  ;;  %8004 = vmatprep.subr.bf16.mxu0 %v12272_v61  ;;  %v12335_v60 = vld [vmem:[%s13648_s26 + $0x2294] ss:$48 sps:$4 sm:$0xff]   ;;  %v12330_v61 = vld [vmem:[%s13648_s26 + $0x1c90] ss:$48 sps:$4 sm:$0xff]  }
 0x28e   : > { %v14287_v27 = vpop.f32.mrf.mxu1  ;;  %8045 = vmatprep.subr.bf16.mxu1 %v12275_v62  ;;  %8034 = vmatprep.mubr.bf16.mxu0 %v13840_v30  ;;  %v12333_v62 = vld [vmem:[%s13648_s26 + $0x2290] ss:$48 sps:$4 sm:$0xff]  }
 0x28f   : > { %8075 = vmatprep.mubr.bf16.mxu1 %v13844_v33  ;;  %v7712_v5 = vpop.f32.mrf.mxu0 }
 0x290   : > { %v7753_v7 = vpop.f32.mrf.mxu1  ;;  %8005 = vmatpush1.bf16.msra.mxu0 %v12270_v63  ;;  %v12338_v63 = vld [vmem:[%s13648_s26 + $0x1c34] ss:$48 sps:$4 sm:$0xff]   ;;  %v12342_v5 = vld [vmem:[%s13648_s26 + $0x1bd0] ss:$48 sps:$4 sm:$0xff]  }
 0x291   : > { %8046 = vmatpush1.bf16.msra.mxu1 %v12273_v1  ;;  %v7713_v8 = vpop.f32.mrf.mxu0  ;;  %8006 = vmatprep.subr.bf16.mxu0 %v12278_v29  ;;  %v12341_v1 = vld [vmem:[%s13648_s26 + $0x2234] ss:$48 sps:$4 sm:$0xff]   ;;  %v12336_v29 = vld [vmem:[%s13648_s26 + $0x1c30] ss:$48 sps:$4 sm:$0xff]  }
 0x292   : > { %v7754_v11 = vpop.f32.mrf.mxu1  ;;  %8047 = vmatprep.subr.bf16.mxu1 %v12281_v28  ;;  %v12339_v28 = vld [vmem:[%s13648_s26 + $0x2230] ss:$48 sps:$4 sm:$0xff]   ;;  %v12350_v8 = vld [vmem:[%s13648_s26 + $0x1b74] ss:$48 sps:$4 sm:$0xff]  }
 0x293   : > { %v12345_v7 = vld [vmem:[%s13648_s26 + $0x21d0] ss:$48 sps:$4 sm:$0xff]   ;;  %v12353_v11 = vld [vmem:[%s13648_s26 + $0x2174] ss:$48 sps:$4 sm:$0xff]  }
 0x294   : > { %8007 = vmatpush1.bf16.msra.mxu0 %v12276_v3  ;;  %v12344_v3 = vld [vmem:[%s13648_s26 + $0x1bd4] ss:$48 sps:$4 sm:$0xff]  }
 0x295   : > { %8048 = vmatpush1.bf16.msra.mxu1 %v12279_v4  ;;  %8008 = vmatprep.subr.bf16.mxu0 %v12284_v12  ;;  %v12347_v4 = vld [vmem:[%s13648_s26 + $0x21d4] ss:$48 sps:$4 sm:$0xff]   ;;  %v12348_v12 = vld [vmem:[%s13648_s26 + $0x1b70] ss:$48 sps:$4 sm:$0xff]  }
 0x296   : > { %8049 = vmatprep.subr.bf16.mxu1 %v12287_v31  ;;  %v12351_v31 = vld [vmem:[%s13648_s26 + $0x2170] ss:$48 sps:$4 sm:$0xff]  }
 0x298   : > { %8009 = vmatpush1.bf16.msra.mxu0 %v12282_v13  ;;  %v12356_v13 = vld [vmem:[%s13648_s26 + $0x1b14] ss:$48 sps:$4 sm:$0xff]  }
 0x299   : > { %8050 = vmatpush1.bf16.msra.mxu1 %v12285_v14  ;;  %8010 = vmatprep.subr.bf16.mxu0 %v12290_v15  ;;  %v12359_v14 = vld [vmem:[%s13648_s26 + $0x2114] ss:$48 sps:$4 sm:$0xff]   ;;  %v12354_v15 = vld [vmem:[%s13648_s26 + $0x1b10] ss:$48 sps:$4 sm:$0xff]  }
 0x29a   : > { %8051 = vmatprep.subr.bf16.mxu1 %v12293_v16  ;;  %v12357_v16 = vld [vmem:[%s13648_s26 + $0x2110] ss:$48 sps:$4 sm:$0xff]  }
 0x29c   : > { %8011 = vmatpush1.bf16.msra.mxu0 %v12288_v17  ;;  %v12362_v17 = vld [vmem:[%s13648_s26 + $0x2bc] ss:$48 sps:$4 sm:$0xff]  }
 0x29d   : > { %8052 = vmatpush1.bf16.msra.mxu1 %v12291_v18  ;;  %8012 = vmatprep.subr.bf16.mxu0 %v12296_v19  ;;  %v12365_v18 = vld [vmem:[%s13648_s26 + $0x8bc] ss:$48 sps:$4 sm:$0xff]   ;;  %v7709_v19 = vadd.f32 %v14279_v2, %v14208_v36 }
 0x29e   : > { %8053 = vmatprep.subr.bf16.mxu1 %v12299_v20  ;;  %v12360_v20 = vld [vmem:[%s13648_s26 + $0x2b8] ss:$48 sps:$4 sm:$0xff]  }
 0x2a0   : > { %8013 = vmatpush1.bf16.msra.mxu0 %v12294_v23  ;;  %v12363_v23 = vld [vmem:[%s13648_s26 + $0x8b8] ss:$48 sps:$4 sm:$0xff]  }
 0x2a1   : > { %8054 = vmatpush1.bf16.msra.mxu1 %v12297_v24  ;;  %8014 = vmatprep.subr.bf16.mxu0 %v12302_v25  ;;  %v7711_v24 = vadd.f32 %v14285_v6, %v14213_v46  ;;  %v12368_v25 = vld [vmem:[%s13648_s26 + $0x25c] ss:$48 sps:$4 sm:$0xff]  }
 0x2a2   : > { %8055 = vmatprep.subr.bf16.mxu1 %v12305_v26  ;;  %v12371_v26 = vld [vmem:[%s13648_s26 + $0x85c] ss:$48 sps:$4 sm:$0xff]  }
 0x2a3   : > { %v7752_v46 = vadd.f32 %v14287_v27, %v7711_v24  ;;  %v12419_v24 = vld [vmem:[%s13648_s26 + $0xb5c] ss:$48 sps:$4 sm:$0xff]  }
 0x2a4   : > { %8015 = vmatpush1.bf16.msra.mxu0 %v12300_v32  ;;  %v7750_v32 = vadd.f32 %v14281_v0, %v7709_v19  ;;  %v425_v0 = vld [vmem:[#allocation2 + $0x18] sm:$0xff] }
 0x2a5   : > { %8056 = vmatpush1.bf16.msra.mxu1 %v12303_v34  ;;  %8016 = vmatprep.subr.bf16.mxu0 %v12308_v35  ;;  %v12366_v34 = vld [vmem:[%s13648_s26 + $0x258] ss:$48 sps:$4 sm:$0xff]  }
 0x2a6   : > { %8057 = vmatprep.subr.bf16.mxu1 %v12311_v37  ;;  %v12369_v35 = vld [vmem:[%s13648_s26 + $0x858] ss:$48 sps:$4 sm:$0xff]  }
 0x2a7   : > { %v12408_v19 = vld [vmem:[%s13648_s26 + $0x5b8] ss:$48 sps:$4 sm:$0xff]  }
 0x2a8   : > { %8017 = vmatpush1.bf16.msra.mxu0 %v12306_v39  ;;  %v424_v39 = vld [vmem:[#allocation2 + $0x58] sm:$0xff] }
 0x2a9   : > { %8058 = vmatpush1.bf16.msra.mxu1 %v12309_v43  ;;  %8018 = vmatprep.subr.bf16.mxu0 %v12314_v44  ;;  %v12374_v44 = vld [vmem:[%s13648_s26 + $0x1fc] ss:$48 sps:$4 sm:$0xff]  }
 0x2aa   : > { %8059 = vmatprep.subr.bf16.mxu1 %v12317_v45  ;;  %v12377_v45 = vld [vmem:[%s13648_s26 + $0x7fc] ss:$48 sps:$4 sm:$0xff]  }
 0x2ac   : > { %8019 = vmatpush2.bf16.msra.mxu0 %v12312_v47 }
 0x2ad   : > { %8060 = vmatpush2.bf16.msra.mxu1 %v12315_v48  ;;  %8020 = vmatprep.subr.bf16.mxu0 %v12320_v49  ;;  %v12372_v49 = vld [vmem:[%s13648_s26 + $0x1f8] ss:$48 sps:$4 sm:$0xff]  }
 0x2ae   : > { %8061 = vmatprep.subr.bf16.mxu1 %v12323_v51  ;;  %v12375_v51 = vld [vmem:[%s13648_s26 + $0x7f8] ss:$48 sps:$4 sm:$0xff]  }
 0x2b0   : > { %8021 = vmatpush2.bf16.msra.mxu0 %v12318_v52 }
 0x2b1   : > { %8062 = vmatpush2.bf16.msra.mxu1 %v12321_v54  ;;  %8022 = vmatprep.subr.bf16.mxu0 %v12326_v55 }
 0x2b2   : > { %8063 = vmatprep.subr.bf16.mxu1 %v12329_v56 }
 0x2b4   : > { %8023 = vmatpush2.bf16.msra.mxu0 %v12324_v57 }
 0x2b5   : > { %8064 = vmatpush2.bf16.msra.mxu1 %v12327_v58  ;;  %8024 = vmatprep.subr.bf16.mxu0 %v12332_v59  ;;  %v12380_v58 = vld [vmem:[%s13648_s26 + $0x19c] ss:$48 sps:$4 sm:$0xff]  }
 0x2b6   : > { %8065 = vmatprep.subr.bf16.mxu1 %v12335_v60  ;;  %v12383_v59 = vld [vmem:[%s13648_s26 + $0x79c] ss:$48 sps:$4 sm:$0xff]  }
 0x2b8   : > { %8025 = vmatpush2.bf16.msra.mxu0 %v12330_v61  ;;  %v12378_v61 = vld [vmem:[%s13648_s26 + $0x198] ss:$48 sps:$4 sm:$0xff]  }
 0x2b9   : > { %8066 = vmatpush2.bf16.msra.mxu1 %v12333_v62  ;;  %8026 = vmatprep.subr.bf16.mxu0 %v12338_v63  ;;  %v12381_v62 = vld [vmem:[%s13648_s26 + $0x798] ss:$48 sps:$4 sm:$0xff]   ;;  %v12386_v63 = vld [vmem:[%s13648_s26 + $0x13c] ss:$48 sps:$4 sm:$0xff]  }
 0x2ba   : > { %8067 = vmatprep.subr.bf16.mxu1 %v12341_v1  ;;  %v12389_v1 = vld [vmem:[%s13648_s26 + $0x73c] ss:$48 sps:$4 sm:$0xff]  }
 0x2bc   : > { %8027 = vmatpush2.bf16.msra.mxu0 %v12336_v29  ;;  %v12384_v29 = vld [vmem:[%s13648_s26 + $0x138] ss:$48 sps:$4 sm:$0xff]  }
 0x2bd   : > { %8068 = vmatpush2.bf16.msra.mxu1 %v12339_v28  ;;  %8028 = vmatprep.subr.bf16.mxu0 %v12344_v3  ;;  %v12387_v28 = vld [vmem:[%s13648_s26 + $0x738] ss:$48 sps:$4 sm:$0xff]   ;;  %v12392_v3 = vld [vmem:[%s13648_s26 + $0xdc] ss:$48 sps:$4 sm:$0xff]  }
 0x2be   : > { %8069 = vmatprep.subr.bf16.mxu1 %v12347_v4  ;;  %v12395_v4 = vld [vmem:[%s13648_s26 + $0x6dc] ss:$48 sps:$4 sm:$0xff]  }
 0x2c0   : > { %8029 = vmatpush2.bf16.msra.mxu0 %v12342_v5  ;;  %v12390_v5 = vld [vmem:[%s13648_s26 + $0xd8] ss:$48 sps:$4 sm:$0xff]  }
 0x2c1   : > { %8070 = vmatpush2.bf16.msra.mxu1 %v12345_v7  ;;  %8030 = vmatprep.subr.bf16.mxu0 %v12350_v8  ;;  %v12393_v7 = vld [vmem:[%s13648_s26 + $0x6d8] ss:$48 sps:$4 sm:$0xff]   ;;  %v12398_v8 = vld [vmem:[%s13648_s26 + $0x7c] ss:$48 sps:$4 sm:$0xff]  }
 0x2c2   : > { %8071 = vmatprep.subr.bf16.mxu1 %v12353_v11  ;;  %v12401_v11 = vld [vmem:[%s13648_s26 + $0x67c] ss:$48 sps:$4 sm:$0xff]  }
 0x2c4   : > { %8031 = vmatpush2.bf16.msra.mxu0 %v12348_v12  ;;  %v12396_v12 = vld [vmem:[%s13648_s26 + $0x78] ss:$48 sps:$4 sm:$0xff]  }
 0x2c5   : > { %8072 = vmatpush2.bf16.msra.mxu1 %v12351_v31  ;;  %8032 = vmatprep.subr.bf16.mxu0 %v12356_v13  ;;  %v12399_v31 = vld [vmem:[%s13648_s26 + $0x678] ss:$48 sps:$4 sm:$0xff]   ;;  %v12404_v13 = vld [vmem:[%s13648_s26 + $0x1c] ss:$48 sps:$4 sm:$0xff]  }
 0x2c6   : > { %8073 = vmatprep.subr.bf16.mxu1 %v12359_v14  ;;  %v12407_v14 = vld [vmem:[%s13648_s26 + $0x61c] ss:$48 sps:$4 sm:$0xff]  }
 0x2c8   : > { %8033 = vmatpush2.bf16.msra.mxu0 %v12354_v15  ;;  %v12402_v15 = vld [vmem:[%s13648_s26 + $0x18] ss:$48 sps:$4 sm:$0xff]  }
 0x2c9   : > { %8074 = vmatpush2.bf16.msra.mxu1 %v12357_v16  ;;  %8084 = vmatprep.subr.bf16.mxu0 %v12362_v17  ;;  %v12405_v16 = vld [vmem:[%s13648_s26 + $0x618] ss:$48 sps:$4 sm:$0xff]   ;;  %v12410_v17 = vld [vmem:[%s13648_s26 + $0x5bc] ss:$48 sps:$4 sm:$0xff]  }
 0x2ca   : > { %8125 = vmatprep.subr.bf16.mxu1 %v12365_v18  ;;  %v12413_v18 = vld [vmem:[%s13648_s26 + $0xbbc] ss:$48 sps:$4 sm:$0xff]  }
 0x2cb   : > { %v7790_v37 = vpop.f32.mrf.mxu0  ;;  %8035 = vmatmul.mubr.bf16.vlgmr.msra.gmra.mxu0 %v13907_v40 }
 0x2cc   : > { %v7831_v36 = vpop.f32.mrf.mxu1  ;;  %8076 = vmatmul.mubr.bf16.vlgmr.msra.gmra.mxu1 %v13909_v42  ;;  %v7791_v2 = vadd.f32 %v7790_v37, %v7750_v32  ;;  %8085 = vmatpush1.bf16.msra.mxu0 %v12360_v20  ;;  %v12411_v20 = vld [vmem:[%s13648_s26 + $0xbb8] ss:$48 sps:$4 sm:$0xff]   ;;  %v12422_v32 = vld [vmem:[%s13648_s26 + $0x4fc] ss:$48 sps:$4 sm:$0xff]  }
 0x2cd   : > { %8126 = vmatpush1.bf16.msra.mxu1 %v12363_v23  ;;  %v7792_v6 = vpop.f32.mrf.mxu0  ;;  %8086 = vmatprep.subr.bf16.mxu0 %v12368_v25  ;;  %v12416_v23 = vld [vmem:[%s13648_s26 + $0x55c] ss:$48 sps:$4 sm:$0xff]   ;;  %v12414_v25 = vld [vmem:[%s13648_s26 + $0x558] ss:$48 sps:$4 sm:$0xff]  }
 0x2ce   : > { %v7833_v43 = vpop.f32.mrf.mxu1  ;;  %8127 = vmatprep.subr.bf16.mxu1 %v12371_v26  ;;  %v7832_v47 = vadd.f32 %v7831_v36, %v7791_v2  ;;  %v7793_v48 = vadd.f32 %v7792_v6, %v7752_v46  ;;  %8116 = vmatprep.mubr.bf16.mxu0 %v13720_v50  ;;  %v12417_v26 = vld [vmem:[%s13648_s26 + $0xb58] ss:$48 sps:$4 sm:$0xff]   ;;  %v12431_v36 = vld [vmem:[%s13648_s26 + $0xa9c] ss:$48 sps:$4 sm:$0xff]  }
 0x2cf   : > { %8157 = vmatprep.mubr.bf16.mxu1 %v13724_v53  ;;  %v7794_v27 = vpop.f32.mrf.mxu0  ;;  %v12423_v37 = vld [vmem:[%s13648_s26 + $0xaf8] ss:$48 sps:$4 sm:$0xff]   ;;  %v12434_v6 = vld [vmem:[%s13648_s26 + $0x43c] ss:$48 sps:$4 sm:$0xff]  }
 0x2d0   : > { %v7835_v52 = vpop.f32.mrf.mxu1  ;;  %v8824_v54 = vadd.f32 %v7832_v47, %v424_v39  ;;  %v7834_v55 = vadd.f32 %v7833_v43, %v7793_v48  ;;  %8087 = vmatpush1.bf16.msra.mxu0 %v12366_v34  ;;  %v12425_v34 = vld [vmem:[%s13648_s26 + $0xafc] ss:$48 sps:$4 sm:$0xff]   ;;  %v12426_v46 = vld [vmem:[%s13648_s26 + $0x498] ss:$48 sps:$4 sm:$0xff]  }
 0x2d1   : > { %8128 = vmatpush1.bf16.msra.mxu1 %v12369_v35  ;;  %v7795_v56 = vpop.f32.mrf.mxu0  ;;  %8088 = vmatprep.subr.bf16.mxu0 %v12374_v44  ;;  %v12420_v35 = vld [vmem:[%s13648_s26 + $0x4f8] ss:$48 sps:$4 sm:$0xff]   ;;  %v12428_v39 = vld [vmem:[%s13648_s26 + $0x49c] ss:$48 sps:$4 sm:$0xff]  }
 0x2d2   : > { %v7836_v57 = vpop.f32.mrf.mxu1  ;;  %8129 = vmatprep.subr.bf16.mxu1 %v12377_v45  ;;  %8836 = vst [vmem:[#allocation2 + $0x58] sm:$0xff] %v8824_v54  ;;  %v8825_v60 = vadd.f32 %v7834_v55, %v425_v0  ;;  %v12429_v2 = vld [vmem:[%s13648_s26 + $0xa98] ss:$48 sps:$4 sm:$0xff]   ;;  %v12437_v0 = vld [vmem:[%s13648_s26 + $0xa3c] ss:$48 sps:$4 sm:$0xff]  }
 0x2d3   : > { %v12432_v43 = vld [vmem:[%s13648_s26 + $0x438] ss:$48 sps:$4 sm:$0xff]   ;;  %v12440_v45 = vld [vmem:[%s13648_s26 + $0x3dc] ss:$48 sps:$4 sm:$0xff]  }
 0x2d4   : > { %8837 = vst [vmem:[#allocation2 + $0x18] sm:$0xff] %v8825_v60  ;;  %8089 = vmatpush1.bf16.msra.mxu0 %v12372_v49  ;;  %v12435_v44 = vld [vmem:[%s13648_s26 + $0xa38] ss:$48 sps:$4 sm:$0xff]   ;;  %v12443_v47 = vld [vmem:[%s13648_s26 + $0x9dc] ss:$48 sps:$4 sm:$0xff]  }
 0x2d5   : > { %8130 = vmatpush1.bf16.msra.mxu1 %v12375_v51  ;;  %8090 = vmatprep.subr.bf16.mxu0 %v12380_v58  ;;  %v12438_v48 = vld [vmem:[%s13648_s26 + $0x3d8] ss:$48 sps:$4 sm:$0xff]   ;;  %v12446_v51 = vld [vmem:[%s13648_s26 + $0x37c] ss:$48 sps:$4 sm:$0xff]  }
 0x2d6   : > { %8131 = vmatprep.subr.bf16.mxu1 %v12383_v59  ;;  %v12441_v49 = vld [vmem:[%s13648_s26 + $0x9d8] ss:$48 sps:$4 sm:$0xff]   ;;  %v12449_v27 = vld [vmem:[%s13648_s26 + $0x97c] ss:$48 sps:$4 sm:$0xff]  }
 0x2d7   : > { %v12444_v52 = vld [vmem:[%s13648_s26 + $0x378] ss:$48 sps:$4 sm:$0xff]   ;;  %v12452_v55 = vld [vmem:[%s13648_s26 + $0x31c] ss:$48 sps:$4 sm:$0xff]  }
 0x2d8   : > { %8091 = vmatpush1.bf16.msra.mxu0 %v12378_v61  ;;  %v12447_v54 = vld [vmem:[%s13648_s26 + $0x978] ss:$48 sps:$4 sm:$0xff]   ;;  %v12455_v56 = vld [vmem:[%s13648_s26 + $0x91c] ss:$48 sps:$4 sm:$0xff]  }
 0x2d9   : > { %8132 = vmatpush1.bf16.msra.mxu1 %v12381_v62  ;;  %8092 = vmatprep.subr.bf16.mxu0 %v12386_v63  ;;  %v12450_v57 = vld [vmem:[%s13648_s26 + $0x318] ss:$48 sps:$4 sm:$0xff]   ;;  %v12458_v59 = vld [vmem:[%s13648_s26 + $0xebc] ss:$48 sps:$4 sm:$0xff]  }
 0x2da   : > { %8133 = vmatprep.subr.bf16.mxu1 %v12389_v1  ;;  %v12453_v58 = vld [vmem:[%s13648_s26 + $0x918] ss:$48 sps:$4 sm:$0xff]   ;;  %v12461_v60 = vld [vmem:[%s13648_s26 + $0x14bc] ss:$48 sps:$4 sm:$0xff]  }
 0x2db   : > { %v12456_v61 = vld [vmem:[%s13648_s26 + $0xeb8] ss:$48 sps:$4 sm:$0xff]   ;;  %v12464_v63 = vld [vmem:[%s13648_s26 + $0xe5c] ss:$48 sps:$4 sm:$0xff]  }
 0x2dc   : > { %8093 = vmatpush1.bf16.msra.mxu0 %v12384_v29  ;;  %v12459_v62 = vld [vmem:[%s13648_s26 + $0x14b8] ss:$48 sps:$4 sm:$0xff]   ;;  %v12467_v1 = vld [vmem:[%s13648_s26 + $0x145c] ss:$48 sps:$4 sm:$0xff]  }
 0x2dd   : > { %8134 = vmatpush1.bf16.msra.mxu1 %v12387_v28  ;;  %8094 = vmatprep.subr.bf16.mxu0 %v12392_v3  ;;  %v12462_v29 = vld [vmem:[%s13648_s26 + $0xe58] ss:$48 sps:$4 sm:$0xff]  }
 0x2de   : > { %8135 = vmatprep.subr.bf16.mxu1 %v12395_v4 }
 0x2e0   : > { %8095 = vmatpush1.bf16.msra.mxu0 %v12390_v5  ;;  %v12465_v5 = vld [vmem:[%s13648_s26 + $0x1458] ss:$48 sps:$4 sm:$0xff]  }
 0x2e1   : > { %8136 = vmatpush1.bf16.msra.mxu1 %v12393_v7  ;;  %8096 = vmatprep.subr.bf16.mxu0 %v12398_v8 }
 0x2e2   : > { %8137 = vmatprep.subr.bf16.mxu1 %v12401_v11  ;;  %v12470_v11 = vld [vmem:[%s13648_s26 + $0xdfc] ss:$48 sps:$4 sm:$0xff]  }
 0x2e4   : > { %8097 = vmatpush1.bf16.msra.mxu0 %v12396_v12  ;;  %v12473_v12 = vld [vmem:[%s13648_s26 + $0x13fc] ss:$48 sps:$4 sm:$0xff]  }
 0x2e5   : > { %8138 = vmatpush1.bf16.msra.mxu1 %v12399_v31  ;;  %8098 = vmatprep.subr.bf16.mxu0 %v12404_v13 }
 0x2e6   : > { %8139 = vmatprep.subr.bf16.mxu1 %v12407_v14 }
 0x2e8   : > { %8099 = vmatpush1.bf16.msra.mxu0 %v12402_v15  ;;  %v12468_v15 = vld [vmem:[%s13648_s26 + $0xdf8] ss:$48 sps:$4 sm:$0xff]  }
 0x2e9   : > { %8140 = vmatpush1.bf16.msra.mxu1 %v12405_v16  ;;  %8100 = vmatprep.subr.bf16.mxu0 %v12410_v17  ;;  %v12471_v16 = vld [vmem:[%s13648_s26 + $0x13f8] ss:$48 sps:$4 sm:$0xff]  }
 0x2ea   : > { %8141 = vmatprep.subr.bf16.mxu1 %v12413_v18 }
 0x2ec   : > { %8101 = vmatpush2.bf16.msra.mxu0 %v12408_v19  ;;  %v12476_v19 = vld [vmem:[%s13648_s26 + $0xd9c] ss:$48 sps:$4 sm:$0xff]  }
 0x2ed   : > { %8142 = vmatpush2.bf16.msra.mxu1 %v12411_v20  ;;  %8102 = vmatprep.subr.bf16.mxu0 %v12416_v23  ;;  %v12479_v20 = vld [vmem:[%s13648_s26 + $0x139c] ss:$48 sps:$4 sm:$0xff]   ;;  %v12474_v23 = vld [vmem:[%s13648_s26 + $0xd98] ss:$48 sps:$4 sm:$0xff]  }
 0x2ee   : > { %8143 = vmatprep.subr.bf16.mxu1 %v12419_v24  ;;  %v12477_v24 = vld [vmem:[%s13648_s26 + $0x1398] ss:$48 sps:$4 sm:$0xff]  }
 0x2f0   : > { %8103 = vmatpush2.bf16.msra.mxu0 %v12414_v25  ;;  %v12482_v25 = vld [vmem:[%s13648_s26 + $0xd3c] ss:$48 sps:$4 sm:$0xff]  }
 0x2f1   : > { %8144 = vmatpush2.bf16.msra.mxu1 %v12417_v26  ;;  %8104 = vmatprep.subr.bf16.mxu0 %v12422_v32  ;;  %v12485_v26 = vld [vmem:[%s13648_s26 + $0x133c] ss:$48 sps:$4 sm:$0xff]   ;;  %v12480_v32 = vld [vmem:[%s13648_s26 + $0xd38] ss:$48 sps:$4 sm:$0xff]  }
 0x2f2   : > { %8145 = vmatprep.subr.bf16.mxu1 %v12425_v34  ;;  %v12483_v34 = vld [vmem:[%s13648_s26 + $0x1338] ss:$48 sps:$4 sm:$0xff]  }
 0x2f4   : > { %8105 = vmatpush2.bf16.msra.mxu0 %v12420_v35  ;;  %v12488_v35 = vld [vmem:[%s13648_s26 + $0xcdc] ss:$48 sps:$4 sm:$0xff]  }
 0x2f5   : > { %8146 = vmatpush2.bf16.msra.mxu1 %v12423_v37  ;;  %8106 = vmatprep.subr.bf16.mxu0 %v12428_v39  ;;  %v12491_v37 = vld [vmem:[%s13648_s26 + $0x12dc] ss:$48 sps:$4 sm:$0xff]   ;;  %v12486_v39 = vld [vmem:[%s13648_s26 + $0xcd8] ss:$48 sps:$4 sm:$0xff]  }
 0x2f6   : > { %8147 = vmatprep.subr.bf16.mxu1 %v12431_v36  ;;  %v12489_v36 = vld [vmem:[%s13648_s26 + $0x12d8] ss:$48 sps:$4 sm:$0xff]  }
 0x2f8   : > { %8107 = vmatpush2.bf16.msra.mxu0 %v12426_v46  ;;  %v12494_v46 = vld [vmem:[%s13648_s26 + $0xc7c] ss:$48 sps:$4 sm:$0xff]  }
 0x2f9   : > { %8148 = vmatpush2.bf16.msra.mxu1 %v12429_v2  ;;  %8108 = vmatprep.subr.bf16.mxu0 %v12434_v6  ;;  %v12497_v2 = vld [vmem:[%s13648_s26 + $0x127c] ss:$48 sps:$4 sm:$0xff]   ;;  %v12492_v6 = vld [vmem:[%s13648_s26 + $0xc78] ss:$48 sps:$4 sm:$0xff]  }
 0x2fa   : > { %8149 = vmatprep.subr.bf16.mxu1 %v12437_v0  ;;  %v12495_v0 = vld [vmem:[%s13648_s26 + $0x1278] ss:$48 sps:$4 sm:$0xff]  }
 0x2fc   : > { %8109 = vmatpush2.bf16.msra.mxu0 %v12432_v43  ;;  %v12500_v43 = vld [vmem:[%s13648_s26 + $0xc1c] ss:$48 sps:$4 sm:$0xff]  }
 0x2fd   : > { %8150 = vmatpush2.bf16.msra.mxu1 %v12435_v44  ;;  %8110 = vmatprep.subr.bf16.mxu0 %v12440_v45  ;;  %v12503_v44 = vld [vmem:[%s13648_s26 + $0x121c] ss:$48 sps:$4 sm:$0xff]   ;;  %v12498_v45 = vld [vmem:[%s13648_s26 + $0xc18] ss:$48 sps:$4 sm:$0xff]  }
 0x2fe   : > { %8151 = vmatprep.subr.bf16.mxu1 %v12443_v47  ;;  %v12501_v47 = vld [vmem:[%s13648_s26 + $0x1218] ss:$48 sps:$4 sm:$0xff]  }
 0x300   : > { %8111 = vmatpush2.bf16.msra.mxu0 %v12438_v48  ;;  %v12506_v48 = vld [vmem:[%s13648_s26 + $0x11bc] ss:$48 sps:$4 sm:$0xff]  }
 0x301   : > { %8152 = vmatpush2.bf16.msra.mxu1 %v12441_v49  ;;  %8112 = vmatprep.subr.bf16.mxu0 %v12446_v51  ;;  %v12509_v49 = vld [vmem:[%s13648_s26 + $0x17bc] ss:$48 sps:$4 sm:$0xff]   ;;  %v12504_v51 = vld [vmem:[%s13648_s26 + $0x11b8] ss:$48 sps:$4 sm:$0xff]  }
 0x302   : > { %8153 = vmatprep.subr.bf16.mxu1 %v12449_v27  ;;  %v12507_v27 = vld [vmem:[%s13648_s26 + $0x17b8] ss:$48 sps:$4 sm:$0xff]  }
 0x304   : > { %8113 = vmatpush2.bf16.msra.mxu0 %v12444_v52  ;;  %v12512_v52 = vld [vmem:[%s13648_s26 + $0x115c] ss:$48 sps:$4 sm:$0xff]  }
 0x305   : > { %8154 = vmatpush2.bf16.msra.mxu1 %v12447_v54  ;;  %8114 = vmatprep.subr.bf16.mxu0 %v12452_v55  ;;  %v12515_v54 = vld [vmem:[%s13648_s26 + $0x175c] ss:$48 sps:$4 sm:$0xff]   ;;  %v12510_v55 = vld [vmem:[%s13648_s26 + $0x1158] ss:$48 sps:$4 sm:$0xff]  }
 0x306   : > { %8155 = vmatprep.subr.bf16.mxu1 %v12455_v56  ;;  %v12513_v56 = vld [vmem:[%s13648_s26 + $0x1758] ss:$48 sps:$4 sm:$0xff]  }
 0x308   : > { %8115 = vmatpush2.bf16.msra.mxu0 %v12450_v57  ;;  %v12518_v57 = vld [vmem:[%s13648_s26 + $0x10fc] ss:$48 sps:$4 sm:$0xff]  }
 0x309   : > { %8156 = vmatpush2.bf16.msra.mxu1 %v12453_v58  ;;  %8166 = vmatprep.subr.bf16.mxu0 %v12458_v59  ;;  %v12521_v58 = vld [vmem:[%s13648_s26 + $0x16fc] ss:$48 sps:$4 sm:$0xff]   ;;  %v12516_v59 = vld [vmem:[%s13648_s26 + $0x10f8] ss:$48 sps:$4 sm:$0xff]  }
 0x30a   : > { %8207 = vmatprep.subr.bf16.mxu1 %v12461_v60  ;;  %v12519_v60 = vld [vmem:[%s13648_s26 + $0x16f8] ss:$48 sps:$4 sm:$0xff]  }
 0x30b   : > { %v7872_v28 = vpop.f32.mrf.mxu0  ;;  %8117 = vmatmul.mubr.bf16.vlgmr.msra.gmra.mxu0 %v13747_v9 }
 0x30c   : > { %v7913_v3 = vpop.f32.mrf.mxu1  ;;  %8158 = vmatmul.mubr.bf16.vlgmr.msra.gmra.mxu1 %v13749_v10  ;;  %8167 = vmatpush1.bf16.msra.mxu0 %v12456_v61  ;;  %v12524_v61 = vld [vmem:[%s13648_s26 + $0x109c] ss:$48 sps:$4 sm:$0xff]  }
 0x30d   : > { %v14430_v4 = vadd.f32 %v7913_v3, %v7872_v28  ;;  %8208 = vmatpush1.bf16.msra.mxu1 %v12459_v62  ;;  %v7874_v7 = vpop.f32.mrf.mxu0  ;;  %8168 = vmatprep.subr.bf16.mxu0 %v12464_v63  ;;  %v12527_v62 = vld [vmem:[%s13648_s26 + $0x169c] ss:$48 sps:$4 sm:$0xff]   ;;  %v12522_v63 = vld [vmem:[%s13648_s26 + $0x1098] ss:$48 sps:$4 sm:$0xff]  }
 0x30e   : > { %v7915_v8 = vpop.f32.mrf.mxu1  ;;  %8209 = vmatprep.subr.bf16.mxu1 %v12467_v1  ;;  %8198 = vmatprep.mubr.bf16.mxu0 %v13780_v38  ;;  %v12525_v1 = vld [vmem:[%s13648_s26 + $0x1698] ss:$48 sps:$4 sm:$0xff]   ;;  %v12533_v28 = vld [vmem:[%s13648_s26 + $0x163c] ss:$48 sps:$4 sm:$0xff]  }
 0x30f   : > { %v14435_v31 = vadd.f32 %v7915_v8, %v7874_v7  ;;  %8239 = vmatprep.mubr.bf16.mxu1 %v13784_v41  ;;  %v7876_v13 = vpop.f32.mrf.mxu0  ;;  %v12528_v3 = vld [vmem:[%s13648_s26 + $0x1038] ss:$48 sps:$4 sm:$0xff]   ;;  %v12536_v7 = vld [vmem:[%s13648_s26 + $0xfdc] ss:$48 sps:$4 sm:$0xff]  }
 0x310   : > { %v7917_v14 = vpop.f32.mrf.mxu1  ;;  %8169 = vmatpush1.bf16.msra.mxu0 %v12462_v29  ;;  %v12530_v29 = vld [vmem:[%s13648_s26 + $0x103c] ss:$48 sps:$4 sm:$0xff]  }
 0x311   : > { %8210 = vmatpush1.bf16.msra.mxu1 %v12465_v5  ;;  %v7877_v17 = vpop.f32.mrf.mxu0  ;;  %8170 = vmatprep.subr.bf16.mxu0 %v12470_v11  ;;  %v12531_v5 = vld [vmem:[%s13648_s26 + $0x1638] ss:$48 sps:$4 sm:$0xff]   ;;  %v12539_v8 = vld [vmem:[%s13648_s26 + $0x15dc] ss:$48 sps:$4 sm:$0xff]  }
 0x312   : > { %v7918_v18 = vpop.f32.mrf.mxu1  ;;  %8211 = vmatprep.subr.bf16.mxu1 %v12473_v12  ;;  %v12534_v11 = vld [vmem:[%s13648_s26 + $0xfd8] ss:$48 sps:$4 sm:$0xff]   ;;  %v12542_v13 = vld [vmem:[%s13648_s26 + $0xf7c] ss:$48 sps:$4 sm:$0xff]  }
 0x313   : > { %v12537_v12 = vld [vmem:[%s13648_s26 + $0x15d8] ss:$48 sps:$4 sm:$0xff]   ;;  %v12545_v14 = vld [vmem:[%s13648_s26 + $0x157c] ss:$48 sps:$4 sm:$0xff]  }
 0x314   : > { %8171 = vmatpush1.bf16.msra.mxu0 %v12468_v15  ;;  %v12540_v15 = vld [vmem:[%s13648_s26 + $0xf78] ss:$48 sps:$4 sm:$0xff]   ;;  %v12548_v17 = vld [vmem:[%s13648_s26 + $0xf1c] ss:$48 sps:$4 sm:$0xff]  }
 0x315   : > { %8212 = vmatpush1.bf16.msra.mxu1 %v12471_v16  ;;  %8172 = vmatprep.subr.bf16.mxu0 %v12476_v19  ;;  %v12543_v16 = vld [vmem:[%s13648_s26 + $0x1578] ss:$48 sps:$4 sm:$0xff]   ;;  %v12551_v18 = vld [vmem:[%s13648_s26 + $0x151c] ss:$48 sps:$4 sm:$0xff]  }
 0x316   : > { %8213 = vmatprep.subr.bf16.mxu1 %v12479_v20  ;;  %v12546_v19 = vld [vmem:[%s13648_s26 + $0xf18] ss:$48 sps:$4 sm:$0xff]  }
 0x317   : > { %v12549_v20 = vld [vmem:[%s13648_s26 + $0x1518] ss:$48 sps:$4 sm:$0xff]  }
 0x318   : > { %8173 = vmatpush1.bf16.msra.mxu0 %v12474_v23  ;;  %v12554_v23 = vld [vmem:[%s13648_s26 + $0x1abc] ss:$48 sps:$4 sm:$0xff]  }
 0x319   : > { %8214 = vmatpush1.bf16.msra.mxu1 %v12477_v24  ;;  %8174 = vmatprep.subr.bf16.mxu0 %v12482_v25  ;;  %v12557_v24 = vld [vmem:[%s13648_s26 + $0x20bc] ss:$48 sps:$4 sm:$0xff]   ;;  %v12552_v25 = vld [vmem:[%s13648_s26 + $0x1ab8] ss:$48 sps:$4 sm:$0xff]  }
 0x31a   : > { %8215 = vmatprep.subr.bf16.mxu1 %v12485_v26  ;;  %v12555_v26 = vld [vmem:[%s13648_s26 + $0x20b8] ss:$48 sps:$4 sm:$0xff]  }
 0x31c   : > { %8175 = vmatpush1.bf16.msra.mxu0 %v12480_v32  ;;  %v12560_v32 = vld [vmem:[%s13648_s26 + $0x1a5c] ss:$48 sps:$4 sm:$0xff]  }
 0x31d   : > { %8216 = vmatpush1.bf16.msra.mxu1 %v12483_v34  ;;  %8176 = vmatprep.subr.bf16.mxu0 %v12488_v35  ;;  %v12563_v34 = vld [vmem:[%s13648_s26 + $0x205c] ss:$48 sps:$4 sm:$0xff]  }
 0x31e   : > { %8217 = vmatprep.subr.bf16.mxu1 %v12491_v37 }
 0x320   : > { %8177 = vmatpush1.bf16.msra.mxu0 %v12486_v39  ;;  %v12558_v39 = vld [vmem:[%s13648_s26 + $0x1a58] ss:$48 sps:$4 sm:$0xff]  }
 0x321   : > { %8218 = vmatpush1.bf16.msra.mxu1 %v12489_v36  ;;  %8178 = vmatprep.subr.bf16.mxu0 %v12494_v46  ;;  %v12561_v36 = vld [vmem:[%s13648_s26 + $0x2058] ss:$48 sps:$4 sm:$0xff]  }
 0x322   : > { %8219 = vmatprep.subr.bf16.mxu1 %v12497_v2 }
 0x324   : > { %8179 = vmatpush1.bf16.msra.mxu0 %v12492_v6  ;;  %v12566_v6 = vld [vmem:[%s13648_s26 + $0x19fc] ss:$48 sps:$4 sm:$0xff]  }
 0x325   : > { %8220 = vmatpush1.bf16.msra.mxu1 %v12495_v0  ;;  %8180 = vmatprep.subr.bf16.mxu0 %v12500_v43  ;;  %v12569_v0 = vld [vmem:[%s13648_s26 + $0x1ffc] ss:$48 sps:$4 sm:$0xff]  }
 0x326   : > { %8221 = vmatprep.subr.bf16.mxu1 %v12503_v44 }
 0x328   : > { %8181 = vmatpush1.bf16.msra.mxu0 %v12498_v45  ;;  %v12564_v45 = vld [vmem:[%s13648_s26 + $0x19f8] ss:$48 sps:$4 sm:$0xff]  }
 0x329   : > { %8222 = vmatpush1.bf16.msra.mxu1 %v12501_v47  ;;  %8182 = vmatprep.subr.bf16.mxu0 %v12506_v48  ;;  %v12567_v47 = vld [vmem:[%s13648_s26 + $0x1ff8] ss:$48 sps:$4 sm:$0xff]  }
 0x32a   : > { %8223 = vmatprep.subr.bf16.mxu1 %v12509_v49 }
 0x32c   : > { %8183 = vmatpush2.bf16.msra.mxu0 %v12504_v51  ;;  %v12572_v51 = vld [vmem:[%s13648_s26 + $0x199c] ss:$48 sps:$4 sm:$0xff]  }
 0x32d   : > { %8224 = vmatpush2.bf16.msra.mxu1 %v12507_v27  ;;  %8184 = vmatprep.subr.bf16.mxu0 %v12512_v52  ;;  %v12575_v27 = vld [vmem:[%s13648_s26 + $0x1f9c] ss:$48 sps:$4 sm:$0xff]   ;;  %v12570_v52 = vld [vmem:[%s13648_s26 + $0x1998] ss:$48 sps:$4 sm:$0xff]  }
 0x32e   : > { %8225 = vmatprep.subr.bf16.mxu1 %v12515_v54  ;;  %v12573_v54 = vld [vmem:[%s13648_s26 + $0x1f98] ss:$48 sps:$4 sm:$0xff]  }
 0x330   : > { %8185 = vmatpush2.bf16.msra.mxu0 %v12510_v55  ;;  %v12578_v55 = vld [vmem:[%s13648_s26 + $0x193c] ss:$48 sps:$4 sm:$0xff]  }
 0x331   : > { %8226 = vmatpush2.bf16.msra.mxu1 %v12513_v56  ;;  %8186 = vmatprep.subr.bf16.mxu0 %v12518_v57  ;;  %v12581_v56 = vld [vmem:[%s13648_s26 + $0x1f3c] ss:$48 sps:$4 sm:$0xff]   ;;  %v12576_v57 = vld [vmem:[%s13648_s26 + $0x1938] ss:$48 sps:$4 sm:$0xff]  }
 0x332   : > { %8227 = vmatprep.subr.bf16.mxu1 %v12521_v58  ;;  %v12579_v58 = vld [vmem:[%s13648_s26 + $0x1f38] ss:$48 sps:$4 sm:$0xff]  }
 0x334   : > { %8187 = vmatpush2.bf16.msra.mxu0 %v12516_v59  ;;  %v12584_v59 = vld [vmem:[%s13648_s26 + $0x18dc] ss:$48 sps:$4 sm:$0xff]  }
 0x335   : > { %8228 = vmatpush2.bf16.msra.mxu1 %v12519_v60  ;;  %8188 = vmatprep.subr.bf16.mxu0 %v12524_v61  ;;  %v12587_v60 = vld [vmem:[%s13648_s26 + $0x1edc] ss:$48 sps:$4 sm:$0xff]   ;;  %v12582_v61 = vld [vmem:[%s13648_s26 + $0x18d8] ss:$48 sps:$4 sm:$0xff]  }
 0x336   : > { %8229 = vmatprep.subr.bf16.mxu1 %v12527_v62  ;;  %v12585_v62 = vld [vmem:[%s13648_s26 + $0x1ed8] ss:$48 sps:$4 sm:$0xff]  }
 0x338   : > { %8189 = vmatpush2.bf16.msra.mxu0 %v12522_v63  ;;  %v12590_v63 = vld [vmem:[%s13648_s26 + $0x187c] ss:$48 sps:$4 sm:$0xff]  }
 0x339   : > { %8230 = vmatpush2.bf16.msra.mxu1 %v12525_v1  ;;  %8190 = vmatprep.subr.bf16.mxu0 %v12530_v29  ;;  %v12593_v1 = vld [vmem:[%s13648_s26 + $0x1e7c] ss:$48 sps:$4 sm:$0xff]   ;;  %v12588_v29 = vld [vmem:[%s13648_s26 + $0x1878] ss:$48 sps:$4 sm:$0xff]  }
 0x33a   : > { %8231 = vmatprep.subr.bf16.mxu1 %v12533_v28  ;;  %v12591_v28 = vld [vmem:[%s13648_s26 + $0x1e78] ss:$48 sps:$4 sm:$0xff]  }
 0x33c   : > { %8191 = vmatpush2.bf16.msra.mxu0 %v12528_v3  ;;  %v12596_v3 = vld [vmem:[%s13648_s26 + $0x181c] ss:$48 sps:$4 sm:$0xff]  }
 0x33d   : > { %8232 = vmatpush2.bf16.msra.mxu1 %v12531_v5  ;;  %8192 = vmatprep.subr.bf16.mxu0 %v12536_v7  ;;  %v12599_v5 = vld [vmem:[%s13648_s26 + $0x1e1c] ss:$48 sps:$4 sm:$0xff]   ;;  %v12594_v7 = vld [vmem:[%s13648_s26 + $0x1818] ss:$48 sps:$4 sm:$0xff]  }
 0x33e   : > { %8233 = vmatprep.subr.bf16.mxu1 %v12539_v8  ;;  %v12597_v8 = vld [vmem:[%s13648_s26 + $0x1e18] ss:$48 sps:$4 sm:$0xff]  }
 0x340   : > { %8193 = vmatpush2.bf16.msra.mxu0 %v12534_v11  ;;  %v12602_v11 = vld [vmem:[%s13648_s26 + $0x1dbc] ss:$48 sps:$4 sm:$0xff]  }
 0x341   : > { %8234 = vmatpush2.bf16.msra.mxu1 %v12537_v12  ;;  %8194 = vmatprep.subr.bf16.mxu0 %v12542_v13  ;;  %v12605_v12 = vld [vmem:[%s13648_s26 + $0x23bc] ss:$48 sps:$4 sm:$0xff]   ;;  %v12600_v13 = vld [vmem:[%s13648_s26 + $0x1db8] ss:$48 sps:$4 sm:$0xff]  }
 0x342   : > { %8235 = vmatprep.subr.bf16.mxu1 %v12545_v14  ;;  %v12603_v14 = vld [vmem:[%s13648_s26 + $0x23b8] ss:$48 sps:$4 sm:$0xff]  }
 0x344   : > { %8195 = vmatpush2.bf16.msra.mxu0 %v12540_v15  ;;  %v12608_v15 = vld [vmem:[%s13648_s26 + $0x1d5c] ss:$48 sps:$4 sm:$0xff]  }
 0x345   : > { %8236 = vmatpush2.bf16.msra.mxu1 %v12543_v16  ;;  %8196 = vmatprep.subr.bf16.mxu0 %v12548_v17  ;;  %v12611_v16 = vld [vmem:[%s13648_s26 + $0x235c] ss:$48 sps:$4 sm:$0xff]   ;;  %v12606_v17 = vld [vmem:[%s13648_s26 + $0x1d58] ss:$48 sps:$4 sm:$0xff]  }
 0x346   : > { %8237 = vmatprep.subr.bf16.mxu1 %v12551_v18  ;;  %v12609_v18 = vld [vmem:[%s13648_s26 + $0x2358] ss:$48 sps:$4 sm:$0xff]  }
 0x348   : > { %8197 = vmatpush2.bf16.msra.mxu0 %v12546_v19  ;;  %v12614_v19 = vld [vmem:[%s13648_s26 + $0x1cfc] ss:$48 sps:$4 sm:$0xff]  }
 0x349   : > { %8238 = vmatpush2.bf16.msra.mxu1 %v12549_v20  ;;  %8248 = vmatprep.subr.bf16.mxu0 %v12554_v23  ;;  %v12617_v20 = vld [vmem:[%s13648_s26 + $0x22fc] ss:$48 sps:$4 sm:$0xff]   ;;  %v12612_v23 = vld [vmem:[%s13648_s26 + $0x1cf8] ss:$48 sps:$4 sm:$0xff]  }
 0x34a   : > { %8289 = vmatprep.subr.bf16.mxu1 %v12557_v24  ;;  %v12615_v24 = vld [vmem:[%s13648_s26 + $0x22f8] ss:$48 sps:$4 sm:$0xff]  }
 0x34b   : > { %v14499_v35 = vpop.f32.mrf.mxu0  ;;  %8199 = vmatmul.mubr.bf16.vlgmr.msra.gmra.mxu0 %v13827_v21 }
 0x34c   : > { %v14501_v37 = vpop.f32.mrf.mxu1  ;;  %8240 = vmatmul.mubr.bf16.vlgmr.msra.gmra.mxu1 %v13829_v22  ;;  %8249 = vmatpush1.bf16.msra.mxu0 %v12552_v25  ;;  %v12620_v25 = vld [vmem:[%s13648_s26 + $0x1c9c] ss:$48 sps:$4 sm:$0xff]  }
 0x34d   : > { %8290 = vmatpush1.bf16.msra.mxu1 %v12555_v26  ;;  %v14507_v46 = vpop.f32.mrf.mxu0  ;;  %8250 = vmatprep.subr.bf16.mxu0 %v12560_v32  ;;  %v12623_v26 = vld [vmem:[%s13648_s26 + $0x229c] ss:$48 sps:$4 sm:$0xff]   ;;  %v12618_v32 = vld [vmem:[%s13648_s26 + $0x1c98] ss:$48 sps:$4 sm:$0xff]  }
 0x34e   : > { %v14509_v2 = vpop.f32.mrf.mxu1  ;;  %8291 = vmatprep.subr.bf16.mxu1 %v12563_v34  ;;  %8280 = vmatprep.mubr.bf16.mxu0 %v13840_v30  ;;  %v12621_v34 = vld [vmem:[%s13648_s26 + $0x2298] ss:$48 sps:$4 sm:$0xff]  }
 0x34f   : > { %8321 = vmatprep.mubr.bf16.mxu1 %v13844_v33  ;;  %v7958_v43 = vpop.f32.mrf.mxu0 }
 0x350   : > { %v7999_v44 = vpop.f32.mrf.mxu1  ;;  %8251 = vmatpush1.bf16.msra.mxu0 %v12558_v39  ;;  %v12626_v39 = vld [vmem:[%s13648_s26 + $0x1c3c] ss:$48 sps:$4 sm:$0xff]  }
 0x351   : > { %8292 = vmatpush1.bf16.msra.mxu1 %v12561_v36  ;;  %v7959_v48 = vpop.f32.mrf.mxu0  ;;  %8252 = vmatprep.subr.bf16.mxu0 %v12566_v6  ;;  %v12629_v36 = vld [vmem:[%s13648_s26 + $0x223c] ss:$48 sps:$4 sm:$0xff]   ;;  %v12624_v6 = vld [vmem:[%s13648_s26 + $0x1c38] ss:$48 sps:$4 sm:$0xff]  }
 0x352   : > { %v8000_v49 = vpop.f32.mrf.mxu1  ;;  %8293 = vmatprep.subr.bf16.mxu1 %v12569_v0  ;;  %v12627_v0 = vld [vmem:[%s13648_s26 + $0x2238] ss:$48 sps:$4 sm:$0xff]   ;;  %v12632_v43 = vld [vmem:[%s13648_s26 + $0x1bdc] ss:$48 sps:$4 sm:$0xff]  }
 0x353   : > { %v12635_v44 = vld [vmem:[%s13648_s26 + $0x21dc] ss:$48 sps:$4 sm:$0xff]  }
 0x354   : > { %8253 = vmatpush1.bf16.msra.mxu0 %v12564_v45  ;;  %v12630_v45 = vld [vmem:[%s13648_s26 + $0x1bd8] ss:$48 sps:$4 sm:$0xff]   ;;  %v12638_v48 = vld [vmem:[%s13648_s26 + $0x1b7c] ss:$48 sps:$4 sm:$0xff]  }
 0x355   : > { %8294 = vmatpush1.bf16.msra.mxu1 %v12567_v47  ;;  %8254 = vmatprep.subr.bf16.mxu0 %v12572_v51  ;;  %v12633_v47 = vld [vmem:[%s13648_s26 + $0x21d8] ss:$48 sps:$4 sm:$0xff]   ;;  %v12641_v49 = vld [vmem:[%s13648_s26 + $0x217c] ss:$48 sps:$4 sm:$0xff]  }
 0x356   : > { %8295 = vmatprep.subr.bf16.mxu1 %v12575_v27  ;;  %v12636_v51 = vld [vmem:[%s13648_s26 + $0x1b78] ss:$48 sps:$4 sm:$0xff]  }
 0x357   : > { %v12639_v27 = vld [vmem:[%s13648_s26 + $0x2178] ss:$48 sps:$4 sm:$0xff]  }
 0x358   : > { %8255 = vmatpush1.bf16.msra.mxu0 %v12570_v52  ;;  %v12644_v52 = vld [vmem:[%s13648_s26 + $0x1b1c] ss:$48 sps:$4 sm:$0xff]  }
 0x359   : > { %8296 = vmatpush1.bf16.msra.mxu1 %v12573_v54  ;;  %8256 = vmatprep.subr.bf16.mxu0 %v12578_v55  ;;  %v12647_v54 = vld [vmem:[%s13648_s26 + $0x211c] ss:$48 sps:$4 sm:$0xff]   ;;  %v12642_v55 = vld [vmem:[%s13648_s26 + $0x1b18] ss:$48 sps:$4 sm:$0xff]  }
 0x35a   : > { %8297 = vmatprep.subr.bf16.mxu1 %v12581_v56  ;;  %v12645_v56 = vld [vmem:[%s13648_s26 + $0x2118] ss:$48 sps:$4 sm:$0xff]  }
 0x35c   : > { %8257 = vmatpush1.bf16.msra.mxu0 %v12576_v57  ;;  %v12650_v57 = vld [vmem:[%s13648_s26 + $0x2c4] ss:$48 sps:$4 sm:$0xff]  }
 0x35d   : > { %8298 = vmatpush1.bf16.msra.mxu1 %v12579_v58  ;;  %8258 = vmatprep.subr.bf16.mxu0 %v12584_v59  ;;  %v12653_v58 = vld [vmem:[%s13648_s26 + $0x8c4] ss:$48 sps:$4 sm:$0xff]   ;;  %v7955_v59 = vadd.f32 %v14499_v35, %v14430_v4  ;;  %v12654_v35 = vld [vmem:[%s13648_s26 + $0x260] ss:$48 sps:$4 sm:$0xff]  }
 0x35e   : > { %8299 = vmatprep.subr.bf16.mxu1 %v12587_v60  ;;  %v7957_v60 = vadd.f32 %v14507_v46, %v14435_v31  ;;  %v12657_v46 = vld [vmem:[%s13648_s26 + $0x860] ss:$48 sps:$4 sm:$0xff]  }
 0x360   : > { %8259 = vmatpush1.bf16.msra.mxu0 %v12582_v61  ;;  %v12648_v61 = vld [vmem:[%s13648_s26 + $0x2c0] ss:$48 sps:$4 sm:$0xff]   ;;  %v7998_v4 = vadd.f32 %v14509_v2, %v7957_v60 }
 0x361   : > { %8300 = vmatpush1.bf16.msra.mxu1 %v12585_v62  ;;  %8260 = vmatprep.subr.bf16.mxu0 %v12590_v63  ;;  %v12651_v62 = vld [vmem:[%s13648_s26 + $0x8c0] ss:$48 sps:$4 sm:$0xff]   ;;  %v12656_v63 = vld [vmem:[%s13648_s26 + $0x264] ss:$48 sps:$4 sm:$0xff]  }
 0x362   : > { %8301 = vmatprep.subr.bf16.mxu1 %v12593_v1  ;;  %v12659_v1 = vld [vmem:[%s13648_s26 + $0x864] ss:$48 sps:$4 sm:$0xff]   ;;  %v12699_v60 = vld [vmem:[%s13648_s26 + $0xbc0] ss:$48 sps:$4 sm:$0xff]  }
 0x363   : > { %v427_v2 = vld [vmem:[#allocation2 + $0x20] sm:$0xff] }
 0x364   : > { %8261 = vmatpush1.bf16.msra.mxu0 %v12588_v29  ;;  %v7996_v29 = vadd.f32 %v14501_v37, %v7955_v59  ;;  %v12662_v37 = vld [vmem:[%s13648_s26 + $0x204] ss:$48 sps:$4 sm:$0xff]   ;;  %v12696_v59 = vld [vmem:[%s13648_s26 + $0x5c0] ss:$48 sps:$4 sm:$0xff]  }
 0x365   : > { %8302 = vmatpush1.bf16.msra.mxu1 %v12591_v28  ;;  %8262 = vmatprep.subr.bf16.mxu0 %v12596_v3 }
 0x366   : > { %8303 = vmatprep.subr.bf16.mxu1 %v12599_v5  ;;  %v426_v5 = vld [vmem:[#allocation2 + $0x50] sm:$0xff] }
 0x368   : > { %8263 = vmatpush1.bf16.msra.mxu0 %v12594_v7 }
 0x369   : > { %8304 = vmatpush1.bf16.msra.mxu1 %v12597_v8  ;;  %8264 = vmatprep.subr.bf16.mxu0 %v12602_v11  ;;  %v12665_v11 = vld [vmem:[%s13648_s26 + $0x804] ss:$48 sps:$4 sm:$0xff]  }
 0x36a   : > { %8305 = vmatprep.subr.bf16.mxu1 %v12605_v12 }
 0x36c   : > { %8265 = vmatpush2.bf16.msra.mxu0 %v12600_v13 }
 0x36d   : > { %8306 = vmatpush2.bf16.msra.mxu1 %v12603_v14  ;;  %8266 = vmatprep.subr.bf16.mxu0 %v12608_v15 }
 0x36e   : > { %8307 = vmatprep.subr.bf16.mxu1 %v12611_v16 }
 0x370   : > { %8267 = vmatpush2.bf16.msra.mxu0 %v12606_v17 }
 0x371   : > { %8308 = vmatpush2.bf16.msra.mxu1 %v12609_v18  ;;  %8268 = vmatprep.subr.bf16.mxu0 %v12614_v19  ;;  %v12660_v18 = vld [vmem:[%s13648_s26 + $0x200] ss:$48 sps:$4 sm:$0xff]  }
 0x372   : > { %8309 = vmatprep.subr.bf16.mxu1 %v12617_v20  ;;  %v12663_v19 = vld [vmem:[%s13648_s26 + $0x800] ss:$48 sps:$4 sm:$0xff]  }
 0x374   : > { %8269 = vmatpush2.bf16.msra.mxu0 %v12612_v23 }
 0x375   : > { %8310 = vmatpush2.bf16.msra.mxu1 %v12615_v24  ;;  %8270 = vmatprep.subr.bf16.mxu0 %v12620_v25  ;;  %v12668_v24 = vld [vmem:[%s13648_s26 + $0x1a4] ss:$48 sps:$4 sm:$0xff]  }
 0x376   : > { %8311 = vmatprep.subr.bf16.mxu1 %v12623_v26  ;;  %v12671_v25 = vld [vmem:[%s13648_s26 + $0x7a4] ss:$48 sps:$4 sm:$0xff]  }
 0x378   : > { %8271 = vmatpush2.bf16.msra.mxu0 %v12618_v32  ;;  %v12666_v32 = vld [vmem:[%s13648_s26 + $0x1a0] ss:$48 sps:$4 sm:$0xff]  }
 0x379   : > { %8312 = vmatpush2.bf16.msra.mxu1 %v12621_v34  ;;  %8272 = vmatprep.subr.bf16.mxu0 %v12626_v39  ;;  %v12669_v34 = vld [vmem:[%s13648_s26 + $0x7a0] ss:$48 sps:$4 sm:$0xff]   ;;  %v12674_v39 = vld [vmem:[%s13648_s26 + $0x144] ss:$48 sps:$4 sm:$0xff]  }
 0x37a   : > { %8313 = vmatprep.subr.bf16.mxu1 %v12629_v36  ;;  %v12677_v36 = vld [vmem:[%s13648_s26 + $0x744] ss:$48 sps:$4 sm:$0xff]  }
 0x37c   : > { %8273 = vmatpush2.bf16.msra.mxu0 %v12624_v6  ;;  %v12672_v6 = vld [vmem:[%s13648_s26 + $0x140] ss:$48 sps:$4 sm:$0xff]  }
 0x37d   : > { %8314 = vmatpush2.bf16.msra.mxu1 %v12627_v0  ;;  %8274 = vmatprep.subr.bf16.mxu0 %v12632_v43  ;;  %v12675_v0 = vld [vmem:[%s13648_s26 + $0x740] ss:$48 sps:$4 sm:$0xff]   ;;  %v12680_v43 = vld [vmem:[%s13648_s26 + $0xe4] ss:$48 sps:$4 sm:$0xff]  }
 0x37e   : > { %8315 = vmatprep.subr.bf16.mxu1 %v12635_v44  ;;  %v12683_v44 = vld [vmem:[%s13648_s26 + $0x6e4] ss:$48 sps:$4 sm:$0xff]  }
 0x380   : > { %8275 = vmatpush2.bf16.msra.mxu0 %v12630_v45  ;;  %v12678_v45 = vld [vmem:[%s13648_s26 + $0xe0] ss:$48 sps:$4 sm:$0xff]  }
 0x381   : > { %8316 = vmatpush2.bf16.msra.mxu1 %v12633_v47  ;;  %8276 = vmatprep.subr.bf16.mxu0 %v12638_v48  ;;  %v12681_v47 = vld [vmem:[%s13648_s26 + $0x6e0] ss:$48 sps:$4 sm:$0xff]   ;;  %v12686_v48 = vld [vmem:[%s13648_s26 + $0x84] ss:$48 sps:$4 sm:$0xff]  }
 0x382   : > { %8317 = vmatprep.subr.bf16.mxu1 %v12641_v49  ;;  %v12689_v49 = vld [vmem:[%s13648_s26 + $0x684] ss:$48 sps:$4 sm:$0xff]  }
 0x384   : > { %8277 = vmatpush2.bf16.msra.mxu0 %v12636_v51  ;;  %v12684_v51 = vld [vmem:[%s13648_s26 + $0x80] ss:$48 sps:$4 sm:$0xff]  }
 0x385   : > { %8318 = vmatpush2.bf16.msra.mxu1 %v12639_v27  ;;  %8278 = vmatprep.subr.bf16.mxu0 %v12644_v52  ;;  %v12687_v27 = vld [vmem:[%s13648_s26 + $0x680] ss:$48 sps:$4 sm:$0xff]   ;;  %v12692_v52 = vld [vmem:[%s13648_s26 + $0x24] ss:$48 sps:$4 sm:$0xff]  }
 0x386   : > { %8319 = vmatprep.subr.bf16.mxu1 %v12647_v54  ;;  %v12695_v54 = vld [vmem:[%s13648_s26 + $0x624] ss:$48 sps:$4 sm:$0xff]  }
 0x388   : > { %8279 = vmatpush2.bf16.msra.mxu0 %v12642_v55  ;;  %v12690_v55 = vld [vmem:[%s13648_s26 + $0x20] ss:$48 sps:$4 sm:$0xff]  }
 0x389   : > { %8320 = vmatpush2.bf16.msra.mxu1 %v12645_v56  ;;  %8330 = vmatprep.subr.bf16.mxu0 %v12650_v57  ;;  %v12693_v56 = vld [vmem:[%s13648_s26 + $0x620] ss:$48 sps:$4 sm:$0xff]   ;;  %v12698_v57 = vld [vmem:[%s13648_s26 + $0x5c4] ss:$48 sps:$4 sm:$0xff]  }
 0x38a   : > { %8371 = vmatprep.subr.bf16.mxu1 %v12653_v58  ;;  %v12701_v58 = vld [vmem:[%s13648_s26 + $0xbc4] ss:$48 sps:$4 sm:$0xff]  }
 0x38b   : > { %v8036_v28 = vpop.f32.mrf.mxu0  ;;  %8281 = vmatmul.mubr.bf16.vlgmr.msra.gmra.mxu0 %v13907_v40 }
 0x38c   : > { %v8077_v3 = vpop.f32.mrf.mxu1  ;;  %8322 = vmatmul.mubr.bf16.vlgmr.msra.gmra.mxu1 %v13909_v42  ;;  %v8037_v31 = vadd.f32 %v8036_v28, %v7996_v29  ;;  %8331 = vmatpush1.bf16.msra.mxu0 %v12648_v61  ;;  %v12704_v61 = vld [vmem:[%s13648_s26 + $0x564] ss:$48 sps:$4 sm:$0xff]  }
 0x38d   : > { %8372 = vmatpush1.bf16.msra.mxu1 %v12651_v62  ;;  %v8038_v7 = vpop.f32.mrf.mxu0  ;;  %8332 = vmatprep.subr.bf16.mxu0 %v12656_v63  ;;  %v12707_v62 = vld [vmem:[%s13648_s26 + $0xb64] ss:$48 sps:$4 sm:$0xff]   ;;  %v12702_v63 = vld [vmem:[%s13648_s26 + $0x560] ss:$48 sps:$4 sm:$0xff]  }
 0x38e   : > { %v8079_v8 = vpop.f32.mrf.mxu1  ;;  %8373 = vmatprep.subr.bf16.mxu1 %v12659_v1  ;;  %v8078_v12 = vadd.f32 %v8077_v3, %v8037_v31  ;;  %v8039_v13 = vadd.f32 %v8038_v7, %v7998_v4  ;;  %8362 = vmatprep.mubr.bf16.mxu0 %v13720_v50  ;;  %v12705_v1 = vld [vmem:[%s13648_s26 + $0xb60] ss:$48 sps:$4 sm:$0xff]   ;;  %v12710_v29 = vld [vmem:[%s13648_s26 + $0x504] ss:$48 sps:$4 sm:$0xff]  }
 0x38f   : > { %8403 = vmatprep.mubr.bf16.mxu1 %v13724_v53  ;;  %v8040_v14 = vpop.f32.mrf.mxu0  ;;  %v12713_v28 = vld [vmem:[%s13648_s26 + $0xb04] ss:$48 sps:$4 sm:$0xff]   ;;  %v12708_v3 = vld [vmem:[%s13648_s26 + $0x500] ss:$48 sps:$4 sm:$0xff]  }
 0x390   : > { %v8081_v15 = vpop.f32.mrf.mxu1  ;;  %v8826_v16 = vadd.f32 %v8078_v12, %v426_v5  ;;  %v8080_v17 = vadd.f32 %v8079_v8, %v8039_v13  ;;  %8333 = vmatpush1.bf16.msra.mxu0 %v12654_v35  ;;  %v12711_v4 = vld [vmem:[%s13648_s26 + $0xb00] ss:$48 sps:$4 sm:$0xff]   ;;  %v12716_v31 = vld [vmem:[%s13648_s26 + $0x4a4] ss:$48 sps:$4 sm:$0xff]  }
 0x391   : > { %8374 = vmatpush1.bf16.msra.mxu1 %v12657_v46  ;;  %v8041_v20 = vpop.f32.mrf.mxu0  ;;  %8334 = vmatprep.subr.bf16.mxu0 %v12662_v37  ;;  %v12719_v35 = vld [vmem:[%s13648_s26 + $0xaa4] ss:$48 sps:$4 sm:$0xff]   ;;  %v12714_v46 = vld [vmem:[%s13648_s26 + $0x4a0] ss:$48 sps:$4 sm:$0xff]  }
 0x392   : > { %v8082_v23 = vpop.f32.mrf.mxu1  ;;  %8375 = vmatprep.subr.bf16.mxu1 %v12665_v11  ;;  %8838 = vst [vmem:[#allocation2 + $0x50] sm:$0xff] %v8826_v16  ;;  %v8827_v26 = vadd.f32 %v8080_v17, %v427_v2  ;;  %v12717_v5 = vld [vmem:[%s13648_s26 + $0xaa0] ss:$48 sps:$4 sm:$0xff]   ;;  %v12722_v7 = vld [vmem:[%s13648_s26 + $0x444] ss:$48 sps:$4 sm:$0xff]  }
 0x393   : > { %v12725_v8 = vld [vmem:[%s13648_s26 + $0xa44] ss:$48 sps:$4 sm:$0xff]   ;;  %v12720_v37 = vld [vmem:[%s13648_s26 + $0x440] ss:$48 sps:$4 sm:$0xff]  }
 0x394   : > { %8839 = vst [vmem:[#allocation2 + $0x20] sm:$0xff] %v8827_v26  ;;  %8335 = vmatpush1.bf16.msra.mxu0 %v12660_v18  ;;  %v12723_v11 = vld [vmem:[%s13648_s26 + $0xa40] ss:$48 sps:$4 sm:$0xff]   ;;  %v12728_v12 = vld [vmem:[%s13648_s26 + $0x3e4] ss:$48 sps:$4 sm:$0xff]  }
 0x395   : > { %8376 = vmatpush1.bf16.msra.mxu1 %v12663_v19  ;;  %8336 = vmatprep.subr.bf16.mxu0 %v12668_v24  ;;  %v12731_v13 = vld [vmem:[%s13648_s26 + $0x9e4] ss:$48 sps:$4 sm:$0xff]   ;;  %v12726_v2 = vld [vmem:[%s13648_s26 + $0x3e0] ss:$48 sps:$4 sm:$0xff]  }
 0x396   : > { %8377 = vmatprep.subr.bf16.mxu1 %v12671_v25  ;;  %v12729_v14 = vld [vmem:[%s13648_s26 + $0x9e0] ss:$48 sps:$4 sm:$0xff]   ;;  %v12734_v15 = vld [vmem:[%s13648_s26 + $0x384] ss:$48 sps:$4 sm:$0xff]  }
 0x397   : > { %v12737_v16 = vld [vmem:[%s13648_s26 + $0x984] ss:$48 sps:$4 sm:$0xff]   ;;  %v12732_v17 = vld [vmem:[%s13648_s26 + $0x380] ss:$48 sps:$4 sm:$0xff]  }
 0x398   : > { %8337 = vmatpush1.bf16.msra.mxu0 %v12666_v32  ;;  %v12735_v18 = vld [vmem:[%s13648_s26 + $0x980] ss:$48 sps:$4 sm:$0xff]   ;;  %v12740_v19 = vld [vmem:[%s13648_s26 + $0x324] ss:$48 sps:$4 sm:$0xff]  }
 0x399   : > { %8378 = vmatpush1.bf16.msra.mxu1 %v12669_v34  ;;  %8338 = vmatprep.subr.bf16.mxu0 %v12674_v39  ;;  %v12743_v20 = vld [vmem:[%s13648_s26 + $0x924] ss:$48 sps:$4 sm:$0xff]   ;;  %v12738_v23 = vld [vmem:[%s13648_s26 + $0x320] ss:$48 sps:$4 sm:$0xff]  }
 0x39a   : > { %8379 = vmatprep.subr.bf16.mxu1 %v12677_v36  ;;  %v12741_v24 = vld [vmem:[%s13648_s26 + $0x920] ss:$48 sps:$4 sm:$0xff]   ;;  %v12746_v25 = vld [vmem:[%s13648_s26 + $0xec4] ss:$48 sps:$4 sm:$0xff]  }
 0x39b   : > { %v12749_v26 = vld [vmem:[%s13648_s26 + $0x14c4] ss:$48 sps:$4 sm:$0xff]   ;;  %v12744_v32 = vld [vmem:[%s13648_s26 + $0xec0] ss:$48 sps:$4 sm:$0xff]  }
 0x39c   : > { %8339 = vmatpush1.bf16.msra.mxu0 %v12672_v6  ;;  %v12747_v34 = vld [vmem:[%s13648_s26 + $0x14c0] ss:$48 sps:$4 sm:$0xff]   ;;  %v12752_v39 = vld [vmem:[%s13648_s26 + $0xe64] ss:$48 sps:$4 sm:$0xff]  }
 0x39d   : > { %8380 = vmatpush1.bf16.msra.mxu1 %v12675_v0  ;;  %8340 = vmatprep.subr.bf16.mxu0 %v12680_v43  ;;  %v12755_v36 = vld [vmem:[%s13648_s26 + $0x1464] ss:$48 sps:$4 sm:$0xff]  }
 0x39e   : > { %8381 = vmatprep.subr.bf16.mxu1 %v12683_v44  ;;  %v12750_v44 = vld [vmem:[%s13648_s26 + $0xe60] ss:$48 sps:$4 sm:$0xff]  }
 0x3a0   : > { %8341 = vmatpush1.bf16.msra.mxu0 %v12678_v45  ;;  %v12753_v45 = vld [vmem:[%s13648_s26 + $0x1460] ss:$48 sps:$4 sm:$0xff]  }
 0x3a1   : > { %8382 = vmatpush1.bf16.msra.mxu1 %v12681_v47  ;;  %8342 = vmatprep.subr.bf16.mxu0 %v12686_v48 }
 0x3a2   : > { %8383 = vmatprep.subr.bf16.mxu1 %v12689_v49  ;;  %v12758_v49 = vld [vmem:[%s13648_s26 + $0xe04] ss:$48 sps:$4 sm:$0xff]  }
 0x3a4   : > { %8343 = vmatpush1.bf16.msra.mxu0 %v12684_v51  ;;  %v12761_v51 = vld [vmem:[%s13648_s26 + $0x1404] ss:$48 sps:$4 sm:$0xff]  }
 0x3a5   : > { %8384 = vmatpush1.bf16.msra.mxu1 %v12687_v27  ;;  %8344 = vmatprep.subr.bf16.mxu0 %v12692_v52 }
 0x3a6   : > { %8385 = vmatprep.subr.bf16.mxu1 %v12695_v54 }
 0x3a8   : > { %8345 = vmatpush1.bf16.msra.mxu0 %v12690_v55  ;;  %v12756_v55 = vld [vmem:[%s13648_s26 + $0xe00] ss:$48 sps:$4 sm:$0xff]  }
 0x3a9   : > { %8386 = vmatpush1.bf16.msra.mxu1 %v12693_v56  ;;  %8346 = vmatprep.subr.bf16.mxu0 %v12698_v57  ;;  %v12759_v56 = vld [vmem:[%s13648_s26 + $0x1400] ss:$48 sps:$4 sm:$0xff]  }
 0x3aa   : > { %8387 = vmatprep.subr.bf16.mxu1 %v12701_v58 }
 0x3ac   : > { %8347 = vmatpush2.bf16.msra.mxu0 %v12696_v59  ;;  %v12764_v59 = vld [vmem:[%s13648_s26 + $0xda4] ss:$48 sps:$4 sm:$0xff]  }
 0x3ad   : > { %8388 = vmatpush2.bf16.msra.mxu1 %v12699_v60  ;;  %8348 = vmatprep.subr.bf16.mxu0 %v12704_v61  ;;  %v12767_v60 = vld [vmem:[%s13648_s26 + $0x13a4] ss:$48 sps:$4 sm:$0xff]   ;;  %v12762_v61 = vld [vmem:[%s13648_s26 + $0xda0] ss:$48 sps:$4 sm:$0xff]  }
 0x3ae   : > { %8389 = vmatprep.subr.bf16.mxu1 %v12707_v62  ;;  %v12765_v62 = vld [vmem:[%s13648_s26 + $0x13a0] ss:$48 sps:$4 sm:$0xff]  }
 0x3b0   : > { %8349 = vmatpush2.bf16.msra.mxu0 %v12702_v63  ;;  %v12770_v63 = vld [vmem:[%s13648_s26 + $0xd44] ss:$48 sps:$4 sm:$0xff]  }
 0x3b1   : > { %8390 = vmatpush2.bf16.msra.mxu1 %v12705_v1  ;;  %8350 = vmatprep.subr.bf16.mxu0 %v12710_v29  ;;  %v12773_v1 = vld [vmem:[%s13648_s26 + $0x1344] ss:$48 sps:$4 sm:$0xff]   ;;  %v12768_v29 = vld [vmem:[%s13648_s26 + $0xd40] ss:$48 sps:$4 sm:$0xff]  }
 0x3b2   : > { %8391 = vmatprep.subr.bf16.mxu1 %v12713_v28  ;;  %v12771_v28 = vld [vmem:[%s13648_s26 + $0x1340] ss:$48 sps:$4 sm:$0xff]  }
 0x3b4   : > { %8351 = vmatpush2.bf16.msra.mxu0 %v12708_v3  ;;  %v12776_v3 = vld [vmem:[%s13648_s26 + $0xce4] ss:$48 sps:$4 sm:$0xff]  }
 0x3b5   : > { %8392 = vmatpush2.bf16.msra.mxu1 %v12711_v4  ;;  %8352 = vmatprep.subr.bf16.mxu0 %v12716_v31  ;;  %v12779_v4 = vld [vmem:[%s13648_s26 + $0x12e4] ss:$48 sps:$4 sm:$0xff]   ;;  %v12774_v31 = vld [vmem:[%s13648_s26 + $0xce0] ss:$48 sps:$4 sm:$0xff]  }
 0x3b6   : > { %8393 = vmatprep.subr.bf16.mxu1 %v12719_v35  ;;  %v12777_v35 = vld [vmem:[%s13648_s26 + $0x12e0] ss:$48 sps:$4 sm:$0xff]  }
 0x3b8   : > { %8353 = vmatpush2.bf16.msra.mxu0 %v12714_v46  ;;  %v12782_v46 = vld [vmem:[%s13648_s26 + $0xc84] ss:$48 sps:$4 sm:$0xff]  }
 0x3b9   : > { %8394 = vmatpush2.bf16.msra.mxu1 %v12717_v5  ;;  %8354 = vmatprep.subr.bf16.mxu0 %v12722_v7  ;;  %v12785_v5 = vld [vmem:[%s13648_s26 + $0x1284] ss:$48 sps:$4 sm:$0xff]   ;;  %v12780_v7 = vld [vmem:[%s13648_s26 + $0xc80] ss:$48 sps:$4 sm:$0xff]  }
 0x3ba   : > { %8395 = vmatprep.subr.bf16.mxu1 %v12725_v8  ;;  %v12783_v8 = vld [vmem:[%s13648_s26 + $0x1280] ss:$48 sps:$4 sm:$0xff]  }
 0x3bc   : > { %8355 = vmatpush2.bf16.msra.mxu0 %v12720_v37  ;;  %v12788_v37 = vld [vmem:[%s13648_s26 + $0xc24] ss:$48 sps:$4 sm:$0xff]  }
 0x3bd   : > { %8396 = vmatpush2.bf16.msra.mxu1 %v12723_v11  ;;  %8356 = vmatprep.subr.bf16.mxu0 %v12728_v12  ;;  %v12791_v11 = vld [vmem:[%s13648_s26 + $0x1224] ss:$48 sps:$4 sm:$0xff]   ;;  %v12786_v12 = vld [vmem:[%s13648_s26 + $0xc20] ss:$48 sps:$4 sm:$0xff]  }
 0x3be   : > { %8397 = vmatprep.subr.bf16.mxu1 %v12731_v13  ;;  %v12789_v13 = vld [vmem:[%s13648_s26 + $0x1220] ss:$48 sps:$4 sm:$0xff]  }
 0x3c0   : > { %8357 = vmatpush2.bf16.msra.mxu0 %v12726_v2  ;;  %v12794_v2 = vld [vmem:[%s13648_s26 + $0x11c4] ss:$48 sps:$4 sm:$0xff]  }
 0x3c1   : > { %8398 = vmatpush2.bf16.msra.mxu1 %v12729_v14  ;;  %8358 = vmatprep.subr.bf16.mxu0 %v12734_v15  ;;  %v12797_v14 = vld [vmem:[%s13648_s26 + $0x17c4] ss:$48 sps:$4 sm:$0xff]   ;;  %v12792_v15 = vld [vmem:[%s13648_s26 + $0x11c0] ss:$48 sps:$4 sm:$0xff]  }
 0x3c2   : > { %8399 = vmatprep.subr.bf16.mxu1 %v12737_v16  ;;  %v12795_v16 = vld [vmem:[%s13648_s26 + $0x17c0] ss:$48 sps:$4 sm:$0xff]  }
 0x3c4   : > { %8359 = vmatpush2.bf16.msra.mxu0 %v12732_v17  ;;  %v12800_v17 = vld [vmem:[%s13648_s26 + $0x1164] ss:$48 sps:$4 sm:$0xff]  }
 0x3c5   : > { %8400 = vmatpush2.bf16.msra.mxu1 %v12735_v18  ;;  %8360 = vmatprep.subr.bf16.mxu0 %v12740_v19  ;;  %v12803_v18 = vld [vmem:[%s13648_s26 + $0x1764] ss:$48 sps:$4 sm:$0xff]   ;;  %v12798_v19 = vld [vmem:[%s13648_s26 + $0x1160] ss:$48 sps:$4 sm:$0xff]  }
 0x3c6   : > { %8401 = vmatprep.subr.bf16.mxu1 %v12743_v20  ;;  %v12801_v20 = vld [vmem:[%s13648_s26 + $0x1760] ss:$48 sps:$4 sm:$0xff]  }
 0x3c8   : > { %8361 = vmatpush2.bf16.msra.mxu0 %v12738_v23  ;;  %v12806_v23 = vld [vmem:[%s13648_s26 + $0x1104] ss:$48 sps:$4 sm:$0xff]  }
 0x3c9   : > { %8402 = vmatpush2.bf16.msra.mxu1 %v12741_v24  ;;  %8412 = vmatprep.subr.bf16.mxu0 %v12746_v25  ;;  %v12809_v24 = vld [vmem:[%s13648_s26 + $0x1704] ss:$48 sps:$4 sm:$0xff]   ;;  %v12804_v25 = vld [vmem:[%s13648_s26 + $0x1100] ss:$48 sps:$4 sm:$0xff]  }
 0x3ca   : > { %8453 = vmatprep.subr.bf16.mxu1 %v12749_v26  ;;  %v12807_v26 = vld [vmem:[%s13648_s26 + $0x1700] ss:$48 sps:$4 sm:$0xff]  }
 0x3cb   : > { %v8118_v6 = vpop.f32.mrf.mxu0  ;;  %8363 = vmatmul.mubr.bf16.vlgmr.msra.gmra.mxu0 %v13747_v9 }
 0x3cc   : > { %v8159_v0 = vpop.f32.mrf.mxu1  ;;  %8404 = vmatmul.mubr.bf16.vlgmr.msra.gmra.mxu1 %v13749_v10  ;;  %8413 = vmatpush1.bf16.msra.mxu0 %v12744_v32  ;;  %v12812_v32 = vld [vmem:[%s13648_s26 + $0x10a4] ss:$48 sps:$4 sm:$0xff]  }
 0x3cd   : > { %v14651_v43 = vadd.f32 %v8159_v0, %v8118_v6  ;;  %8454 = vmatpush1.bf16.msra.mxu1 %v12747_v34  ;;  %v8120_v47 = vpop.f32.mrf.mxu0  ;;  %8414 = vmatprep.subr.bf16.mxu0 %v12752_v39  ;;  %v12815_v34 = vld [vmem:[%s13648_s26 + $0x16a4] ss:$48 sps:$4 sm:$0xff]   ;;  %v12810_v39 = vld [vmem:[%s13648_s26 + $0x10a0] ss:$48 sps:$4 sm:$0xff]  }
 0x3ce   : > { %v8161_v48 = vpop.f32.mrf.mxu1  ;;  %8455 = vmatprep.subr.bf16.mxu1 %v12755_v36  ;;  %8444 = vmatprep.mubr.bf16.mxu0 %v13780_v38  ;;  %v12813_v36 = vld [vmem:[%s13648_s26 + $0x16a0] ss:$48 sps:$4 sm:$0xff]   ;;  %v12818_v6 = vld [vmem:[%s13648_s26 + $0x1044] ss:$48 sps:$4 sm:$0xff]  }
 0x3cf   : > { %v14657_v27 = vadd.f32 %v8161_v48, %v8120_v47  ;;  %8485 = vmatprep.mubr.bf16.mxu1 %v13784_v41  ;;  %v8122_v52 = vpop.f32.mrf.mxu0  ;;  %v12821_v0 = vld [vmem:[%s13648_s26 + $0x1644] ss:$48 sps:$4 sm:$0xff]  }
 0x3d0   : > { %v8163_v54 = vpop.f32.mrf.mxu1  ;;  %8415 = vmatpush1.bf16.msra.mxu0 %v12750_v44  ;;  %v12816_v44 = vld [vmem:[%s13648_s26 + $0x1040] ss:$48 sps:$4 sm:$0xff]   ;;  %v12824_v47 = vld [vmem:[%s13648_s26 + $0xfe4] ss:$48 sps:$4 sm:$0xff]  }
 0x3d1   : > { %8456 = vmatpush1.bf16.msra.mxu1 %v12753_v45  ;;  %v8123_v57 = vpop.f32.mrf.mxu0  ;;  %8416 = vmatprep.subr.bf16.mxu0 %v12758_v49  ;;  %v12819_v45 = vld [vmem:[%s13648_s26 + $0x1640] ss:$48 sps:$4 sm:$0xff]   ;;  %v12827_v48 = vld [vmem:[%s13648_s26 + $0x15e4] ss:$48 sps:$4 sm:$0xff]  }
 0x3d2   : > { %v8164_v58 = vpop.f32.mrf.mxu1  ;;  %8457 = vmatprep.subr.bf16.mxu1 %v12761_v51  ;;  %v12822_v49 = vld [vmem:[%s13648_s26 + $0xfe0] ss:$48 sps:$4 sm:$0xff]   ;;  %v12830_v52 = vld [vmem:[%s13648_s26 + $0xf84] ss:$48 sps:$4 sm:$0xff]  }
 0x3d3   : > { %v12825_v51 = vld [vmem:[%s13648_s26 + $0x15e0] ss:$48 sps:$4 sm:$0xff]   ;;  %v12833_v54 = vld [vmem:[%s13648_s26 + $0x1584] ss:$48 sps:$4 sm:$0xff]  }
 0x3d4   : > { %8417 = vmatpush1.bf16.msra.mxu0 %v12756_v55  ;;  %v12828_v55 = vld [vmem:[%s13648_s26 + $0xf80] ss:$48 sps:$4 sm:$0xff]   ;;  %v12836_v57 = vld [vmem:[%s13648_s26 + $0xf24] ss:$48 sps:$4 sm:$0xff]  }
 0x3d5   : > { %8458 = vmatpush1.bf16.msra.mxu1 %v12759_v56  ;;  %8418 = vmatprep.subr.bf16.mxu0 %v12764_v59  ;;  %v12831_v56 = vld [vmem:[%s13648_s26 + $0x1580] ss:$48 sps:$4 sm:$0xff]   ;;  %v12839_v58 = vld [vmem:[%s13648_s26 + $0x1524] ss:$48 sps:$4 sm:$0xff]  }
 0x3d6   : > { %8459 = vmatprep.subr.bf16.mxu1 %v12767_v60  ;;  %v12834_v59 = vld [vmem:[%s13648_s26 + $0xf20] ss:$48 sps:$4 sm:$0xff]  }
 0x3d7   : > { %v12837_v60 = vld [vmem:[%s13648_s26 + $0x1520] ss:$48 sps:$4 sm:$0xff]  }
 0x3d8   : > { %8419 = vmatpush1.bf16.msra.mxu0 %v12762_v61  ;;  %v12842_v61 = vld [vmem:[%s13648_s26 + $0x1ac4] ss:$48 sps:$4 sm:$0xff]  }
 0x3d9   : > { %8460 = vmatpush1.bf16.msra.mxu1 %v12765_v62  ;;  %8420 = vmatprep.subr.bf16.mxu0 %v12770_v63  ;;  %v12845_v62 = vld [vmem:[%s13648_s26 + $0x20c4] ss:$48 sps:$4 sm:$0xff]   ;;  %v12840_v63 = vld [vmem:[%s13648_s26 + $0x1ac0] ss:$48 sps:$4 sm:$0xff]  }
 0x3da   : > { %8461 = vmatprep.subr.bf16.mxu1 %v12773_v1  ;;  %v12843_v1 = vld [vmem:[%s13648_s26 + $0x20c0] ss:$48 sps:$4 sm:$0xff]  }
 0x3dc   : > { %8421 = vmatpush1.bf16.msra.mxu0 %v12768_v29  ;;  %v12848_v29 = vld [vmem:[%s13648_s26 + $0x1a64] ss:$48 sps:$4 sm:$0xff]  }
 0x3dd   : > { %8462 = vmatpush1.bf16.msra.mxu1 %v12771_v28  ;;  %8422 = vmatprep.subr.bf16.mxu0 %v12776_v3  ;;  %v12851_v28 = vld [vmem:[%s13648_s26 + $0x2064] ss:$48 sps:$4 sm:$0xff]  }
 0x3de   : > { %8463 = vmatprep.subr.bf16.mxu1 %v12779_v4 }
 0x3e0   : > { %8423 = vmatpush1.bf16.msra.mxu0 %v12774_v31  ;;  %v12846_v31 = vld [vmem:[%s13648_s26 + $0x1a60] ss:$48 sps:$4 sm:$0xff]  }
 0x3e1   : > { %8464 = vmatpush1.bf16.msra.mxu1 %v12777_v35  ;;  %8424 = vmatprep.subr.bf16.mxu0 %v12782_v46  ;;  %v12849_v35 = vld [vmem:[%s13648_s26 + $0x2060] ss:$48 sps:$4 sm:$0xff]  }
 0x3e2   : > { %8465 = vmatprep.subr.bf16.mxu1 %v12785_v5 }
 0x3e4   : > { %8425 = vmatpush1.bf16.msra.mxu0 %v12780_v7  ;;  %v12854_v7 = vld [vmem:[%s13648_s26 + $0x1a04] ss:$48 sps:$4 sm:$0xff]  }
 0x3e5   : > { %8466 = vmatpush1.bf16.msra.mxu1 %v12783_v8  ;;  %8426 = vmatprep.subr.bf16.mxu0 %v12788_v37  ;;  %v12857_v8 = vld [vmem:[%s13648_s26 + $0x2004] ss:$48 sps:$4 sm:$0xff]  }
 0x3e6   : > { %8467 = vmatprep.subr.bf16.mxu1 %v12791_v11 }
 0x3e8   : > { %8427 = vmatpush1.bf16.msra.mxu0 %v12786_v12  ;;  %v12852_v12 = vld [vmem:[%s13648_s26 + $0x1a00] ss:$48 sps:$4 sm:$0xff]  }
 0x3e9   : > { %8468 = vmatpush1.bf16.msra.mxu1 %v12789_v13  ;;  %8428 = vmatprep.subr.bf16.mxu0 %v12794_v2  ;;  %v12855_v13 = vld [vmem:[%s13648_s26 + $0x2000] ss:$48 sps:$4 sm:$0xff]  }
 0x3ea   : > { %8469 = vmatprep.subr.bf16.mxu1 %v12797_v14 }
 0x3ec   : > { %8429 = vmatpush2.bf16.msra.mxu0 %v12792_v15  ;;  %v12860_v15 = vld [vmem:[%s13648_s26 + $0x19a4] ss:$48 sps:$4 sm:$0xff]  }
 0x3ed   : > { %8470 = vmatpush2.bf16.msra.mxu1 %v12795_v16  ;;  %8430 = vmatprep.subr.bf16.mxu0 %v12800_v17  ;;  %v12863_v16 = vld [vmem:[%s13648_s26 + $0x1fa4] ss:$48 sps:$4 sm:$0xff]   ;;  %v12858_v17 = vld [vmem:[%s13648_s26 + $0x19a0] ss:$48 sps:$4 sm:$0xff]  }
 0x3ee   : > { %8471 = vmatprep.subr.bf16.mxu1 %v12803_v18  ;;  %v12861_v18 = vld [vmem:[%s13648_s26 + $0x1fa0] ss:$48 sps:$4 sm:$0xff]  }
 0x3f0   : > { %8431 = vmatpush2.bf16.msra.mxu0 %v12798_v19  ;;  %v12866_v19 = vld [vmem:[%s13648_s26 + $0x1944] ss:$48 sps:$4 sm:$0xff]  }
 0x3f1   : > { %8472 = vmatpush2.bf16.msra.mxu1 %v12801_v20  ;;  %8432 = vmatprep.subr.bf16.mxu0 %v12806_v23  ;;  %v12869_v20 = vld [vmem:[%s13648_s26 + $0x1f44] ss:$48 sps:$4 sm:$0xff]   ;;  %v12864_v23 = vld [vmem:[%s13648_s26 + $0x1940] ss:$48 sps:$4 sm:$0xff]  }
 0x3f2   : > { %8473 = vmatprep.subr.bf16.mxu1 %v12809_v24  ;;  %v12867_v24 = vld [vmem:[%s13648_s26 + $0x1f40] ss:$48 sps:$4 sm:$0xff]  }
 0x3f4   : > { %8433 = vmatpush2.bf16.msra.mxu0 %v12804_v25  ;;  %v12872_v25 = vld [vmem:[%s13648_s26 + $0x18e4] ss:$48 sps:$4 sm:$0xff]  }
 0x3f5   : > { %8474 = vmatpush2.bf16.msra.mxu1 %v12807_v26  ;;  %8434 = vmatprep.subr.bf16.mxu0 %v12812_v32  ;;  %v12875_v26 = vld [vmem:[%s13648_s26 + $0x1ee4] ss:$48 sps:$4 sm:$0xff]   ;;  %v12870_v32 = vld [vmem:[%s13648_s26 + $0x18e0] ss:$48 sps:$4 sm:$0xff]  }
 0x3f6   : > { %8475 = vmatprep.subr.bf16.mxu1 %v12815_v34  ;;  %v12873_v34 = vld [vmem:[%s13648_s26 + $0x1ee0] ss:$48 sps:$4 sm:$0xff]  }
 0x3f8   : > { %8435 = vmatpush2.bf16.msra.mxu0 %v12810_v39  ;;  %v12878_v39 = vld [vmem:[%s13648_s26 + $0x1884] ss:$48 sps:$4 sm:$0xff]  }
 0x3f9   : > { %8476 = vmatpush2.bf16.msra.mxu1 %v12813_v36  ;;  %8436 = vmatprep.subr.bf16.mxu0 %v12818_v6  ;;  %v12881_v36 = vld [vmem:[%s13648_s26 + $0x1e84] ss:$48 sps:$4 sm:$0xff]   ;;  %v12876_v6 = vld [vmem:[%s13648_s26 + $0x1880] ss:$48 sps:$4 sm:$0xff]  }
 0x3fa   : > { %8477 = vmatprep.subr.bf16.mxu1 %v12821_v0  ;;  %v12879_v0 = vld [vmem:[%s13648_s26 + $0x1e80] ss:$48 sps:$4 sm:$0xff]  }
 0x3fc   : > { %8437 = vmatpush2.bf16.msra.mxu0 %v12816_v44  ;;  %v12884_v44 = vld [vmem:[%s13648_s26 + $0x1824] ss:$48 sps:$4 sm:$0xff]  }
 0x3fd   : > { %8478 = vmatpush2.bf16.msra.mxu1 %v12819_v45  ;;  %8438 = vmatprep.subr.bf16.mxu0 %v12824_v47  ;;  %v12887_v45 = vld [vmem:[%s13648_s26 + $0x1e24] ss:$48 sps:$4 sm:$0xff]   ;;  %v12882_v47 = vld [vmem:[%s13648_s26 + $0x1820] ss:$48 sps:$4 sm:$0xff]  }
 0x3fe   : > { %8479 = vmatprep.subr.bf16.mxu1 %v12827_v48  ;;  %v12885_v48 = vld [vmem:[%s13648_s26 + $0x1e20] ss:$48 sps:$4 sm:$0xff]  }
 0x400   : > { %8439 = vmatpush2.bf16.msra.mxu0 %v12822_v49  ;;  %v12890_v49 = vld [vmem:[%s13648_s26 + $0x1dc4] ss:$48 sps:$4 sm:$0xff]  }
 0x401   : > { %8480 = vmatpush2.bf16.msra.mxu1 %v12825_v51  ;;  %8440 = vmatprep.subr.bf16.mxu0 %v12830_v52  ;;  %v12893_v51 = vld [vmem:[%s13648_s26 + $0x23c4] ss:$48 sps:$4 sm:$0xff]   ;;  %v12888_v52 = vld [vmem:[%s13648_s26 + $0x1dc0] ss:$48 sps:$4 sm:$0xff]  }
 0x402   : > { %8481 = vmatprep.subr.bf16.mxu1 %v12833_v54  ;;  %v12891_v54 = vld [vmem:[%s13648_s26 + $0x23c0] ss:$48 sps:$4 sm:$0xff]  }
 0x404   : > { %8441 = vmatpush2.bf16.msra.mxu0 %v12828_v55  ;;  %v12896_v55 = vld [vmem:[%s13648_s26 + $0x1d64] ss:$48 sps:$4 sm:$0xff]  }
 0x405   : > { %8482 = vmatpush2.bf16.msra.mxu1 %v12831_v56  ;;  %8442 = vmatprep.subr.bf16.mxu0 %v12836_v57  ;;  %v12899_v56 = vld [vmem:[%s13648_s26 + $0x2364] ss:$48 sps:$4 sm:$0xff]   ;;  %v12894_v57 = vld [vmem:[%s13648_s26 + $0x1d60] ss:$48 sps:$4 sm:$0xff]  }
 0x406   : > { %8483 = vmatprep.subr.bf16.mxu1 %v12839_v58  ;;  %v12897_v58 = vld [vmem:[%s13648_s26 + $0x2360] ss:$48 sps:$4 sm:$0xff]  }
 0x408   : > { %8443 = vmatpush2.bf16.msra.mxu0 %v12834_v59  ;;  %v12902_v59 = vld [vmem:[%s13648_s26 + $0x1d04] ss:$48 sps:$4 sm:$0xff]  }
 0x409   : > { %8484 = vmatpush2.bf16.msra.mxu1 %v12837_v60  ;;  %8494 = vmatprep.subr.bf16.mxu0 %v12842_v61  ;;  %v12905_v60 = vld [vmem:[%s13648_s26 + $0x2304] ss:$48 sps:$4 sm:$0xff]   ;;  %v12900_v61 = vld [vmem:[%s13648_s26 + $0x1d00] ss:$48 sps:$4 sm:$0xff]  }
 0x40a   : > { %8535 = vmatprep.subr.bf16.mxu1 %v12845_v62  ;;  %v12903_v62 = vld [vmem:[%s13648_s26 + $0x2300] ss:$48 sps:$4 sm:$0xff]  }
 0x40b   : > { %v14721_v3 = vpop.f32.mrf.mxu0  ;;  %8445 = vmatmul.mubr.bf16.vlgmr.msra.gmra.mxu0 %v13827_v21 }
 0x40c   : > { %v14723_v4 = vpop.f32.mrf.mxu1  ;;  %8486 = vmatmul.mubr.bf16.vlgmr.msra.gmra.mxu1 %v13829_v22  ;;  %8495 = vmatpush1.bf16.msra.mxu0 %v12840_v63  ;;  %v12908_v63 = vld [vmem:[%s13648_s26 + $0x1ca4] ss:$48 sps:$4 sm:$0xff]  }
 0x40d   : > { %8536 = vmatpush1.bf16.msra.mxu1 %v12843_v1  ;;  %v14729_v46 = vpop.f32.mrf.mxu0  ;;  %8496 = vmatprep.subr.bf16.mxu0 %v12848_v29  ;;  %v12911_v1 = vld [vmem:[%s13648_s26 + $0x22a4] ss:$48 sps:$4 sm:$0xff]   ;;  %v12906_v29 = vld [vmem:[%s13648_s26 + $0x1ca0] ss:$48 sps:$4 sm:$0xff]  }
 0x40e   : > { %v14731_v5 = vpop.f32.mrf.mxu1  ;;  %8537 = vmatprep.subr.bf16.mxu1 %v12851_v28  ;;  %8526 = vmatprep.mubr.bf16.mxu0 %v13840_v30  ;;  %v12909_v28 = vld [vmem:[%s13648_s26 + $0x22a0] ss:$48 sps:$4 sm:$0xff]  }
 0x40f   : > { %8567 = vmatprep.mubr.bf16.mxu1 %v13844_v33  ;;  %v8204_v37 = vpop.f32.mrf.mxu0 }
 0x410   : > { %v8245_v11 = vpop.f32.mrf.mxu1  ;;  %8497 = vmatpush1.bf16.msra.mxu0 %v12846_v31  ;;  %v12914_v31 = vld [vmem:[%s13648_s26 + $0x1c44] ss:$48 sps:$4 sm:$0xff]  }
 0x411   : > { %8538 = vmatpush1.bf16.msra.mxu1 %v12849_v35  ;;  %v8205_v2 = vpop.f32.mrf.mxu0  ;;  %8498 = vmatprep.subr.bf16.mxu0 %v12854_v7  ;;  %v12917_v35 = vld [vmem:[%s13648_s26 + $0x2244] ss:$48 sps:$4 sm:$0xff]   ;;  %v12912_v7 = vld [vmem:[%s13648_s26 + $0x1c40] ss:$48 sps:$4 sm:$0xff]  }
 0x412   : > { %v8246_v14 = vpop.f32.mrf.mxu1  ;;  %8539 = vmatprep.subr.bf16.mxu1 %v12857_v8  ;;  %v12915_v8 = vld [vmem:[%s13648_s26 + $0x2240] ss:$48 sps:$4 sm:$0xff]   ;;  %v12920_v37 = vld [vmem:[%s13648_s26 + $0x1be4] ss:$48 sps:$4 sm:$0xff]  }
 0x413   : > { %v12923_v11 = vld [vmem:[%s13648_s26 + $0x21e4] ss:$48 sps:$4 sm:$0xff]  }
 0x414   : > { %8499 = vmatpush1.bf16.msra.mxu0 %v12852_v12  ;;  %v12918_v12 = vld [vmem:[%s13648_s26 + $0x1be0] ss:$48 sps:$4 sm:$0xff]   ;;  %v12926_v2 = vld [vmem:[%s13648_s26 + $0x1b84] ss:$48 sps:$4 sm:$0xff]  }
 0x415   : > { %8540 = vmatpush1.bf16.msra.mxu1 %v12855_v13  ;;  %8500 = vmatprep.subr.bf16.mxu0 %v12860_v15  ;;  %v12921_v13 = vld [vmem:[%s13648_s26 + $0x21e0] ss:$48 sps:$4 sm:$0xff]   ;;  %v12929_v14 = vld [vmem:[%s13648_s26 + $0x2184] ss:$48 sps:$4 sm:$0xff]  }
 0x416   : > { %8541 = vmatprep.subr.bf16.mxu1 %v12863_v16  ;;  %v12924_v15 = vld [vmem:[%s13648_s26 + $0x1b80] ss:$48 sps:$4 sm:$0xff]  }
 0x417   : > { %v12927_v16 = vld [vmem:[%s13648_s26 + $0x2180] ss:$48 sps:$4 sm:$0xff]  }
 0x418   : > { %8501 = vmatpush1.bf16.msra.mxu0 %v12858_v17  ;;  %v12932_v17 = vld [vmem:[%s13648_s26 + $0x1b24] ss:$48 sps:$4 sm:$0xff]  }
 0x419   : > { %8542 = vmatpush1.bf16.msra.mxu1 %v12861_v18  ;;  %8502 = vmatprep.subr.bf16.mxu0 %v12866_v19  ;;  %v12935_v18 = vld [vmem:[%s13648_s26 + $0x2124] ss:$48 sps:$4 sm:$0xff]   ;;  %v12930_v19 = vld [vmem:[%s13648_s26 + $0x1b20] ss:$48 sps:$4 sm:$0xff]  }
 0x41a   : > { %8543 = vmatprep.subr.bf16.mxu1 %v12869_v20  ;;  %v12933_v20 = vld [vmem:[%s13648_s26 + $0x2120] ss:$48 sps:$4 sm:$0xff]  }
 0x41c   : > { %8503 = vmatpush1.bf16.msra.mxu0 %v12864_v23  ;;  %v12938_v23 = vld [vmem:[%s13648_s26 + $0x2cc] ss:$48 sps:$4 sm:$0xff]  }
 0x41d   : > { %8544 = vmatpush1.bf16.msra.mxu1 %v12867_v24  ;;  %8504 = vmatprep.subr.bf16.mxu0 %v12872_v25  ;;  %v12941_v24 = vld [vmem:[%s13648_s26 + $0x8cc] ss:$48 sps:$4 sm:$0xff]   ;;  %v8201_v25 = vadd.f32 %v14721_v3, %v14651_v43  ;;  %v12942_v3 = vld [vmem:[%s13648_s26 + $0x268] ss:$48 sps:$4 sm:$0xff]  }
 0x41e   : > { %8545 = vmatprep.subr.bf16.mxu1 %v12875_v26  ;;  %v8203_v26 = vadd.f32 %v14729_v46, %v14657_v27  ;;  %v12945_v46 = vld [vmem:[%s13648_s26 + $0x868] ss:$48 sps:$4 sm:$0xff]  }
 0x420   : > { %8505 = vmatpush1.bf16.msra.mxu0 %v12870_v32  ;;  %v12936_v32 = vld [vmem:[%s13648_s26 + $0x2c8] ss:$48 sps:$4 sm:$0xff]   ;;  %v8244_v43 = vadd.f32 %v14731_v5, %v8203_v26  ;;  %v12995_v26 = vld [vmem:[%s13648_s26 + $0xb6c] ss:$48 sps:$4 sm:$0xff]  }
 0x421   : > { %8546 = vmatpush1.bf16.msra.mxu1 %v12873_v34  ;;  %8506 = vmatprep.subr.bf16.mxu0 %v12878_v39  ;;  %v12939_v34 = vld [vmem:[%s13648_s26 + $0x8c8] ss:$48 sps:$4 sm:$0xff]   ;;  %v12944_v39 = vld [vmem:[%s13648_s26 + $0x26c] ss:$48 sps:$4 sm:$0xff]  }
 0x422   : > { %8547 = vmatprep.subr.bf16.mxu1 %v12881_v36  ;;  %v12947_v36 = vld [vmem:[%s13648_s26 + $0x86c] ss:$48 sps:$4 sm:$0xff]  }
 0x423   : > { %v429_v5 = vld [vmem:[#allocation2 + $0x38] sm:$0xff] }
 0x424   : > { %8507 = vmatpush1.bf16.msra.mxu0 %v12876_v6  ;;  %v8242_v6 = vadd.f32 %v14723_v4, %v8201_v25  ;;  %v12950_v4 = vld [vmem:[%s13648_s26 + $0x20c] ss:$48 sps:$4 sm:$0xff]  }
 0x425   : > { %8548 = vmatpush1.bf16.msra.mxu1 %v12879_v0  ;;  %8508 = vmatprep.subr.bf16.mxu0 %v12884_v44  ;;  %v12992_v25 = vld [vmem:[%s13648_s26 + $0x56c] ss:$48 sps:$4 sm:$0xff]  }
 0x426   : > { %8549 = vmatprep.subr.bf16.mxu1 %v12887_v45  ;;  %v428_v45 = vld [vmem:[#allocation2 + $0x8] sm:$0xff] }
 0x428   : > { %8509 = vmatpush1.bf16.msra.mxu0 %v12882_v47 }
 0x429   : > { %8550 = vmatpush1.bf16.msra.mxu1 %v12885_v48  ;;  %8510 = vmatprep.subr.bf16.mxu0 %v12890_v49  ;;  %v12953_v49 = vld [vmem:[%s13648_s26 + $0x80c] ss:$48 sps:$4 sm:$0xff]  }
 0x42a   : > { %8551 = vmatprep.subr.bf16.mxu1 %v12893_v51 }
 0x42c   : > { %8511 = vmatpush2.bf16.msra.mxu0 %v12888_v52 }
 0x42d   : > { %8552 = vmatpush2.bf16.msra.mxu1 %v12891_v54  ;;  %8512 = vmatprep.subr.bf16.mxu0 %v12896_v55 }
 0x42e   : > { %8553 = vmatprep.subr.bf16.mxu1 %v12899_v56 }
 0x430   : > { %8513 = vmatpush2.bf16.msra.mxu0 %v12894_v57 }
 0x431   : > { %8554 = vmatpush2.bf16.msra.mxu1 %v12897_v58  ;;  %8514 = vmatprep.subr.bf16.mxu0 %v12902_v59  ;;  %v12948_v58 = vld [vmem:[%s13648_s26 + $0x208] ss:$48 sps:$4 sm:$0xff]  }
 0x432   : > { %8555 = vmatprep.subr.bf16.mxu1 %v12905_v60  ;;  %v12951_v59 = vld [vmem:[%s13648_s26 + $0x808] ss:$48 sps:$4 sm:$0xff]  }
 0x434   : > { %8515 = vmatpush2.bf16.msra.mxu0 %v12900_v61 }
 0x435   : > { %8556 = vmatpush2.bf16.msra.mxu1 %v12903_v62  ;;  %8516 = vmatprep.subr.bf16.mxu0 %v12908_v63  ;;  %v12954_v63 = vld [vmem:[%s13648_s26 + $0x1a8] ss:$48 sps:$4 sm:$0xff]  }
 0x436   : > { %8557 = vmatprep.subr.bf16.mxu1 %v12911_v1  ;;  %v12957_v1 = vld [vmem:[%s13648_s26 + $0x7a8] ss:$48 sps:$4 sm:$0xff]  }
 0x438   : > { %8517 = vmatpush2.bf16.msra.mxu0 %v12906_v29  ;;  %v12962_v29 = vld [vmem:[%s13648_s26 + $0x14c] ss:$48 sps:$4 sm:$0xff]  }
 0x439   : > { %8558 = vmatpush2.bf16.msra.mxu1 %v12909_v28  ;;  %8518 = vmatprep.subr.bf16.mxu0 %v12914_v31  ;;  %v12965_v28 = vld [vmem:[%s13648_s26 + $0x74c] ss:$48 sps:$4 sm:$0xff]   ;;  %v12960_v31 = vld [vmem:[%s13648_s26 + $0x148] ss:$48 sps:$4 sm:$0xff]  }
 0x43a   : > { %8559 = vmatprep.subr.bf16.mxu1 %v12917_v35  ;;  %v12963_v35 = vld [vmem:[%s13648_s26 + $0x748] ss:$48 sps:$4 sm:$0xff]  }
 0x43c   : > { %8519 = vmatpush2.bf16.msra.mxu0 %v12912_v7  ;;  %v12968_v7 = vld [vmem:[%s13648_s26 + $0xec] ss:$48 sps:$4 sm:$0xff]  }
 0x43d   : > { %8560 = vmatpush2.bf16.msra.mxu1 %v12915_v8  ;;  %8520 = vmatprep.subr.bf16.mxu0 %v12920_v37  ;;  %v12971_v8 = vld [vmem:[%s13648_s26 + $0x6ec] ss:$48 sps:$4 sm:$0xff]   ;;  %v12966_v37 = vld [vmem:[%s13648_s26 + $0xe8] ss:$48 sps:$4 sm:$0xff]  }
 0x43e   : > { %8561 = vmatprep.subr.bf16.mxu1 %v12923_v11  ;;  %v12969_v11 = vld [vmem:[%s13648_s26 + $0x6e8] ss:$48 sps:$4 sm:$0xff]  }
 0x440   : > { %8521 = vmatpush2.bf16.msra.mxu0 %v12918_v12  ;;  %v12974_v12 = vld [vmem:[%s13648_s26 + $0x8c] ss:$48 sps:$4 sm:$0xff]  }
 0x441   : > { %8562 = vmatpush2.bf16.msra.mxu1 %v12921_v13  ;;  %8522 = vmatprep.subr.bf16.mxu0 %v12926_v2  ;;  %v12977_v13 = vld [vmem:[%s13648_s26 + $0x68c] ss:$48 sps:$4 sm:$0xff]   ;;  %v12972_v2 = vld [vmem:[%s13648_s26 + $0x88] ss:$48 sps:$4 sm:$0xff]  }
 0x442   : > { %8563 = vmatprep.subr.bf16.mxu1 %v12929_v14  ;;  %v12975_v14 = vld [vmem:[%s13648_s26 + $0x688] ss:$48 sps:$4 sm:$0xff]  }
 0x444   : > { %8523 = vmatpush2.bf16.msra.mxu0 %v12924_v15  ;;  %v12980_v15 = vld [vmem:[%s13648_s26 + $0x2c] ss:$48 sps:$4 sm:$0xff]  }
 0x445   : > { %8564 = vmatpush2.bf16.msra.mxu1 %v12927_v16  ;;  %8524 = vmatprep.subr.bf16.mxu0 %v12932_v17  ;;  %v12983_v16 = vld [vmem:[%s13648_s26 + $0x62c] ss:$48 sps:$4 sm:$0xff]   ;;  %v12978_v17 = vld [vmem:[%s13648_s26 + $0x28] ss:$48 sps:$4 sm:$0xff]  }
 0x446   : > { %8565 = vmatprep.subr.bf16.mxu1 %v12935_v18  ;;  %v12981_v18 = vld [vmem:[%s13648_s26 + $0x628] ss:$48 sps:$4 sm:$0xff]  }
 0x448   : > { %8525 = vmatpush2.bf16.msra.mxu0 %v12930_v19  ;;  %v12986_v19 = vld [vmem:[%s13648_s26 + $0x5cc] ss:$48 sps:$4 sm:$0xff]  }
 0x449   : > { %8566 = vmatpush2.bf16.msra.mxu1 %v12933_v20  ;;  %8576 = vmatprep.subr.bf16.mxu0 %v12938_v23  ;;  %v12989_v20 = vld [vmem:[%s13648_s26 + $0xbcc] ss:$48 sps:$4 sm:$0xff]   ;;  %v12984_v23 = vld [vmem:[%s13648_s26 + $0x5c8] ss:$48 sps:$4 sm:$0xff]  }
 0x44a   : > { %8617 = vmatprep.subr.bf16.mxu1 %v12941_v24  ;;  %v12987_v24 = vld [vmem:[%s13648_s26 + $0xbc8] ss:$48 sps:$4 sm:$0xff]  }
 0x44b   : > { %v8282_v0 = vpop.f32.mrf.mxu0  ;;  %8527 = vmatmul.mubr.bf16.vlgmr.msra.gmra.mxu0 %v13907_v40 }
 0x44c   : > { %v8323_v44 = vpop.f32.mrf.mxu1  ;;  %8568 = vmatmul.mubr.bf16.vlgmr.msra.gmra.mxu1 %v13909_v42  ;;  %v8283_v27 = vadd.f32 %v8282_v0, %v8242_v6  ;;  %8577 = vmatpush1.bf16.msra.mxu0 %v12936_v32  ;;  %v12990_v32 = vld [vmem:[%s13648_s26 + $0x568] ss:$48 sps:$4 sm:$0xff]  }
 0x44d   : > { %8618 = vmatpush1.bf16.msra.mxu1 %v12939_v34  ;;  %v8284_v47 = vpop.f32.mrf.mxu0  ;;  %8578 = vmatprep.subr.bf16.mxu0 %v12944_v39  ;;  %v12993_v34 = vld [vmem:[%s13648_s26 + $0xb68] ss:$48 sps:$4 sm:$0xff]   ;;  %v12998_v39 = vld [vmem:[%s13648_s26 + $0x50c] ss:$48 sps:$4 sm:$0xff]  }
 0x44e   : > { %v8325_v48 = vpop.f32.mrf.mxu1  ;;  %8619 = vmatprep.subr.bf16.mxu1 %v12947_v36  ;;  %v8324_v51 = vadd.f32 %v8323_v44, %v8283_v27  ;;  %v8285_v52 = vadd.f32 %v8284_v47, %v8244_v43  ;;  %8608 = vmatprep.mubr.bf16.mxu0 %v13720_v50  ;;  %v12956_v50 = vld [vmem:[%s13648_s26 + $0x1ac] ss:$48 sps:$4 sm:$0xff]   ;;  %v12996_v6 = vld [vmem:[%s13648_s26 + $0x508] ss:$48 sps:$4 sm:$0xff]  }
 0x44f   : > { %8649 = vmatprep.mubr.bf16.mxu1 %v13724_v53  ;;  %v8286_v54 = vpop.f32.mrf.mxu0  ;;  %v12959_v53 = vld [vmem:[%s13648_s26 + $0x7ac] ss:$48 sps:$4 sm:$0xff]   ;;  %v12999_v0 = vld [vmem:[%s13648_s26 + $0xb08] ss:$48 sps:$4 sm:$0xff]  }
 0x450   : > { %v8327_v55 = vpop.f32.mrf.mxu1  ;;  %v8828_v56 = vadd.f32 %v8324_v51, %v428_v45  ;;  %v8326_v57 = vadd.f32 %v8325_v48, %v8285_v52  ;;  %8579 = vmatpush1.bf16.msra.mxu0 %v12942_v3  ;;  %v13001_v36 = vld [vmem:[%s13648_s26 + $0xb0c] ss:$48 sps:$4 sm:$0xff]   ;;  %v13002_v27 = vld [vmem:[%s13648_s26 + $0x4a8] ss:$48 sps:$4 sm:$0xff]  }
 0x451   : > { %8620 = vmatpush1.bf16.msra.mxu1 %v12945_v46  ;;  %v8287_v60 = vpop.f32.mrf.mxu0  ;;  %8580 = vmatprep.subr.bf16.mxu0 %v12950_v4  ;;  %v13004_v44 = vld [vmem:[%s13648_s26 + $0x4ac] ss:$48 sps:$4 sm:$0xff]   ;;  %v13005_v3 = vld [vmem:[%s13648_s26 + $0xaa8] ss:$48 sps:$4 sm:$0xff]  }
 0x452   : > { %v8328_v61 = vpop.f32.mrf.mxu1  ;;  %8621 = vmatprep.subr.bf16.mxu1 %v12953_v49  ;;  %8840 = vst [vmem:[#allocation2 + $0x8] sm:$0xff] %v8828_v56  ;;  %v8829_v62 = vadd.f32 %v8326_v57, %v429_v5  ;;  %v13007_v43 = vld [vmem:[%s13648_s26 + $0xaac] ss:$48 sps:$4 sm:$0xff]   ;;  %v13008_v47 = vld [vmem:[%s13648_s26 + $0x448] ss:$48 sps:$4 sm:$0xff]  }
 0x453   : > { %v13010_v46 = vld [vmem:[%s13648_s26 + $0x44c] ss:$48 sps:$4 sm:$0xff]   ;;  %v13011_v48 = vld [vmem:[%s13648_s26 + $0xa48] ss:$48 sps:$4 sm:$0xff]  }
 0x454   : > { %8841 = vst [vmem:[#allocation2 + $0x38] sm:$0xff] %v8829_v62  ;;  %8581 = vmatpush1.bf16.msra.mxu0 %v12948_v58  ;;  %v13013_v45 = vld [vmem:[%s13648_s26 + $0xa4c] ss:$48 sps:$4 sm:$0xff]   ;;  %v13014_v51 = vld [vmem:[%s13648_s26 + $0x3e8] ss:$48 sps:$4 sm:$0xff]  }
 0x455   : > { %8622 = vmatpush1.bf16.msra.mxu1 %v12951_v59  ;;  %8582 = vmatprep.subr.bf16.mxu0 %v12956_v50  ;;  %v13016_v4 = vld [vmem:[%s13648_s26 + $0x3ec] ss:$48 sps:$4 sm:$0xff]   ;;  %v13017_v52 = vld [vmem:[%s13648_s26 + $0x9e8] ss:$48 sps:$4 sm:$0xff]  }
 0x456   : > { %8623 = vmatprep.subr.bf16.mxu1 %v12959_v53  ;;  %v13019_v49 = vld [vmem:[%s13648_s26 + $0x9ec] ss:$48 sps:$4 sm:$0xff]   ;;  %v13020_v55 = vld [vmem:[%s13648_s26 + $0x388] ss:$48 sps:$4 sm:$0xff]  }
 0x457   : > { %v13022_v5 = vld [vmem:[%s13648_s26 + $0x38c] ss:$48 sps:$4 sm:$0xff]   ;;  %v13023_v56 = vld [vmem:[%s13648_s26 + $0x988] ss:$48 sps:$4 sm:$0xff]  }
 0x458   : > { %8583 = vmatpush1.bf16.msra.mxu0 %v12954_v63  ;;  %v13025_v54 = vld [vmem:[%s13648_s26 + $0x98c] ss:$48 sps:$4 sm:$0xff]   ;;  %v13026_v59 = vld [vmem:[%s13648_s26 + $0x328] ss:$48 sps:$4 sm:$0xff]  }
 0x459   : > { %8624 = vmatpush1.bf16.msra.mxu1 %v12957_v1  ;;  %8584 = vmatprep.subr.bf16.mxu0 %v12962_v29  ;;  %v13028_v57 = vld [vmem:[%s13648_s26 + $0x32c] ss:$48 sps:$4 sm:$0xff]   ;;  %v13029_v60 = vld [vmem:[%s13648_s26 + $0x928] ss:$48 sps:$4 sm:$0xff]  }
 0x45a   : > { %8625 = vmatprep.subr.bf16.mxu1 %v12965_v28  ;;  %v13031_v58 = vld [vmem:[%s13648_s26 + $0x92c] ss:$48 sps:$4 sm:$0xff]   ;;  %v13032_v53 = vld [vmem:[%s13648_s26 + $0xec8] ss:$48 sps:$4 sm:$0xff]  }
 0x45b   : > { %v13034_v61 = vld [vmem:[%s13648_s26 + $0xecc] ss:$48 sps:$4 sm:$0xff]   ;;  %v13035_v62 = vld [vmem:[%s13648_s26 + $0x14c8] ss:$48 sps:$4 sm:$0xff]  }
 0x45c   : > { %8585 = vmatpush1.bf16.msra.mxu0 %v12960_v31  ;;  %v13037_v50 = vld [vmem:[%s13648_s26 + $0x14cc] ss:$48 sps:$4 sm:$0xff]  }
 0x45d   : > { %8626 = vmatpush1.bf16.msra.mxu1 %v12963_v35  ;;  %8586 = vmatprep.subr.bf16.mxu0 %v12968_v7  ;;  %v13040_v63 = vld [vmem:[%s13648_s26 + $0xe6c] ss:$48 sps:$4 sm:$0xff]   ;;  %v13038_v35 = vld [vmem:[%s13648_s26 + $0xe68] ss:$48 sps:$4 sm:$0xff]  }
 0x45e   : > { %8627 = vmatprep.subr.bf16.mxu1 %v12971_v8  ;;  %v13043_v1 = vld [vmem:[%s13648_s26 + $0x146c] ss:$48 sps:$4 sm:$0xff]   ;;  %v13041_v7 = vld [vmem:[%s13648_s26 + $0x1468] ss:$48 sps:$4 sm:$0xff]  }
 0x460   : > { %8587 = vmatpush1.bf16.msra.mxu0 %v12966_v37 }
 0x461   : > { %8628 = vmatpush1.bf16.msra.mxu1 %v12969_v11  ;;  %8588 = vmatprep.subr.bf16.mxu0 %v12974_v12  ;;  %v13046_v11 = vld [vmem:[%s13648_s26 + $0xe0c] ss:$48 sps:$4 sm:$0xff]  }
 0x462   : > { %8629 = vmatprep.subr.bf16.mxu1 %v12977_v13  ;;  %v13049_v12 = vld [vmem:[%s13648_s26 + $0x140c] ss:$48 sps:$4 sm:$0xff]  }
 0x464   : > { %8589 = vmatpush1.bf16.msra.mxu0 %v12972_v2  ;;  %v13044_v2 = vld [vmem:[%s13648_s26 + $0xe08] ss:$48 sps:$4 sm:$0xff]  }
 0x465   : > { %8630 = vmatpush1.bf16.msra.mxu1 %v12975_v14  ;;  %8590 = vmatprep.subr.bf16.mxu0 %v12980_v15  ;;  %v13047_v14 = vld [vmem:[%s13648_s26 + $0x1408] ss:$48 sps:$4 sm:$0xff]  }
 0x466   : > { %8631 = vmatprep.subr.bf16.mxu1 %v12983_v16 }
 0x468   : > { %8591 = vmatpush1.bf16.msra.mxu0 %v12978_v17  ;;  %v13052_v17 = vld [vmem:[%s13648_s26 + $0xdac] ss:$48 sps:$4 sm:$0xff]  }
 0x469   : > { %8632 = vmatpush1.bf16.msra.mxu1 %v12981_v18  ;;  %8592 = vmatprep.subr.bf16.mxu0 %v12986_v19  ;;  %v13053_v18 = vld [vmem:[%s13648_s26 + $0x13a8] ss:$48 sps:$4 sm:$0xff]   ;;  %v13058_v19 = vld [vmem:[%s13648_s26 + $0xd4c] ss:$48 sps:$4 sm:$0xff]  }
 0x46a   : > { %8633 = vmatprep.subr.bf16.mxu1 %v12989_v20  ;;  %v13061_v20 = vld [vmem:[%s13648_s26 + $0x134c] ss:$48 sps:$4 sm:$0xff]  }
 0x46c   : > { %8593 = vmatpush2.bf16.msra.mxu0 %v12984_v23  ;;  %v13056_v23 = vld [vmem:[%s13648_s26 + $0xd48] ss:$48 sps:$4 sm:$0xff]  }
 0x46d   : > { %8634 = vmatpush2.bf16.msra.mxu1 %v12987_v24  ;;  %8594 = vmatprep.subr.bf16.mxu0 %v12992_v25  ;;  %v13059_v24 = vld [vmem:[%s13648_s26 + $0x1348] ss:$48 sps:$4 sm:$0xff]   ;;  %v13064_v25 = vld [vmem:[%s13648_s26 + $0xcec] ss:$48 sps:$4 sm:$0xff]  }
 0x46e   : > { %8635 = vmatprep.subr.bf16.mxu1 %v12995_v26  ;;  %v13067_v26 = vld [vmem:[%s13648_s26 + $0x12ec] ss:$48 sps:$4 sm:$0xff]  }
 0x470   : > { %8595 = vmatpush2.bf16.msra.mxu0 %v12990_v32  ;;  %v13062_v32 = vld [vmem:[%s13648_s26 + $0xce8] ss:$48 sps:$4 sm:$0xff]  }
 0x471   : > { %8636 = vmatpush2.bf16.msra.mxu1 %v12993_v34  ;;  %8596 = vmatprep.subr.bf16.mxu0 %v12998_v39  ;;  %v13065_v34 = vld [vmem:[%s13648_s26 + $0x12e8] ss:$48 sps:$4 sm:$0xff]   ;;  %v13070_v39 = vld [vmem:[%s13648_s26 + $0xc8c] ss:$48 sps:$4 sm:$0xff]  }
 0x472   : > { %8637 = vmatprep.subr.bf16.mxu1 %v13001_v36  ;;  %v13073_v36 = vld [vmem:[%s13648_s26 + $0x128c] ss:$48 sps:$4 sm:$0xff]  }
 0x474   : > { %8597 = vmatpush2.bf16.msra.mxu0 %v12996_v6  ;;  %v13068_v6 = vld [vmem:[%s13648_s26 + $0xc88] ss:$48 sps:$4 sm:$0xff]  }
 0x475   : > { %8638 = vmatpush2.bf16.msra.mxu1 %v12999_v0  ;;  %8598 = vmatprep.subr.bf16.mxu0 %v13004_v44  ;;  %v13071_v0 = vld [vmem:[%s13648_s26 + $0x1288] ss:$48 sps:$4 sm:$0xff]   ;;  %v13076_v44 = vld [vmem:[%s13648_s26 + $0xc2c] ss:$48 sps:$4 sm:$0xff]  }
 0x476   : > { %8639 = vmatprep.subr.bf16.mxu1 %v13007_v43  ;;  %v13079_v43 = vld [vmem:[%s13648_s26 + $0x122c] ss:$48 sps:$4 sm:$0xff]  }
 0x478   : > { %8599 = vmatpush2.bf16.msra.mxu0 %v13002_v27  ;;  %v13074_v27 = vld [vmem:[%s13648_s26 + $0xc28] ss:$48 sps:$4 sm:$0xff]  }
 0x479   : > { %8640 = vmatpush2.bf16.msra.mxu1 %v13005_v3  ;;  %8600 = vmatprep.subr.bf16.mxu0 %v13010_v46  ;;  %v13077_v3 = vld [vmem:[%s13648_s26 + $0x1228] ss:$48 sps:$4 sm:$0xff]   ;;  %v13082_v46 = vld [vmem:[%s13648_s26 + $0x11cc] ss:$48 sps:$4 sm:$0xff]  }
 0x47a   : > { %8641 = vmatprep.subr.bf16.mxu1 %v13013_v45  ;;  %v13085_v45 = vld [vmem:[%s13648_s26 + $0x17cc] ss:$48 sps:$4 sm:$0xff]  }
 0x47c   : > { %8601 = vmatpush2.bf16.msra.mxu0 %v13008_v47  ;;  %v13080_v47 = vld [vmem:[%s13648_s26 + $0x11c8] ss:$48 sps:$4 sm:$0xff]  }
 0x47d   : > { %8642 = vmatpush2.bf16.msra.mxu1 %v13011_v48  ;;  %8602 = vmatprep.subr.bf16.mxu0 %v13016_v4  ;;  %v13083_v48 = vld [vmem:[%s13648_s26 + $0x17c8] ss:$48 sps:$4 sm:$0xff]   ;;  %v13088_v4 = vld [vmem:[%s13648_s26 + $0x116c] ss:$48 sps:$4 sm:$0xff]  }
 0x47e   : > { %8643 = vmatprep.subr.bf16.mxu1 %v13019_v49  ;;  %v13091_v49 = vld [vmem:[%s13648_s26 + $0x176c] ss:$48 sps:$4 sm:$0xff]  }
 0x480   : > { %8603 = vmatpush2.bf16.msra.mxu0 %v13014_v51  ;;  %v13086_v51 = vld [vmem:[%s13648_s26 + $0x1168] ss:$48 sps:$4 sm:$0xff]  }
 0x481   : > { %8644 = vmatpush2.bf16.msra.mxu1 %v13017_v52  ;;  %8604 = vmatprep.subr.bf16.mxu0 %v13022_v5  ;;  %v13089_v52 = vld [vmem:[%s13648_s26 + $0x1768] ss:$48 sps:$4 sm:$0xff]   ;;  %v13094_v5 = vld [vmem:[%s13648_s26 + $0x110c] ss:$48 sps:$4 sm:$0xff]  }
 0x482   : > { %8645 = vmatprep.subr.bf16.mxu1 %v13025_v54  ;;  %v13097_v54 = vld [vmem:[%s13648_s26 + $0x170c] ss:$48 sps:$4 sm:$0xff]  }
 0x484   : > { %8605 = vmatpush2.bf16.msra.mxu0 %v13020_v55  ;;  %v13092_v55 = vld [vmem:[%s13648_s26 + $0x1108] ss:$48 sps:$4 sm:$0xff]  }
 0x485   : > { %8646 = vmatpush2.bf16.msra.mxu1 %v13023_v56  ;;  %8606 = vmatprep.subr.bf16.mxu0 %v13028_v57  ;;  %v13095_v56 = vld [vmem:[%s13648_s26 + $0x1708] ss:$48 sps:$4 sm:$0xff]   ;;  %v13100_v57 = vld [vmem:[%s13648_s26 + $0x10ac] ss:$48 sps:$4 sm:$0xff]  }
 0x486   : > { %8647 = vmatprep.subr.bf16.mxu1 %v13031_v58  ;;  %v13103_v58 = vld [vmem:[%s13648_s26 + $0x16ac] ss:$48 sps:$4 sm:$0xff]  }
 0x488   : > { %8607 = vmatpush2.bf16.msra.mxu0 %v13026_v59  ;;  %v13098_v59 = vld [vmem:[%s13648_s26 + $0x10a8] ss:$48 sps:$4 sm:$0xff]  }
 0x489   : > { %8648 = vmatpush2.bf16.msra.mxu1 %v13029_v60  ;;  %8658 = vmatprep.subr.bf16.mxu0 %v13034_v61  ;;  %v13101_v60 = vld [vmem:[%s13648_s26 + $0x16a8] ss:$48 sps:$4 sm:$0xff]   ;;  %v13106_v61 = vld [vmem:[%s13648_s26 + $0x104c] ss:$48 sps:$4 sm:$0xff]  }
 0x48a   : > { %8699 = vmatprep.subr.bf16.mxu1 %v13037_v50  ;;  %v13109_v50 = vld [vmem:[%s13648_s26 + $0x164c] ss:$48 sps:$4 sm:$0xff]  }
 0x48b   : > { %v8364_v29 = vpop.f32.mrf.mxu0  ;;  %8609 = vmatmul.mubr.bf16.vlgmr.msra.gmra.mxu0 %v13747_v9 }
 0x48c   : > { %v8405_v28 = vpop.f32.mrf.mxu1  ;;  %8650 = vmatmul.mubr.bf16.vlgmr.msra.gmra.mxu1 %v13749_v10  ;;  %8659 = vmatpush1.bf16.msra.mxu0 %v13032_v53  ;;  %v13104_v53 = vld [vmem:[%s13648_s26 + $0x1048] ss:$48 sps:$4 sm:$0xff]  }
 0x48d   : > { %v14873_v31 = vadd.f32 %v8405_v28, %v8364_v29  ;;  %8700 = vmatpush1.bf16.msra.mxu1 %v13035_v62  ;;  %v8366_v8 = vpop.f32.mrf.mxu0  ;;  %8660 = vmatprep.subr.bf16.mxu0 %v13040_v63  ;;  %v13107_v62 = vld [vmem:[%s13648_s26 + $0x1648] ss:$48 sps:$4 sm:$0xff]   ;;  %v13112_v63 = vld [vmem:[%s13648_s26 + $0xfec] ss:$48 sps:$4 sm:$0xff]  }
 0x48e   : > { %v8407_v37 = vpop.f32.mrf.mxu1  ;;  %8701 = vmatprep.subr.bf16.mxu1 %v13043_v1  ;;  %8690 = vmatprep.mubr.bf16.mxu0 %v13780_v38  ;;  %v13055_v38 = vld [vmem:[%s13648_s26 + $0x13ac] ss:$48 sps:$4 sm:$0xff]   ;;  %v13110_v29 = vld [vmem:[%s13648_s26 + $0xfe8] ss:$48 sps:$4 sm:$0xff]  }
 0x48f   : > { %v14879_v13 = vadd.f32 %v8407_v37, %v8366_v8  ;;  %8731 = vmatprep.mubr.bf16.mxu1 %v13784_v41  ;;  %v8368_v9 = vpop.f32.mrf.mxu0  ;;  %v13050_v41 = vld [vmem:[%s13648_s26 + $0xda8] ss:$48 sps:$4 sm:$0xff]   ;;  %v13115_v1 = vld [vmem:[%s13648_s26 + $0x15ec] ss:$48 sps:$4 sm:$0xff]  }
 0x490   : > { %v8409_v10 = vpop.f32.mrf.mxu1  ;;  %8661 = vmatpush1.bf16.msra.mxu0 %v13038_v35  ;;  %v13113_v28 = vld [vmem:[%s13648_s26 + $0x15e8] ss:$48 sps:$4 sm:$0xff]   ;;  %v13118_v35 = vld [vmem:[%s13648_s26 + $0xf8c] ss:$48 sps:$4 sm:$0xff]  }
 0x491   : > { %8702 = vmatpush1.bf16.msra.mxu1 %v13041_v7  ;;  %v8369_v15 = vpop.f32.mrf.mxu0  ;;  %8662 = vmatprep.subr.bf16.mxu0 %v13046_v11  ;;  %v13121_v7 = vld [vmem:[%s13648_s26 + $0x158c] ss:$48 sps:$4 sm:$0xff]   ;;  %v13116_v8 = vld [vmem:[%s13648_s26 + $0xf88] ss:$48 sps:$4 sm:$0xff]  }
 0x492   : > { %v8410_v16 = vpop.f32.mrf.mxu1  ;;  %8703 = vmatprep.subr.bf16.mxu1 %v13049_v12  ;;  %v13119_v37 = vld [vmem:[%s13648_s26 + $0x1588] ss:$48 sps:$4 sm:$0xff]   ;;  %v13124_v11 = vld [vmem:[%s13648_s26 + $0xf2c] ss:$48 sps:$4 sm:$0xff]  }
 0x493   : > { %v13127_v12 = vld [vmem:[%s13648_s26 + $0x152c] ss:$48 sps:$4 sm:$0xff]   ;;  %v13122_v9 = vld [vmem:[%s13648_s26 + $0xf28] ss:$48 sps:$4 sm:$0xff]  }
 0x494   : > { %8663 = vmatpush1.bf16.msra.mxu0 %v13044_v2  ;;  %v13125_v10 = vld [vmem:[%s13648_s26 + $0x1528] ss:$48 sps:$4 sm:$0xff]   ;;  %v13130_v2 = vld [vmem:[%s13648_s26 + $0x1acc] ss:$48 sps:$4 sm:$0xff]  }
 0x495   : > { %8704 = vmatpush1.bf16.msra.mxu1 %v13047_v14  ;;  %8664 = vmatprep.subr.bf16.mxu0 %v13052_v17  ;;  %v13133_v14 = vld [vmem:[%s13648_s26 + $0x20cc] ss:$48 sps:$4 sm:$0xff]   ;;  %v13128_v15 = vld [vmem:[%s13648_s26 + $0x1ac8] ss:$48 sps:$4 sm:$0xff]  }
 0x496   : > { %8705 = vmatprep.subr.bf16.mxu1 %v13055_v38  ;;  %v13131_v16 = vld [vmem:[%s13648_s26 + $0x20c8] ss:$48 sps:$4 sm:$0xff]   ;;  %v13136_v17 = vld [vmem:[%s13648_s26 + $0x1a6c] ss:$48 sps:$4 sm:$0xff]  }
 0x497   : > { %v13139_v38 = vld [vmem:[%s13648_s26 + $0x206c] ss:$48 sps:$4 sm:$0xff]  }
 0x498   : > { %8665 = vmatpush1.bf16.msra.mxu0 %v13050_v41 }
 0x499   : > { %8706 = vmatpush1.bf16.msra.mxu1 %v13053_v18  ;;  %8666 = vmatprep.subr.bf16.mxu0 %v13058_v19  ;;  %v13134_v19 = vld [vmem:[%s13648_s26 + $0x1a68] ss:$48 sps:$4 sm:$0xff]  }
 0x49a   : > { %8707 = vmatprep.subr.bf16.mxu1 %v13061_v20  ;;  %v13137_v20 = vld [vmem:[%s13648_s26 + $0x2068] ss:$48 sps:$4 sm:$0xff]  }
 0x49c   : > { %8667 = vmatpush1.bf16.msra.mxu0 %v13056_v23 }
 0x49d   : > { %8708 = vmatpush1.bf16.msra.mxu1 %v13059_v24  ;;  %8668 = vmatprep.subr.bf16.mxu0 %v13064_v25  ;;  %v13142_v25 = vld [vmem:[%s13648_s26 + $0x1a0c] ss:$48 sps:$4 sm:$0xff]  }
 0x49e   : > { %8709 = vmatprep.subr.bf16.mxu1 %v13067_v26  ;;  %v13145_v26 = vld [vmem:[%s13648_s26 + $0x200c] ss:$48 sps:$4 sm:$0xff]  }
 0x4a0   : > { %8669 = vmatpush1.bf16.msra.mxu0 %v13062_v32  ;;  %v13140_v32 = vld [vmem:[%s13648_s26 + $0x1a08] ss:$48 sps:$4 sm:$0xff]  }
 0x4a1   : > { %8710 = vmatpush1.bf16.msra.mxu1 %v13065_v34  ;;  %8670 = vmatprep.subr.bf16.mxu0 %v13070_v39  ;;  %v13143_v34 = vld [vmem:[%s13648_s26 + $0x2008] ss:$48 sps:$4 sm:$0xff]  }
 0x4a2   : > { %8711 = vmatprep.subr.bf16.mxu1 %v13073_v36 }
 0x4a4   : > { %8671 = vmatpush1.bf16.msra.mxu0 %v13068_v6  ;;  %v13148_v6 = vld [vmem:[%s13648_s26 + $0x19ac] ss:$48 sps:$4 sm:$0xff]  }
 0x4a5   : > { %8712 = vmatpush1.bf16.msra.mxu1 %v13071_v0  ;;  %8672 = vmatprep.subr.bf16.mxu0 %v13076_v44  ;;  %v13149_v0 = vld [vmem:[%s13648_s26 + $0x1fa8] ss:$48 sps:$4 sm:$0xff]   ;;  %v13154_v44 = vld [vmem:[%s13648_s26 + $0x194c] ss:$48 sps:$4 sm:$0xff]  }
 0x4a6   : > { %8713 = vmatprep.subr.bf16.mxu1 %v13079_v43  ;;  %v13157_v43 = vld [vmem:[%s13648_s26 + $0x1f4c] ss:$48 sps:$4 sm:$0xff]  }
 0x4a8   : > { %8673 = vmatpush1.bf16.msra.mxu0 %v13074_v27  ;;  %v13152_v27 = vld [vmem:[%s13648_s26 + $0x1948] ss:$48 sps:$4 sm:$0xff]  }
 0x4a9   : > { %8714 = vmatpush1.bf16.msra.mxu1 %v13077_v3  ;;  %8674 = vmatprep.subr.bf16.mxu0 %v13082_v46  ;;  %v13155_v3 = vld [vmem:[%s13648_s26 + $0x1f48] ss:$48 sps:$4 sm:$0xff]   ;;  %v13160_v46 = vld [vmem:[%s13648_s26 + $0x18ec] ss:$48 sps:$4 sm:$0xff]  }
 0x4aa   : > { %8715 = vmatprep.subr.bf16.mxu1 %v13085_v45  ;;  %v13163_v45 = vld [vmem:[%s13648_s26 + $0x1eec] ss:$48 sps:$4 sm:$0xff]  }
 0x4ac   : > { %8675 = vmatpush2.bf16.msra.mxu0 %v13080_v47  ;;  %v13158_v47 = vld [vmem:[%s13648_s26 + $0x18e8] ss:$48 sps:$4 sm:$0xff]  }
 0x4ad   : > { %8716 = vmatpush2.bf16.msra.mxu1 %v13083_v48  ;;  %8676 = vmatprep.subr.bf16.mxu0 %v13088_v4  ;;  %v13161_v48 = vld [vmem:[%s13648_s26 + $0x1ee8] ss:$48 sps:$4 sm:$0xff]   ;;  %v13166_v4 = vld [vmem:[%s13648_s26 + $0x188c] ss:$48 sps:$4 sm:$0xff]  }
 0x4ae   : > { %8717 = vmatprep.subr.bf16.mxu1 %v13091_v49  ;;  %v13169_v49 = vld [vmem:[%s13648_s26 + $0x1e8c] ss:$48 sps:$4 sm:$0xff]  }
 0x4b0   : > { %8677 = vmatpush2.bf16.msra.mxu0 %v13086_v51  ;;  %v13164_v51 = vld [vmem:[%s13648_s26 + $0x1888] ss:$48 sps:$4 sm:$0xff]  }
 0x4b1   : > { %8718 = vmatpush2.bf16.msra.mxu1 %v13089_v52  ;;  %8678 = vmatprep.subr.bf16.mxu0 %v13094_v5  ;;  %v13167_v52 = vld [vmem:[%s13648_s26 + $0x1e88] ss:$48 sps:$4 sm:$0xff]   ;;  %v13172_v5 = vld [vmem:[%s13648_s26 + $0x182c] ss:$48 sps:$4 sm:$0xff]  }
 0x4b2   : > { %8719 = vmatprep.subr.bf16.mxu1 %v13097_v54  ;;  %v13175_v54 = vld [vmem:[%s13648_s26 + $0x1e2c] ss:$48 sps:$4 sm:$0xff]  }
 0x4b4   : > { %8679 = vmatpush2.bf16.msra.mxu0 %v13092_v55  ;;  %v13170_v55 = vld [vmem:[%s13648_s26 + $0x1828] ss:$48 sps:$4 sm:$0xff]  }
 0x4b5   : > { %8720 = vmatpush2.bf16.msra.mxu1 %v13095_v56  ;;  %8680 = vmatprep.subr.bf16.mxu0 %v13100_v57  ;;  %v13173_v56 = vld [vmem:[%s13648_s26 + $0x1e28] ss:$48 sps:$4 sm:$0xff]   ;;  %v13178_v57 = vld [vmem:[%s13648_s26 + $0x1dcc] ss:$48 sps:$4 sm:$0xff]  }
 0x4b6   : > { %8721 = vmatprep.subr.bf16.mxu1 %v13103_v58  ;;  %v13181_v58 = vld [vmem:[%s13648_s26 + $0x23cc] ss:$48 sps:$4 sm:$0xff]  }
 0x4b8   : > { %8681 = vmatpush2.bf16.msra.mxu0 %v13098_v59  ;;  %v13176_v59 = vld [vmem:[%s13648_s26 + $0x1dc8] ss:$48 sps:$4 sm:$0xff]  }
 0x4b9   : > { %8722 = vmatpush2.bf16.msra.mxu1 %v13101_v60  ;;  %8682 = vmatprep.subr.bf16.mxu0 %v13106_v61  ;;  %v13179_v60 = vld [vmem:[%s13648_s26 + $0x23c8] ss:$48 sps:$4 sm:$0xff]   ;;  %v13184_v61 = vld [vmem:[%s13648_s26 + $0x1d6c] ss:$48 sps:$4 sm:$0xff]  }
 0x4ba   : > { %8723 = vmatprep.subr.bf16.mxu1 %v13109_v50  ;;  %v13187_v50 = vld [vmem:[%s13648_s26 + $0x236c] ss:$48 sps:$4 sm:$0xff]  }
 0x4bc   : > { %8683 = vmatpush2.bf16.msra.mxu0 %v13104_v53  ;;  %v13182_v53 = vld [vmem:[%s13648_s26 + $0x1d68] ss:$48 sps:$4 sm:$0xff]  }
 0x4bd   : > { %8724 = vmatpush2.bf16.msra.mxu1 %v13107_v62  ;;  %8684 = vmatprep.subr.bf16.mxu0 %v13112_v63  ;;  %v13185_v62 = vld [vmem:[%s13648_s26 + $0x2368] ss:$48 sps:$4 sm:$0xff]   ;;  %v13190_v63 = vld [vmem:[%s13648_s26 + $0x1d0c] ss:$48 sps:$4 sm:$0xff]  }
 0x4be   : > { %8725 = vmatprep.subr.bf16.mxu1 %v13115_v1  ;;  %v13193_v1 = vld [vmem:[%s13648_s26 + $0x230c] ss:$48 sps:$4 sm:$0xff]  }
 0x4c0   : > { %8685 = vmatpush2.bf16.msra.mxu0 %v13110_v29  ;;  %v13188_v29 = vld [vmem:[%s13648_s26 + $0x1d08] ss:$48 sps:$4 sm:$0xff]  }
 0x4c1   : > { %8726 = vmatpush2.bf16.msra.mxu1 %v13113_v28  ;;  %8686 = vmatprep.subr.bf16.mxu0 %v13118_v35  ;;  %v13191_v28 = vld [vmem:[%s13648_s26 + $0x2308] ss:$48 sps:$4 sm:$0xff]   ;;  %v13196_v35 = vld [vmem:[%s13648_s26 + $0x1cac] ss:$48 sps:$4 sm:$0xff]  }
 0x4c2   : > { %8727 = vmatprep.subr.bf16.mxu1 %v13121_v7  ;;  %v13199_v7 = vld [vmem:[%s13648_s26 + $0x22ac] ss:$48 sps:$4 sm:$0xff]  }
 0x4c4   : > { %8687 = vmatpush2.bf16.msra.mxu0 %v13116_v8  ;;  %v13194_v8 = vld [vmem:[%s13648_s26 + $0x1ca8] ss:$48 sps:$4 sm:$0xff]  }
 0x4c5   : > { %8728 = vmatpush2.bf16.msra.mxu1 %v13119_v37  ;;  %8688 = vmatprep.subr.bf16.mxu0 %v13124_v11  ;;  %v13197_v37 = vld [vmem:[%s13648_s26 + $0x22a8] ss:$48 sps:$4 sm:$0xff]   ;;  %v13202_v11 = vld [vmem:[%s13648_s26 + $0x1c4c] ss:$48 sps:$4 sm:$0xff]  }
 0x4c6   : > { %8729 = vmatprep.subr.bf16.mxu1 %v13127_v12  ;;  %v13205_v12 = vld [vmem:[%s13648_s26 + $0x224c] ss:$48 sps:$4 sm:$0xff]  }
 0x4c8   : > { %8689 = vmatpush2.bf16.msra.mxu0 %v13122_v9  ;;  %v13200_v9 = vld [vmem:[%s13648_s26 + $0x1c48] ss:$48 sps:$4 sm:$0xff]  }
 0x4c9   : > { %8730 = vmatpush2.bf16.msra.mxu1 %v13125_v10  ;;  %8740 = vmatprep.subr.bf16.mxu0 %v13130_v2  ;;  %v13203_v10 = vld [vmem:[%s13648_s26 + $0x2248] ss:$48 sps:$4 sm:$0xff]   ;;  %v13208_v2 = vld [vmem:[%s13648_s26 + $0x1bec] ss:$48 sps:$4 sm:$0xff]  }
 0x4ca   : > { %8781 = vmatprep.subr.bf16.mxu1 %v13133_v14  ;;  %v13211_v14 = vld [vmem:[%s13648_s26 + $0x21ec] ss:$48 sps:$4 sm:$0xff]  }
 0x4cb   : > { %v14943_v41 = vpop.f32.mrf.mxu0  ;;  %8691 = vmatmul.mubr.bf16.vlgmr.msra.gmra.mxu0 %v13827_v21 }
 0x4cc   : > { %v14945_v18 = vpop.f32.mrf.mxu1  ;;  %8732 = vmatmul.mubr.bf16.vlgmr.msra.gmra.mxu1 %v13829_v22  ;;  %8741 = vmatpush1.bf16.msra.mxu0 %v13128_v15  ;;  %v13206_v15 = vld [vmem:[%s13648_s26 + $0x1be8] ss:$48 sps:$4 sm:$0xff]  }
 0x4cd   : > { %8782 = vmatpush1.bf16.msra.mxu1 %v13131_v16  ;;  %v14951_v23 = vpop.f32.mrf.mxu0  ;;  %8742 = vmatprep.subr.bf16.mxu0 %v13136_v17  ;;  %v13209_v16 = vld [vmem:[%s13648_s26 + $0x21e8] ss:$48 sps:$4 sm:$0xff]   ;;  %v13214_v17 = vld [vmem:[%s13648_s26 + $0x1b8c] ss:$48 sps:$4 sm:$0xff]  }
 0x4ce   : > { %v14953_v24 = vpop.f32.mrf.mxu1  ;;  %8783 = vmatprep.subr.bf16.mxu1 %v13139_v38  ;;  %8772 = vmatprep.mubr.bf16.mxu0 %v13840_v30  ;;  %v13151_v30 = vld [vmem:[%s13648_s26 + $0x1fac] ss:$48 sps:$4 sm:$0xff]  }
 0x4cf   : > { %8813 = vmatprep.mubr.bf16.mxu1 %v13844_v33  ;;  %v8450_v21 = vpop.f32.mrf.mxu0  ;;  %v13146_v33 = vld [vmem:[%s13648_s26 + $0x19a8] ss:$48 sps:$4 sm:$0xff]   ;;  %v13217_v38 = vld [vmem:[%s13648_s26 + $0x218c] ss:$48 sps:$4 sm:$0xff]  }
 0x4d0   : > { %v8491_v22 = vpop.f32.mrf.mxu1  ;;  %8743 = vmatpush1.bf16.msra.mxu0 %v13134_v19  ;;  %v13212_v19 = vld [vmem:[%s13648_s26 + $0x1b88] ss:$48 sps:$4 sm:$0xff]  }
 0x4d1   : > { %8784 = vmatpush1.bf16.msra.mxu1 %v13137_v20  ;;  %v8451_v39 = vpop.f32.mrf.mxu0  ;;  %8744 = vmatprep.subr.bf16.mxu0 %v13142_v25  ;;  %v13215_v20 = vld [vmem:[%s13648_s26 + $0x2188] ss:$48 sps:$4 sm:$0xff]   ;;  %v13220_v25 = vld [vmem:[%s13648_s26 + $0x1b2c] ss:$48 sps:$4 sm:$0xff]  }
 0x4d2   : > { %v8492_v36 = vpop.f32.mrf.mxu1  ;;  %8785 = vmatprep.subr.bf16.mxu1 %v13145_v26  ;;  %v13223_v26 = vld [vmem:[%s13648_s26 + $0x212c] ss:$48 sps:$4 sm:$0xff]   ;;  %v13218_v21 = vld [vmem:[%s13648_s26 + $0x1b28] ss:$48 sps:$4 sm:$0xff]  }
 0x4d3   : > { %v13221_v22 = vld [vmem:[%s13648_s26 + $0x2128] ss:$48 sps:$4 sm:$0xff]  }
 0x4d4   : > { %8745 = vmatpush1.bf16.msra.mxu0 %v13140_v32  ;;  %v8447_v32 = vadd.f32 %v14943_v41, %v14873_v31 }
 0x4d5   : > { %8786 = vmatpush1.bf16.msra.mxu1 %v13143_v34  ;;  %8746 = vmatprep.subr.bf16.mxu0 %v13148_v6  ;;  %v8449_v34 = vadd.f32 %v14951_v23, %v14879_v13 }
 0x4d6   : > { %8787 = vmatprep.subr.bf16.mxu1 %v13151_v30  ;;  %v8488_v39 = vadd.f32 %v14945_v18, %v8447_v32 }
 0x4d7   : > { %v8490_v30 = vadd.f32 %v14953_v24, %v8449_v34 }
 0x4d8   : > { %8747 = vmatpush1.bf16.msra.mxu0 %v13146_v33 }
 0x4d9   : > { %8788 = vmatpush1.bf16.msra.mxu1 %v13149_v0  ;;  %8748 = vmatprep.subr.bf16.mxu0 %v13154_v44  ;;  %v430_v0 = vld [vmem:[#allocation2 + $0x28] sm:$0xff] }
 0x4da   : > { %8789 = vmatprep.subr.bf16.mxu1 %v13157_v43 }
 0x4dc   : > { %8749 = vmatpush1.bf16.msra.mxu0 %v13152_v27  ;;  %v431_v27 = vld [vmem:[#allocation2 + $0x48] sm:$0xff] }
 0x4dd   : > { %8790 = vmatpush1.bf16.msra.mxu1 %v13155_v3  ;;  %8750 = vmatprep.subr.bf16.mxu0 %v13160_v46 }
 0x4de   : > { %8791 = vmatprep.subr.bf16.mxu1 %v13163_v45 }
 0x4e0   : > { %8751 = vmatpush1.bf16.msra.mxu0 %v13158_v47 }
 0x4e1   : > { %8792 = vmatpush1.bf16.msra.mxu1 %v13161_v48  ;;  %8752 = vmatprep.subr.bf16.mxu0 %v13166_v4 }
 0x4e2   : > { %8793 = vmatprep.subr.bf16.mxu1 %v13169_v49 }
 0x4e4   : > { %8753 = vmatpush1.bf16.msra.mxu0 %v13164_v51 }
 0x4e5   : > { %8794 = vmatpush1.bf16.msra.mxu1 %v13167_v52  ;;  %8754 = vmatprep.subr.bf16.mxu0 %v13172_v5 }
 0x4e6   : > { %8795 = vmatprep.subr.bf16.mxu1 %v13175_v54 }
 0x4e8   : > { %8755 = vmatpush1.bf16.msra.mxu0 %v13170_v55 }
 0x4e9   : > { %8796 = vmatpush1.bf16.msra.mxu1 %v13173_v56  ;;  %8756 = vmatprep.subr.bf16.mxu0 %v13178_v57 }
 0x4ea   : > { %8797 = vmatprep.subr.bf16.mxu1 %v13181_v58 }
 0x4ec   : > { %8757 = vmatpush2.bf16.msra.mxu0 %v13176_v59 }
 0x4ed   : > { %8798 = vmatpush2.bf16.msra.mxu1 %v13179_v60  ;;  %8758 = vmatprep.subr.bf16.mxu0 %v13184_v61 }
 0x4ee   : > { %8799 = vmatprep.subr.bf16.mxu1 %v13187_v50 }
 0x4f0   : > { %8759 = vmatpush2.bf16.msra.mxu0 %v13182_v53 }
 0x4f1   : > { %8800 = vmatpush2.bf16.msra.mxu1 %v13185_v62  ;;  %8760 = vmatprep.subr.bf16.mxu0 %v13190_v63 }
 0x4f2   : > { %8801 = vmatprep.subr.bf16.mxu1 %v13193_v1 }
 0x4f4   : > { %8761 = vmatpush2.bf16.msra.mxu0 %v13188_v29 }
 0x4f5   : > { %8802 = vmatpush2.bf16.msra.mxu1 %v13191_v28  ;;  %8762 = vmatprep.subr.bf16.mxu0 %v13196_v35 }
 0x4f6   : > { %8803 = vmatprep.subr.bf16.mxu1 %v13199_v7  ;;  %v432_v7 = vld [vmem:[#allocation2 + $0x10] sm:$0xff] }
 0x4f8   : > { %8763 = vmatpush2.bf16.msra.mxu0 %v13194_v8 }
 0x4f9   : > { %8804 = vmatpush2.bf16.msra.mxu1 %v13197_v37  ;;  %8764 = vmatprep.subr.bf16.mxu0 %v13202_v11 }
 0x4fa   : > { %8805 = vmatprep.subr.bf16.mxu1 %v13205_v12 }
 0x4fc   : > { %8765 = vmatpush2.bf16.msra.mxu0 %v13200_v9  ;;  %v433_v9 = vld [vmem:[#allocation2 + $0x40] sm:$0xff] }
 0x4fd   : > { %8806 = vmatpush2.bf16.msra.mxu1 %v13203_v10  ;;  %8766 = vmatprep.subr.bf16.mxu0 %v13208_v2 }
 0x4fe   : > { %8807 = vmatprep.subr.bf16.mxu1 %v13211_v14 }
 0x500   : > { %8767 = vmatpush2.bf16.msra.mxu0 %v13206_v15 }
 0x501   : > { %8808 = vmatpush2.bf16.msra.mxu1 %v13209_v16  ;;  %8768 = vmatprep.subr.bf16.mxu0 %v13214_v17 }
 0x502   : > { %8809 = vmatprep.subr.bf16.mxu1 %v13217_v38 }
 0x504   : > { %8769 = vmatpush2.bf16.msra.mxu0 %v13212_v19 }
 0x505   : > { %8810 = vmatpush2.bf16.msra.mxu1 %v13215_v20  ;;  %8770 = vmatprep.subr.bf16.mxu0 %v13220_v25 }
 0x506   : > { %8811 = vmatprep.subr.bf16.mxu1 %v13223_v26 }
 0x508   : > { %8771 = vmatpush2.bf16.msra.mxu0 %v13218_v21 }
 0x509   : > { %8812 = vmatpush2.bf16.msra.mxu1 %v13221_v22 }
 0x50b   : > { %v8528_v36 = vpop.f32.mrf.mxu0  ;;  %8773 = vmatmul.mubr.bf16.vlgmr.msra.gmra.mxu0 %v13907_v40 }
 0x50c   : > { %v8569_v6 = vpop.f32.mrf.mxu1  ;;  %8814 = vmatmul.mubr.bf16.vlgmr.msra.gmra.mxu1 %v13909_v42  ;;  %v8529_v33 = vadd.f32 %v8528_v36, %v8488_v39 }
 0x50d   : > { %v8530_v44 = vpop.f32.mrf.mxu0 }
 0x50e   : > { %v8571_v43 = vpop.f32.mrf.mxu1  ;;  %v8570_v31 = vadd.f32 %v8569_v6, %v8529_v33  ;;  %v8531_v41 = vadd.f32 %v8530_v44, %v8490_v30 }
 0x50f   : > { %v8532_v13 = vpop.f32.mrf.mxu0 }
 0x510   : > { %v8573_v23 = vpop.f32.mrf.mxu1  ;;  %v8830_v3 = vadd.f32 %v8570_v31, %v430_v0  ;;  %v8572_v46 = vadd.f32 %v8571_v43, %v8531_v41 }
 0x511   : > { %v8533_v18 = vpop.f32.mrf.mxu0 }
 0x512   : > { %v8574_v45 = vpop.f32.mrf.mxu1  ;;  %8842 = vst [vmem:[#allocation2 + $0x28] sm:$0xff] %v8830_v3  ;;  %v8831_v47 = vadd.f32 %v8572_v46, %v431_v27 }
 0x514   : > { %8843 = vst [vmem:[#allocation2 + $0x48] sm:$0xff] %v8831_v47 }
 0x54b   : > { %v8610_v40 = vpop.f32.mrf.mxu0 }
 0x54c   : > { %v8651_v42 = vpop.f32.mrf.mxu1 }
 0x54d   : > { %v8652_v48 = vadd.f32 %v8651_v42, %v8610_v40  ;;  %v8612_v24 = vpop.f32.mrf.mxu0 }
 0x54e   : > { %v8653_v4 = vpop.f32.mrf.mxu1 }
 0x54f   : > { %v8654_v49 = vadd.f32 %v8653_v4, %v8612_v24  ;;  %v8614_v51 = vpop.f32.mrf.mxu0 }
 0x550   : > { %v8655_v52 = vpop.f32.mrf.mxu1 }
 0x551   : > { %v8615_v5 = vpop.f32.mrf.mxu0 }
 0x552   : > { %v8656_v54 = vpop.f32.mrf.mxu1 }
 0x58b   : > { %v8692_v55 = vpop.f32.mrf.mxu0 }
 0x58c   : > { %v8733_v56 = vpop.f32.mrf.mxu1  ;;  %v8693_v53 = vadd.f32 %v8692_v55, %v8652_v48 }
 0x58d   : > { %v8694_v57 = vpop.f32.mrf.mxu0 }
 0x58e   : > { %v8735_v58 = vpop.f32.mrf.mxu1  ;;  %v8695_v62 = vadd.f32 %v8694_v57, %v8654_v49  ;;  %v8734_v63 = vadd.f32 %v8733_v56, %v8693_v53 }
 0x58f   : > { %v8696_v59 = vpop.f32.mrf.mxu0 }
 0x590   : > { %v8737_v60 = vpop.f32.mrf.mxu1  ;;  %v8736_v28 = vadd.f32 %v8735_v58, %v8695_v62 }
 0x591   : > { %v8697_v61 = vpop.f32.mrf.mxu0 }
 0x592   : > { %v8738_v50 = vpop.f32.mrf.mxu1 }
 0x5cb   : > { %v8774_v1 = vpop.f32.mrf.mxu0 }
 0x5cc   : > { %v8815_v29 = vpop.f32.mrf.mxu1  ;;  %v8775_v35 = vadd.f32 %v8774_v1, %v8734_v63 }
 0x5cd   : > { %v8776_v8 = vpop.f32.mrf.mxu0 }
 0x5ce   : > { %v8817_v37 = vpop.f32.mrf.mxu1  ;;  %v8816_v11 = vadd.f32 %v8815_v29, %v8775_v35  ;;  %v8777_v12 = vadd.f32 %v8776_v8, %v8736_v28 }
 0x5cf   : > { %v8778_v10 = vpop.f32.mrf.mxu0 }
 0x5d0   : > { %v8819_v2 = vpop.f32.mrf.mxu1  ;;  %v8832_v14 = vadd.f32 %v8816_v11, %v432_v7  ;;  %v8818_v15 = vadd.f32 %v8817_v37, %v8777_v12  ;;  %8849 = sbr.rel (%p11161_p13) target bundleno = 2576 (0xa10), region = 80 }
 0x5d1   : > { %v8779_v16 = vpop.f32.mrf.mxu0 }
 0x5d2   : > { %v8820_v17 = vpop.f32.mrf.mxu1  ;;  %8844 = vst [vmem:[#allocation2 + $0x10] sm:$0xff] %v8832_v14  ;;  %v8833_v38 = vadd.f32 %v8818_v15, %v433_v9 }
 0x5d4   : > { %8845 = vst [vmem:[#allocation2 + $0x40] sm:$0xff] %v8833_v38 }
 0x5d5   : > { %v8866_v19 = vlaneseq  ;;  %v8862_v25 = vld [vmem:[#allocation10] sm:$0xff]  ;;  %v8850_v34 = vld [vmem:[#allocation2 + $0x30] sm:$0xff]  ;;  %v8852_v0 = vld [vmem:[#allocation2 + $0x58] sm:$0xff]  ;;  %vm9873_vm15 = vcmask 7168  }
 0x5d6   : > { %v8851_v39 = vld [vmem:[#allocation2] sm:$0xff]  ;;  %v8853_v31 = vld [vmem:[#allocation2 + $0x18] sm:$0xff]  ;;  %v8854_v46 = vld [vmem:[#allocation2 + $0x50] sm:$0xff] }
 0x5d7   : > { %v15023_v20 = vshrl.u32 %v8866_v19, 7  ;;  %v8855_v42 = vld [vmem:[#allocation2 + $0x20] sm:$0xff]  ;;  %v8856_v49 = vld [vmem:[#allocation2 + $0x8] sm:$0xff]  ;;  %v8857_v55 = vld [vmem:[#allocation2 + $0x38] sm:$0xff] }
 0x5d8   : > { %v8863_v51 = vld [vmem:[#allocation10 + $0x8] sm:$0xf] }
 0x5d9   : > { %v8868_v26 = vsub.s32 0, %v15023_v20  ;;  %v8872_v21 = vsub.s32 1, %v15023_v20  ;;  %v8876_v22 = vsub.s32 2, %v15023_v20  ;;  %v8880_v32 = vsub.s32 3, %v15023_v20  ;;  %v8858_v59 = vld [vmem:[#allocation2 + $0x28] sm:$0xff]  ;;  %v8860_v29 = vld [vmem:[#allocation2 + $0x10] sm:$0xff] }
 0x5da   : > { %v8884_v33 = vsub.s32 4, %v15023_v20  ;;  %v8888_v43 = vsub.s32 5, %v15023_v20  ;;  %v8892_v23 = vsub.s32 6, %v15023_v20  ;;  %v8896_v45 = vsub.s32 7, %v15023_v20  ;;  %v8859_v53 = vld [vmem:[#allocation2 + $0x48] sm:$0xff] }
 0x5db   : > { %v8869_v36 = vrot.slane %v8862_v25, %v8868_v26  ;;  %v8873_v6 = vrot.slane %v8862_v25, %v8872_v21  ;;  %v8877_v30 = vrot.slane %v8862_v25, %v8876_v22  ;;  %v8881_v44 = vrot.slane %v8862_v25, %v8880_v32  ;;  %v8861_v8 = vld [vmem:[#allocation2 + $0x40] sm:$0xff] }
 0x5dc   : > { %v8885_v13 = vrot.slane %v8862_v25, %v8884_v33  ;;  %v8889_v18 = vrot.slane %v8862_v25, %v8888_v43  ;;  %v8893_v48 = vrot.slane %v8862_v25, %v8892_v23  ;;  %v8897_v52 = vrot.slane %v8862_v25, %v8896_v45 }
 0x5dd   : > { %v8926_v41 = vadd.f32 %v8869_v36, %v8850_v34  ;;  %v8927_v27 = vadd.f32 %v8873_v6, %v8851_v39  ;;  %v8928_v3 = vadd.f32 %v8877_v30, %v8852_v0  ;;  %v8929_v47 = vadd.f32 %v8881_v44, %v8853_v31 }
 0x5de   : > { %v8930_v24 = vadd.f32 %v8885_v13, %v8854_v46  ;;  %v8931_v5 = vadd.f32 %v8889_v18, %v8855_v42  ;;  %v8901_v56 = vrot.slane %v8863_v51, %v8868_v26  ;;  %v8932_v57 = vadd.f32 %v8893_v48, %v8856_v49 }
 0x5df   : > { %v8938_v40 = vadd.f32 %v8927_v27, %v8926_v41  ;;  %v8905_v60 = vrot.slane %v8863_v51, %v8872_v21  ;;  %v8933_v61 = vadd.f32 %v8897_v52, %v8857_v55  ;;  %v8909_v62 = vrot.slane %v8863_v51, %v8876_v22 }
 0x5e0   : > { %v8934_v63 = vadd.f32 %v8901_v56, %v8858_v59  ;;  %v8913_v28 = vrot.slane %v8863_v51, %v8880_v32  ;;  %v9264_v59 = vld [vmem:[#allocation11 + $0xf8] sm:$0xff] }
 0x5e1   : > { %v8939_v4 = vadd.f32 %v8938_v40, %v8928_v3  ;;  %v8935_v35 = vadd.f32 %v8905_v60, %v8859_v53  ;;  %v8936_v37 = vadd.f32 %v8909_v62, %v8860_v29  ;;  %v9296_v60 = vld [vmem:[#allocation11 + $0x1f8] sm:$0xff]  ;;  %11180 = vmatprep.subr.mxu0 %v9264_v59  ;;  %v9263_v53 = vld [vmem:[#allocation11 + $0xf0] sm:$0xff]  ;;  %v9262_v29 = vld [vmem:[#allocation11 + $0xe8] sm:$0xff] }
 0x5e2   : > { %v8937_v12 = vadd.f32 %v8913_v28, %v8861_v8  ;;  %11215 = vmatprep.subr.mxu1 %v9296_v60  ;;  %v9295_v62 = vld [vmem:[#allocation11 + $0x1f0] sm:$0xff]  ;;  %v9294_v28 = vld [vmem:[#allocation11 + $0x1e8] sm:$0xff]  ;;  %v9261_v8 = vld [vmem:[#allocation11 + $0xe0] sm:$0xff] }
 0x5e3   : > { %v8940_v54 = vadd.f32 %v8939_v4, %v8929_v47  ;;  %v9236_v59 = vld [vmem:[#allocation11 + $0x18] sm:$0xff] }
 0x5e4   : > { %v9268_v60 = vld [vmem:[#allocation11 + $0x118] sm:$0xff] }
 0x5e5   : > { %v8941_v58 = vadd.f32 %v8940_v54, %v8930_v24 }
 0x5e7   : > { %v8942_v50 = vadd.f32 %v8941_v58, %v8931_v5 }
 0x5e9   : > { %v8943_v1 = vadd.f32 %v8942_v50, %v8932_v57  ;;  %v9280_v50 = vld [vmem:[#allocation11 + $0x178] sm:$0xff] }
 0x5ea   : > { %11216 = vmatpush3.msra.mxu1 %v9280_v50  ;;  %v9283_v50 = vld [vmem:[#allocation11 + $0x190] sm:$0xff] }
 0x5eb   : > { %v8944_v7 = vadd.f32 %v8943_v1, %v8933_v61  ;;  %11217 = vmatprep.subr.mxu1 %v9295_v62  ;;  %v9279_v1 = vld [vmem:[#allocation11 + $0x170] sm:$0xff] }
 0x5ec   : > { %11218 = vmatpush3.msra.mxu1 %v9279_v1  ;;  %v9267_v62 = vld [vmem:[#allocation11 + $0x110] sm:$0xff]  ;;  %v9282_v1 = vld [vmem:[#allocation11 + $0x188] sm:$0xff] }
 0x5ed   : > { %v8945_v11 = vadd.f32 %v8944_v7, %v8934_v63  ;;  %11219 = vmatprep.subr.mxu1 %v9294_v28  ;;  %v9278_v7 = vld [vmem:[#allocation11 + $0x168] sm:$0xff] }
 0x5ee   : > { %11220 = vmatpush3.msra.mxu1 %v9278_v7  ;;  %v9266_v28 = vld [vmem:[#allocation11 + $0x108] sm:$0xff]  ;;  %v9281_v7 = vld [vmem:[#allocation11 + $0x180] sm:$0xff] }
 0x5ef   : > { %v8946_v9 = vadd.f32 %v8945_v11, %v8935_v35  ;;  %v9245_v11 = vld [vmem:[#allocation11 + $0x60] sm:$0xff] }
 0x5f1   : > { %v8947_v10 = vadd.f32 %v8946_v9, %v8936_v37  ;;  %v9260_v9 = vld [vmem:[#allocation11 + $0xd8] sm:$0xff] }
 0x5f3   : > { %v8948_v2 = vadd.f32 %v8947_v10, %v8937_v12  ;;  %v9292_v10 = vld [vmem:[#allocation11 + $0x1d8] sm:$0xff] }
 0x5f5   : > { %8949 = vadd.xlane.f32.xlu0 %v8948_v2  ;;  %v9244_v2 = vld [vmem:[#allocation11 + $0x58] sm:$0xff] }
 0x67e   : > { %v8950_v14 = vpop.xlane.xlu0 %8949 }
 0x67f   : > { %v8951_v15 = vrot.slane %v8950_v14, 4 }
 0x681   : > { %v8952_v16 = vadd.f32 %v8951_v15, %v8950_v14  ;;  %v9276_v14 = vld [vmem:[#allocation11 + $0x158] sm:$0xff]  ;;  %v9259_v15 = vld [vmem:[#allocation11 + $0xd0] sm:$0xff] }
 0x683   : > { %v8953_v17 = vrot.slane %v8952_v16, 2 }
 0x685   : > { %v8954_v38 = vadd.f32 %v8953_v17, %v8952_v16  ;;  %v9291_v16 = vld [vmem:[#allocation11 + $0x1d0] sm:$0xff] }
 0x686   : > { %v9243_v17 = vld [vmem:[#allocation11 + $0x50] sm:$0xff] }
 0x687   : > { %v8955_v25 = vrot.slane %v8954_v38, 1 }
 0x689   : > { %v8956_v26 = vadd.f32 %v8955_v25, %v8954_v38  ;;  %v9275_v38 = vld [vmem:[#allocation11 + $0x150] sm:$0xff]  ;;  %v9258_v25 = vld [vmem:[#allocation11 + $0xc8] sm:$0xff] }
 0x68b   : > { %v8958_v21 = vmul.f32 8.138021e-05, %v8956_v26  ;;  %v9290_v26 = vld [vmem:[#allocation11 + $0x1c8] sm:$0xff] }
 0x68d   : > { %v15033_v22 = vsub.f32 %v8926_v41, %v8958_v21  ;;  %v15035_v32 = vsub.f32 %v8927_v27, %v8958_v21  ;;  %v15037_v34 = vsub.f32 %v8928_v3, %v8958_v21  ;;  %v15043_v6 = vsub.f32 %v8929_v47, %v8958_v21 }
 0x68e   : > { %v15045_v30 = vsub.f32 %v8930_v24, %v8958_v21  ;;  %v15049_v44 = vsub.f32 %v8931_v5, %v8958_v21  ;;  %v15053_v41 = vsub.f32 %v8932_v57, %v8958_v21  ;;  %v15057_v23 = vsub.f32 %v8933_v61, %v8958_v21  ;;  %v9248_v61 = vld [vmem:[#allocation11 + $0x78] sm:$0xff] }
 0x68f   : > { %v8971_v39 = vmul.f32 %v15033_v22, %v15033_v22  ;;  %v8972_v36 = vmul.f32 %v15035_v32, %v15035_v32  ;;  %v8973_v33 = vmul.f32 %v15037_v34, %v15037_v34  ;;  %v8974_v43 = vmul.f32 %v15043_v6, %v15043_v6  ;;  %11181 = vmatpush3.msra.mxu0 %v9248_v61  ;;  %v9251_v61 = vld [vmem:[#allocation11 + $0x90] sm:$0xff] }
 0x690   : > { %v8975_v27 = vmul.f32 %v15045_v30, %v15045_v30  ;;  %v8976_v3 = vmul.f32 %v15049_v44, %v15049_v44  ;;  %v15061_v18 = vsub.f32 %v8934_v63, %v8958_v21  ;;  %v8977_v45 = vmul.f32 %v15053_v41, %v15053_v41  ;;  %11182 = vmatprep.subr.mxu0 %v9263_v53  ;;  %v9247_v63 = vld [vmem:[#allocation11 + $0x70] sm:$0xff] }
 0x691   : > { %v8983_v0 = vadd.f32 %v8972_v36, %v8971_v39  ;;  %v15065_v40 = vsub.f32 %v8935_v35, %v8958_v21  ;;  %v8978_v42 = vmul.f32 %v15057_v23, %v15057_v23  ;;  %v15069_v24 = vsub.f32 %v8936_v37, %v8958_v21  ;;  %11183 = vmatpush3.msra.mxu0 %v9247_v63  ;;  %v9246_v35 = vld [vmem:[#allocation11 + $0x68] sm:$0xff]  ;;  %v9293_v37 = vld [vmem:[#allocation11 + $0x1e0] sm:$0xff]  ;;  %v9235_v53 = vld [vmem:[#allocation11 + $0x10] sm:$0xff] }
 0x692   : > { %v8979_v4 = vmul.f32 %v15061_v18, %v15061_v18  ;;  %v15073_v51 = vsub.f32 %v8937_v12, %v8958_v21  ;;  %11184 = vmatprep.subr.mxu0 %v9262_v29  ;;  %11221 = vmatprep.subr.mxu1 %v9293_v37  ;;  %v9277_v12 = vld [vmem:[#allocation11 + $0x160] sm:$0xff]  ;;  %v9242_v21 = vld [vmem:[#allocation11 + $0x48] sm:$0xff] }
 0x693   : > { %v8984_v31 = vadd.f32 %v8983_v0, %v8973_v33  ;;  %v8980_v52 = vmul.f32 %v15065_v40, %v15065_v40  ;;  %v8981_v54 = vmul.f32 %v15069_v24, %v15069_v24  ;;  %11185 = vmatpush3.msra.mxu0 %v9246_v35  ;;  %11222 = vmatpush3.msra.mxu1 %v9277_v12  ;;  %v9274_v39 = vld [vmem:[#allocation11 + $0x148] sm:$0xff]  ;;  %v9257_v36 = vld [vmem:[#allocation11 + $0xc0] sm:$0xff]  ;;  %v9360_v12 = vld [vmem:[#allocation11 + $0x3f8] sm:$0xff] }
 0x694   : > { %v8982_v56 = vmul.f32 %v15073_v51, %v15073_v51  ;;  %11186 = vmatprep.subr.mxu0 %v9261_v8  ;;  %11223 = vmatprep.subr.mxu1 %v9292_v10  ;;  %v9289_v33 = vld [vmem:[#allocation11 + $0x1c0] sm:$0xff]  ;;  %v9250_v63 = vld [vmem:[#allocation11 + $0x88] sm:$0xff] }
 0x695   : > { %v8985_v13 = vadd.f32 %v8984_v31, %v8974_v43  ;;  %11187 = vmatpush3.msra.mxu0 %v9245_v11  ;;  %11224 = vmatpush3.msra.mxu1 %v9276_v14  ;;  %v9241_v0 = vld [vmem:[#allocation11 + $0x40] sm:$0xff]  ;;  %v9256_v31 = vld [vmem:[#allocation11 + $0xb8] sm:$0xff]  ;;  %v9234_v29 = vld [vmem:[#allocation11 + $0x8] sm:$0xff] }
 0x696   : > { %11188 = vmatprep.subr.mxu0 %v9260_v9  ;;  %11225 = vmatprep.subr.mxu1 %v9291_v16  ;;  %v9273_v43 = vld [vmem:[#allocation11 + $0x140] sm:$0xff]  ;;  %v9328_v11 = vld [vmem:[#allocation11 + $0x2f8] sm:$0xff]  ;;  %v15082_v9 = vand.u32 127, %v8866_v19 }
 0x697   : > { %v8986_v46 = vadd.f32 %v8985_v13, %v8975_v27  ;;  %11189 = vmatpush3.msra.mxu0 %v9244_v2  ;;  %11226 = vmatpush3.msra.mxu1 %v9275_v38  ;;  %v9288_v27 = vld [vmem:[#allocation11 + $0x1b8] sm:$0xff]  ;;  %v9249_v35 = vld [vmem:[#allocation11 + $0x80] sm:$0xff]  ;;  %v15086_v2 = vmul.u32 1536, %v15023_v20 }
 0x698   : > { %11190 = vmatprep.subr.mxu0 %v9259_v15  ;;  %11227 = vmatprep.subr.mxu1 %v9290_v26  ;;  %v9240_v13 = vld [vmem:[#allocation11 + $0x38] sm:$0xff]  ;;  %v9233_v8 = vld [vmem:[#allocation11] sm:$0xff]  ;;  %v9051_v10 = vadd.s32 128, %v15082_v9  ;;  %v9053_v14 = vadd.s32 384, %v15082_v9  ;;  %v9052_v15 = vadd.s32 256, %v15082_v9  ;;  %v9055_v19 = vadd.s32 640, %v15082_v9 }
 0x699   : > { %v8987_v47 = vadd.f32 %v8986_v46, %v8976_v3  ;;  %11191 = vmatpush3.msra.mxu0 %v9243_v17  ;;  %11228 = vmatpush3.msra.mxu1 %v9274_v39  ;;  %v9272_v3 = vld [vmem:[#allocation11 + $0x138] sm:$0xff]  ;;  %v9255_v46 = vld [vmem:[#allocation11 + $0xb0] sm:$0xff]  ;;  %v9265_v37 = vld [vmem:[#allocation11 + $0x100] sm:$0xff]  ;;  %v9063_v38 = vadd.s32 %v15086_v2, %v15082_v9  ;;  %v9057_v26 = vadd.s32 896, %v15082_v9  ;;  %vm9853_vm12 = vcmp.lt.s32.totalorder %v15082_v9, 10 }
 0x69a   : > { %11192 = vmatprep.subr.mxu0 %v9258_v25  ;;  %11229 = vmatprep.subr.mxu1 %v9289_v33  ;;  %v9064_v16 = vadd.s32 %v15086_v2, %v9051_v10  ;;  %v9066_v17 = vadd.s32 %v15086_v2, %v9053_v14  ;;  %v9065_v25 = vadd.s32 %v15086_v2, %v9052_v15 }
 0x69b   : > { %v8988_v48 = vadd.f32 %v8987_v47, %v8977_v45  ;;  %11193 = vmatpush3.msra.mxu0 %v9242_v21  ;;  %11230 = vmatpush3.msra.mxu1 %v9273_v43  ;;  %v9287_v45 = vld [vmem:[#allocation11 + $0x1b0] sm:$0xff]  ;;  %v15097_v21 = vstv %s9087_s20  ;;  %v9068_v33 = vadd.s32 %v15086_v2, %v9055_v19  ;;  %v9070_v43 = vadd.s32 %v15086_v2, %v9057_v26 }
 0x69c   : > { %11194 = vmatprep.subr.mxu0 %v9257_v36  ;;  %11231 = vmatprep.subr.mxu1 %v9288_v27  ;;  %v9239_v47 = vld [vmem:[#allocation11 + $0x30] sm:$0xff]  ;;  %v9076_v20 = vmul.u32 40503, %v9064_v16  ;;  %v9078_v39 = vmul.u32 40503, %v9066_v17 }
 0x69d   : > { %v8989_v49 = vadd.f32 %v8988_v48, %v8978_v42  ;;  %11195 = vmatpush3.msra.mxu0 %v9241_v0  ;;  %11232 = vmatpush3.msra.mxu1 %v9272_v3  ;;  %v9271_v42 = vld [vmem:[#allocation11 + $0x130] sm:$0xff]  ;;  %v9254_v48 = vld [vmem:[#allocation11 + $0xa8] sm:$0xff]  ;;  %v9075_v36 = vmul.u32 40503, %v9063_v38  ;;  %v9077_v0 = vmul.u32 40503, %v9065_v25 }
 0x69e   : > { %11196 = vmatprep.subr.mxu0 %v9256_v31  ;;  %11233 = vmatprep.subr.mxu1 %v9287_v45  ;;  %v9090_v31 = vadd.s32 %v15097_v21, %v9076_v20  ;;  %v9092_v27 = vadd.s32 %v15097_v21, %v9078_v39  ;;  %v9080_v3 = vmul.u32 40503, %v9068_v33  ;;  %v9082_v45 = vmul.u32 40503, %v9070_v43 }
 0x69f   : > { %v8990_v5 = vadd.f32 %v8989_v49, %v8979_v4  ;;  %11197 = vmatpush3.msra.mxu0 %v9240_v13  ;;  %11234 = vmatpush3.msra.mxu1 %v9271_v42  ;;  %v9286_v4 = vld [vmem:[#allocation11 + $0x1a8] sm:$0xff]  ;;  %v9089_v13 = vadd.s32 %v15097_v21, %v9075_v36 }
 0x6a0   : > { %11198 = vmatprep.subr.mxu0 %v9255_v46  ;;  %11235 = vmatprep.subr.mxu1 %v9286_v4  ;;  %v9238_v49 = vld [vmem:[#allocation11 + $0x28] sm:$0xff]  ;;  %v9091_v46 = vadd.s32 %v15097_v21, %v9077_v0  ;;  %v9104_v42 = vshra.s32 %v9092_v27, 16  ;;  %v9094_v4 = vadd.s32 %v15097_v21, %v9080_v3  ;;  %v9054_v3 = vadd.s32 512, %v15082_v9 }
 0x6a1   : > { %v8991_v55 = vadd.f32 %v8990_v5, %v8980_v52  ;;  %11199 = vmatpush3.msra.mxu0 %v9239_v47  ;;  %v9270_v52 = vld [vmem:[#allocation11 + $0x128] sm:$0xff]  ;;  %v9253_v5 = vld [vmem:[#allocation11 + $0xa0] sm:$0xff]  ;;  %v9102_v47 = vshra.s32 %v9090_v31, 16 }
 0x6a2   : > { %11200 = vmatprep.subr.mxu0 %v9254_v48  ;;  %11236 = vmatpush3.msra.mxu1 %v9270_v52  ;;  %v9101_v48 = vshra.s32 %v9089_v13, 16  ;;  %v9096_v52 = vadd.s32 %v15097_v21, %v9082_v45 }
 0x6a3   : > { %v8992_v57 = vadd.f32 %v8991_v55, %v8981_v54  ;;  %11201 = vmatpush3.msra.mxu0 %v9238_v49  ;;  %v9285_v54 = vld [vmem:[#allocation11 + $0x1a0] sm:$0xff]  ;;  %v9103_v49 = vshra.s32 %v9091_v46, 16 }
 0x6a4   : > { %11202 = vmatprep.subr.mxu0 %v9253_v5  ;;  %11237 = vmatprep.subr.mxu1 %v9285_v54  ;;  %v9237_v55 = vld [vmem:[#allocation11 + $0x20] sm:$0xff]  ;;  %v9114_v5 = vxor.u32 %v9102_v47, %v9090_v31  ;;  %v9116_v54 = vxor.u32 %v9104_v42, %v9092_v27 }
 0x6a5   : > { %v8993_v58 = vadd.f32 %v8992_v57, %v8982_v56  ;;  %v9269_v56 = vld [vmem:[#allocation11 + $0x120] sm:$0xff]  ;;  %11203 = vmatpush3.msra.mxu0 %v9237_v55  ;;  %v9252_v57 = vld [vmem:[#allocation11 + $0x98] sm:$0xff]  ;;  %v9113_v55 = vxor.u32 %v9101_v48, %v9089_v13 }
 0x6a6   : > { %11238 = vmatpush3.msra.mxu1 %v9269_v56  ;;  %11204 = vmatprep.subr.mxu0 %v9252_v57  ;;  %v9106_v56 = vshra.s32 %v9094_v4, 16 }
 0x6a7   : > { %8994 = vadd.xlane.f32.xlu0 %v8993_v58  ;;  %v9284_v58 = vld [vmem:[#allocation11 + $0x198] sm:$0xff]  ;;  %11205 = vmatpush3.msra.mxu0 %v9236_v59  ;;  %v9108_v59 = vshra.s32 %v9096_v52, 16 }
 0x6a8   : > { %11239 = vmatprep.subr.mxu1 %v9284_v58  ;;  %11206 = vmatprep.subr.mxu0 %v9251_v61  ;;  %v9115_v58 = vxor.u32 %v9103_v49, %v9091_v46  ;;  %v9126_v61 = vmul.u32 73244475, %v9114_v5  ;;  %v9056_v46 = vadd.s32 768, %v15082_v9  ;;  %v9059_v49 = vadd.s32 1152, %v15082_v9 }
 0x6a9   : > { %11240 = vmatpush3.msra.mxu1 %v9268_v60  ;;  %11207 = vmatpush3.msra.mxu0 %v9235_v53  ;;  %v9128_v53 = vmul.u32 73244475, %v9116_v54  ;;  %v9067_v54 = vadd.s32 %v15086_v2, %v9054_v3 }
 0x6aa   : > { %11241 = vmatprep.subr.mxu1 %v9283_v50  ;;  %11208 = vmatprep.subr.mxu0 %v9250_v63  ;;  %v9118_v63 = vxor.u32 %v9106_v56, %v9094_v4 }
 0x6ab   : > { %11242 = vmatpush3.msra.mxu1 %v9267_v62  ;;  %11209 = vmatpush3.msra.mxu0 %v9234_v29  ;;  %v9125_v62 = vmul.u32 73244475, %v9113_v55  ;;  %v9120_v29 = vxor.u32 %v9108_v59, %v9096_v52  ;;  %v9061_v52 = vadd.s32 1408, %v15082_v9  ;;  %v9069_v55 = vadd.s32 %v15086_v2, %v9056_v46 }
 0x6ac   : > { %11243 = vmatprep.subr.mxu1 %v9282_v1  ;;  %11210 = vmatprep.subr.mxu0 %v9249_v35  ;;  %v9127_v1 = vmul.u32 73244475, %v9115_v58  ;;  %v9138_v35 = vshra.s32 %v9126_v61, 16 }
 0x6ad   : > { %11244 = vmatpush3.msra.mxu1 %v9266_v28  ;;  %11211 = vmatpush3.msra.mxu0 %v9233_v8  ;;  %v9140_v8 = vshra.s32 %v9128_v53, 16  ;;  %v9132_v10 = vmul.u32 73244475, %v9120_v29 }
 0x6ae   : > { %11245 = vmatprep.subr.mxu1 %v9281_v7  ;;  %11250 = vmatprep.subr.mxu0 %v9328_v11  ;;  %v9130_v11 = vmul.u32 73244475, %v9118_v63  ;;  %v9150_v15 = vxor.u32 %v9138_v35, %v9126_v61  ;;  %v9072_v61 = vadd.s32 %v15086_v2, %v9059_v49  ;;  %v9081_v63 = vmul.u32 40503, %v9069_v55 }
 0x6af   : > { %11246 = vmatpush3.msra.mxu1 %v9265_v37  ;;  %v9137_v37 = vshra.s32 %v9125_v62, 16  ;;  %v9152_v17 = vxor.u32 %v9140_v8, %v9128_v53  ;;  %v9144_v26 = vshra.s32 %v9132_v10, 16 }
 0x6b0   : > { %11285 = vmatprep.subr.mxu1 %v9360_v12  ;;  %v9139_v12 = vshra.s32 %v9127_v1, 16  ;;  %v9142_v19 = vshra.s32 %v9130_v11, 16  ;;  %v9162_v39 = vmul.u32 73244475, %v9150_v15 }
 0x6b1   : > { %v9149_v38 = vxor.u32 %v9137_v37, %v9125_v62  ;;  %v9164_v33 = vmul.u32 73244475, %v9152_v17  ;;  %v9156_v27 = vxor.u32 %v9144_v26, %v9132_v10  ;;  %v9079_v62 = vmul.u32 40503, %v9067_v54  ;;  %v9356_v26 = vld [vmem:[#allocation11 + $0x3d8] sm:$0xff] }
 0x6b2   : > { %v9151_v25 = vxor.u32 %v9139_v12, %v9127_v1  ;;  %v9154_v43 = vxor.u32 %v9142_v19, %v9130_v11  ;;  %v9174_v13 = vshra.s32 %v9162_v39, 16  ;;  %v9008_v1 = vstv %s15109_s21 }
 0x6b3   : > { %v9161_v0 = vmul.u32 73244475, %v9149_v38  ;;  %v9176_v45 = vshra.s32 %v9164_v33, 16  ;;  %v9168_v4 = vmul.u32 73244475, %v9156_v27  ;;  %v15118_v10 = vstv %s11162_s29  ;;  %v9341_v38 = vld [vmem:[#allocation11 + $0x360] sm:$0xff] }
 0x6b4   : > { %v9163_v31 = vmul.u32 73244475, %v9151_v25  ;;  %v9166_v42 = vmul.u32 73244475, %v9154_v43  ;;  %v9186_v5 = vxor.u32 %v9174_v13, %v9162_v39  ;;  %v9093_v15 = vadd.s32 %v15097_v21, %v9079_v62  ;;  %v9311_v62 = vld [vmem:[#allocation11 + $0x270] sm:$0xff] }
 0x6b5   : > { %v9173_v47 = vshra.s32 %v9161_v0, 16  ;;  %v9188_v56 = vxor.u32 %v9176_v45, %v9164_v33  ;;  %v9084_v37 = vmul.u32 40503, %v9072_v61 }
 0x6b6   : > { %v9175_v48 = vshra.s32 %v9163_v31, 16  ;;  %v9178_v58 = vshra.s32 %v9166_v42, 16  ;;  %v9198_v53 = vand.u32 2147483647, %v9186_v5  ;;  %v9105_v3 = vshra.s32 %v9093_v15, 16  ;;  %v9344_v5 = vld [vmem:[#allocation11 + $0x378] sm:$0xff] }
 0x6b7   : > { %v9200_v29 = vand.u32 2147483647, %v9188_v56  ;;  %v9098_v39 = vadd.s32 %v15097_v21, %v9084_v37  ;;  %v9327_v56 = vld [vmem:[#allocation11 + $0x2f0] sm:$0xff]  ;;  %v9310_v37 = vld [vmem:[#allocation11 + $0x268] sm:$0xff] }
 0x6b8   : > { %v9187_v59 = vxor.u32 %v9175_v48, %v9163_v31  ;;  %v9190_v35 = vxor.u32 %v9178_v58, %v9166_v42  ;;  %vm15120_vm0 = vcmp.lt.s32.totalorder %v9198_v53, 1073741824  ;;  %v15160_v54 = vxor.u32 %v9105_v3, %v9093_v15 }
 0x6b9   : > { %vm15128_vm1 = vcmp.lt.s32.totalorder %v9200_v29, 1073741824  ;;  %v9110_v42 = vshra.s32 %v9098_v39, 16 }
 0x6ba   : > { %v9202_v25 = vand.u32 2147483647, %v9190_v35  ;;  %v9358_v35 = vld [vmem:[#allocation11 + $0x3e8] sm:$0xff] }
 0x6bc   : > { %vm15168_vm4 = vcmp.lt.s32.totalorder %v9202_v25, 1073741824  ;;  %v9324_v25 = vld [vmem:[#allocation11 + $0x2d8] sm:$0xff] }
 0x730   : > { %v8995_v57 = vpop.xlane.xlu0 %8994 }
 0x731   : > { %v8996_v60 = vrot.slane %v8995_v57, 4 }
 0x733   : > { %v8997_v50 = vadd.f32 %v8996_v60, %v8995_v57  ;;  %v9185_v57 = vxor.u32 %v9173_v47, %v9161_v0  ;;  %v9180_v60 = vshra.s32 %v9168_v4, 16 }
 0x735   : > { %v8998_v28 = vrot.slane %v8997_v50, 2  ;;  %v9192_v8 = vxor.u32 %v9180_v60, %v9168_v4  ;;  %v9359_v60 = vld [vmem:[#allocation11 + $0x3f0] sm:$0xff] }
 0x737   : > { %v8999_v7 = vadd.f32 %v8998_v28, %v8997_v50  ;;  %v9074_v50 = vadd.s32 %v15086_v2, %v9061_v52  ;;  %v9197_v28 = vand.u32 2147483647, %v9185_v57  ;;  %v9312_v52 = vld [vmem:[#allocation11 + $0x278] sm:$0xff] }
 0x738   : > { %v9304_v57 = vld [vmem:[#allocation11 + $0x238] sm:$0xff] }
 0x739   : > { %v9000_v14 = vrot.slane %v8999_v7, 1  ;;  %v9086_v11 = vmul.u32 40503, %v9074_v50  ;;  %vm15132_vm2 = vcmp.lt.s32.totalorder %v9197_v28, 1073741824  ;;  %v15182_v50 = vxor.u32 %v9110_v42, %v9098_v39  ;;  %v9326_v28 = vld [vmem:[#allocation11 + $0x2e8] sm:$0xff]  ;;  %v9353_v42 = vld [vmem:[#allocation11 + $0x3c0] sm:$0xff] }
 0x73b   : > { %v9001_v16 = vadd.f32 %v9000_v14, %v8999_v7  ;;  %v9199_v7 = vand.u32 2147483647, %v9187_v59  ;;  %v9357_v14 = vld [vmem:[#allocation11 + $0x3e0] sm:$0xff]  ;;  %v9134_v15 = vmul.u32 73244475, %v15182_v50 }
 0x73d   : > { %v9003_v20 = vmul.f32 8.138683e-05, %v9001_v16  ;;  %v9095_v16 = vadd.s32 %v15097_v21, %v9081_v63  ;;  %vm15136_vm3 = vcmp.lt.s32.totalorder %v9199_v7, 1073741824  ;;  %v9343_v63 = vld [vmem:[#allocation11 + $0x370] sm:$0xff]  ;;  %v9129_v7 = vmul.u32 73244475, %v15160_v54 }
 0x73e   : > { %v9352_v54 = vld [vmem:[#allocation11 + $0x3b8] sm:$0xff] }
 0x73f   : > { %v9006_v36 = vadd.f32 1e-05, %v9003_v20  ;;  %v9204_v20 = vand.u32 2147483647, %v9192_v8  ;;  %v9107_v46 = vshra.s32 %v9095_v16, 16 }
 0x741   : > { %13224 = vrsqrt.f32 %v9006_v36  ;;  %v9100_v36 = vadd.s32 %v15097_v21, %v9086_v11  ;;  %v15162_v55 = vxor.u32 %v9107_v46, %v9095_v16  ;;  %vm15178_vm5 = vcmp.lt.s32.totalorder %v9204_v20, 1073741824  ;;  %v9342_v11 = vld [vmem:[#allocation11 + $0x368] sm:$0xff]  ;;  %v9309_v16 = vld [vmem:[#allocation11 + $0x260] sm:$0xff] }
 0x742   : > { %v9141_v20 = vshra.s32 %v9129_v7, 16  ;;  %v9322_v46 = vld [vmem:[#allocation11 + $0x2c8] sm:$0xff] }
 0x743   : > { %v9112_v48 = vshra.s32 %v9100_v36, 16 }
 0x74e   : > { %v13225_v12 = vpop.eup %13224 }
 0x74f   : > { %v15126_v17 = vmul.f32 %v13225_v12, %v9008_v1  ;;  %v15186_v1 = vxor.u32 %v9112_v48, %v9100_v36  ;;  %v9325_v12 = vld [vmem:[#allocation11 + $0x2e0] sm:$0xff]  ;;  %v9308_v36 = vld [vmem:[#allocation11 + $0x258] sm:$0xff] }
 0x751   : > { %v9011_v33 = vmul.f32 %v15126_v17, %v15035_v32  ;;  %v9013_v0 = vmul.f32 %v15126_v17, %v15043_v6  ;;  %v9010_v43 = vmul.f32 %v15126_v17, %v15033_v22  ;;  %v9012_v31 = vmul.f32 %v15126_v17, %v15037_v34 }
 0x752   : > { %v9015_v27 = vmul.f32 %v15126_v17, %v15049_v44  ;;  %v9017_v13 = vmul.f32 %v15126_v17, %v15057_v23  ;;  %v9018_v58 = vmul.f32 %v15126_v17, %v15061_v18  ;;  %v9020_v53 = vmul.f32 %v15126_v17, %v15069_v24 }
 0x753   : > { %v9024_v45 = vadd.f32 %v15118_v10, %v9011_v33  ;;  %v9026_v32 = vadd.f32 %v15118_v10, %v9013_v0  ;;  %v9023_v6 = vadd.f32 %v15118_v10, %v9010_v43  ;;  %v9025_v47 = vadd.f32 %v15118_v10, %v9012_v31  ;;  %v9340_v33 = vld [vmem:[#allocation11 + $0x358] sm:$0xff]  ;;  %v9323_v0 = vld [vmem:[#allocation11 + $0x2d0] sm:$0xff] }
 0x754   : > { %v9028_v22 = vadd.f32 %v15118_v10, %v9015_v27  ;;  %v9030_v34 = vadd.f32 %v15118_v10, %v9017_v13  ;;  %v15189_v29 = vadd.f32 %v15118_v10, %v9018_v58  ;;  %v9131_v24 = vmul.u32 73244475, %v15162_v55  ;;  %v9355_v43 = vld [vmem:[#allocation11 + $0x3d0] sm:$0xff]  ;;  %v9336_v58 = vld [vmem:[#allocation11 + $0x338] sm:$0xff] }
 0x755   : > { %v9036_v44 = vmax.f32 %v9024_v45, 0.0  ;;  %v9038_v4 = vmax.f32 %v9026_v32, 0.0  ;;  %v9035_v49 = vmax.f32 %v9023_v6, 0.0  ;;  %v9037_v23 = vmax.f32 %v9025_v47, 0.0  ;;  %v9307_v27 = vld [vmem:[#allocation11 + $0x250] sm:$0xff]  ;;  %v9354_v45 = vld [vmem:[#allocation11 + $0x3c8] sm:$0xff] }
 0x756   : > { %v9040_v59 = vmax.f32 %v9028_v22, 0.0  ;;  %v9042_v18 = vmax.f32 %v9030_v34, 0.0  ;;  %v15196_v8 = vadd.f32 %v15118_v10, %v9020_v53  ;;  %v9136_v19 = vmul.u32 73244475, %v15186_v1  ;;  %v9339_v13 = vld [vmem:[#allocation11 + $0x350] sm:$0xff]  ;;  %v9306_v47 = vld [vmem:[#allocation11 + $0x248] sm:$0xff] }
 0x757   : > { %11164 = vmatprep.mubr.msk.f32.mxu0 %vm15120_vm0, %v9036_v44  ;;  %11166 = vmatprep.mubr.msk.f32.mxu1 %vm15128_vm1, %v9038_v4  ;;  %v9143_v39 = vshra.s32 %v9131_v24, 16  ;;  %v9146_v31 = vshra.s32 %v9134_v15, 16  ;;  %v15202_v32 = vxor.u32 %v9141_v20, %v9129_v7  ;;  %v9338_v22 = vld [vmem:[#allocation11 + $0x348] sm:$0xff]  ;;  %v9321_v34 = vld [vmem:[#allocation11 + $0x2c0] sm:$0xff]  ;;  %v9058_v44 = vadd.s32 1024, %v15082_v9 }
 0x758   : > { %11165 = vmatmul.mubr.msk.f32.vlgmr.msra.gmra.mxu0 %vm15132_vm2, %v9035_v49  ;;  %11167 = vmatmul.mubr.msk.f32.vlgmr.msra.gmra.mxu1 %vm15136_vm3, %v9037_v23  ;;  %v9148_v3 = vshra.s32 %v9136_v19, 16  ;;  %v9060_v4 = vadd.s32 1280, %v15082_v9  ;;  %v9305_v49 = vld [vmem:[#allocation11 + $0x240] sm:$0xff]  ;;  %v9318_v1 = vld [vmem:[#allocation11 + $0x2a8] sm:$0xff] }
 0x759   : > { %11251 = vmatpush3.msra.mxu0 %v9312_v52  ;;  %11286 = vmatpush3.msra.mxu1 %v9344_v5  ;;  %v15204_v6 = vxor.u32 %v9143_v39, %v9131_v24  ;;  %v15206_v48 = vxor.u32 %v9146_v31, %v9134_v15  ;;  %v9337_v23 = vld [vmem:[#allocation11 + $0x340] sm:$0xff]  ;;  %v9320_v5 = vld [vmem:[#allocation11 + $0x2b8] sm:$0xff]  ;;  %v9165_v55 = vmul.u32 73244475, %v15202_v32  ;;  %v9071_v50 = vadd.s32 %v15086_v2, %v9058_v44  ;;  %v9302_v24 = vld [vmem:[#allocation11 + $0x228] sm:$0xff] }
 0x75a   : > { %11252 = vmatprep.subr.mxu0 %v9327_v56  ;;  %11168 = vmatprep.mubr.msk.f32.mxu0 %vm15168_vm4, %v9040_v59  ;;  %v15210_v52 = vxor.u32 %v9148_v3, %v9136_v19  ;;  %v9319_v59 = vld [vmem:[#allocation11 + $0x2b0] sm:$0xff]  ;;  %v9073_v53 = vadd.s32 %v15086_v2, %v9060_v4  ;;  %v9349_v2 = vld [vmem:[#allocation11 + $0x3a0] sm:$0xff] }
 0x75b   : > { %11287 = vmatprep.subr.mxu1 %v9359_v60  ;;  %11170 = vmatprep.mubr.msk.f32.mxu1 %vm15178_vm5, %v9042_v18  ;;  %v9167_v56 = vmul.u32 73244475, %v15204_v6  ;;  %v9351_v60 = vld [vmem:[#allocation11 + $0x3b0] sm:$0xff]  ;;  %v9170_v61 = vmul.u32 73244475, %v15206_v48  ;;  %v9019_v6 = vmul.f32 %v15126_v17, %v15065_v40  ;;  %v9330_v48 = vld [vmem:[#allocation11 + $0x308] sm:$0xff] }
 0x75c   : > { %11253 = vmatpush3.msra.mxu0 %v9311_v62  ;;  %11288 = vmatpush3.msra.mxu1 %v9343_v63  ;;  %v9303_v18 = vld [vmem:[#allocation11 + $0x230] sm:$0xff]  ;;  %v9172_v63 = vmul.u32 73244475, %v15210_v52  ;;  %v9085_v15 = vmul.u32 40503, %v9073_v53  ;;  %v9313_v40 = vld [vmem:[#allocation11 + $0x280] sm:$0xff] }
 0x75d   : > { %11254 = vmatprep.subr.mxu0 %v9326_v28  ;;  %11289 = vmatprep.subr.mxu1 %v9358_v35  ;;  %v9335_v62 = vld [vmem:[#allocation11 + $0x330] sm:$0xff]  ;;  %v9350_v28 = vld [vmem:[#allocation11 + $0x3a8] sm:$0xff]  ;;  %v9177_v35 = vshra.s32 %v9165_v55, 16  ;;  %v9179_v7 = vshra.s32 %v9167_v56, 16 }
 0x75e   : > { %11255 = vmatpush3.msra.mxu0 %v9310_v37  ;;  %11290 = vmatpush3.msra.mxu1 %v9342_v11  ;;  %v9334_v37 = vld [vmem:[#allocation11 + $0x328] sm:$0xff]  ;;  %v9317_v11 = vld [vmem:[#allocation11 + $0x2a0] sm:$0xff]  ;;  %v9184_v19 = vshra.s32 %v9172_v63, 16  ;;  %v9315_v31 = vld [vmem:[#allocation11 + $0x290] sm:$0xff] }
 0x75f   : > { %11256 = vmatprep.subr.mxu0 %v9325_v12  ;;  %11291 = vmatprep.subr.mxu1 %v9357_v14  ;;  %v9182_v12 = vshra.s32 %v9170_v61, 16  ;;  %v9083_v14 = vmul.u32 40503, %v9071_v50  ;;  %v9189_v20 = vxor.u32 %v9177_v35, %v9165_v55  ;;  %v9191_v39 = vxor.u32 %v9179_v7, %v9167_v56  ;;  %v9331_v32 = vld [vmem:[#allocation11 + $0x310] sm:$0xff]  ;;  %v9329_v55 = vld [vmem:[#allocation11 + $0x300] sm:$0xff]  ;;  %v9390_v7 = vld [vmem:[#allocation11 + $0x4e8] sm:$0xff] }
 0x760   : > { %11257 = vmatpush3.msra.mxu0 %v9309_v16  ;;  %11292 = vmatpush3.msra.mxu1 %v9341_v38  ;;  %v9301_v16 = vld [vmem:[#allocation11 + $0x220] sm:$0xff]  ;;  %v9407_v35 = vld [vmem:[#allocation11 + $0x570] sm:$0xff] }
 0x761   : > { %11258 = vmatprep.subr.mxu0 %v9324_v25  ;;  %11293 = vmatprep.subr.mxu1 %v9356_v26  ;;  %v9333_v38 = vld [vmem:[#allocation11 + $0x320] sm:$0xff]  ;;  %v9316_v25 = vld [vmem:[#allocation11 + $0x298] sm:$0xff]  ;;  %v9097_v3 = vadd.s32 %v15097_v21, %v9083_v14 }
 0x762   : > { %11259 = vmatpush3.msra.mxu0 %v9308_v36  ;;  %11294 = vmatpush3.msra.mxu1 %v9340_v33  ;;  %v9348_v26 = vld [vmem:[#allocation11 + $0x398] sm:$0xff]  ;;  %v9389_v14 = vld [vmem:[#allocation11 + $0x4e0] sm:$0xff] }
 0x763   : > { %11260 = vmatprep.subr.mxu0 %v9323_v0  ;;  %11295 = vmatprep.subr.mxu1 %v9355_v43  ;;  %v9300_v36 = vld [vmem:[#allocation11 + $0x218] sm:$0xff]  ;;  %v9014_v0 = vmul.f32 %v15126_v17, %v15045_v30  ;;  %v9016_v43 = vmul.f32 %v15126_v17, %v15053_v41  ;;  %v9196_v30 = vxor.u32 %v9184_v19, %v9172_v63  ;;  %v9314_v41 = vld [vmem:[#allocation11 + $0x288] sm:$0xff]  ;;  %v9109_v52 = vshra.s32 %v9097_v3, 16  ;;  %v9391_v63 = vld [vmem:[#allocation11 + $0x4f0] sm:$0xff] }
 0x764   : > { %11261 = vmatpush3.msra.mxu0 %v9307_v27  ;;  %11296 = vmatpush3.msra.mxu1 %v9339_v13  ;;  %v9332_v33 = vld [vmem:[#allocation11 + $0x318] sm:$0xff]  ;;  %v9347_v27 = vld [vmem:[#allocation11 + $0x390] sm:$0xff]  ;;  %v9194_v13 = vxor.u32 %v9182_v12, %v9170_v61  ;;  %v9406_v12 = vld [vmem:[#allocation11 + $0x568] sm:$0xff] }
 0x765   : > { %11262 = vmatprep.subr.mxu0 %v9322_v46  ;;  %11297 = vmatprep.subr.mxu1 %v9354_v45  ;;  %v9099_v46 = vadd.s32 %v15097_v21, %v9085_v15  ;;  %v9299_v45 = vld [vmem:[#allocation11 + $0x210] sm:$0xff]  ;;  %v9298_v21 = vld [vmem:[#allocation11 + $0x208] sm:$0xff]  ;;  %v9027_v44 = vadd.f32 %v15118_v10, %v9014_v0  ;;  %v9029_v4 = vadd.f32 %v15118_v10, %v9016_v43  ;;  %v9376_v61 = vld [vmem:[#allocation11 + $0x478] sm:$0xff] }
 0x766   : > { %11263 = vmatpush3.msra.mxu0 %v9306_v47  ;;  %11298 = vmatpush3.msra.mxu1 %v9338_v22  ;;  %v9346_v47 = vld [vmem:[#allocation11 + $0x388] sm:$0xff]  ;;  %v9201_v22 = vand.u32 2147483647, %v9189_v20  ;;  %v9121_v50 = vxor.u32 %v9109_v52, %v9097_v3  ;;  %v9421_v15 = vld [vmem:[#allocation11 + $0x5e0] sm:$0xff]  ;;  %v9388_v19 = vld [vmem:[#allocation11 + $0x4d8] sm:$0xff] }
 0x767   : > { %11264 = vmatprep.subr.mxu0 %v9321_v34  ;;  %11299 = vmatprep.subr.mxu1 %v9353_v42  ;;  %v9203_v34 = vand.u32 2147483647, %v9191_v39  ;;  %v9021_v42 = vmul.f32 %v15126_v17, %v15073_v51  ;;  %v9032_v51 = vadd.f32 %v15118_v10, %v9019_v6  ;;  %v9208_v17 = vand.u32 2147483647, %v9196_v30  ;;  %v9372_v39 = vld [vmem:[#allocation11 + $0x458] sm:$0xff]  ;;  %v9419_v0 = vld [vmem:[#allocation11 + $0x5d0] sm:$0xff] }
 0x768   : > { %11265 = vmatpush3.msra.mxu0 %v9305_v49  ;;  %11300 = vmatpush3.msra.mxu1 %v9337_v23  ;;  %v9345_v49 = vld [vmem:[#allocation11 + $0x380] sm:$0xff]  ;;  %v9206_v23 = vand.u32 2147483647, %v9194_v13  ;;  %vm9213_vm6 = vcmp.lt.s32.totalorder %v9201_v22, 1073741824  ;;  %v9371_v43 = vld [vmem:[#allocation11 + $0x450] sm:$0xff]  ;;  %v9418_v13 = vld [vmem:[#allocation11 + $0x5c8] sm:$0xff] }
 0x769   : > { %11266 = vmatprep.subr.mxu0 %v9320_v5  ;;  %11301 = vmatprep.subr.mxu1 %v9352_v54  ;;  %v9111_v5 = vshra.s32 %v9099_v46, 16  ;;  %v9297_v54 = vld [vmem:[#allocation11 + $0x200] sm:$0xff]  ;;  %vm9215_vm7 = vcmp.lt.s32.totalorder %v9203_v34, 1073741824  ;;  %v9034_v56 = vadd.f32 %v15118_v10, %v9021_v42  ;;  %vm9220_vm9 = vcmp.lt.s32.totalorder %v9208_v17, 1073741824  ;;  %v9384_v22 = vld [vmem:[#allocation11 + $0x4b8] sm:$0xff]  ;;  %v9382_v52 = vld [vmem:[#allocation11 + $0x4a8] sm:$0xff] }
 0x76a   : > { %11267 = vmatpush3.msra.mxu0 %v9304_v57  ;;  %11302 = vmatpush3.msra.mxu1 %v9336_v58  ;;  %v9039_v57 = vmax.f32 %v9027_v44, 0.0  ;;  %v9041_v58 = vmax.f32 %v9029_v4, 0.0  ;;  %vm9218_vm8 = vcmp.lt.s32.totalorder %v9206_v23, 1073741824  ;;  %v9385_v6 = vld [vmem:[#allocation11 + $0x4c0] sm:$0xff]  ;;  %v9416_v34 = vld [vmem:[#allocation11 + $0x5b8] sm:$0xff]  ;;  %v9383_v4 = vld [vmem:[#allocation11 + $0x4b0] sm:$0xff] }
 0x76b   : > { %11268 = vmatprep.subr.mxu0 %v9319_v59  ;;  %11303 = vmatprep.subr.mxu1 %v9351_v60  ;;  %v9392_v59 = vld [vmem:[#allocation11 + $0x4f8] sm:$0xff]  ;;  %v9123_v53 = vxor.u32 %v9111_v5, %v9099_v46  ;;  %v9046_v10 = vmax.f32 %v9034_v56, 0.0  ;;  %v9417_v30 = vld [vmem:[#allocation11 + $0x5c0] sm:$0xff]  ;;  %v9399_v23 = vld [vmem:[#allocation11 + $0x530] sm:$0xff] }
 0x76c   : > { %11269 = vmatpush3.msra.mxu0 %v9303_v18  ;;  %11304 = vmatpush3.msra.mxu1 %v9335_v62  ;;  %v9424_v60 = vld [vmem:[#allocation11 + $0x5f8] sm:$0xff]  ;;  %v9044_v18 = vmax.f32 %v9032_v51, 0.0  ;;  %v9414_v5 = vld [vmem:[#allocation11 + $0x5a8] sm:$0xff]  ;;  %v9381_v56 = vld [vmem:[#allocation11 + $0x4a0] sm:$0xff] }
 0x76d   : > { %11270 = vmatprep.subr.mxu0 %v9318_v1  ;;  %11305 = vmatprep.subr.mxu1 %v9350_v28  ;;  %v9408_v62 = vld [vmem:[#allocation11 + $0x578] sm:$0xff]  ;;  %v9423_v1 = vld [vmem:[#allocation11 + $0x5f0] sm:$0xff]  ;;  %v9366_v51 = vld [vmem:[#allocation11 + $0x428] sm:$0xff] }
 0x76e   : > { %11271 = vmatpush3.msra.mxu0 %v9302_v24  ;;  %11306 = vmatpush3.msra.mxu1 %v9334_v37  ;;  %v9375_v28 = vld [vmem:[#allocation11 + $0x470] sm:$0xff]  ;;  %v9422_v24 = vld [vmem:[#allocation11 + $0x5e8] sm:$0xff]  ;;  %v9133_v37 = vmul.u32 73244475, %v9121_v50  ;;  %v9400_v44 = vld [vmem:[#allocation11 + $0x538] sm:$0xff] }
 0x76f   : > { %11272 = vmatprep.subr.mxu0 %v9317_v11  ;;  %11307 = vmatprep.subr.mxu1 %v9349_v2  ;;  %v9135_v11 = vmul.u32 73244475, %v9123_v53  ;;  %v9374_v2 = vld [vmem:[#allocation11 + $0x468] sm:$0xff] }
 0x770   : > { %11273 = vmatpush3.msra.mxu0 %v9301_v16  ;;  %11308 = vmatpush3.msra.mxu1 %v9333_v38  ;;  %v9373_v16 = vld [vmem:[#allocation11 + $0x460] sm:$0xff]  ;;  %v9398_v17 = vld [vmem:[#allocation11 + $0x528] sm:$0xff] }
 0x771   : > { %11274 = vmatprep.subr.mxu0 %v9316_v25  ;;  %11309 = vmatprep.subr.mxu1 %v9348_v26  ;;  %v9405_v38 = vld [vmem:[#allocation11 + $0x560] sm:$0xff]  ;;  %v9420_v25 = vld [vmem:[#allocation11 + $0x5d8] sm:$0xff]  ;;  %v9145_v26 = vshra.s32 %v9133_v37, 16  ;;  %v9147_v20 = vshra.s32 %v9135_v11, 16 }
 0x772   : > { %11275 = vmatpush3.msra.mxu0 %v9300_v36  ;;  %11310 = vmatpush3.msra.mxu1 %v9332_v33  ;;  %v9404_v36 = vld [vmem:[#allocation11 + $0x558] sm:$0xff]  ;;  %v9387_v33 = vld [vmem:[#allocation11 + $0x4d0] sm:$0xff] }
 0x773   : > { %11276 = vmatprep.subr.mxu0 %v9315_v31  ;;  %11311 = vmatprep.subr.mxu1 %v9347_v27  ;;  %v9403_v31 = vld [vmem:[#allocation11 + $0x550] sm:$0xff]  ;;  %v9386_v27 = vld [vmem:[#allocation11 + $0x4c8] sm:$0xff]  ;;  %v9157_v3 = vxor.u32 %v9145_v26, %v9133_v37  ;;  %v9159_v46 = vxor.u32 %v9147_v20, %v9135_v11 }
 0x774   : > { %11277 = vmatpush3.msra.mxu0 %v9299_v45  ;;  %11312 = vmatpush3.msra.mxu1 %v9331_v32  ;;  %v9370_v45 = vld [vmem:[#allocation11 + $0x448] sm:$0xff] }
 0x775   : > { %11278 = vmatprep.subr.mxu0 %v9314_v41  ;;  %11313 = vmatprep.subr.mxu1 %v9346_v47  ;;  %v9402_v32 = vld [vmem:[#allocation11 + $0x548] sm:$0xff]  ;;  %v9369_v41 = vld [vmem:[#allocation11 + $0x440] sm:$0xff]  ;;  %v9169_v42 = vmul.u32 73244475, %v9157_v3 }
 0x776   : > { %11279 = vmatpush3.msra.mxu0 %v9298_v21  ;;  %11314 = vmatpush3.msra.mxu1 %v9330_v48  ;;  %v9401_v47 = vld [vmem:[#allocation11 + $0x540] sm:$0xff]  ;;  %v9171_v21 = vmul.u32 73244475, %v9159_v46  ;;  %v9368_v48 = vld [vmem:[#allocation11 + $0x438] sm:$0xff]  ;;  %v9362_v11 = vld [vmem:[#allocation11 + $0x408] sm:$0xff] }
 0x777   : > { %11280 = vmatprep.subr.mxu0 %v9313_v40  ;;  %11315 = vmatprep.subr.mxu1 %v9345_v49  ;;  %v9415_v40 = vld [vmem:[#allocation11 + $0x5b0] sm:$0xff] }
 0x778   : > { %11281 = vmatpush3.msra.mxu0 %v9297_v54  ;;  %11316 = vmatpush3.msra.mxu1 %v9329_v55  ;;  %v9367_v49 = vld [vmem:[#allocation11 + $0x430] sm:$0xff]  ;;  %v9181_v54 = vshra.s32 %v9169_v42, 16  ;;  %v9183_v55 = vshra.s32 %v9171_v21, 16 }
 0x779   : > { %11169 = vmatmul.mubr.msk.f32.vlgmr.msra.gmra.mxu0 %vm9213_vm6, %v9039_v57  ;;  %11171 = vmatmul.mubr.msk.f32.vlgmr.msra.gmra.mxu1 %vm9215_vm7, %v9041_v58  ;;  %v9413_v57 = vld [vmem:[#allocation11 + $0x5a0] sm:$0xff] }
 0x77a   : > { %11320 = vmatprep.subr.mxu0 %v9392_v59  ;;  %11355 = vmatprep.subr.mxu1 %v9424_v60  ;;  %v9365_v58 = vld [vmem:[#allocation11 + $0x420] sm:$0xff]  ;;  %v9380_v60 = vld [vmem:[#allocation11 + $0x498] sm:$0xff]  ;;  %v9193_v50 = vxor.u32 %v9181_v54, %v9169_v42  ;;  %v9195_v53 = vxor.u32 %v9183_v55, %v9171_v21 }
 0x77b   : > { %11321 = vmatpush3.msra.mxu0 %v9376_v61  ;;  %11172 = vmatprep.mubr.msk.f32.mxu0 %vm9218_vm8, %v9044_v18  ;;  %v9397_v59 = vld [vmem:[#allocation11 + $0x520] sm:$0xff]  ;;  %v9412_v61 = vld [vmem:[#allocation11 + $0x598] sm:$0xff] }
 0x77c   : > { %11356 = vmatpush3.msra.mxu1 %v9408_v62  ;;  %11174 = vmatprep.mubr.msk.f32.mxu1 %vm9220_vm9, %v9046_v10  ;;  %v9364_v18 = vld [vmem:[#allocation11 + $0x418] sm:$0xff]  ;;  %v9379_v10 = vld [vmem:[#allocation11 + $0x490] sm:$0xff]  ;;  %v9207_v37 = vand.u32 2147483647, %v9195_v53 }
 0x77d   : > { %11322 = vmatprep.subr.mxu0 %v9391_v63  ;;  %11357 = vmatprep.subr.mxu1 %v9423_v1  ;;  %v9396_v62 = vld [vmem:[#allocation11 + $0x518] sm:$0xff]  ;;  %v9411_v63 = vld [vmem:[#allocation11 + $0x590] sm:$0xff] }
 0x77e   : > { %11323 = vmatpush3.msra.mxu0 %v9375_v28  ;;  %11358 = vmatpush3.msra.mxu1 %v9407_v35  ;;  %v9363_v1 = vld [vmem:[#allocation11 + $0x410] sm:$0xff]  ;;  %v9378_v35 = vld [vmem:[#allocation11 + $0x488] sm:$0xff]  ;;  %vm9219_vm11 = vcmp.lt.s32.totalorder %v9207_v37, 1073741824 }
 0x77f   : > { %11324 = vmatprep.subr.mxu0 %v9390_v7  ;;  %11359 = vmatprep.subr.mxu1 %v9422_v24  ;;  %v9395_v28 = vld [vmem:[#allocation11 + $0x510] sm:$0xff]  ;;  %v9410_v7 = vld [vmem:[#allocation11 + $0x588] sm:$0xff]  ;;  %v9205_v24 = vand.u32 2147483647, %v9193_v50 }
 0x780   : > { %11325 = vmatpush3.msra.mxu0 %v9374_v2  ;;  %11360 = vmatpush3.msra.mxu1 %v9406_v12  ;;  %v9394_v2 = vld [vmem:[#allocation11 + $0x508] sm:$0xff]  ;;  %v9377_v12 = vld [vmem:[#allocation11 + $0x480] sm:$0xff] }
 0x781   : > { %11326 = vmatprep.subr.mxu0 %v9389_v14  ;;  %11361 = vmatprep.subr.mxu1 %v9421_v15  ;;  %v9409_v14 = vld [vmem:[#allocation11 + $0x580] sm:$0xff]  ;;  %vm9217_vm10 = vcmp.lt.s32.totalorder %v9205_v24, 1073741824 }
 0x782   : > { %11327 = vmatpush3.msra.mxu0 %v9373_v16  ;;  %11362 = vmatpush3.msra.mxu1 %v9405_v38  ;;  %v9361_v15 = vld [vmem:[#allocation11 + $0x400] sm:$0xff]  ;;  %v9043_v38 = vmax.f32 %v15189_v29, 0.0 }
 0x783   : > { %11328 = vmatprep.subr.mxu0 %v9388_v19  ;;  %11363 = vmatprep.subr.mxu1 %v9420_v25  ;;  %v9393_v16 = vld [vmem:[#allocation11 + $0x500] sm:$0xff]  ;;  %v9045_v19 = vmax.f32 %v15196_v8, 0.0 }
 0x784   : > { %11329 = vmatpush3.msra.mxu0 %v9372_v39  ;;  %11364 = vmatpush3.msra.mxu1 %v9404_v36 }
 0x785   : > { %11330 = vmatprep.subr.mxu0 %v9387_v33  ;;  %11365 = vmatprep.subr.mxu1 %v9419_v0  ;;  %v11163_v33 = vld [vmem:[#allocation13] ss:$0 sm:$0xff] }
 0x786   : > { %11331 = vmatpush3.msra.mxu0 %v9371_v43  ;;  %11366 = vmatpush3.msra.mxu1 %v9403_v31 }
 0x787   : > { %11332 = vmatprep.subr.mxu0 %v9386_v27  ;;  %11367 = vmatprep.subr.mxu1 %v9418_v13 }
 0x788   : > { %11333 = vmatpush3.msra.mxu0 %v9370_v45  ;;  %11368 = vmatpush3.msra.mxu1 %v9402_v32 }
 0x789   : > { %11334 = vmatprep.subr.mxu0 %v9385_v6  ;;  %11369 = vmatprep.subr.mxu1 %v9417_v30 }
 0x78a   : > { %11335 = vmatpush3.msra.mxu0 %v9369_v41  ;;  %11370 = vmatpush3.msra.mxu1 %v9401_v47 }
 0x78b   : > { %11336 = vmatprep.subr.mxu0 %v9384_v22  ;;  %11371 = vmatprep.subr.mxu1 %v9416_v34 }
 0x78c   : > { %11337 = vmatpush3.msra.mxu0 %v9368_v48  ;;  %11372 = vmatpush3.msra.mxu1 %v9400_v44 }
 0x78d   : > { %11338 = vmatprep.subr.mxu0 %v9383_v4  ;;  %11373 = vmatprep.subr.mxu1 %v9415_v40 }
 0x78e   : > { %11339 = vmatpush3.msra.mxu0 %v9367_v49  ;;  %11374 = vmatpush3.msra.mxu1 %v9399_v23 }
 0x78f   : > { %11340 = vmatprep.subr.mxu0 %v9382_v52  ;;  %11375 = vmatprep.subr.mxu1 %v9414_v5 }
 0x790   : > { %11341 = vmatpush3.msra.mxu0 %v9366_v51  ;;  %11376 = vmatpush3.msra.mxu1 %v9398_v17 }
 0x791   : > { %11342 = vmatprep.subr.mxu0 %v9381_v56  ;;  %11377 = vmatprep.subr.mxu1 %v9413_v57 }
 0x792   : > { %11343 = vmatpush3.msra.mxu0 %v9365_v58  ;;  %11378 = vmatpush3.msra.mxu1 %v9397_v59 }
 0x793   : > { %11344 = vmatprep.subr.mxu0 %v9380_v60  ;;  %11379 = vmatprep.subr.mxu1 %v9412_v61 }
 0x794   : > { %11345 = vmatpush3.msra.mxu0 %v9364_v18  ;;  %11380 = vmatpush3.msra.mxu1 %v9396_v62 }
 0x795   : > { %11346 = vmatprep.subr.mxu0 %v9379_v10  ;;  %11381 = vmatprep.subr.mxu1 %v9411_v63 }
 0x796   : > { %11347 = vmatpush3.msra.mxu0 %v9363_v1  ;;  %11382 = vmatpush3.msra.mxu1 %v9395_v28 }
 0x797   : > { %11348 = vmatprep.subr.mxu0 %v9378_v35  ;;  %11383 = vmatprep.subr.mxu1 %v9410_v7 }
 0x798   : > { %11349 = vmatpush3.msra.mxu0 %v9362_v11  ;;  %11384 = vmatpush3.msra.mxu1 %v9394_v2 }
 0x799   : > { %11350 = vmatprep.subr.mxu0 %v9377_v12  ;;  %11385 = vmatprep.subr.mxu1 %v9409_v14 }
 0x79a   : > { %11351 = vmatpush3.msra.mxu0 %v9361_v15  ;;  %11386 = vmatpush3.msra.mxu1 %v9393_v16 }
 0x79b   : > { %11173 = vmatmul.mubr.msk.f32.vlgmr.msra.gmra.mxu0 %vm9217_vm10, %v9043_v38  ;;  %11175 = vmatmul.mubr.msk.f32.vlgmr.msra.gmra.mxu1 %vm9219_vm11, %v9045_v19 }
 0x818   : > { %v11212_v25 = vpop.f32.mrf.mxu0  ;;  %v11247_v20 = vpop.f32.mrf.mxu1 }
 0x81a   : > { %v11213_v26 = vpop.f32.mrf.mxu0  ;;  %v11248_v0 = vpop.f32.mrf.mxu1 }
 0x81b   : > { %v11214_v36 = vadd.f32 %v11213_v26, %v11212_v25  ;;  %v11249_v13 = vadd.f32 %v11248_v0, %v11247_v20 }
 0x81d   : > { %v9499_v31 = vadd.f32 %v11214_v36, %v11163_v33 }
 0x81f   : > { %v9569_v46 = vadd.f32 %v11249_v13, %v9499_v31 }
 0x839   : > { %v11282_v39 = vpop.f32.mrf.mxu0  ;;  %v11317_v27 = vpop.f32.mrf.mxu1 }
 0x83b   : > { %v11283_v43 = vpop.f32.mrf.mxu0  ;;  %v11318_v29 = vpop.f32.mrf.mxu1 }
 0x83c   : > { %v11284_v3 = vadd.f32 %v11283_v43, %v11282_v39  ;;  %v11319_v6 = vadd.f32 %v11318_v29, %v11317_v27 }
 0x83e   : > { %v9639_v45 = vadd.f32 %v11284_v3, %v9569_v46 }
 0x840   : > { %v9709_v47 = vadd.f32 %v11319_v6, %v9639_v45 }
 0x85b   : > { %v11352_v8 = vpop.f32.mrf.mxu0  ;;  %v11387_v32 = vpop.f32.mrf.mxu1 }
 0x85d   : > { %v11353_v30 = vpop.f32.mrf.mxu0  ;;  %v11388_v41 = vpop.f32.mrf.mxu1 }
 0x85e   : > { %v11354_v22 = vadd.f32 %v11353_v30, %v11352_v8  ;;  %v11389_v42 = vadd.f32 %v11388_v41, %v11387_v32 }
 0x860   : > { %v9779_v34 = vadd.f32 %v11354_v22, %v9709_v47 }
 0x862   : > { %v9849_v21 = vadd.f32 %v11389_v42, %v9779_v34 }
 0x864   : > { %v9854_v48 = vsel %vm9853_vm12, %v9849_v21, -inf  ;;  %9852 = vst [vmem:[#allocation15] sm:$0xff] %v9849_v21 }
 0x865   : > { %9855 = vmax.xlane.f32.xlu1 %v9854_v48 }
 0x8ee   : > { %v9856_v44 = vpop.xlane.xlu1 %9855 }
 0x8ef   : > { %vm9857_vm13 = vcmp.eq.f32.partialorder %v9854_v48, %v9856_v44 }
 0x8f0   : > { %v9858_v4 = vsel %vm9857_vm13, %v15082_v9, 128 }
 0x8f1   : > { %v9860_v40 = vshra.s32 %v9858_v4, 16  ;;  %v9859_v23 = vand.u32 65535, %v9858_v4 }
 0x8f3   : > { %v9862_v49 = vcvt.s32.f32 %v9860_v40  ;;  %v9861_v5 = vcvt.s32.f32 %v9859_v23 }
 0x8f5   : > { %9863 = vmin.xlane.f32.xlu1 %v9862_v49 }
 0x97e   : > { %v9864_v52 = vpop.xlane.xlu1 %9863 }
 0x97f   : > { %vm9865_vm14 = vcmp.eq.f32.partialorder %v9862_v49, %v9864_v52  ;;  %v9870_v55 = vcvt.f32.s32 %v9864_v52 }
 0x980   : > { %v9866_v54 = vsel %vm9865_vm14, %v9861_v5, inf }
 0x981   : > { %9867 = vmin.xlane.f32.xlu0 %v9866_v54  ;;  %v9871_v17 = vshll.u32 %v9870_v55, 16 }
 0xa0a   : > { %v9868_v51 = vpop.xlane.xlu0 %9867 }
 0xa0b   : > { %v9869_v56 = vcvt.f32.s32 %v9868_v51 }
 0xa0d   : > { %v9872_v57 = vadd.s32 %v9871_v17, %v9869_v56 }
 0xa0f   : > { %9874 = vst.msk [vmem:[%s15272_s8] sm:$0xff] %vm9873_vm15, %v9872_v57 }
 0xa10 PF: > { %p11451_p8 = scmp.eq.s32.totalorder %s13528_s5, 1  ;;  %s13460_s15 = smov [#allocation15]  }
 0xa11   : > { %s9882_s16 = sshll.u32 %s13460_s15, 4  ;;  %s9883_s16 = int_to_ptr.vmem [resolvable:$true] %s9882_s16 }
 0xa12   : > { %s13369_s17 = scalar_lea.vmem %s9883_s16, 128  ;;  %p13376_p10 = scmp.lt.s32.totalorder %s9883_s16, %s9883_s16 }
 0xa13   : > { %p13370_p3 = scmp.ne.s32.totalorder %s9883_s16, %s13369_s17  ;;  %p13377_p11 = scmp.lt.s32.totalorder %s13369_s17, %s13369_s17 }
 0xa15   : > { %p13371_p2 = pnand %p13370_p3, %p11451_p8  ;;  %p13378_p0 = por %p13377_p11, %p13376_p10 }
 0xa17   : > { %p13372_p7 = pneg %p13371_p2 }
 0xa19   : > { %p13379_p4 = pnand %p13378_p0, %p13372_p7 }
 0xa1b   : > { %13382 = shalt.err (!%p13379_p4)
}
 0xa1c   : > { %11416 = dma.vmem_to_hbm [thread:$0]  (%p11451_p8), %s9883_s16, 128, %s15271_s7, [#allocation6]  }
 0xa1d   : > { %13430 = dma.done.wait (%p11451_p8), [#allocation6], 128  }
 0xa1e   : > { %13432 = vsyncadd (%p11451_p8), [#allocation6], 4294967168 }
 0xa1f PF: > { %p24_p1 = scmp.ge.s32.totalorder %s13593_s24, 4   ;;  %s15303_s29 = smov %s13439_s30 }
 0xa20   : > { %s15304_s30 = smov %s13443_s9  ;;  %s15305_s9 = smov %s13602_s27 }
 0xa21   : > { %s15306_s10 = smov %s13593_s24  ;;  %26 = sbr.rel (!%p24_p1) target bundleno = 9 (0x9), region = 124 }
 0xa26   :  { %9901 = vsyncpa [#allocation5], 1 }
 0xa27   :  { %9903 = vsyncpa [#allocation5 + $0x1], 1 }
 0xa28   :  { %9904 = vsyncpa [#allocation9], 1 }
 0xa29   :  { %9906 = vsyncpa [#allocation9 + $0x1], 1 }
 0xa2a   :  { %9907 = vsyncpa [#allocation12], 1 }
 0xa2b   :  { %9908 = vsyncpa [#allocation6], 1 }
 0xa2c   :  { %9910 = vsyncpa [#allocation6 + $0x1], 1 }
 0xa2d   :  { %9911 = vsyncpa [#allocation7], 1 }
 0xa2e   :  { %9913 = vsyncpa [#allocation7 + $0x1], 1 }

</bundles_post_ra>
